<compile_context>
chip_gen: v6e
topology: v6e:2x2x1
jax: 0.10.0
libtpu: 0.0.40
codegen_flags: <defaults>
</compile_context>

<pallas_src>
import numpy as np
import jax
import jax.numpy as jnp
from jax.experimental import pallas as pl
from jax.experimental.pallas import tpu as pltpu

B = 2              # batch
C_IN = 64          # conv in_channels
L_IN = 768         # input length  (768 - 2*(3-1) = 764 -> pool -> 382 -> 32*382 = 12224)
C_OUT = 32         # conv out_channels
KSIZE = 3
DILATION = 2
L_CONV = L_IN - DILATION * (KSIZE - 1)   # 764
L_POOL = L_CONV // 2                      # 382
L_POOL_PAD = 384                          # padded pooled length: 384*32 = 12288
FC1_IN = C_OUT * L_POOL                   # 12224
FC1_IN_PAD = C_OUT * L_POOL_PAD           # 12288 = 3 * TK
TK = 4096                                 # fc1 reduction tile (bf16: 4 MB per (TK,H1) buffer)
H1 = 512
H2 = 64
EPS = 1e-5


# ---------------------------------------------------------------------------
# Kernel A: dilated conv1d + relu + maxpool(k=2), emitting the fc1-ready
#           bfloat16 activation block (L_POOL_PAD rows, tail rows zeroed).
#           One batch element per grid step.
# ---------------------------------------------------------------------------
def conv_relu_pool_kernel(x_ref, w_ref, b_ref, o_ref, y_scr):
    # x_ref: (L_IN, C_IN) f32     w_ref: (KSIZE, C_IN, C_OUT)   b_ref: (1, C_OUT)
    # o_ref: (L_POOL_PAD, C_OUT) bf16                            y_scr: (L_CONV, C_OUT) f32
    # Accumulate the 3 dilated-tap matmuls directly in VMEM scratch.
    y_scr[...] = jnp.dot(x_ref[pl.ds(0, L_CONV), :], w_ref[0],
                         preferred_element_type=jnp.float32)
    for k in range(1, KSIZE):
        y_scr[...] += jnp.dot(x_ref[pl.ds(k * DILATION, L_CONV), :], w_ref[k],
                              preferred_element_type=jnp.float32)
    y_scr[...] = jnp.maximum(y_scr[...] + b_ref[...], 0.0)       # bias + ReLU in place
    even = y_scr[pl.ds(0, L_POOL, stride=2), :]                  # strided reads = maxpool(2)
    odd = y_scr[pl.ds(1, L_POOL, stride=2), :]
    # fc1-ready bf16 store; both stores are aligned to packed-bf16 sublane pairs (382 even).
    o_ref[pl.ds(0, L_POOL), :] = jnp.maximum(even, odd).astype(o_ref.dtype)
    o_ref[pl.ds(L_POOL, L_POOL_PAD - L_POOL), :] = jnp.zeros(
        (L_POOL_PAD - L_POOL, C_OUT), o_ref.dtype)


def conv_relu_pool(x_nlc, w_kco, b_row):
    return pl.pallas_call(
        conv_relu_pool_kernel,
        out_shape=jax.ShapeDtypeStruct((B, L_POOL_PAD, C_OUT), jnp.bfloat16),
        grid_spec=pltpu.PrefetchScalarGridSpec(
            num_scalar_prefetch=0,
            grid=(B,),
            in_specs=[
                pl.BlockSpec((None, L_IN, C_IN), lambda b: (b, 0, 0)),
                pl.BlockSpec((KSIZE, C_IN, C_OUT), lambda b: (0, 0, 0)),
                pl.BlockSpec((1, C_OUT), lambda b: (0, 0)),
            ],
            out_specs=pl.BlockSpec((None, L_POOL_PAD, C_OUT), lambda b: (b, 0, 0)),
            scratch_shapes=[pltpu.VMEM((L_CONV, C_OUT), jnp.float32)],
        ),
        compiler_params=pltpu.CompilerParams(dimension_semantics=("parallel",)),
    )(x_nlc, w_kco, b_row)


# ---------------------------------------------------------------------------
# Kernel B: fc1 (bf16 weight stream, K tiled) + folded BN1 + relu, with the
#           whole head (fc2 + folded BN2 + relu + fc3 + sigmoid) fused into the
#           final K step.  Single "arbitrary" reduction axis, f32 VMEM accumulator.
# ---------------------------------------------------------------------------
def fc1_head_kernel(h_ref, w1_ref, b1_ref, w2_ref, b2_ref, w3_ref, b3_ref,
                    o_ref, acc_ref):
    k = pl.program_id(0)

    @pl.when(k == 0)
    def _():
        acc_ref[...] = jnp.zeros_like(acc_ref)

    # bf16 x bf16 -> f32 accumulation on the MXU (zero-padded K tail is zeros x zeros)
    acc_ref[...] += jnp.dot(h_ref[...], w1_ref[...], preferred_element_type=jnp.float32)

    @pl.when(k == pl.num_programs(0) - 1)
    def _():
        # BN1/BN2 already folded into weights/biases; dropout1/2 = identity (eval)
        z1 = jnp.maximum(acc_ref[...] + b1_ref[...], 0.0)                       # (B, H1)
        z2 = jnp.dot(z1, w2_ref[...], preferred_element_type=jnp.float32) + b2_ref[...]
        z2 = jnp.maximum(z2, 0.0)                                               # (B, H2)
        z3 = jnp.dot(z2, w3_ref[...], preferred_element_type=jnp.float32) + b3_ref[...]
        o_ref[...] = jax.nn.sigmoid(z3)                                         # (B, 1)


def fused_fc1_head(h_pad, w1, b1, w2, b2, w3, b3):
    return pl.pallas_call(
        fc1_head_kernel,
        out_shape=jax.ShapeDtypeStruct((B, 1), jnp.float32),
        grid_spec=pltpu.PrefetchScalarGridSpec(
            num_scalar_prefetch=0,
            grid=(FC1_IN_PAD // TK,),                               # K reduction only
            in_specs=[
                pl.BlockSpec((B, TK), lambda k: (0, k)),            # activations (bf16, K tiled)
                pl.BlockSpec((TK, H1), lambda k: (k, 0)),           # fc1 weight (bf16, K tiled)
                pl.BlockSpec((1, H1), lambda k: (0, 0)),            # folded fc1 bias (f32)
                pl.BlockSpec((H1, H2), lambda k: (0, 0)),           # fc2 weight (BN2 folded)
                pl.BlockSpec((1, H2), lambda k: (0, 0)),            # folded fc2 bias
                pl.BlockSpec((H2, 1), lambda k: (0, 0)),            # fc3 weight
                pl.BlockSpec((1, 1), lambda k: (0, 0)),             # fc3 bias
            ],
            out_specs=pl.BlockSpec((B, 1), lambda k: (0, 0)),
            scratch_shapes=[pltpu.VMEM((B, H1), jnp.float32)],
        ),
        compiler_params=pltpu.CompilerParams(
            dimension_semantics=("arbitrary",),
            vmem_limit_bytes=32 * 1024 * 1024),
    )(h_pad, w1, b1, w2, b2, w3, b3)


# ---------------------------------------------------------------------------
# One-time parameter preparation (transpose / permute / BN fold / pad / bf16 cast)
# ---------------------------------------------------------------------------
def prepare_params(p):
    s1 = p["g1"] * jax.lax.rsqrt(p["v1"] + EPS)                 # (H1,)
    s2 = p["g2"] * jax.lax.rsqrt(p["v2"] + EPS)                 # (H2,)

    # fc1: (H1, FC1_IN) -> (FC1_IN, H1); rows channel-major (c*382+t) -> time-major (t*32+c)
    w1t = p["w1"].T
    w1t = w1t.reshape(C_OUT, L_POOL, H1).transpose(1, 0, 2).reshape(FC1_IN, H1)
    w1t = w1t * s1[None, :]                                     # fold BN1 scale
    w1t = jnp.pad(w1t, ((0, FC1_IN_PAD - FC1_IN), (0, 0))).astype(jnp.bfloat16)
    b1 = ((p["b1"] - p["m1"]) * s1 + p["be1"])[None, :]         # (1, H1) f32

    w2 = p["w2"].T * s2[None, :]                                # (H1, H2), BN2 folded
    b2 = ((p["b2"] - p["m2"]) * s2 + p["be2"])[None, :]         # (1, H2)
    w3 = p["w3"].T                                              # (H2, 1)
    b3 = p["b3"][None, :]                                       # (1, 1)

    conv_w = jnp.transpose(p["conv_w"], (2, 1, 0))              # (KSIZE, C_IN, C_OUT)
    conv_b = p["conv_b"][None, :]                               # (1, C_OUT)
    return dict(conv_w=conv_w, conv_b=conv_b,
                w1=w1t, b1=b1, w2=w2, b2=b2, w3=w3, b3=b3)


# ---------------------------------------------------------------------------
# Forward (per-call path only touches already-prepared params) and reference
# ---------------------------------------------------------------------------
def mlp_forward(x_ncl, q):
    x_nlc = jnp.transpose(x_ncl, (0, 2, 1))                     # NCL -> NLC (small)
    h3 = conv_relu_pool(x_nlc, q["conv_w"], q["conv_b"])        # (B, 384, 32) bf16, fc1-ready
    h = h3.reshape(B, FC1_IN_PAD)                               # free reshape (t*32+c layout)
    out = fused_fc1_head(h, q["w1"], q["b1"], q["w2"], q["b2"], q["w3"], q["b3"])  # (B, 1)
    return out[:, 0]                                            # squeeze(dim=1)


def reference_forward(x_ncl, p):
    hp = jax.lax.Precision.HIGHEST
    y = jnp.zeros((B, C_OUT, L_CONV), jnp.float32)
    for k in range(KSIZE):
        y = y + jnp.einsum("bcl,oc->bol",
                           x_ncl[:, :, k * DILATION:k * DILATION + L_CONV],
                           p["conv_w"][:, :, k], precision=hp)
    y = jnp.maximum(y + p["conv_b"][None, :, None], 0.0)
    y = y.reshape(B, C_OUT, L_POOL, 2).max(axis=-1)
    h = y.reshape(B, FC1_IN)
    z1 = jnp.dot(h, p["w1"].T, precision=hp) + p["b1"]
    z1 = jnp.maximum((z1 - p["m1"]) / jnp.sqrt(p["v1"] + EPS) * p["g1"] + p["be1"], 0.0)
    z2 = jnp.dot(z1, p["w2"].T, precision=hp) + p["b2"]
    z2 = jnp.maximum((z2 - p["m2"]) / jnp.sqrt(p["v2"] + EPS) * p["g2"] + p["be2"], 0.0)
    z3 = jnp.dot(z2, p["w3"].T, precision=hp) + p["b3"]
    return jax.nn.sigmoid(z3)[:, 0]


def init_params(key):
    ks = jax.random.split(key, 16)
    p = {}
    p["conv_w"] = 0.05 * jax.random.normal(ks[0], (C_OUT, C_IN, KSIZE), jnp.float32)
    p["conv_b"] = 0.05 * jax.random.normal(ks[1], (C_OUT,), jnp.float32)
    p["w1"] = 0.01 * jax.random.normal(ks[2], (H1, FC1_IN), jnp.float32)
    p["b1"] = 0.01 * jax.random.normal(ks[3], (H1,), jnp.float32)
    p["g1"] = 1.0 + 0.1 * jax.random.normal(ks[4], (H1,), jnp.float32)
    p["be1"] = 0.1 * jax.random.normal(ks[5], (H1,), jnp.float32)
    p["m1"] = 0.1 * jax.random.normal(ks[6], (H1,), jnp.float32)
    p["v1"] = 0.5 + jax.random.uniform(ks[7], (H1,), jnp.float32)
    p["w2"] = 0.05 * jax.random.normal(ks[8], (H2, H1), jnp.float32)
    p["b2"] = 0.05 * jax.random.normal(ks[9], (H2,), jnp.float32)
    p["g2"] = 1.0 + 0.1 * jax.random.normal(ks[10], (H2,), jnp.float32)
    p["be2"] = 0.1 * jax.random.normal(ks[11], (H2,), jnp.float32)
    p["m2"] = 0.1 * jax.random.normal(ks[12], (H2,), jnp.float32)
    p["v2"] = 0.5 + jax.random.uniform(ks[13], (H2,), jnp.float32)
    p["w3"] = 0.1 * jax.random.normal(ks[14], (1, H2), jnp.float32)
    p["b3"] = 0.1 * jax.random.normal(ks[15], (1,), jnp.float32)
    return p


if __name__ == "__main__":
    key = jax.random.PRNGKey(0)
    kx, kp = jax.random.split(key)
    x = jax.random.normal(kx, (B, C_IN, L_IN), jnp.float32)     # PyTorch NCL input
    params = init_params(kp)

    prepared = jax.tree_util.tree_map(jax.block_until_ready, prepare_params(params))  # one-time
    fwd = jax.jit(mlp_forward)

    out = jax.block_until_ready(fwd(x, prepared))
    ref = jax.block_until_ready(reference_forward(x, params))

    assert out.shape == (B,)
    np.testing.assert_allclose(np.asarray(out), np.asarray(ref), rtol=5e-3, atol=5e-3)
    print("KERNEL_OK")
</pallas_src>

<mosaic_0001>
module attributes {stable_mosaic.version = 11 : i64} {
  func.func @conv_relu_pool_kernel(%arg0: i32, %arg1: memref<1x768x64xf32, #tpu.memory_space<vmem>>, %arg2: memref<3x64x32xf32, #tpu.memory_space<vmem>>, %arg3: memref<1x32xf32, #tpu.memory_space<vmem>>, %arg4: memref<1x384x32xbf16, #tpu.memory_space<vmem>>, %arg5: memref<764x32xf32, #tpu.memory_space<vmem>>) attributes {dimension_semantics = [#tpu.dimension_semantics<parallel>], iteration_bounds = array<i64: 2>, scalar_prefetch = 0 : i64, scratch_operands = 1 : i64, tpu.core_type = #tpu.core_type<tc>, window_params = [{transform_indices = @transform_0, window_bounds = array<i64: 1, 768, 64>}, {pipeline_mode = #tpu.pipeline_mode<synchronous>, transform_indices = @transform_1, window_bounds = array<i64: 3, 64, 32>}, {pipeline_mode = #tpu.pipeline_mode<synchronous>, transform_indices = @transform_2, window_bounds = array<i64: 1, 32>}, {transform_indices = @transform_3, window_bounds = array<i64: 1, 384, 32>}]} {
    %c0 = arith.constant 0 : index
    %c0_0 = arith.constant 0 : index
    %c0_1 = arith.constant 0 : index
    %0 = vector.load %arg1[%c0, %c0_0, %c0_1] : memref<1x768x64xf32, #tpu.memory_space<vmem>>, vector<1x764x64xf32>
    %1 = vector.shape_cast %0 : vector<1x764x64xf32> to vector<764x64xf32>
    %c0_2 = arith.constant 0 : index
    %c0_3 = arith.constant 0 : index
    %c0_4 = arith.constant 0 : index
    %2 = vector.load %arg2[%c0_2, %c0_3, %c0_4] : memref<3x64x32xf32, #tpu.memory_space<vmem>>, vector<1x64x32xf32>
    %3 = vector.shape_cast %2 : vector<1x64x32xf32> to vector<64x32xf32>
    %cst = arith.constant dense<0.000000e+00> : vector<764x32xf32>
    %4 = tpu.matmul %1, %3, %cst {dimension_numbers = #tpu.dot_dimension_numbers<[1], [0], [0], [1], [0, 0, 1, 1], [], []>} : vector<764x64xf32>, vector<64x32xf32>, vector<764x32xf32> -> vector<764x32xf32>
    %c0_5 = arith.constant 0 : index
    %c0_6 = arith.constant 0 : index
    %5 = vector.load %arg5[%c0_5, %c0_6] : memref<764x32xf32, #tpu.memory_space<vmem>>, vector<764x32xf32>
    tpu.vector_store %arg5[%c0_5, %c0_6], %4 {strides = array<i32>} : memref<764x32xf32, #tpu.memory_space<vmem>>, vector<764x32xf32>,
    %c0_7 = arith.constant 0 : index
    %c0_8 = arith.constant 0 : index
    %6 = vector.load %arg5[%c0_7, %c0_8] : memref<764x32xf32, #tpu.memory_space<vmem>>, vector<764x32xf32>
    %c0_9 = arith.constant 0 : index
    %c2 = arith.constant 2 : index
    %c0_10 = arith.constant 0 : index
    %7 = vector.load %arg1[%c0_9, %c2, %c0_10] : memref<1x768x64xf32, #tpu.memory_space<vmem>>, vector<1x764x64xf32>
    %8 = vector.shape_cast %7 : vector<1x764x64xf32> to vector<764x64xf32>
    %c1 = arith.constant 1 : index
    %c0_11 = arith.constant 0 : index
    %c0_12 = arith.constant 0 : index
    %9 = vector.load %arg2[%c1, %c0_11, %c0_12] : memref<3x64x32xf32, #tpu.memory_space<vmem>>, vector<1x64x32xf32>
    %10 = vector.shape_cast %9 : vector<1x64x32xf32> to vector<64x32xf32>
    %cst_13 = arith.constant dense<0.000000e+00> : vector<764x32xf32>
    %11 = tpu.matmul %8, %10, %cst_13 {dimension_numbers = #tpu.dot_dimension_numbers<[1], [0], [0], [1], [0, 0, 1, 1], [], []>} : vector<764x64xf32>, vector<64x32xf32>, vector<764x32xf32> -> vector<764x32xf32>
    %12 = arith.addf %6, %11 : vector<764x32xf32>
    %c0_14 = arith.constant 0 : index
    %c0_15 = arith.constant 0 : index
    %13 = vector.load %arg5[%c0_14, %c0_15] : memref<764x32xf32, #tpu.memory_space<vmem>>, vector<764x32xf32>
    tpu.vector_store %arg5[%c0_14, %c0_15], %12 {strides = array<i32>} : memref<764x32xf32, #tpu.memory_space<vmem>>, vector<764x32xf32>,
    %c0_16 = arith.constant 0 : index
    %c0_17 = arith.constant 0 : index
    %14 = vector.load %arg5[%c0_16, %c0_17] : memref<764x32xf32, #tpu.memory_space<vmem>>, vector<764x32xf32>
    %c0_18 = arith.constant 0 : index
    %c4 = arith.constant 4 : index
    %c0_19 = arith.constant 0 : index
    %15 = vector.load %arg1[%c0_18, %c4, %c0_19] : memref<1x768x64xf32, #tpu.memory_space<vmem>>, vector<1x764x64xf32>
    %16 = vector.shape_cast %15 : vector<1x764x64xf32> to vector<764x64xf32>
    %c2_20 = arith.constant 2 : index
    %c0_21 = arith.constant 0 : index
    %c0_22 = arith.constant 0 : index
    %17 = vector.load %arg2[%c2_20, %c0_21, %c0_22] : memref<3x64x32xf32, #tpu.memory_space<vmem>>, vector<1x64x32xf32>
    %18 = vector.shape_cast %17 : vector<1x64x32xf32> to vector<64x32xf32>
    %cst_23 = arith.constant dense<0.000000e+00> : vector<764x32xf32>
    %19 = tpu.matmul %16, %18, %cst_23 {dimension_numbers = #tpu.dot_dimension_numbers<[1], [0], [0], [1], [0, 0, 1, 1], [], []>} : vector<764x64xf32>, vector<64x32xf32>, vector<764x32xf32> -> vector<764x32xf32>
    %20 = arith.addf %14, %19 : vector<764x32xf32>
    %c0_24 = arith.constant 0 : index
    %c0_25 = arith.constant 0 : index
    %21 = vector.load %arg5[%c0_24, %c0_25] : memref<764x32xf32, #tpu.memory_space<vmem>>, vector<764x32xf32>
    tpu.vector_store %arg5[%c0_24, %c0_25], %20 {strides = array<i32>} : memref<764x32xf32, #tpu.memory_space<vmem>>, vector<764x32xf32>,
    %c0_26 = arith.constant 0 : index
    %c0_27 = arith.constant 0 : index
    %22 = vector.load %arg5[%c0_26, %c0_27] : memref<764x32xf32, #tpu.memory_space<vmem>>, vector<764x32xf32>
    %c0_28 = arith.constant 0 : index
    %c0_29 = arith.constant 0 : index
    %23 = vector.load %arg3[%c0_28, %c0_29] : memref<1x32xf32, #tpu.memory_space<vmem>>, vector<1x32xf32>
    %24 = vector.broadcast %23 : vector<1x32xf32> to vector<764x32xf32>
    %25 = arith.addf %22, %24 : vector<764x32xf32>
    %cst_30 = arith.constant 0.000000e+00 : f32
    %26 = vector.broadcast %cst_30 : f32 to vector<764x32xf32>
    %27 = arith.maximumf %25, %26 : vector<764x32xf32>
    %c0_31 = arith.constant 0 : index
    %c0_32 = arith.constant 0 : index
    %28 = vector.load %arg5[%c0_31, %c0_32] : memref<764x32xf32, #tpu.memory_space<vmem>>, vector<764x32xf32>
    tpu.vector_store %arg5[%c0_31, %c0_32], %27 {strides = array<i32>} : memref<764x32xf32, #tpu.memory_space<vmem>>, vector<764x32xf32>,
    %c0_33 = arith.constant 0 : index
    %c0_34 = arith.constant 0 : index
    %29 = tpu.strided_load %arg5[%c0_33, %c0_34] {strides = array<i32: 2, 1>} : memref<764x32xf32, #tpu.memory_space<vmem>>, vector<382x32xf32>
    %c1_35 = arith.constant 1 : index
    %c0_36 = arith.constant 0 : index
    %30 = tpu.strided_load %arg5[%c1_35, %c0_36] {strides = array<i32: 2, 1>} : memref<764x32xf32, #tpu.memory_space<vmem>>, vector<382x32xf32>
    %31 = arith.maximumf %29, %30 : vector<382x32xf32>
    %32 = arith.truncf %31 : vector<382x32xf32> to vector<382x32xbf16>
    %c0_37 = arith.constant 0 : index
    %c0_38 = arith.constant 0 : index
    %c0_39 = arith.constant 0 : index
    %33 = vector.load %arg4[%c0_37, %c0_38, %c0_39] : memref<1x384x32xbf16, #tpu.memory_space<vmem>>, vector<1x382x32xbf16>
    %34 = vector.shape_cast %33 : vector<1x382x32xbf16> to vector<382x32xbf16>
    %35 = vector.shape_cast %32 : vector<382x32xbf16> to vector<1x382x32xbf16>
    tpu.vector_store %arg4[%c0_37, %c0_38, %c0_39], %35 {strides = array<i32>} : memref<1x384x32xbf16, #tpu.memory_space<vmem>>, vector<1x382x32xbf16>,
    %cst_40 = arith.constant 0.000000e+00 : bf16
    %36 = vector.broadcast %cst_40 : bf16 to vector<2x32xbf16>
    %c0_41 = arith.constant 0 : index
    %c382 = arith.constant 382 : index
    %c0_42 = arith.constant 0 : index
    %37 = vector.load %arg4[%c0_41, %c382, %c0_42] : memref<1x384x32xbf16, #tpu.memory_space<vmem>>, vector<1x2x32xbf16>
    %38 = vector.shape_cast %37 : vector<1x2x32xbf16> to vector<2x32xbf16>
    %39 = vector.shape_cast %36 : vector<2x32xbf16> to vector<1x2x32xbf16>
    tpu.vector_store %arg4[%c0_41, %c382, %c0_42], %39 {strides = array<i32>} : memref<1x384x32xbf16, #tpu.memory_space<vmem>>, vector<1x2x32xbf16>,
    return
  }
  func.func @transform_0(%arg0: i32) -> (i32, i32, i32) {
    %c0_i32 = arith.constant 0 : i32
    %c0_i32_0 = arith.constant 0 : i32
    %c0_i32_1 = arith.constant 0 : i32
    return %arg0, %c0_i32, %c0_i32_0 : i32, i32, i32
  }
  func.func @transform_1(%arg0: i32) -> (i32, i32, i32) {
    %c0_i32 = arith.constant 0 : i32
    %c0_i32_0 = arith.constant 0 : i32
    %c0_i32_1 = arith.constant 0 : i32
    %c0_i32_2 = arith.constant 0 : i32
    return %c0_i32, %c0_i32_0, %c0_i32_1 : i32, i32, i32
  }
  func.func @transform_2(%arg0: i32) -> (i32, i32) {
    %c0_i32 = arith.constant 0 : i32
    %c0_i32_0 = arith.constant 0 : i32
    %c0_i32_1 = arith.constant 0 : i32
    return %c0_i32, %c0_i32_0 : i32, i32
  }
  func.func @transform_3(%arg0: i32) -> (i32, i32, i32) {
    %c0_i32 = arith.constant 0 : i32
    %c0_i32_0 = arith.constant 0 : i32
    %c0_i32_1 = arith.constant 0 : i32
    return %arg0, %c0_i32, %c0_i32_0 : i32, i32, i32
  }
}

module attributes {stable_mosaic.version = 11 : i64} {
  func.func @fc1_head_kernel(%arg0: i32, %arg1: memref<2x4096xbf16, #tpu.memory_space<vmem>>, %arg2: memref<4096x512xbf16, #tpu.memory_space<vmem>>, %arg3: memref<1x512xf32, #tpu.memory_space<vmem>>, %arg4: memref<512x64xf32, #tpu.memory_space<vmem>>, %arg5: memref<1x64xf32, #tpu.memory_space<vmem>>, %arg6: memref<64x1xf32, #tpu.memory_space<vmem>>, %arg7: memref<1x1xf32, #tpu.memory_space<vmem>>, %arg8: memref<2x1xf32, #tpu.memory_space<vmem>>, %arg9: memref<2x512xf32, #tpu.memory_space<vmem>>) attributes {dimension_semantics = [#tpu.dimension_semantics<arbitrary>], iteration_bounds = array<i64: 3>, scalar_prefetch = 0 : i64, scratch_operands = 1 : i64, tpu.core_type = #tpu.core_type<tc>, window_params = [{transform_indices = @transform_0, window_bounds = array<i64: 2, 4096>}, {transform_indices = @transform_1, window_bounds = array<i64: 4096, 512>}, {pipeline_mode = #tpu.pipeline_mode<synchronous>, transform_indices = @transform_2, window_bounds = array<i64: 1, 512>}, {pipeline_mode = #tpu.pipeline_mode<synchronous>, transform_indices = @transform_3, window_bounds = array<i64: 512, 64>}, {pipeline_mode = #tpu.pipeline_mode<synchronous>, transform_indices = @transform_4, window_bounds = array<i64: 1, 64>}, {pipeline_mode = #tpu.pipeline_mode<synchronous>, transform_indices = @transform_5, window_bounds = array<i64: 64, 1>}, {pipeline_mode = #tpu.pipeline_mode<synchronous>, transform_indices = @transform_6, window_bounds = array<i64: 1, 1>}, {pipeline_mode = #tpu.pipeline_mode<synchronous>, transform_indices = @transform_7, window_bounds = array<i64: 2, 1>}]} {
    %c0_i32 = arith.constant 0 : i32
    %0 = arith.cmpi eq, %arg0, %c0_i32 : i32
    %1 = arith.extui %0 : i1 to i32
    %c0_i32_0 = arith.constant 0 : i32
    %2 = arith.cmpi ne, %1, %c0_i32_0 : i32
    scf.if %2 {
      %cst_9 = arith.constant 0.000000e+00 : f32
      %12 = vector.broadcast %cst_9 : f32 to vector<2x512xf32>
      %c0_10 = arith.constant 0 : index
      %c0_11 = arith.constant 0 : index
      %13 = vector.load %arg9[%c0_10, %c0_11] : memref<2x512xf32, #tpu.memory_space<vmem>>, vector<2x512xf32>
      tpu.vector_store %arg9[%c0_10, %c0_11], %12 {strides = array<i32>} : memref<2x512xf32, #tpu.memory_space<vmem>>, vector<2x512xf32>,
    } else {
    }
    %c0 = arith.constant 0 : index
    %c0_1 = arith.constant 0 : index
    %3 = vector.load %arg9[%c0, %c0_1] : memref<2x512xf32, #tpu.memory_space<vmem>>, vector<2x512xf32>
    %c0_2 = arith.constant 0 : index
    %c0_3 = arith.constant 0 : index
    %4 = vector.load %arg1[%c0_2, %c0_3] : memref<2x4096xbf16, #tpu.memory_space<vmem>>, vector<2x4096xbf16>
    %c0_4 = arith.constant 0 : index
    %c0_5 = arith.constant 0 : index
    %5 = vector.load %arg2[%c0_4, %c0_5] : memref<4096x512xbf16, #tpu.memory_space<vmem>>, vector<4096x512xbf16>
    %cst = arith.constant dense<0.000000e+00> : vector<2x512xf32>
    %6 = tpu.matmul %4, %5, %cst {dimension_numbers = #tpu.dot_dimension_numbers<[1], [0], [0], [1], [0, 0, 1, 1], [], []>} : vector<2x4096xbf16>, vector<4096x512xbf16>, vector<2x512xf32> -> vector<2x512xf32>
    %7 = arith.addf %3, %6 : vector<2x512xf32>
    %c0_6 = arith.constant 0 : index
    %c0_7 = arith.constant 0 : index
    %8 = vector.load %arg9[%c0_6, %c0_7] : memref<2x512xf32, #tpu.memory_space<vmem>>, vector<2x512xf32>
    tpu.vector_store %arg9[%c0_6, %c0_7], %7 {strides = array<i32>} : memref<2x512xf32, #tpu.memory_space<vmem>>, vector<2x512xf32>,
    %c2_i32 = arith.constant 2 : i32
    %9 = arith.cmpi eq, %arg0, %c2_i32 : i32
    %10 = arith.extui %9 : i1 to i32
    %c0_i32_8 = arith.constant 0 : i32
    %11 = arith.cmpi ne, %10, %c0_i32_8 : i32
    scf.if %11 {
      %c0_9 = arith.constant 0 : index
      %c0_10 = arith.constant 0 : index
      %12 = vector.load %arg9[%c0_9, %c0_10] : memref<2x512xf32, #tpu.memory_space<vmem>>, vector<2x512xf32>
      %c0_11 = arith.constant 0 : index
      %c0_12 = arith.constant 0 : index
      %13 = vector.load %arg3[%c0_11, %c0_12] : memref<1x512xf32, #tpu.memory_space<vmem>>, vector<1x512xf32>
      %14 = vector.broadcast %13 : vector<1x512xf32> to vector<2x512xf32>
      %15 = arith.addf %12, %14 : vector<2x512xf32>
      %cst_13 = arith.constant 0.000000e+00 : f32
      %16 = vector.broadcast %cst_13 : f32 to vector<2x512xf32>
      %17 = arith.maximumf %15, %16 : vector<2x512xf32>
      %c0_14 = arith.constant 0 : index
      %c0_15 = arith.constant 0 : index
      %18 = vector.load %arg4[%c0_14, %c0_15] : memref<512x64xf32, #tpu.memory_space<vmem>>, vector<512x64xf32>
      %cst_16 = arith.constant dense<0.000000e+00> : vector<2x64xf32>
      %19 = tpu.matmul %17, %18, %cst_16 {dimension_numbers = #tpu.dot_dimension_numbers<[1], [0], [0], [1], [0, 0, 1, 1], [], []>} : vector<2x512xf32>, vector<512x64xf32>, vector<2x64xf32> -> vector<2x64xf32>
      %c0_17 = arith.constant 0 : index
      %c0_18 = arith.constant 0 : index
      %20 = vector.load %arg5[%c0_17, %c0_18] : memref<1x64xf32, #tpu.memory_space<vmem>>, vector<1x64xf32>
      %21 = vector.broadcast %20 : vector<1x64xf32> to vector<2x64xf32>
      %22 = arith.addf %19, %21 : vector<2x64xf32>
      %cst_19 = arith.constant 0.000000e+00 : f32
      %23 = vector.broadcast %cst_19 : f32 to vector<2x64xf32>
      %24 = arith.maximumf %22, %23 : vector<2x64xf32>
      %c0_20 = arith.constant 0 : index
      %c0_21 = arith.constant 0 : index
      %25 = vector.load %arg6[%c0_20, %c0_21] : memref<64x1xf32, #tpu.memory_space<vmem>>, vector<64x1xf32>
      %cst_22 = arith.constant dense<0.000000e+00> : vector<2x1xf32>
      %26 = tpu.matmul %24, %25, %cst_22 {dimension_numbers = #tpu.dot_dimension_numbers<[1], [0], [0], [1], [0, 0, 1, 1], [], []>} : vector<2x64xf32>, vector<64x1xf32>, vector<2x1xf32> -> vector<2x1xf32>
      %c0_23 = arith.constant 0 : index
      %c0_24 = arith.constant 0 : index
      %27 = vector.load %arg7[%c0_23, %c0_24] : memref<1x1xf32, #tpu.memory_space<vmem>>, vector<1x1xf32>
      %28 = vector.broadcast %27 : vector<1x1xf32> to vector<2x1xf32>
      %29 = arith.addf %26, %28 : vector<2x1xf32>
      %30 = arith.negf %29 : vector<2x1xf32>
      %31 = math.exp %30 : vector<2x1xf32>
      %cst_25 = arith.constant 1.000000e+00 : f32
      %32 = vector.broadcast %cst_25 : f32 to vector<2x1xf32>
      %33 = arith.addf %32, %31 : vector<2x1xf32>
      %34 = arith.divf %32, %33 : vector<2x1xf32>
      %c0_26 = arith.constant 0 : index
      %c0_27 = arith.constant 0 : index
      %35 = vector.load %arg8[%c0_26, %c0_27] : memref<2x1xf32, #tpu.memory_space<vmem>>, vector<2x1xf32>
      tpu.vector_store %arg8[%c0_26, %c0_27], %34 {strides = array<i32>} : memref<2x1xf32, #tpu.memory_space<vmem>>, vector<2x1xf32>,
    } else {
    }
    return
  }
  func.func @transform_0(%arg0: i32) -> (i32, i32) {
    %c0_i32 = arith.constant 0 : i32
    %c0_i32_0 = arith.constant 0 : i32
    return %c0_i32, %arg0 : i32, i32
  }
  func.func @transform_1(%arg0: i32) -> (i32, i32) {
    %c0_i32 = arith.constant 0 : i32
    %c0_i32_0 = arith.constant 0 : i32
    return %arg0, %c0_i32 : i32, i32
  }
  func.func @transform_2(%arg0: i32) -> (i32, i32) {
    %c0_i32 = arith.constant 0 : i32
    %c0_i32_0 = arith.constant 0 : i32
    %c0_i32_1 = arith.constant 0 : i32
    return %c0_i32, %c0_i32_0 : i32, i32
  }
  func.func @transform_3(%arg0: i32) -> (i32, i32) {
    %c0_i32 = arith.constant 0 : i32
    %c0_i32_0 = arith.constant 0 : i32
    %c0_i32_1 = arith.constant 0 : i32
    return %c0_i32, %c0_i32_0 : i32, i32
  }
  func.func @transform_4(%arg0: i32) -> (i32, i32) {
    %c0_i32 = arith.constant 0 : i32
    %c0_i32_0 = arith.constant 0 : i32
    %c0_i32_1 = arith.constant 0 : i32
    return %c0_i32, %c0_i32_0 : i32, i32
  }
  func.func @transform_5(%arg0: i32) -> (i32, i32) {
    %c0_i32 = arith.constant 0 : i32
    %c0_i32_0 = arith.constant 0 : i32
    %c0_i32_1 = arith.constant 0 : i32
    return %c0_i32, %c0_i32_0 : i32, i32
  }
  func.func @transform_6(%arg0: i32) -> (i32, i32) {
    %c0_i32 = arith.constant 0 : i32
    %c0_i32_0 = arith.constant 0 : i32
    %c0_i32_1 = arith.constant 0 : i32
    return %c0_i32, %c0_i32_0 : i32, i32
  }
  func.func @transform_7(%arg0: i32) -> (i32, i32) {
    %c0_i32 = arith.constant 0 : i32
    %c0_i32_0 = arith.constant 0 : i32
    %c0_i32_1 = arith.constant 0 : i32
    return %c0_i32, %c0_i32_0 : i32, i32
  }
}

</mosaic_0001>

<bundles_post_ra>
// kernel: mlp_forward.2
= control target key start
LH: loop header
LB: loop body
LE: loop exit
PB: predicated region body
PF: predicated region fallthrough
CT: control target
= control target key end

     0   :  { %8 = vsyncpa [#allocation4], 0  ;;  %s5917_s12 = smov 0   ;;  %s7182_s0 = inlined_call_operand.vmem [shape: f32[2,768,64], index: 0, kind: input, shape index: {}]   ;;  %s7183_s1 = inlined_call_operand.vmem [shape: f32[3,64,32], index: 1, kind: input, shape index: {}]   ;;  %s7184_s2 = inlined_call_operand.hbm [shape: f32[1,32], index: 2, kind: input, shape index: {}]   ;;  %s7185_s3 = inlined_call_operand.vmem [shape: bf16[2,384,32], index: 3, kind: output, shape index: {}]  }
   0x1 LB: > { %s4613_s13 = sadd.s32 4294967295, %s5893_s12   ;;  %p4615_p0 = scmp.ge.s32.totalorder %s5893_s12, 1  ;;  %s5893_s12 = sphi %s5917_s12, %s14_s12  }
   0x2   : > { %p113_p1 = scmp.lt.s32.totalorder %s5893_s12, 3  ;;  %p5843_p3 = scmp.eq.s32.totalorder %s4613_s13, 0 }
   0x3   : > { %s5895_s15 = smov [#allocation3]  }
   0x4   : > { %p5925_p2 = pnand %p4615_p0, %p113_p1  ;;  %s129_s16 = sshll.u32 %s5895_s15, 4  ;;  %s130_s16 = int_to_ptr.vmem [resolvable:$true] %s129_s16 }
   0x5   : > { %s5868_s17 = scalar_lea.vmem %s130_s16, 16  ;;  %s5875_s18 = scalar_lea.vmem %s130_s16, 32 }
   0x6   : > { %p5839_p4 = pneg %p5925_p2  ;;  %p5869_p7 = scmp.ne.s32.totalorder %s130_s16, %s5868_s17 }
   0x7   : > { %p5876_p10 = scmp.lt.s32.totalorder %s130_s16, %s130_s16  ;;  %p5877_p11 = scmp.lt.s32.totalorder %s5875_s18, %s5868_s17 }
   0x8   : > { %p5840_p5 = pnand %p5843_p3, %p5839_p4 }
   0x9   : > { %p5878_p12 = por %p5877_p11, %p5876_p10 }
   0xa   : > { %p5859_p6 = pneg %p5840_p5 }
   0xc   : > { %p5871_p8 = pnand %p5869_p7, %p5859_p6 }
   0xe   : > { %p5872_p9 = pneg %p5871_p8 }
  0x10   : > { %p5879_p13 = pnand %p5878_p12, %p5872_p9 }
  0x12   : > { %5882 = shalt.err (!%p5879_p13)
}
  0x13   : > { %5842 = dma.hbm_to_vmem [thread:$0]  (!%p5840_p5), %s7184_s2, 16, %s130_s16, [#allocation4]  }
  0x14   : > { %150 = sbr.rel (%p5925_p2) target bundleno = 572 (0x23c), region = 32 }
  0x19   : > { %5888 = dma.done.wait (%p5843_p3), [#allocation4], 16  }
  0x1a   : > { %5890 = vsyncadd (%p5843_p3), [#allocation4], 4294967280  ;;  %p174_p0 = scmp.lt.s32.totalorder %s4613_s13, 1  ;;  %vm4544_vm0 = vcmask 257027   ;;  %v5896_v0 = vmov 0   ;;  %v288_v1 = vld [vmem:[%s7183_s1 + $0x38] sm:$0xff] }
  0x1b   : > { %v287_v2 = vld [vmem:[%s7183_s1 + $0x30] sm:$0xff]  ;;  %5817 = vmatprep.subr.mxu1 %v288_v1  ;;  %5337 = vmatprep.subr.mxu0 %v288_v1  ;;  %v286_v3 = vld [vmem:[%s7183_s1 + $0x28] sm:$0xff]  ;;  %v285_v4 = vld [vmem:[%s7183_s1 + $0x20] sm:$0xff]  ;;  %vm289_vm1 = vcmask 523264   ;;  %vm1123_vm2 = vcmask 261120   ;;  %vm1219_vm3 = vcmask 257024  }
  0x1c   : > { %s7188_s13 = smov (!%p174_p0, %s4613_s13), 1  ;;  %5825 = vmatpush3.msra.mxu1 %v288_v1  ;;  %5338 = vmatpush3.msra.mxu0 %v288_v1  ;;  %v284_v6 = vld [vmem:[%s7183_s1 + $0x18] sm:$0xff]  ;;  %v283_v7 = vld [vmem:[%s7183_s1 + $0x10] sm:$0xff]  ;;  %v282_v8 = vld [vmem:[%s7183_s1 + $0x8] sm:$0xff]  ;;  %vm4542_vm4 = vcmask 256000  }
  0x1d   : > { %s5834_s21 = smul.u32 192, %s7188_s13  ;;  %5818 = vmatprep.subr.mxu1 %v287_v2  ;;  %5339 = vmatprep.subr.mxu0 %v287_v2  ;;  %v281_v9 = vld [vmem:[%s7183_s1] sm:$0xff]  ;;  %v4725_v11 = vld [vmem:[%s7183_s1 + $0x78] sm:$0xff]  ;;  %v4724_v19 = vld [vmem:[%s7183_s1 + $0x70] sm:$0xff] }
  0x1e   : > { %s5833_s22 = smul.u32 768, %s7188_s13  ;;  %5826 = vmatpush3.msra.mxu1 %v287_v2  ;;  %5340 = vmatpush3.msra.mxu0 %v287_v2  ;;  %v4829_v15 = vld [vmem:[%s7183_s1 + $0xb8] sm:$0xff]  ;;  %v4828_v20 = vld [vmem:[%s7183_s1 + $0xb0] sm:$0xff]  ;;  %v4723_v25 = vld [vmem:[%s7183_s1 + $0x68] sm:$0xff] }
  0x1f   : > { %s5942_s25 = scalar_lea.vmem %s7185_s3, %s5834_s21  ;;  %5819 = vmatprep.subr.mxu1 %v286_v3  ;;  %5341 = vmatprep.subr.mxu0 %v286_v3  ;;  %v4827_v26 = vld [vmem:[%s7183_s1 + $0xa8] sm:$0xff]  ;;  %v4722_v31 = vld [vmem:[%s7183_s1 + $0x60] sm:$0xff]  ;;  %v4721_v37 = vld [vmem:[%s7183_s1 + $0x58] sm:$0xff] }
  0x20   : > { %4545 = vst.msk [vmem:[%s5942_s25 + $0xbc] sm:$0x8] %vm4544_vm0, %v5896_v0  ;;  %s5957_s7 = scalar_lea.vmem %s7182_s0, %s5833_s22  ;;  %5827 = vmatpush3.msra.mxu1 %v286_v3  ;;  %5342 = vmatpush3.msra.mxu0 %v286_v3  ;;  %v4826_v32 = vld [vmem:[%s7183_s1 + $0xa0] sm:$0xff]  ;;  %v4825_v38 = vld [vmem:[%s7183_s1 + $0x98] sm:$0xff]  ;;  %v4720_v43 = vld [vmem:[%s7183_s1 + $0x50] sm:$0xff] }
  0x21   : > { %v233_v5 = vld [vmem:[%s5957_s7 + $0x180] sm:$0xff]  ;;  %5820 = vmatprep.subr.mxu1 %v285_v4  ;;  %5343 = vmatprep.subr.mxu0 %v285_v4  ;;  %v234_v10 = vld [vmem:[%s5957_s7 + $0x188] sm:$0xff]  ;;  %v235_v12 = vld [vmem:[%s5957_s7 + $0x190] sm:$0xff] }
  0x22   : > { %5828 = vmatpush3.msra.mxu1 %v285_v4  ;;  %5425 = vmatprep.mubr.msk.f32.mxu1 %vm289_vm1, %v233_v5  ;;  %v185_v13 = vld [vmem:[%s5957_s7] sm:$0xff]  ;;  %v186_v14 = vld [vmem:[%s5957_s7 + $0x8] sm:$0xff]  ;;  %v236_v16 = vld [vmem:[%s5957_s7 + $0x198] sm:$0xff] }
  0x23   : > { %5821 = vmatprep.subr.mxu1 %v284_v6  ;;  %5344 = vmatpush3.msra.mxu0 %v285_v4  ;;  %v237_v17 = vld [vmem:[%s5957_s7 + $0x1a0] sm:$0xff]  ;;  %v187_v18 = vld [vmem:[%s5957_s7 + $0x10] sm:$0xff]  ;;  %v188_v21 = vld [vmem:[%s5957_s7 + $0x18] sm:$0xff] }
  0x24   : > { %5829 = vmatpush3.msra.mxu1 %v284_v6  ;;  %5345 = vmatprep.subr.mxu0 %v284_v6  ;;  %v238_v22 = vld [vmem:[%s5957_s7 + $0x1a8] sm:$0xff]  ;;  %v189_v23 = vld [vmem:[%s5957_s7 + $0x20] sm:$0xff]  ;;  %v239_v24 = vld [vmem:[%s5957_s7 + $0x1b0] sm:$0xff] }
  0x25   : > { %5822 = vmatprep.subr.mxu1 %v283_v7  ;;  %5346 = vmatpush3.msra.mxu0 %v284_v6  ;;  %v190_v27 = vld [vmem:[%s5957_s7 + $0x28] sm:$0xff]  ;;  %v240_v28 = vld [vmem:[%s5957_s7 + $0x1b8] sm:$0xff]  ;;  %v191_v29 = vld [vmem:[%s5957_s7 + $0x30] sm:$0xff] }
  0x26   : > { %5830 = vmatpush3.msra.mxu1 %v283_v7  ;;  %5347 = vmatprep.subr.mxu0 %v283_v7  ;;  %v241_v30 = vld [vmem:[%s5957_s7 + $0x1c0] sm:$0xff]  ;;  %v192_v33 = vld [vmem:[%s5957_s7 + $0x38] sm:$0xff]  ;;  %v242_v34 = vld [vmem:[%s5957_s7 + $0x1c8] sm:$0xff] }
  0x27   : > { %5823 = vmatprep.subr.mxu1 %v282_v8  ;;  %5348 = vmatpush3.msra.mxu0 %v283_v7  ;;  %v193_v35 = vld [vmem:[%s5957_s7 + $0x40] sm:$0xff]  ;;  %v243_v36 = vld [vmem:[%s5957_s7 + $0x1d0] sm:$0xff]  ;;  %v194_v39 = vld [vmem:[%s5957_s7 + $0x48] sm:$0xff] }
  0x28   : > { %5831 = vmatpush3.msra.mxu1 %v282_v8  ;;  %5349 = vmatprep.subr.mxu0 %v282_v8  ;;  %v244_v40 = vld [vmem:[%s5957_s7 + $0x1d8] sm:$0xff]  ;;  %v195_v41 = vld [vmem:[%s5957_s7 + $0x50] sm:$0xff]  ;;  %v245_v42 = vld [vmem:[%s5957_s7 + $0x1e0] sm:$0xff] }
  0x29   : > { %5824 = vmatprep.subr.mxu1 %v281_v9  ;;  %5350 = vmatpush3.msra.mxu0 %v282_v8  ;;  %v4824_v44 = vld [vmem:[%s7183_s1 + $0x90] sm:$0xff]  ;;  %v196_v45 = vld [vmem:[%s5957_s7 + $0x58] sm:$0xff]  ;;  %v246_v46 = vld [vmem:[%s5957_s7 + $0x1e8] sm:$0xff] }
  0x2a   : > { %5832 = vmatpush3.msra.mxu1 %v281_v9  ;;  %5351 = vmatprep.subr.mxu0 %v281_v9  ;;  %v197_v47 = vld [vmem:[%s5957_s7 + $0x60] sm:$0xff]  ;;  %v247_v48 = vld [vmem:[%s5957_s7 + $0x1f0] sm:$0xff]  ;;  %v4719_v49 = vld [vmem:[%s7183_s1 + $0x48] sm:$0xff] }
  0x2b   : > { %5426 = vmatmul.mubr.msk.f32.vlgmr.msra.gmra.mxu1 %vm289_vm1, %v234_v10  ;;  %5497 = vmatprep.subr.mxu1 %v4725_v11  ;;  %v4823_v50 = vld [vmem:[%s7183_s1 + $0x88] sm:$0xff]  ;;  %v248_v52 = vld [vmem:[%s5957_s7 + $0x1f8] sm:$0xff]  ;;  %v199_v53 = vld [vmem:[%s5957_s7 + $0x70] sm:$0xff] }
  0x2c   : > { %5498 = vmatpush3.msra.mxu1 %v4725_v11  ;;  %5428 = vmatprep.mubr.msk.f32.mxu1 %vm289_vm1, %v235_v12  ;;  %v198_v51 = vld [vmem:[%s5957_s7 + $0x68] sm:$0xff]  ;;  %v249_v54 = vld [vmem:[%s5957_s7 + $0x200] sm:$0xff]  ;;  %v200_v57 = vld [vmem:[%s5957_s7 + $0x78] sm:$0xff] }
  0x2d   : > { %5352 = vmatpush3.msra.mxu0 %v281_v9  ;;  %5353 = vmatprep.mubr.msk.f32.mxu0 %vm289_vm1, %v185_v13  ;;  %v4718_v55 = vld [vmem:[%s7183_s1 + $0x40] sm:$0xff]  ;;  %v250_v58 = vld [vmem:[%s5957_s7 + $0x208] sm:$0xff]  ;;  %v251_v60 = vld [vmem:[%s5957_s7 + $0x210] sm:$0xff] }
  0x2e   : > { %5354 = vmatmul.mubr.msk.f32.vlgmr.msra.gmra.mxu0 %vm289_vm1, %v186_v14  ;;  %5657 = vmatprep.subr.mxu0 %v4829_v15  ;;  %v4822_v56 = vld [vmem:[%s7183_s1 + $0x80] sm:$0xff]  ;;  %v202_v61 = vld [vmem:[%s5957_s7 + $0x88] sm:$0xff]  ;;  %v252_v62 = vld [vmem:[%s5957_s7 + $0x218] sm:$0xff] }
  0x2f   : > { %5429 = vmatmul.mubr.msk.f32.gmra.mxu1 %vm289_vm1, %v236_v16  ;;  %5658 = vmatpush3.msra.mxu0 %v4829_v15  ;;  %v201_v59 = vld [vmem:[%s5957_s7 + $0x80] sm:$0xff]  ;;  %v203_v63 = vld [vmem:[%s5957_s7 + $0x90] sm:$0xff]  ;;  %v204_v1 = vld [vmem:[%s5957_s7 + $0x98] sm:$0xff] }
  0x30   : > { %5431 = vmatprep.mubr.msk.f32.mxu1 %vm289_vm1, %v237_v17  ;;  %5356 = vmatprep.mubr.msk.f32.mxu0 %vm289_vm1, %v187_v18  ;;  %v253_v0 = vld [vmem:[%s5957_s7 + $0x220] sm:$0xff]  ;;  %v254_v2 = vld [vmem:[%s5957_s7 + $0x228] sm:$0xff]  ;;  %v255_v4 = vld [vmem:[%s5957_s7 + $0x230] sm:$0xff] }
  0x31   : > { %5499 = vmatprep.subr.mxu1 %v4724_v19  ;;  %5659 = vmatprep.subr.mxu0 %v4828_v20  ;;  %v205_v3 = vld [vmem:[%s5957_s7 + $0xa0] sm:$0xff]  ;;  %v206_v5 = vld [vmem:[%s5957_s7 + $0xa8] sm:$0xff]  ;;  %v256_v6 = vld [vmem:[%s5957_s7 + $0x238] sm:$0xff] }
  0x32   : > { %5357 = vmatmul.mubr.msk.f32.gmra.mxu0 %vm289_vm1, %v188_v21  ;;  %5500 = vmatpush3.msra.mxu1 %v4724_v19  ;;  %v207_v7 = vld [vmem:[%s5957_s7 + $0xb0] sm:$0xff]  ;;  %v257_v8 = vld [vmem:[%s5957_s7 + $0x240] sm:$0xff]  ;;  %v208_v9 = vld [vmem:[%s5957_s7 + $0xb8] sm:$0xff] }
  0x33   : > { %5432 = vmatmul.mubr.msk.f32.gmra.mxu1 %vm289_vm1, %v238_v22  ;;  %5359 = vmatprep.mubr.msk.f32.mxu0 %vm289_vm1, %v189_v23  ;;  %v258_v10 = vld [vmem:[%s5957_s7 + $0x248] sm:$0xff]  ;;  %v209_v11 = vld [vmem:[%s5957_s7 + $0xc0] sm:$0xff]  ;;  %v259_v12 = vld [vmem:[%s5957_s7 + $0x250] sm:$0xff] }
  0x34   : > { %5434 = vmatprep.mubr.msk.f32.mxu1 %vm289_vm1, %v239_v24  ;;  %5660 = vmatpush3.msra.mxu0 %v4828_v20  ;;  %v210_v13 = vld [vmem:[%s5957_s7 + $0xc8] sm:$0xff]  ;;  %v260_v14 = vld [vmem:[%s5957_s7 + $0x258] sm:$0xff]  ;;  %v211_v15 = vld [vmem:[%s5957_s7 + $0xd0] sm:$0xff] }
  0x35   : > { %5501 = vmatprep.subr.mxu1 %v4723_v25  ;;  %5661 = vmatprep.subr.mxu0 %v4827_v26  ;;  %v261_v16 = vld [vmem:[%s5957_s7 + $0x260] sm:$0xff]  ;;  %v212_v17 = vld [vmem:[%s5957_s7 + $0xd8] sm:$0xff]  ;;  %v262_v18 = vld [vmem:[%s5957_s7 + $0x268] sm:$0xff] }
  0x36   : > { %5360 = vmatmul.mubr.msk.f32.gmra.mxu0 %vm289_vm1, %v190_v27  ;;  %5502 = vmatpush3.msra.mxu1 %v4723_v25  ;;  %v213_v19 = vld [vmem:[%s5957_s7 + $0xe0] sm:$0xff]  ;;  %v263_v20 = vld [vmem:[%s5957_s7 + $0x270] sm:$0xff]  ;;  %v214_v21 = vld [vmem:[%s5957_s7 + $0xe8] sm:$0xff] }
  0x37   : > { %5435 = vmatmul.mubr.msk.f32.gmra.mxu1 %vm289_vm1, %v240_v28  ;;  %5362 = vmatprep.mubr.msk.f32.mxu0 %vm289_vm1, %v191_v29  ;;  %v264_v22 = vld [vmem:[%s5957_s7 + $0x278] sm:$0xff]  ;;  %v215_v23 = vld [vmem:[%s5957_s7 + $0xf0] sm:$0xff]  ;;  %v265_v24 = vld [vmem:[%s5957_s7 + $0x280] sm:$0xff] }
  0x38   : > { %5437 = vmatprep.mubr.msk.f32.mxu1 %vm289_vm1, %v241_v30  ;;  %5662 = vmatpush3.msra.mxu0 %v4827_v26  ;;  %v216_v25 = vld [vmem:[%s5957_s7 + $0xf8] sm:$0xff]  ;;  %v266_v26 = vld [vmem:[%s5957_s7 + $0x288] sm:$0xff]  ;;  %v217_v27 = vld [vmem:[%s5957_s7 + $0x100] sm:$0xff] }
  0x39   : > { %5503 = vmatprep.subr.mxu1 %v4722_v31  ;;  %5663 = vmatprep.subr.mxu0 %v4826_v32  ;;  %v267_v28 = vld [vmem:[%s5957_s7 + $0x290] sm:$0xff]  ;;  %v218_v29 = vld [vmem:[%s5957_s7 + $0x108] sm:$0xff]  ;;  %v268_v30 = vld [vmem:[%s5957_s7 + $0x298] sm:$0xff] }
  0x3a   : > { %5363 = vmatmul.mubr.msk.f32.gmra.mxu0 %vm289_vm1, %v192_v33  ;;  %5504 = vmatpush3.msra.mxu1 %v4722_v31  ;;  %v219_v31 = vld [vmem:[%s5957_s7 + $0x110] sm:$0xff]  ;;  %v220_v33 = vld [vmem:[%s5957_s7 + $0x118] sm:$0xff] }
  0x3b   : > { %5438 = vmatmul.mubr.msk.f32.gmra.mxu1 %vm289_vm1, %v242_v34  ;;  %5365 = vmatprep.mubr.msk.f32.mxu0 %vm289_vm1, %v193_v35  ;;  %v270_v34 = vld [vmem:[%s5957_s7 + $0x2a8] sm:$0xff]  ;;  %v221_v35 = vld [vmem:[%s5957_s7 + $0x120] sm:$0xff] }
  0x3c   : > { %5440 = vmatprep.mubr.msk.f32.mxu1 %vm289_vm1, %v243_v36  ;;  %5664 = vmatpush3.msra.mxu0 %v4826_v32  ;;  %v269_v32 = vld [vmem:[%s5957_s7 + $0x2a0] sm:$0xff]  ;;  %v271_v36 = vld [vmem:[%s5957_s7 + $0x2b0] sm:$0xff] }
  0x3d   : > { %5505 = vmatprep.subr.mxu1 %v4721_v37  ;;  %5665 = vmatprep.subr.mxu0 %v4825_v38 }
  0x3e   : > { %5366 = vmatmul.mubr.msk.f32.gmra.mxu0 %vm289_vm1, %v194_v39  ;;  %5506 = vmatpush3.msra.mxu1 %v4721_v37  ;;  %v222_v37 = vld [vmem:[%s5957_s7 + $0x128] sm:$0xff]  ;;  %v223_v39 = vld [vmem:[%s5957_s7 + $0x130] sm:$0xff] }
  0x3f   : > { %5441 = vmatmul.mubr.msk.f32.gmra.mxu1 %vm289_vm1, %v244_v40  ;;  %5368 = vmatprep.mubr.msk.f32.mxu0 %vm289_vm1, %v195_v41  ;;  %v273_v40 = vld [vmem:[%s5957_s7 + $0x2c0] sm:$0xff]  ;;  %v224_v41 = vld [vmem:[%s5957_s7 + $0x138] sm:$0xff] }
  0x40   : > { %5443 = vmatprep.mubr.msk.f32.mxu1 %vm289_vm1, %v245_v42  ;;  %5666 = vmatpush3.msra.mxu0 %v4825_v38  ;;  %v272_v38 = vld [vmem:[%s5957_s7 + $0x2b8] sm:$0xff]  ;;  %v274_v42 = vld [vmem:[%s5957_s7 + $0x2c8] sm:$0xff] }
  0x41   : > { %5507 = vmatprep.subr.mxu1 %v4720_v43  ;;  %5667 = vmatprep.subr.mxu0 %v4824_v44 }
  0x42   : > { %5369 = vmatmul.mubr.msk.f32.gmra.mxu0 %vm289_vm1, %v196_v45  ;;  %5508 = vmatpush3.msra.mxu1 %v4720_v43  ;;  %v225_v43 = vld [vmem:[%s5957_s7 + $0x140] sm:$0xff]  ;;  %v226_v45 = vld [vmem:[%s5957_s7 + $0x148] sm:$0xff] }
  0x43   : > { %5444 = vmatmul.mubr.msk.f32.gmra.mxu1 %vm289_vm1, %v246_v46  ;;  %5371 = vmatprep.mubr.msk.f32.mxu0 %vm289_vm1, %v197_v47  ;;  %v276_v46 = vld [vmem:[%s5957_s7 + $0x2d8] sm:$0xff]  ;;  %v227_v47 = vld [vmem:[%s5957_s7 + $0x150] sm:$0xff] }
  0x44   : > { %5446 = vmatprep.mubr.msk.f32.mxu1 %vm289_vm1, %v247_v48  ;;  %5668 = vmatpush3.msra.mxu0 %v4824_v44  ;;  %v275_v44 = vld [vmem:[%s5957_s7 + $0x2d0] sm:$0xff]  ;;  %v277_v48 = vld [vmem:[%s5957_s7 + $0x2e0] sm:$0xff] }
  0x45   : > { %5509 = vmatprep.subr.mxu1 %v4719_v49  ;;  %5669 = vmatprep.subr.mxu0 %v4823_v50 }
  0x46   : > { %5372 = vmatmul.mubr.msk.f32.gmra.mxu0 %vm289_vm1, %v198_v51  ;;  %5510 = vmatpush3.msra.mxu1 %v4719_v49  ;;  %v228_v49 = vld [vmem:[%s5957_s7 + $0x158] sm:$0xff]  ;;  %v229_v51 = vld [vmem:[%s5957_s7 + $0x160] sm:$0xff] }
  0x47   : > { %5447 = vmatmul.mubr.msk.f32.gmra.mxu1 %vm289_vm1, %v248_v52  ;;  %5374 = vmatprep.mubr.msk.f32.mxu0 %vm289_vm1, %v199_v53  ;;  %v279_v52 = vld [vmem:[%s5957_s7 + $0x2f0] sm:$0xff]  ;;  %v230_v53 = vld [vmem:[%s5957_s7 + $0x168] sm:$0xff] }
  0x48   : > { %5449 = vmatprep.mubr.msk.f32.mxu1 %vm289_vm1, %v249_v54  ;;  %5670 = vmatpush3.msra.mxu0 %v4823_v50  ;;  %v278_v50 = vld [vmem:[%s5957_s7 + $0x2e8] sm:$0xff]  ;;  %v280_v54 = vld [vmem:[%s5957_s7 + $0x2f8] sm:$0xf] }
  0x49   : > { %5511 = vmatprep.subr.mxu1 %v4718_v55  ;;  %5671 = vmatprep.subr.mxu0 %v4822_v56 }
  0x4a   : > { %5375 = vmatmul.mubr.msk.f32.gmra.mxu0 %vm289_vm1, %v200_v57  ;;  %5512 = vmatpush3.msra.mxu1 %v4718_v55  ;;  %v231_v55 = vld [vmem:[%s5957_s7 + $0x170] sm:$0xff]  ;;  %v232_v57 = vld [vmem:[%s5957_s7 + $0x178] sm:$0xff] }
  0x4b   : > { %5450 = vmatmul.mubr.msk.f32.gmra.mxu1 %vm289_vm1, %v250_v58  ;;  %5377 = vmatprep.mubr.msk.f32.mxu0 %vm289_vm1, %v201_v59  ;;  %v1318_v58 = vld [vmem:[%s5957_s7 + $0xa] sm:$0xff] }
  0x4c   : > { %5452 = vmatprep.mubr.msk.f32.mxu1 %vm289_vm1, %v251_v60  ;;  %5672 = vmatpush3.msra.mxu0 %v4822_v56  ;;  %v1317_v56 = vld [vmem:[%s5957_s7 + $0x2] sm:$0xff]  ;;  %v1319_v60 = vld [vmem:[%s5957_s7 + $0x12] sm:$0xff] }
  0x4d   : > { %v2543_v59 = vld [vmem:[%s5957_s7 + $0x4] sm:$0xff] }
  0x4e   : > { %5378 = vmatmul.mubr.msk.f32.gmra.mxu0 %vm289_vm1, %v202_v61  ;;  %v2544_v61 = vld [vmem:[%s5957_s7 + $0xc] sm:$0xff] }
  0x4f   : > { %5453 = vmatmul.mubr.msk.f32.gmra.mxu1 %vm289_vm1, %v252_v62  ;;  %5380 = vmatprep.mubr.msk.f32.mxu0 %vm289_vm1, %v203_v63  ;;  %v1320_v62 = vld [vmem:[%s5957_s7 + $0x1a] sm:$0xff] }
  0x50   : > { %5455 = vmatprep.mubr.msk.f32.mxu1 %vm289_vm1, %v253_v0  ;;  %v2545_v63 = vld [vmem:[%s5957_s7 + $0x14] sm:$0xff]  ;;  %v1321_v0 = vld [vmem:[%s5957_s7 + $0x22] sm:$0xff] }
  0x52   : > { %5381 = vmatmul.mubr.msk.f32.gmra.mxu0 %vm289_vm1, %v204_v1  ;;  %v2546_v1 = vld [vmem:[%s5957_s7 + $0x1c] sm:$0xff] }
  0x53   : > { %5456 = vmatmul.mubr.msk.f32.gmra.mxu1 %vm289_vm1, %v254_v2  ;;  %5383 = vmatprep.mubr.msk.f32.mxu0 %vm289_vm1, %v205_v3  ;;  %v1322_v2 = vld [vmem:[%s5957_s7 + $0x2a] sm:$0xff] }
  0x54   : > { %5458 = vmatprep.mubr.msk.f32.mxu1 %vm289_vm1, %v255_v4  ;;  %v2547_v3 = vld [vmem:[%s5957_s7 + $0x24] sm:$0xff]  ;;  %v1323_v4 = vld [vmem:[%s5957_s7 + $0x32] sm:$0xff] }
  0x56   : > { %5384 = vmatmul.mubr.msk.f32.gmra.mxu0 %vm289_vm1, %v206_v5  ;;  %v2548_v5 = vld [vmem:[%s5957_s7 + $0x2c] sm:$0xff] }
  0x57   : > { %5459 = vmatmul.mubr.msk.f32.gmra.mxu1 %vm289_vm1, %v256_v6  ;;  %5386 = vmatprep.mubr.msk.f32.mxu0 %vm289_vm1, %v207_v7  ;;  %v1324_v6 = vld [vmem:[%s5957_s7 + $0x3a] sm:$0xff] }
  0x58   : > { %5461 = vmatprep.mubr.msk.f32.mxu1 %vm289_vm1, %v257_v8  ;;  %v2549_v7 = vld [vmem:[%s5957_s7 + $0x34] sm:$0xff]  ;;  %v1325_v8 = vld [vmem:[%s5957_s7 + $0x42] sm:$0xff] }
  0x5a   : > { %5387 = vmatmul.mubr.msk.f32.gmra.mxu0 %vm289_vm1, %v208_v9  ;;  %v2550_v9 = vld [vmem:[%s5957_s7 + $0x3c] sm:$0xff] }
  0x5b   : > { %5462 = vmatmul.mubr.msk.f32.gmra.mxu1 %vm289_vm1, %v258_v10  ;;  %5389 = vmatprep.mubr.msk.f32.mxu0 %vm289_vm1, %v209_v11  ;;  %v1326_v10 = vld [vmem:[%s5957_s7 + $0x4a] sm:$0xff] }
  0x5c   : > { %5464 = vmatprep.mubr.msk.f32.mxu1 %vm289_vm1, %v259_v12  ;;  %v2551_v11 = vld [vmem:[%s5957_s7 + $0x44] sm:$0xff]  ;;  %v1327_v12 = vld [vmem:[%s5957_s7 + $0x52] sm:$0xff] }
  0x5e   : > { %5390 = vmatmul.mubr.msk.f32.gmra.mxu0 %vm289_vm1, %v210_v13  ;;  %v2552_v13 = vld [vmem:[%s5957_s7 + $0x4c] sm:$0xff] }
  0x5f   : > { %5465 = vmatmul.mubr.msk.f32.gmra.mxu1 %vm289_vm1, %v260_v14  ;;  %5392 = vmatprep.mubr.msk.f32.mxu0 %vm289_vm1, %v211_v15  ;;  %v1328_v14 = vld [vmem:[%s5957_s7 + $0x5a] sm:$0xff] }
  0x60   : > { %5467 = vmatprep.mubr.msk.f32.mxu1 %vm289_vm1, %v261_v16  ;;  %v2553_v15 = vld [vmem:[%s5957_s7 + $0x54] sm:$0xff]  ;;  %v1329_v16 = vld [vmem:[%s5957_s7 + $0x62] sm:$0xff] }
  0x62   : > { %5393 = vmatmul.mubr.msk.f32.gmra.mxu0 %vm289_vm1, %v212_v17  ;;  %v2554_v17 = vld [vmem:[%s5957_s7 + $0x5c] sm:$0xff] }
  0x63   : > { %5468 = vmatmul.mubr.msk.f32.gmra.mxu1 %vm289_vm1, %v262_v18  ;;  %5395 = vmatprep.mubr.msk.f32.mxu0 %vm289_vm1, %v213_v19  ;;  %v1330_v18 = vld [vmem:[%s5957_s7 + $0x6a] sm:$0xff] }
  0x64   : > { %5470 = vmatprep.mubr.msk.f32.mxu1 %vm289_vm1, %v263_v20  ;;  %v2555_v19 = vld [vmem:[%s5957_s7 + $0x64] sm:$0xff]  ;;  %v1331_v20 = vld [vmem:[%s5957_s7 + $0x72] sm:$0xff] }
  0x66   : > { %5396 = vmatmul.mubr.msk.f32.gmra.mxu0 %vm289_vm1, %v214_v21  ;;  %v2556_v21 = vld [vmem:[%s5957_s7 + $0x6c] sm:$0xff] }
  0x67   : > { %5471 = vmatmul.mubr.msk.f32.gmra.mxu1 %vm289_vm1, %v264_v22  ;;  %5398 = vmatprep.mubr.msk.f32.mxu0 %vm289_vm1, %v215_v23  ;;  %v1332_v22 = vld [vmem:[%s5957_s7 + $0x7a] sm:$0xff] }
  0x68   : > { %5473 = vmatprep.mubr.msk.f32.mxu1 %vm289_vm1, %v265_v24  ;;  %v2557_v23 = vld [vmem:[%s5957_s7 + $0x74] sm:$0xff]  ;;  %v1333_v24 = vld [vmem:[%s5957_s7 + $0x82] sm:$0xff] }
  0x6a   : > { %5399 = vmatmul.mubr.msk.f32.gmra.mxu0 %vm289_vm1, %v216_v25  ;;  %v2558_v25 = vld [vmem:[%s5957_s7 + $0x7c] sm:$0xff] }
  0x6b   : > { %5474 = vmatmul.mubr.msk.f32.gmra.mxu1 %vm289_vm1, %v266_v26  ;;  %5401 = vmatprep.mubr.msk.f32.mxu0 %vm289_vm1, %v217_v27  ;;  %v1334_v26 = vld [vmem:[%s5957_s7 + $0x8a] sm:$0xff] }
  0x6c   : > { %5476 = vmatprep.mubr.msk.f32.mxu1 %vm289_vm1, %v267_v28  ;;  %v2559_v27 = vld [vmem:[%s5957_s7 + $0x84] sm:$0xff]  ;;  %v1335_v28 = vld [vmem:[%s5957_s7 + $0x92] sm:$0xff] }
  0x6e   : > { %5402 = vmatmul.mubr.msk.f32.gmra.mxu0 %vm289_vm1, %v218_v29  ;;  %v2560_v29 = vld [vmem:[%s5957_s7 + $0x8c] sm:$0xff] }
  0x6f   : > { %5477 = vmatmul.mubr.msk.f32.gmra.mxu1 %vm289_vm1, %v268_v30  ;;  %5404 = vmatprep.mubr.msk.f32.mxu0 %vm289_vm1, %v219_v31  ;;  %v1336_v30 = vld [vmem:[%s5957_s7 + $0x9a] sm:$0xff] }
  0x70   : > { %5479 = vmatprep.mubr.msk.f32.mxu1 %vm289_vm1, %v269_v32  ;;  %v2561_v31 = vld [vmem:[%s5957_s7 + $0x94] sm:$0xff]  ;;  %v1337_v32 = vld [vmem:[%s5957_s7 + $0xa2] sm:$0xff] }
  0x72   : > { %5405 = vmatmul.mubr.msk.f32.gmra.mxu0 %vm289_vm1, %v220_v33  ;;  %v2562_v33 = vld [vmem:[%s5957_s7 + $0x9c] sm:$0xff] }
  0x73   : > { %5480 = vmatmul.mubr.msk.f32.gmra.mxu1 %vm289_vm1, %v270_v34  ;;  %5407 = vmatprep.mubr.msk.f32.mxu0 %vm289_vm1, %v221_v35  ;;  %v1338_v34 = vld [vmem:[%s5957_s7 + $0xaa] sm:$0xff] }
  0x74   : > { %5482 = vmatprep.mubr.msk.f32.mxu1 %vm289_vm1, %v271_v36  ;;  %v2563_v35 = vld [vmem:[%s5957_s7 + $0xa4] sm:$0xff]  ;;  %v1339_v36 = vld [vmem:[%s5957_s7 + $0xb2] sm:$0xff] }
  0x76   : > { %5408 = vmatmul.mubr.msk.f32.gmra.mxu0 %vm289_vm1, %v222_v37  ;;  %v2564_v37 = vld [vmem:[%s5957_s7 + $0xac] sm:$0xff] }
  0x77   : > { %5483 = vmatmul.mubr.msk.f32.gmra.mxu1 %vm289_vm1, %v272_v38  ;;  %5410 = vmatprep.mubr.msk.f32.mxu0 %vm289_vm1, %v223_v39  ;;  %v1340_v38 = vld [vmem:[%s5957_s7 + $0xba] sm:$0xff] }
  0x78   : > { %5485 = vmatprep.mubr.msk.f32.mxu1 %vm289_vm1, %v273_v40  ;;  %v2565_v39 = vld [vmem:[%s5957_s7 + $0xb4] sm:$0xff]  ;;  %v1341_v40 = vld [vmem:[%s5957_s7 + $0xc2] sm:$0xff] }
  0x7a   : > { %5411 = vmatmul.mubr.msk.f32.gmra.mxu0 %vm289_vm1, %v224_v41  ;;  %v2566_v41 = vld [vmem:[%s5957_s7 + $0xbc] sm:$0xff] }
  0x7b   : > { %5486 = vmatmul.mubr.msk.f32.gmra.mxu1 %vm289_vm1, %v274_v42  ;;  %5413 = vmatprep.mubr.msk.f32.mxu0 %vm289_vm1, %v225_v43  ;;  %v1342_v42 = vld [vmem:[%s5957_s7 + $0xca] sm:$0xff] }
  0x7c   : > { %5488 = vmatprep.mubr.msk.f32.mxu1 %vm289_vm1, %v275_v44  ;;  %v2567_v43 = vld [vmem:[%s5957_s7 + $0xc4] sm:$0xff]  ;;  %v1343_v44 = vld [vmem:[%s5957_s7 + $0xd2] sm:$0xff] }
  0x7e   : > { %5414 = vmatmul.mubr.msk.f32.gmra.mxu0 %vm289_vm1, %v226_v45  ;;  %v2568_v45 = vld [vmem:[%s5957_s7 + $0xcc] sm:$0xff] }
  0x7f   : > { %5489 = vmatmul.mubr.msk.f32.gmra.mxu1 %vm289_vm1, %v276_v46  ;;  %5416 = vmatprep.mubr.msk.f32.mxu0 %vm289_vm1, %v227_v47  ;;  %v1344_v46 = vld [vmem:[%s5957_s7 + $0xda] sm:$0xff] }
  0x80   : > { %5491 = vmatprep.mubr.msk.f32.mxu1 %vm289_vm1, %v277_v48  ;;  %v2569_v47 = vld [vmem:[%s5957_s7 + $0xd4] sm:$0xff]  ;;  %v1345_v48 = vld [vmem:[%s5957_s7 + $0xe2] sm:$0xff] }
  0x82   : > { %5417 = vmatmul.mubr.msk.f32.gmra.mxu0 %vm289_vm1, %v228_v49  ;;  %v2570_v49 = vld [vmem:[%s5957_s7 + $0xdc] sm:$0xff] }
  0x83   : > { %5492 = vmatmul.mubr.msk.f32.gmra.mxu1 %vm289_vm1, %v278_v50  ;;  %5419 = vmatprep.mubr.msk.f32.mxu0 %vm289_vm1, %v229_v51  ;;  %v1346_v50 = vld [vmem:[%s5957_s7 + $0xea] sm:$0xff] }
  0x84   : > { %5494 = vmatprep.mubr.msk.f32.mxu1 %vm289_vm1, %v279_v52  ;;  %v2571_v51 = vld [vmem:[%s5957_s7 + $0xe4] sm:$0xff]  ;;  %v1347_v52 = vld [vmem:[%s5957_s7 + $0xf2] sm:$0xff] }
  0x86   : > { %5420 = vmatmul.mubr.msk.f32.gmra.mxu0 %vm289_vm1, %v230_v53  ;;  %v2572_v53 = vld [vmem:[%s5957_s7 + $0xec] sm:$0xff] }
  0x87   : > { %5495 = vmatmul.mubr.msk.f32.gmra.mxu1 %vm289_vm1, %v280_v54  ;;  %5422 = vmatprep.mubr.msk.f32.mxu0 %vm289_vm1, %v231_v55  ;;  %v1348_v54 = vld [vmem:[%s5957_s7 + $0xfa] sm:$0xff] }
  0x88   : > { %5513 = vmatprep.mubr.msk.f32.mxu1 %vm289_vm1, %v1317_v56  ;;  %v2573_v55 = vld [vmem:[%s5957_s7 + $0xf4] sm:$0xff]  ;;  %v1349_v56 = vld [vmem:[%s5957_s7 + $0x102] sm:$0xff] }
  0x8a   : > { %5423 = vmatmul.mubr.msk.f32.gmra.mxu0 %vm289_vm1, %v232_v57  ;;  %v2574_v57 = vld [vmem:[%s5957_s7 + $0xfc] sm:$0xff] }
  0x8b   : > { %5514 = vmatmul.mubr.msk.f32.vlgmr.msra.gmra.mxu1 %vm289_vm1, %v1318_v58  ;;  %5673 = vmatprep.mubr.msk.f32.mxu0 %vm289_vm1, %v2543_v59  ;;  %v1350_v58 = vld [vmem:[%s5957_s7 + $0x10a] sm:$0xff] }
  0x8c   : > { %5516 = vmatprep.mubr.msk.f32.mxu1 %vm289_vm1, %v1319_v60  ;;  %v2575_v59 = vld [vmem:[%s5957_s7 + $0x104] sm:$0xff]  ;;  %v1351_v60 = vld [vmem:[%s5957_s7 + $0x112] sm:$0xff] }
  0x8e   : > { %5674 = vmatmul.mubr.msk.f32.vlgmr.msra.gmra.mxu0 %vm289_vm1, %v2544_v61  ;;  %v2576_v61 = vld [vmem:[%s5957_s7 + $0x10c] sm:$0xff] }
  0x8f   : > { %5517 = vmatmul.mubr.msk.f32.gmra.mxu1 %vm289_vm1, %v1320_v62  ;;  %5676 = vmatprep.mubr.msk.f32.mxu0 %vm289_vm1, %v2545_v63  ;;  %v1352_v62 = vld [vmem:[%s5957_s7 + $0x11a] sm:$0xff] }
  0x90   : > { %5519 = vmatprep.mubr.msk.f32.mxu1 %vm289_vm1, %v1321_v0  ;;  %v2577_v63 = vld [vmem:[%s5957_s7 + $0x114] sm:$0xff]  ;;  %v1353_v0 = vld [vmem:[%s5957_s7 + $0x122] sm:$0xff] }
  0x92   : > { %5677 = vmatmul.mubr.msk.f32.gmra.mxu0 %vm289_vm1, %v2546_v1  ;;  %v2578_v1 = vld [vmem:[%s5957_s7 + $0x11c] sm:$0xff] }
  0x93   : > { %5520 = vmatmul.mubr.msk.f32.gmra.mxu1 %vm289_vm1, %v1322_v2  ;;  %5679 = vmatprep.mubr.msk.f32.mxu0 %vm289_vm1, %v2547_v3  ;;  %v1354_v2 = vld [vmem:[%s5957_s7 + $0x12a] sm:$0xff] }
  0x94   : > { %5522 = vmatprep.mubr.msk.f32.mxu1 %vm289_vm1, %v1323_v4  ;;  %v2579_v3 = vld [vmem:[%s5957_s7 + $0x124] sm:$0xff]  ;;  %v1355_v4 = vld [vmem:[%s5957_s7 + $0x132] sm:$0xff] }
  0x96   : > { %5680 = vmatmul.mubr.msk.f32.gmra.mxu0 %vm289_vm1, %v2548_v5  ;;  %v2580_v5 = vld [vmem:[%s5957_s7 + $0x12c] sm:$0xff] }
  0x97   : > { %5523 = vmatmul.mubr.msk.f32.gmra.mxu1 %vm289_vm1, %v1324_v6  ;;  %5682 = vmatprep.mubr.msk.f32.mxu0 %vm289_vm1, %v2549_v7  ;;  %v1356_v6 = vld [vmem:[%s5957_s7 + $0x13a] sm:$0xff] }
  0x98   : > { %5525 = vmatprep.mubr.msk.f32.mxu1 %vm289_vm1, %v1325_v8  ;;  %v2581_v7 = vld [vmem:[%s5957_s7 + $0x134] sm:$0xff]  ;;  %v1357_v8 = vld [vmem:[%s5957_s7 + $0x142] sm:$0xff] }
  0x9a   : > { %5683 = vmatmul.mubr.msk.f32.gmra.mxu0 %vm289_vm1, %v2550_v9  ;;  %v2582_v9 = vld [vmem:[%s5957_s7 + $0x13c] sm:$0xff] }
  0x9b   : > { %5526 = vmatmul.mubr.msk.f32.gmra.mxu1 %vm289_vm1, %v1326_v10  ;;  %5685 = vmatprep.mubr.msk.f32.mxu0 %vm289_vm1, %v2551_v11  ;;  %v1358_v10 = vld [vmem:[%s5957_s7 + $0x14a] sm:$0xff] }
  0x9c   : > { %5528 = vmatprep.mubr.msk.f32.mxu1 %vm289_vm1, %v1327_v12  ;;  %v2583_v11 = vld [vmem:[%s5957_s7 + $0x144] sm:$0xff]  ;;  %v1359_v12 = vld [vmem:[%s5957_s7 + $0x152] sm:$0xff] }
  0x9e   : > { %5686 = vmatmul.mubr.msk.f32.gmra.mxu0 %vm289_vm1, %v2552_v13  ;;  %v2584_v13 = vld [vmem:[%s5957_s7 + $0x14c] sm:$0xff] }
  0x9f   : > { %5529 = vmatmul.mubr.msk.f32.gmra.mxu1 %vm289_vm1, %v1328_v14  ;;  %5688 = vmatprep.mubr.msk.f32.mxu0 %vm289_vm1, %v2553_v15  ;;  %v1360_v14 = vld [vmem:[%s5957_s7 + $0x15a] sm:$0xff] }
  0xa0   : > { %5531 = vmatprep.mubr.msk.f32.mxu1 %vm289_vm1, %v1329_v16  ;;  %v2585_v15 = vld [vmem:[%s5957_s7 + $0x154] sm:$0xff]  ;;  %v1361_v16 = vld [vmem:[%s5957_s7 + $0x162] sm:$0xff] }
  0xa2   : > { %5689 = vmatmul.mubr.msk.f32.gmra.mxu0 %vm289_vm1, %v2554_v17  ;;  %v2586_v17 = vld [vmem:[%s5957_s7 + $0x15c] sm:$0xff] }
  0xa3   : > { %5532 = vmatmul.mubr.msk.f32.gmra.mxu1 %vm289_vm1, %v1330_v18  ;;  %5691 = vmatprep.mubr.msk.f32.mxu0 %vm289_vm1, %v2555_v19  ;;  %v1362_v18 = vld [vmem:[%s5957_s7 + $0x16a] sm:$0xff] }
  0xa4   : > { %5534 = vmatprep.mubr.msk.f32.mxu1 %vm289_vm1, %v1331_v20  ;;  %v2587_v19 = vld [vmem:[%s5957_s7 + $0x164] sm:$0xff]  ;;  %v1363_v20 = vld [vmem:[%s5957_s7 + $0x172] sm:$0xff] }
  0xa6   : > { %5692 = vmatmul.mubr.msk.f32.gmra.mxu0 %vm289_vm1, %v2556_v21  ;;  %v2588_v21 = vld [vmem:[%s5957_s7 + $0x16c] sm:$0xff] }
  0xa7   : > { %5535 = vmatmul.mubr.msk.f32.gmra.mxu1 %vm289_vm1, %v1332_v22  ;;  %5694 = vmatprep.mubr.msk.f32.mxu0 %vm289_vm1, %v2557_v23  ;;  %v1364_v22 = vld [vmem:[%s5957_s7 + $0x17a] sm:$0xff] }
  0xa8   : > { %5537 = vmatprep.mubr.msk.f32.mxu1 %vm289_vm1, %v1333_v24  ;;  %v2589_v23 = vld [vmem:[%s5957_s7 + $0x174] sm:$0xff]  ;;  %v1365_v24 = vld [vmem:[%s5957_s7 + $0x182] sm:$0xff] }
  0xaa   : > { %5695 = vmatmul.mubr.msk.f32.gmra.mxu0 %vm289_vm1, %v2558_v25  ;;  %v2590_v25 = vld [vmem:[%s5957_s7 + $0x17c] sm:$0xff] }
  0xab   : > { %5538 = vmatmul.mubr.msk.f32.gmra.mxu1 %vm289_vm1, %v1334_v26  ;;  %5697 = vmatprep.mubr.msk.f32.mxu0 %vm289_vm1, %v2559_v27  ;;  %v1366_v26 = vld [vmem:[%s5957_s7 + $0x18a] sm:$0xff] }
  0xac   : > { %5540 = vmatprep.mubr.msk.f32.mxu1 %vm289_vm1, %v1335_v28  ;;  %v2591_v27 = vld [vmem:[%s5957_s7 + $0x184] sm:$0xff]  ;;  %v1367_v28 = vld [vmem:[%s5957_s7 + $0x192] sm:$0xff] }
  0xae   : > { %5698 = vmatmul.mubr.msk.f32.gmra.mxu0 %vm289_vm1, %v2560_v29 }
  0xaf   : > { %5541 = vmatmul.mubr.msk.f32.gmra.mxu1 %vm289_vm1, %v1336_v30  ;;  %5700 = vmatprep.mubr.msk.f32.mxu0 %vm289_vm1, %v2561_v31  ;;  %v2592_v30 = vld [vmem:[%s5957_s7 + $0x18c] sm:$0xff]  ;;  %v1368_v31 = vld [vmem:[%s5957_s7 + $0x19a] sm:$0xff] }
  0xb0   : > { %5543 = vmatprep.mubr.msk.f32.mxu1 %vm289_vm1, %v1337_v32  ;;  %v2593_v32 = vld [vmem:[%s5957_s7 + $0x194] sm:$0xff] }
  0xb2   : > { %5701 = vmatmul.mubr.msk.f32.gmra.mxu0 %vm289_vm1, %v2562_v33 }
  0xb3   : > { %5544 = vmatmul.mubr.msk.f32.gmra.mxu1 %vm289_vm1, %v1338_v34  ;;  %5703 = vmatprep.mubr.msk.f32.mxu0 %vm289_vm1, %v2563_v35  ;;  %v1369_v34 = vld [vmem:[%s5957_s7 + $0x1a2] sm:$0xff] }
  0xb4   : > { %5546 = vmatprep.mubr.msk.f32.mxu1 %vm289_vm1, %v1339_v36 }
  0xb6   : > { %5704 = vmatmul.mubr.msk.f32.gmra.mxu0 %vm289_vm1, %v2564_v37  ;;  %v2594_v37 = vld [vmem:[%s5957_s7 + $0x19c] sm:$0xff] }
  0xb7   : > { %5547 = vmatmul.mubr.msk.f32.gmra.mxu1 %vm289_vm1, %v1340_v38  ;;  %5706 = vmatprep.mubr.msk.f32.mxu0 %vm289_vm1, %v2565_v39  ;;  %v1370_v38 = vld [vmem:[%s5957_s7 + $0x1aa] sm:$0xff] }
  0xb8   : > { %5549 = vmatprep.mubr.msk.f32.mxu1 %vm289_vm1, %v1341_v40  ;;  %v2595_v40 = vld [vmem:[%s5957_s7 + $0x1a4] sm:$0xff] }
  0xba   : > { %5707 = vmatmul.mubr.msk.f32.gmra.mxu0 %vm289_vm1, %v2566_v41 }
  0xbb   : > { %5550 = vmatmul.mubr.msk.f32.gmra.mxu1 %vm289_vm1, %v1342_v42  ;;  %5709 = vmatprep.mubr.msk.f32.mxu0 %vm289_vm1, %v2567_v43  ;;  %v1371_v42 = vld [vmem:[%s5957_s7 + $0x1b2] sm:$0xff] }
  0xbc   : > { %5552 = vmatprep.mubr.msk.f32.mxu1 %vm289_vm1, %v1343_v44 }
  0xbe   : > { %5710 = vmatmul.mubr.msk.f32.gmra.mxu0 %vm289_vm1, %v2568_v45  ;;  %v2596_v45 = vld [vmem:[%s5957_s7 + $0x1ac] sm:$0xff] }
  0xbf   : > { %5553 = vmatmul.mubr.msk.f32.gmra.mxu1 %vm289_vm1, %v1344_v46  ;;  %5712 = vmatprep.mubr.msk.f32.mxu0 %vm289_vm1, %v2569_v47  ;;  %v1372_v46 = vld [vmem:[%s5957_s7 + $0x1ba] sm:$0xff] }
  0xc0   : > { %5555 = vmatprep.mubr.msk.f32.mxu1 %vm289_vm1, %v1345_v48  ;;  %v2597_v48 = vld [vmem:[%s5957_s7 + $0x1b4] sm:$0xff] }
  0xc2   : > { %5713 = vmatmul.mubr.msk.f32.gmra.mxu0 %vm289_vm1, %v2570_v49 }
  0xc3   : > { %5556 = vmatmul.mubr.msk.f32.gmra.mxu1 %vm289_vm1, %v1346_v50  ;;  %5715 = vmatprep.mubr.msk.f32.mxu0 %vm289_vm1, %v2571_v51  ;;  %v1373_v50 = vld [vmem:[%s5957_s7 + $0x1c2] sm:$0xff] }
  0xc4   : > { %5558 = vmatprep.mubr.msk.f32.mxu1 %vm289_vm1, %v1347_v52 }
  0xc6   : > { %5716 = vmatmul.mubr.msk.f32.gmra.mxu0 %vm289_vm1, %v2572_v53  ;;  %v2598_v53 = vld [vmem:[%s5957_s7 + $0x1bc] sm:$0xff] }
  0xc7   : > { %5559 = vmatmul.mubr.msk.f32.gmra.mxu1 %vm289_vm1, %v1348_v54  ;;  %5718 = vmatprep.mubr.msk.f32.mxu0 %vm289_vm1, %v2573_v55  ;;  %v1374_v54 = vld [vmem:[%s5957_s7 + $0x1ca] sm:$0xff] }
  0xc8   : > { %5561 = vmatprep.mubr.msk.f32.mxu1 %vm289_vm1, %v1349_v56  ;;  %v2599_v56 = vld [vmem:[%s5957_s7 + $0x1c4] sm:$0xff] }
  0xca   : > { %5719 = vmatmul.mubr.msk.f32.gmra.mxu0 %vm289_vm1, %v2574_v57 }
  0xcb   : > { %5562 = vmatmul.mubr.msk.f32.gmra.mxu1 %vm289_vm1, %v1350_v58  ;;  %5721 = vmatprep.mubr.msk.f32.mxu0 %vm289_vm1, %v2575_v59  ;;  %v1375_v58 = vld [vmem:[%s5957_s7 + $0x1d2] sm:$0xff] }
  0xcc   : > { %5564 = vmatprep.mubr.msk.f32.mxu1 %vm289_vm1, %v1351_v60 }
  0xce   : > { %5722 = vmatmul.mubr.msk.f32.gmra.mxu0 %vm289_vm1, %v2576_v61  ;;  %v2600_v61 = vld [vmem:[%s5957_s7 + $0x1cc] sm:$0xff] }
  0xcf   : > { %5565 = vmatmul.mubr.msk.f32.gmra.mxu1 %vm289_vm1, %v1352_v62  ;;  %5724 = vmatprep.mubr.msk.f32.mxu0 %vm289_vm1, %v2577_v63  ;;  %v1376_v62 = vld [vmem:[%s5957_s7 + $0x1da] sm:$0xff] }
  0xd0   : > { %5567 = vmatprep.mubr.msk.f32.mxu1 %vm289_vm1, %v1353_v0  ;;  %v2601_v0 = vld [vmem:[%s5957_s7 + $0x1d4] sm:$0xff] }
  0xd2   : > { %5725 = vmatmul.mubr.msk.f32.gmra.mxu0 %vm289_vm1, %v2578_v1 }
  0xd3   : > { %5568 = vmatmul.mubr.msk.f32.gmra.mxu1 %vm289_vm1, %v1354_v2  ;;  %5727 = vmatprep.mubr.msk.f32.mxu0 %vm289_vm1, %v2579_v3  ;;  %v1377_v2 = vld [vmem:[%s5957_s7 + $0x1e2] sm:$0xff] }
  0xd4   : > { %5570 = vmatprep.mubr.msk.f32.mxu1 %vm289_vm1, %v1355_v4 }
  0xd6   : > { %5728 = vmatmul.mubr.msk.f32.gmra.mxu0 %vm289_vm1, %v2580_v5  ;;  %v2602_v5 = vld [vmem:[%s5957_s7 + $0x1dc] sm:$0xff] }
  0xd7   : > { %5571 = vmatmul.mubr.msk.f32.gmra.mxu1 %vm289_vm1, %v1356_v6  ;;  %5730 = vmatprep.mubr.msk.f32.mxu0 %vm289_vm1, %v2581_v7  ;;  %v1378_v6 = vld [vmem:[%s5957_s7 + $0x1ea] sm:$0xff] }
  0xd8   : > { %5573 = vmatprep.mubr.msk.f32.mxu1 %vm289_vm1, %v1357_v8  ;;  %v2603_v8 = vld [vmem:[%s5957_s7 + $0x1e4] sm:$0xff] }
  0xda   : > { %5731 = vmatmul.mubr.msk.f32.gmra.mxu0 %vm289_vm1, %v2582_v9 }
  0xdb   : > { %5574 = vmatmul.mubr.msk.f32.gmra.mxu1 %vm289_vm1, %v1358_v10  ;;  %5733 = vmatprep.mubr.msk.f32.mxu0 %vm289_vm1, %v2583_v11  ;;  %v1379_v10 = vld [vmem:[%s5957_s7 + $0x1f2] sm:$0xff] }
  0xdc   : > { %5576 = vmatprep.mubr.msk.f32.mxu1 %vm289_vm1, %v1359_v12 }
  0xde   : > { %5734 = vmatmul.mubr.msk.f32.gmra.mxu0 %vm289_vm1, %v2584_v13  ;;  %v2604_v13 = vld [vmem:[%s5957_s7 + $0x1ec] sm:$0xff] }
  0xdf   : > { %5577 = vmatmul.mubr.msk.f32.gmra.mxu1 %vm289_vm1, %v1360_v14  ;;  %5736 = vmatprep.mubr.msk.f32.mxu0 %vm289_vm1, %v2585_v15  ;;  %v1380_v14 = vld [vmem:[%s5957_s7 + $0x1fa] sm:$0xff] }
  0xe0   : > { %5579 = vmatprep.mubr.msk.f32.mxu1 %vm289_vm1, %v1361_v16  ;;  %v2605_v16 = vld [vmem:[%s5957_s7 + $0x1f4] sm:$0xff] }
  0xe2   : > { %5737 = vmatmul.mubr.msk.f32.gmra.mxu0 %vm289_vm1, %v2586_v17 }
  0xe3   : > { %5580 = vmatmul.mubr.msk.f32.gmra.mxu1 %vm289_vm1, %v1362_v18  ;;  %5739 = vmatprep.mubr.msk.f32.mxu0 %vm289_vm1, %v2587_v19  ;;  %v1381_v18 = vld [vmem:[%s5957_s7 + $0x202] sm:$0xff] }
  0xe4   : > { %5582 = vmatprep.mubr.msk.f32.mxu1 %vm289_vm1, %v1363_v20 }
  0xe6   : > { %5740 = vmatmul.mubr.msk.f32.gmra.mxu0 %vm289_vm1, %v2588_v21  ;;  %v2606_v21 = vld [vmem:[%s5957_s7 + $0x1fc] sm:$0xff] }
  0xe7   : > { %5583 = vmatmul.mubr.msk.f32.gmra.mxu1 %vm289_vm1, %v1364_v22  ;;  %5742 = vmatprep.mubr.msk.f32.mxu0 %vm289_vm1, %v2589_v23  ;;  %v1382_v22 = vld [vmem:[%s5957_s7 + $0x20a] sm:$0xff] }
  0xe8   : > { %5585 = vmatprep.mubr.msk.f32.mxu1 %vm289_vm1, %v1365_v24  ;;  %v2607_v24 = vld [vmem:[%s5957_s7 + $0x204] sm:$0xff] }
  0xea   : > { %5743 = vmatmul.mubr.msk.f32.gmra.mxu0 %vm289_vm1, %v2590_v25 }
  0xeb   : > { %v5427_v29 = vpop.f32.mrf.mxu1  ;;  %5586 = vmatmul.mubr.msk.f32.gmra.mxu1 %vm289_vm1, %v1366_v26  ;;  %5745 = vmatprep.mubr.msk.f32.mxu0 %vm289_vm1, %v2591_v27  ;;  %v1383_v26 = vld [vmem:[%s5957_s7 + $0x212] sm:$0xff] }
  0xec   : > { %1173 = vst.msk [vmem:[#allocation2 + $0x188] sm:$0xff] %vm1123_vm2, %v5427_v29  ;;  %5588 = vmatprep.mubr.msk.f32.mxu1 %vm289_vm1, %v1367_v28  ;;  %v2608_v29 = vld [vmem:[%s5957_s7 + $0x20c] sm:$0xff] }
  0xed   : > { %v884_v33 = vpop.f32.mrf.mxu1 }
  0xee   : > { %1172 = vst.msk [vmem:[#allocation2 + $0x180] sm:$0xff] %vm1123_vm2, %v884_v33  ;;  %v5355_v35 = vpop.f32.mrf.mxu0  ;;  %5746 = vmatmul.mubr.msk.f32.gmra.mxu0 %vm289_vm1, %v2592_v30  ;;  %v1384_v30 = vld [vmem:[%s5957_s7 + $0x21a] sm:$0xff] }
  0xef   : > { %v5430_v36 = vpop.f32.mrf.mxu1  ;;  %5589 = vmatmul.mubr.msk.f32.gmra.mxu1 %vm289_vm1, %v1368_v31  ;;  %1125 = vst.msk [vmem:[#allocation2 + $0x8] sm:$0xff] %vm1123_vm2, %v5355_v35  ;;  %5748 = vmatprep.mubr.msk.f32.mxu0 %vm289_vm1, %v2593_v32  ;;  %v2609_v32 = vld [vmem:[%s5957_s7 + $0x214] sm:$0xff] }
  0xf0   : > { %1175 = vst.msk [vmem:[#allocation2 + $0x198] sm:$0xff] %vm1123_vm2, %v5430_v36  ;;  %5591 = vmatprep.mubr.msk.f32.mxu1 %vm289_vm1, %v1369_v34  ;;  %v644_v39 = vpop.f32.mrf.mxu0  ;;  %v1385_v34 = vld [vmem:[%s5957_s7 + $0x222] sm:$0xff] }
  0xf1   : > { %v894_v41 = vpop.f32.mrf.mxu1  ;;  %1124 = vst.msk [vmem:[#allocation2] sm:$0xff] %vm1123_vm2, %v644_v39 }
  0xf2   : > { %1174 = vst.msk [vmem:[#allocation2 + $0x190] sm:$0xff] %vm1123_vm2, %v894_v41  ;;  %v5358_v43 = vpop.f32.mrf.mxu0  ;;  %5749 = vmatmul.mubr.msk.f32.gmra.mxu0 %vm289_vm1, %v2594_v37  ;;  %v2610_v37 = vld [vmem:[%s5957_s7 + $0x21c] sm:$0xff] }
  0xf3   : > { %v5433_v44 = vpop.f32.mrf.mxu1  ;;  %5592 = vmatmul.mubr.msk.f32.gmra.mxu1 %vm289_vm1, %v1370_v38  ;;  %1127 = vst.msk [vmem:[#allocation2 + $0x18] sm:$0xff] %vm1123_vm2, %v5358_v43  ;;  %5751 = vmatprep.mubr.msk.f32.mxu0 %vm289_vm1, %v2595_v40  ;;  %v1386_v38 = vld [vmem:[%s5957_s7 + $0x22a] sm:$0xff] }
  0xf4   : > { %1177 = vst.msk [vmem:[#allocation2 + $0x1a8] sm:$0xff] %vm1123_vm2, %v5433_v44  ;;  %5594 = vmatprep.mubr.msk.f32.mxu1 %vm289_vm1, %v1371_v42  ;;  %v654_v47 = vpop.f32.mrf.mxu0  ;;  %v2611_v40 = vld [vmem:[%s5957_s7 + $0x224] sm:$0xff]  ;;  %v1387_v42 = vld [vmem:[%s5957_s7 + $0x232] sm:$0xff] }
  0xf5   : > { %v904_v49 = vpop.f32.mrf.mxu1  ;;  %1126 = vst.msk [vmem:[#allocation2 + $0x10] sm:$0xff] %vm1123_vm2, %v654_v47 }
  0xf6   : > { %1176 = vst.msk [vmem:[#allocation2 + $0x1a0] sm:$0xff] %vm1123_vm2, %v904_v49  ;;  %v5361_v51 = vpop.f32.mrf.mxu0  ;;  %5752 = vmatmul.mubr.msk.f32.gmra.mxu0 %vm289_vm1, %v2596_v45  ;;  %v2612_v45 = vld [vmem:[%s5957_s7 + $0x22c] sm:$0xff] }
  0xf7   : > { %v5436_v52 = vpop.f32.mrf.mxu1  ;;  %5595 = vmatmul.mubr.msk.f32.gmra.mxu1 %vm289_vm1, %v1372_v46  ;;  %1129 = vst.msk [vmem:[#allocation2 + $0x28] sm:$0xff] %vm1123_vm2, %v5361_v51  ;;  %5754 = vmatprep.mubr.msk.f32.mxu0 %vm289_vm1, %v2597_v48  ;;  %v1388_v46 = vld [vmem:[%s5957_s7 + $0x23a] sm:$0xff] }
  0xf8   : > { %1179 = vst.msk [vmem:[#allocation2 + $0x1b8] sm:$0xff] %vm1123_vm2, %v5436_v52  ;;  %5597 = vmatprep.mubr.msk.f32.mxu1 %vm289_vm1, %v1373_v50  ;;  %v664_v55 = vpop.f32.mrf.mxu0  ;;  %v2613_v48 = vld [vmem:[%s5957_s7 + $0x234] sm:$0xff]  ;;  %v1389_v50 = vld [vmem:[%s5957_s7 + $0x242] sm:$0xff] }
  0xf9   : > { %v914_v57 = vpop.f32.mrf.mxu1  ;;  %1128 = vst.msk [vmem:[#allocation2 + $0x20] sm:$0xff] %vm1123_vm2, %v664_v55 }
  0xfa   : > { %1178 = vst.msk [vmem:[#allocation2 + $0x1b0] sm:$0xff] %vm1123_vm2, %v914_v57  ;;  %v5364_v59 = vpop.f32.mrf.mxu0  ;;  %5755 = vmatmul.mubr.msk.f32.gmra.mxu0 %vm289_vm1, %v2598_v53  ;;  %v2614_v53 = vld [vmem:[%s5957_s7 + $0x23c] sm:$0xff] }
  0xfb   : > { %v5439_v60 = vpop.f32.mrf.mxu1  ;;  %5598 = vmatmul.mubr.msk.f32.gmra.mxu1 %vm289_vm1, %v1374_v54  ;;  %1131 = vst.msk [vmem:[#allocation2 + $0x38] sm:$0xff] %vm1123_vm2, %v5364_v59  ;;  %5757 = vmatprep.mubr.msk.f32.mxu0 %vm289_vm1, %v2599_v56  ;;  %v1390_v54 = vld [vmem:[%s5957_s7 + $0x24a] sm:$0xff] }
  0xfc   : > { %1181 = vst.msk [vmem:[#allocation2 + $0x1c8] sm:$0xff] %vm1123_vm2, %v5439_v60  ;;  %5600 = vmatprep.mubr.msk.f32.mxu1 %vm289_vm1, %v1375_v58  ;;  %v674_v63 = vpop.f32.mrf.mxu0  ;;  %v2615_v56 = vld [vmem:[%s5957_s7 + $0x244] sm:$0xff]  ;;  %v1391_v58 = vld [vmem:[%s5957_s7 + $0x252] sm:$0xff] }
  0xfd   : > { %v924_v1 = vpop.f32.mrf.mxu1  ;;  %1130 = vst.msk [vmem:[#allocation2 + $0x30] sm:$0xff] %vm1123_vm2, %v674_v63 }
  0xfe   : > { %1180 = vst.msk [vmem:[#allocation2 + $0x1c0] sm:$0xff] %vm1123_vm2, %v924_v1  ;;  %v5367_v3 = vpop.f32.mrf.mxu0  ;;  %5758 = vmatmul.mubr.msk.f32.gmra.mxu0 %vm289_vm1, %v2600_v61  ;;  %v2616_v61 = vld [vmem:[%s5957_s7 + $0x24c] sm:$0xff] }
  0xff   : > { %v5442_v4 = vpop.f32.mrf.mxu1  ;;  %5601 = vmatmul.mubr.msk.f32.gmra.mxu1 %vm289_vm1, %v1376_v62  ;;  %1133 = vst.msk [vmem:[#allocation2 + $0x48] sm:$0xff] %vm1123_vm2, %v5367_v3  ;;  %5760 = vmatprep.mubr.msk.f32.mxu0 %vm289_vm1, %v2601_v0  ;;  %v1392_v62 = vld [vmem:[%s5957_s7 + $0x25a] sm:$0xff] }
 0x100   : > { %1183 = vst.msk [vmem:[#allocation2 + $0x1d8] sm:$0xff] %vm1123_vm2, %v5442_v4  ;;  %5603 = vmatprep.mubr.msk.f32.mxu1 %vm289_vm1, %v1377_v2  ;;  %v684_v7 = vpop.f32.mrf.mxu0  ;;  %v2617_v0 = vld [vmem:[%s5957_s7 + $0x254] sm:$0xff]  ;;  %v1393_v2 = vld [vmem:[%s5957_s7 + $0x262] sm:$0xff] }
 0x101   : > { %v934_v9 = vpop.f32.mrf.mxu1  ;;  %1132 = vst.msk [vmem:[#allocation2 + $0x40] sm:$0xff] %vm1123_vm2, %v684_v7 }
 0x102   : > { %1182 = vst.msk [vmem:[#allocation2 + $0x1d0] sm:$0xff] %vm1123_vm2, %v934_v9  ;;  %v5370_v11 = vpop.f32.mrf.mxu0  ;;  %5761 = vmatmul.mubr.msk.f32.gmra.mxu0 %vm289_vm1, %v2602_v5  ;;  %v2618_v5 = vld [vmem:[%s5957_s7 + $0x25c] sm:$0xff] }
 0x103   : > { %v5445_v12 = vpop.f32.mrf.mxu1  ;;  %5604 = vmatmul.mubr.msk.f32.gmra.mxu1 %vm289_vm1, %v1378_v6  ;;  %1135 = vst.msk [vmem:[#allocation2 + $0x58] sm:$0xff] %vm1123_vm2, %v5370_v11  ;;  %5763 = vmatprep.mubr.msk.f32.mxu0 %vm289_vm1, %v2603_v8  ;;  %v1394_v6 = vld [vmem:[%s5957_s7 + $0x26a] sm:$0xff] }
 0x104   : > { %1185 = vst.msk [vmem:[#allocation2 + $0x1e8] sm:$0xff] %vm1123_vm2, %v5445_v12  ;;  %5606 = vmatprep.mubr.msk.f32.mxu1 %vm289_vm1, %v1379_v10  ;;  %v694_v15 = vpop.f32.mrf.mxu0  ;;  %v2619_v8 = vld [vmem:[%s5957_s7 + $0x264] sm:$0xff]  ;;  %v1395_v10 = vld [vmem:[%s5957_s7 + $0x272] sm:$0xff] }
 0x105   : > { %v944_v17 = vpop.f32.mrf.mxu1  ;;  %1134 = vst.msk [vmem:[#allocation2 + $0x50] sm:$0xff] %vm1123_vm2, %v694_v15 }
 0x106   : > { %1184 = vst.msk [vmem:[#allocation2 + $0x1e0] sm:$0xff] %vm1123_vm2, %v944_v17  ;;  %v5373_v19 = vpop.f32.mrf.mxu0  ;;  %5764 = vmatmul.mubr.msk.f32.gmra.mxu0 %vm289_vm1, %v2604_v13  ;;  %v2620_v13 = vld [vmem:[%s5957_s7 + $0x26c] sm:$0xff] }
 0x107   : > { %v5448_v20 = vpop.f32.mrf.mxu1  ;;  %5607 = vmatmul.mubr.msk.f32.gmra.mxu1 %vm289_vm1, %v1380_v14  ;;  %1137 = vst.msk [vmem:[#allocation2 + $0x68] sm:$0xff] %vm1123_vm2, %v5373_v19  ;;  %5766 = vmatprep.mubr.msk.f32.mxu0 %vm289_vm1, %v2605_v16  ;;  %v1396_v14 = vld [vmem:[%s5957_s7 + $0x27a] sm:$0xff] }
 0x108   : > { %1187 = vst.msk [vmem:[#allocation2 + $0x1f8] sm:$0xff] %vm1123_vm2, %v5448_v20  ;;  %5609 = vmatprep.mubr.msk.f32.mxu1 %vm289_vm1, %v1381_v18  ;;  %v704_v23 = vpop.f32.mrf.mxu0  ;;  %v2621_v16 = vld [vmem:[%s5957_s7 + $0x274] sm:$0xff]  ;;  %v1397_v18 = vld [vmem:[%s5957_s7 + $0x282] sm:$0xff] }
 0x109   : > { %v954_v25 = vpop.f32.mrf.mxu1  ;;  %1136 = vst.msk [vmem:[#allocation2 + $0x60] sm:$0xff] %vm1123_vm2, %v704_v23 }
 0x10a   : > { %1186 = vst.msk [vmem:[#allocation2 + $0x1f0] sm:$0xff] %vm1123_vm2, %v954_v25  ;;  %v5376_v27 = vpop.f32.mrf.mxu0  ;;  %5767 = vmatmul.mubr.msk.f32.gmra.mxu0 %vm289_vm1, %v2606_v21  ;;  %v2622_v21 = vld [vmem:[%s5957_s7 + $0x27c] sm:$0xff] }
 0x10b   : > { %v5451_v28 = vpop.f32.mrf.mxu1  ;;  %5610 = vmatmul.mubr.msk.f32.gmra.mxu1 %vm289_vm1, %v1382_v22  ;;  %1139 = vst.msk [vmem:[#allocation2 + $0x78] sm:$0xff] %vm1123_vm2, %v5376_v27  ;;  %5769 = vmatprep.mubr.msk.f32.mxu0 %vm289_vm1, %v2607_v24  ;;  %v1398_v22 = vld [vmem:[%s5957_s7 + $0x28a] sm:$0xff] }
 0x10c   : > { %1189 = vst.msk [vmem:[#allocation2 + $0x208] sm:$0xff] %vm1123_vm2, %v5451_v28  ;;  %5612 = vmatprep.mubr.msk.f32.mxu1 %vm289_vm1, %v1383_v26  ;;  %v714_v31 = vpop.f32.mrf.mxu0  ;;  %v2623_v24 = vld [vmem:[%s5957_s7 + $0x284] sm:$0xff]  ;;  %v1399_v26 = vld [vmem:[%s5957_s7 + $0x292] sm:$0xff] }
 0x10d   : > { %v964_v33 = vpop.f32.mrf.mxu1  ;;  %1138 = vst.msk [vmem:[#allocation2 + $0x70] sm:$0xff] %vm1123_vm2, %v714_v31 }
 0x10e   : > { %1188 = vst.msk [vmem:[#allocation2 + $0x200] sm:$0xff] %vm1123_vm2, %v964_v33  ;;  %v5379_v35 = vpop.f32.mrf.mxu0  ;;  %5770 = vmatmul.mubr.msk.f32.gmra.mxu0 %vm289_vm1, %v2608_v29  ;;  %v2624_v29 = vld [vmem:[%s5957_s7 + $0x28c] sm:$0xff] }
 0x10f   : > { %v5454_v36 = vpop.f32.mrf.mxu1  ;;  %5613 = vmatmul.mubr.msk.f32.gmra.mxu1 %vm289_vm1, %v1384_v30  ;;  %1141 = vst.msk [vmem:[#allocation2 + $0x88] sm:$0xff] %vm1123_vm2, %v5379_v35  ;;  %5772 = vmatprep.mubr.msk.f32.mxu0 %vm289_vm1, %v2609_v32  ;;  %v1400_v30 = vld [vmem:[%s5957_s7 + $0x29a] sm:$0xff] }
 0x110   : > { %1191 = vst.msk [vmem:[#allocation2 + $0x218] sm:$0xff] %vm1123_vm2, %v5454_v36  ;;  %5615 = vmatprep.mubr.msk.f32.mxu1 %vm289_vm1, %v1385_v34  ;;  %v724_v39 = vpop.f32.mrf.mxu0  ;;  %v2625_v32 = vld [vmem:[%s5957_s7 + $0x294] sm:$0xff]  ;;  %v1401_v34 = vld [vmem:[%s5957_s7 + $0x2a2] sm:$0xff] }
 0x111   : > { %v974_v41 = vpop.f32.mrf.mxu1  ;;  %1140 = vst.msk [vmem:[#allocation2 + $0x80] sm:$0xff] %vm1123_vm2, %v724_v39 }
 0x112   : > { %1190 = vst.msk [vmem:[#allocation2 + $0x210] sm:$0xff] %vm1123_vm2, %v974_v41  ;;  %v5382_v43 = vpop.f32.mrf.mxu0  ;;  %5773 = vmatmul.mubr.msk.f32.gmra.mxu0 %vm289_vm1, %v2610_v37  ;;  %v2626_v37 = vld [vmem:[%s5957_s7 + $0x29c] sm:$0xff] }
 0x113   : > { %v5457_v44 = vpop.f32.mrf.mxu1  ;;  %5616 = vmatmul.mubr.msk.f32.gmra.mxu1 %vm289_vm1, %v1386_v38  ;;  %1143 = vst.msk [vmem:[#allocation2 + $0x98] sm:$0xff] %vm1123_vm2, %v5382_v43  ;;  %5775 = vmatprep.mubr.msk.f32.mxu0 %vm289_vm1, %v2611_v40  ;;  %v1402_v38 = vld [vmem:[%s5957_s7 + $0x2aa] sm:$0xff] }
 0x114   : > { %1193 = vst.msk [vmem:[#allocation2 + $0x228] sm:$0xff] %vm1123_vm2, %v5457_v44  ;;  %5618 = vmatprep.mubr.msk.f32.mxu1 %vm289_vm1, %v1387_v42  ;;  %v734_v47 = vpop.f32.mrf.mxu0  ;;  %v2627_v40 = vld [vmem:[%s5957_s7 + $0x2a4] sm:$0xff]  ;;  %v1403_v42 = vld [vmem:[%s5957_s7 + $0x2b2] sm:$0xff] }
 0x115   : > { %v984_v49 = vpop.f32.mrf.mxu1  ;;  %1142 = vst.msk [vmem:[#allocation2 + $0x90] sm:$0xff] %vm1123_vm2, %v734_v47 }
 0x116   : > { %1192 = vst.msk [vmem:[#allocation2 + $0x220] sm:$0xff] %vm1123_vm2, %v984_v49  ;;  %v5385_v51 = vpop.f32.mrf.mxu0  ;;  %5776 = vmatmul.mubr.msk.f32.gmra.mxu0 %vm289_vm1, %v2612_v45  ;;  %v2628_v45 = vld [vmem:[%s5957_s7 + $0x2ac] sm:$0xff] }
 0x117   : > { %v5460_v52 = vpop.f32.mrf.mxu1  ;;  %5619 = vmatmul.mubr.msk.f32.gmra.mxu1 %vm289_vm1, %v1388_v46  ;;  %1145 = vst.msk [vmem:[#allocation2 + $0xa8] sm:$0xff] %vm1123_vm2, %v5385_v51  ;;  %5778 = vmatprep.mubr.msk.f32.mxu0 %vm289_vm1, %v2613_v48  ;;  %v1404_v46 = vld [vmem:[%s5957_s7 + $0x2ba] sm:$0xff] }
 0x118   : > { %1195 = vst.msk [vmem:[#allocation2 + $0x238] sm:$0xff] %vm1123_vm2, %v5460_v52  ;;  %5621 = vmatprep.mubr.msk.f32.mxu1 %vm289_vm1, %v1389_v50  ;;  %v744_v55 = vpop.f32.mrf.mxu0  ;;  %v2629_v48 = vld [vmem:[%s5957_s7 + $0x2b4] sm:$0xff]  ;;  %v1405_v50 = vld [vmem:[%s5957_s7 + $0x2c2] sm:$0xff] }
 0x119   : > { %v994_v57 = vpop.f32.mrf.mxu1  ;;  %1144 = vst.msk [vmem:[#allocation2 + $0xa0] sm:$0xff] %vm1123_vm2, %v744_v55 }
 0x11a   : > { %1194 = vst.msk [vmem:[#allocation2 + $0x230] sm:$0xff] %vm1123_vm2, %v994_v57  ;;  %v5388_v59 = vpop.f32.mrf.mxu0  ;;  %5779 = vmatmul.mubr.msk.f32.gmra.mxu0 %vm289_vm1, %v2614_v53  ;;  %v2630_v53 = vld [vmem:[%s5957_s7 + $0x2bc] sm:$0xff] }
 0x11b   : > { %v5463_v60 = vpop.f32.mrf.mxu1  ;;  %5622 = vmatmul.mubr.msk.f32.gmra.mxu1 %vm289_vm1, %v1390_v54  ;;  %1147 = vst.msk [vmem:[#allocation2 + $0xb8] sm:$0xff] %vm1123_vm2, %v5388_v59  ;;  %5781 = vmatprep.mubr.msk.f32.mxu0 %vm289_vm1, %v2615_v56  ;;  %v1406_v54 = vld [vmem:[%s5957_s7 + $0x2ca] sm:$0xff] }
 0x11c   : > { %1197 = vst.msk [vmem:[#allocation2 + $0x248] sm:$0xff] %vm1123_vm2, %v5463_v60  ;;  %5624 = vmatprep.mubr.msk.f32.mxu1 %vm289_vm1, %v1391_v58  ;;  %v754_v63 = vpop.f32.mrf.mxu0  ;;  %v2631_v56 = vld [vmem:[%s5957_s7 + $0x2c4] sm:$0xff]  ;;  %v1407_v58 = vld [vmem:[%s5957_s7 + $0x2d2] sm:$0xff] }
 0x11d   : > { %v1004_v1 = vpop.f32.mrf.mxu1  ;;  %1146 = vst.msk [vmem:[#allocation2 + $0xb0] sm:$0xff] %vm1123_vm2, %v754_v63 }
 0x11e   : > { %1196 = vst.msk [vmem:[#allocation2 + $0x240] sm:$0xff] %vm1123_vm2, %v1004_v1  ;;  %v5391_v3 = vpop.f32.mrf.mxu0  ;;  %5782 = vmatmul.mubr.msk.f32.gmra.mxu0 %vm289_vm1, %v2616_v61  ;;  %v2632_v61 = vld [vmem:[%s5957_s7 + $0x2cc] sm:$0xff] }
 0x11f   : > { %v5466_v4 = vpop.f32.mrf.mxu1  ;;  %5625 = vmatmul.mubr.msk.f32.gmra.mxu1 %vm289_vm1, %v1392_v62  ;;  %1149 = vst.msk [vmem:[#allocation2 + $0xc8] sm:$0xff] %vm1123_vm2, %v5391_v3  ;;  %5784 = vmatprep.mubr.msk.f32.mxu0 %vm289_vm1, %v2617_v0  ;;  %v1408_v62 = vld [vmem:[%s5957_s7 + $0x2da] sm:$0xff] }
 0x120   : > { %1199 = vst.msk [vmem:[#allocation2 + $0x258] sm:$0xff] %vm1123_vm2, %v5466_v4  ;;  %5627 = vmatprep.mubr.msk.f32.mxu1 %vm289_vm1, %v1393_v2  ;;  %v764_v7 = vpop.f32.mrf.mxu0  ;;  %v2633_v0 = vld [vmem:[%s5957_s7 + $0x2d4] sm:$0xff]  ;;  %v1409_v2 = vld [vmem:[%s5957_s7 + $0x2e2] sm:$0xff] }
 0x121   : > { %v1014_v9 = vpop.f32.mrf.mxu1  ;;  %1148 = vst.msk [vmem:[#allocation2 + $0xc0] sm:$0xff] %vm1123_vm2, %v764_v7 }
 0x122   : > { %1198 = vst.msk [vmem:[#allocation2 + $0x250] sm:$0xff] %vm1123_vm2, %v1014_v9  ;;  %v5394_v11 = vpop.f32.mrf.mxu0  ;;  %5785 = vmatmul.mubr.msk.f32.gmra.mxu0 %vm289_vm1, %v2618_v5  ;;  %v2634_v5 = vld [vmem:[%s5957_s7 + $0x2dc] sm:$0xff] }
 0x123   : > { %v5469_v12 = vpop.f32.mrf.mxu1  ;;  %5628 = vmatmul.mubr.msk.f32.gmra.mxu1 %vm289_vm1, %v1394_v6  ;;  %1151 = vst.msk [vmem:[#allocation2 + $0xd8] sm:$0xff] %vm1123_vm2, %v5394_v11  ;;  %5787 = vmatprep.mubr.msk.f32.mxu0 %vm289_vm1, %v2619_v8  ;;  %v1410_v6 = vld [vmem:[%s5957_s7 + $0x2ea] sm:$0xff] }
 0x124   : > { %1201 = vst.msk [vmem:[#allocation2 + $0x268] sm:$0xff] %vm1123_vm2, %v5469_v12  ;;  %5630 = vmatprep.mubr.msk.f32.mxu1 %vm289_vm1, %v1395_v10  ;;  %v774_v15 = vpop.f32.mrf.mxu0  ;;  %v2635_v8 = vld [vmem:[%s5957_s7 + $0x2e4] sm:$0xff]  ;;  %v1411_v10 = vld [vmem:[%s5957_s7 + $0x2f2] sm:$0xff] }
 0x125   : > { %v1024_v17 = vpop.f32.mrf.mxu1  ;;  %1150 = vst.msk [vmem:[#allocation2 + $0xd0] sm:$0xff] %vm1123_vm2, %v774_v15 }
 0x126   : > { %1200 = vst.msk [vmem:[#allocation2 + $0x260] sm:$0xff] %vm1123_vm2, %v1024_v17  ;;  %v5397_v19 = vpop.f32.mrf.mxu0  ;;  %5788 = vmatmul.mubr.msk.f32.gmra.mxu0 %vm289_vm1, %v2620_v13  ;;  %v2636_v13 = vld [vmem:[%s5957_s7 + $0x2ec] sm:$0xff] }
 0x127   : > { %v5472_v20 = vpop.f32.mrf.mxu1  ;;  %5631 = vmatmul.mubr.msk.f32.gmra.mxu1 %vm289_vm1, %v1396_v14  ;;  %1153 = vst.msk [vmem:[#allocation2 + $0xe8] sm:$0xff] %vm1123_vm2, %v5397_v19  ;;  %5790 = vmatprep.mubr.msk.f32.mxu0 %vm289_vm1, %v2621_v16  ;;  %v1412_v14 = vld [vmem:[%s5957_s7 + $0x2fa] sm:$0xf] }
 0x128   : > { %1203 = vst.msk [vmem:[#allocation2 + $0x278] sm:$0xff] %vm1123_vm2, %v5472_v20  ;;  %5633 = vmatprep.mubr.msk.f32.mxu1 %vm289_vm1, %v1397_v18  ;;  %v784_v23 = vpop.f32.mrf.mxu0  ;;  %v2637_v16 = vld [vmem:[%s5957_s7 + $0x2f4] sm:$0xff]  ;;  %v2638_v20 = vld [vmem:[%s5957_s7 + $0x2fc] sm:$0xf] }
 0x129   : > { %v1034_v25 = vpop.f32.mrf.mxu1  ;;  %1152 = vst.msk [vmem:[#allocation2 + $0xe0] sm:$0xff] %vm1123_vm2, %v784_v23 }
 0x12a   : > { %1202 = vst.msk [vmem:[#allocation2 + $0x270] sm:$0xff] %vm1123_vm2, %v1034_v25  ;;  %v5400_v27 = vpop.f32.mrf.mxu0  ;;  %5791 = vmatmul.mubr.msk.f32.gmra.mxu0 %vm289_vm1, %v2622_v21 }
 0x12b   : > { %v5475_v28 = vpop.f32.mrf.mxu1  ;;  %5634 = vmatmul.mubr.msk.f32.gmra.mxu1 %vm289_vm1, %v1398_v22  ;;  %1155 = vst.msk [vmem:[#allocation2 + $0xf8] sm:$0xff] %vm1123_vm2, %v5400_v27  ;;  %5793 = vmatprep.mubr.msk.f32.mxu0 %vm289_vm1, %v2623_v24  ;;  %v1222_v24 = vld [vmem:[#allocation2 + $0x8] sm:$0xff] }
 0x12c   : > { %1205 = vst.msk [vmem:[#allocation2 + $0x288] sm:$0xff] %vm1123_vm2, %v5475_v28  ;;  %5636 = vmatprep.mubr.msk.f32.mxu1 %vm289_vm1, %v1399_v26  ;;  %v794_v31 = vpop.f32.mrf.mxu0  ;;  %v1221_v28 = vld [vmem:[#allocation2] sm:$0xff] }
 0x12d   : > { %v1044_v33 = vpop.f32.mrf.mxu1  ;;  %1154 = vst.msk [vmem:[#allocation2 + $0xf0] sm:$0xff] %vm1123_vm2, %v794_v31 }
 0x12e   : > { %1204 = vst.msk [vmem:[#allocation2 + $0x280] sm:$0xff] %vm1123_vm2, %v1044_v33  ;;  %v5403_v35 = vpop.f32.mrf.mxu0  ;;  %5794 = vmatmul.mubr.msk.f32.gmra.mxu0 %vm289_vm1, %v2624_v29 }
 0x12f   : > { %v5478_v36 = vpop.f32.mrf.mxu1  ;;  %5637 = vmatmul.mubr.msk.f32.gmra.mxu1 %vm289_vm1, %v1400_v30  ;;  %1157 = vst.msk [vmem:[#allocation2 + $0x108] sm:$0xff] %vm1123_vm2, %v5403_v35  ;;  %5796 = vmatprep.mubr.msk.f32.mxu0 %vm289_vm1, %v2625_v32  ;;  %v1224_v32 = vld [vmem:[#allocation2 + $0x18] sm:$0xff] }
 0x130   : > { %1207 = vst.msk [vmem:[#allocation2 + $0x298] sm:$0xff] %vm1123_vm2, %v5478_v36  ;;  %5639 = vmatprep.mubr.msk.f32.mxu1 %vm289_vm1, %v1401_v34  ;;  %v804_v39 = vpop.f32.mrf.mxu0  ;;  %v1223_v36 = vld [vmem:[#allocation2 + $0x10] sm:$0xff] }
 0x131   : > { %v1054_v41 = vpop.f32.mrf.mxu1  ;;  %1156 = vst.msk [vmem:[#allocation2 + $0x100] sm:$0xff] %vm1123_vm2, %v804_v39 }
 0x132   : > { %1206 = vst.msk [vmem:[#allocation2 + $0x290] sm:$0xff] %vm1123_vm2, %v1054_v41  ;;  %v5406_v43 = vpop.f32.mrf.mxu0  ;;  %5797 = vmatmul.mubr.msk.f32.gmra.mxu0 %vm289_vm1, %v2626_v37 }
 0x133   : > { %v5481_v44 = vpop.f32.mrf.mxu1  ;;  %5640 = vmatmul.mubr.msk.f32.gmra.mxu1 %vm289_vm1, %v1402_v38  ;;  %1159 = vst.msk [vmem:[#allocation2 + $0x118] sm:$0xff] %vm1123_vm2, %v5406_v43  ;;  %5799 = vmatprep.mubr.msk.f32.mxu0 %vm289_vm1, %v2627_v40  ;;  %v1226_v40 = vld [vmem:[#allocation2 + $0x28] sm:$0xff] }
 0x134   : > { %1209 = vst.msk [vmem:[#allocation2 + $0x2a8] sm:$0xff] %vm1123_vm2, %v5481_v44  ;;  %5642 = vmatprep.mubr.msk.f32.mxu1 %vm289_vm1, %v1403_v42  ;;  %v814_v47 = vpop.f32.mrf.mxu0 }
 0x135   : > { %v1064_v49 = vpop.f32.mrf.mxu1  ;;  %1158 = vst.msk [vmem:[#allocation2 + $0x110] sm:$0xff] %vm1123_vm2, %v814_v47 }
 0x136   : > { %1208 = vst.msk [vmem:[#allocation2 + $0x2a0] sm:$0xff] %vm1123_vm2, %v1064_v49  ;;  %v5409_v51 = vpop.f32.mrf.mxu0  ;;  %5800 = vmatmul.mubr.msk.f32.gmra.mxu0 %vm289_vm1, %v2628_v45  ;;  %v1225_v45 = vld [vmem:[#allocation2 + $0x20] sm:$0xff] }
 0x137   : > { %v5484_v52 = vpop.f32.mrf.mxu1  ;;  %5643 = vmatmul.mubr.msk.f32.gmra.mxu1 %vm289_vm1, %v1404_v46  ;;  %1161 = vst.msk [vmem:[#allocation2 + $0x128] sm:$0xff] %vm1123_vm2, %v5409_v51  ;;  %5802 = vmatprep.mubr.msk.f32.mxu0 %vm289_vm1, %v2629_v48  ;;  %v1228_v51 = vld [vmem:[#allocation2 + $0x38] sm:$0xff] }
 0x138   : > { %1211 = vst.msk [vmem:[#allocation2 + $0x2b8] sm:$0xff] %vm1123_vm2, %v5484_v52  ;;  %5645 = vmatprep.mubr.msk.f32.mxu1 %vm289_vm1, %v1405_v50  ;;  %v824_v55 = vpop.f32.mrf.mxu0 }
 0x139   : > { %v1074_v57 = vpop.f32.mrf.mxu1  ;;  %1160 = vst.msk [vmem:[#allocation2 + $0x120] sm:$0xff] %vm1123_vm2, %v824_v55 }
 0x13a   : > { %1210 = vst.msk [vmem:[#allocation2 + $0x2b0] sm:$0xff] %vm1123_vm2, %v1074_v57  ;;  %v5412_v59 = vpop.f32.mrf.mxu0  ;;  %5803 = vmatmul.mubr.msk.f32.gmra.mxu0 %vm289_vm1, %v2630_v53  ;;  %v1227_v57 = vld [vmem:[#allocation2 + $0x30] sm:$0xff] }
 0x13b   : > { %v5487_v60 = vpop.f32.mrf.mxu1  ;;  %5646 = vmatmul.mubr.msk.f32.gmra.mxu1 %vm289_vm1, %v1406_v54  ;;  %1163 = vst.msk [vmem:[#allocation2 + $0x138] sm:$0xff] %vm1123_vm2, %v5412_v59  ;;  %5805 = vmatprep.mubr.msk.f32.mxu0 %vm289_vm1, %v2631_v56 }
 0x13c   : > { %1213 = vst.msk [vmem:[#allocation2 + $0x2c8] sm:$0xff] %vm1123_vm2, %v5487_v60  ;;  %5648 = vmatprep.mubr.msk.f32.mxu1 %vm289_vm1, %v1407_v58  ;;  %v834_v63 = vpop.f32.mrf.mxu0 }
 0x13d   : > { %v1084_v1 = vpop.f32.mrf.mxu1  ;;  %1162 = vst.msk [vmem:[#allocation2 + $0x130] sm:$0xff] %vm1123_vm2, %v834_v63  ;;  %v1230_v63 = vld [vmem:[#allocation2 + $0x48] sm:$0xff] }
 0x13e   : > { %1212 = vst.msk [vmem:[#allocation2 + $0x2c0] sm:$0xff] %vm1123_vm2, %v1084_v1  ;;  %v5415_v3 = vpop.f32.mrf.mxu0  ;;  %5806 = vmatmul.mubr.msk.f32.gmra.mxu0 %vm289_vm1, %v2632_v61 }
 0x13f   : > { %v5490_v4 = vpop.f32.mrf.mxu1  ;;  %5649 = vmatmul.mubr.msk.f32.gmra.mxu1 %vm289_vm1, %v1408_v62  ;;  %1165 = vst.msk [vmem:[#allocation2 + $0x148] sm:$0xff] %vm1123_vm2, %v5415_v3  ;;  %5808 = vmatprep.mubr.msk.f32.mxu0 %vm289_vm1, %v2633_v0 }
 0x140   : > { %1215 = vst.msk [vmem:[#allocation2 + $0x2d8] sm:$0xff] %vm1123_vm2, %v5490_v4  ;;  %5651 = vmatprep.mubr.msk.f32.mxu1 %vm289_vm1, %v1409_v2  ;;  %v844_v7 = vpop.f32.mrf.mxu0  ;;  %v6705_v4 = vld [vmem:[#allocation3] ss:$0 sm:$0xff] }
 0x141   : > { %v1094_v9 = vpop.f32.mrf.mxu1  ;;  %1164 = vst.msk [vmem:[#allocation2 + $0x140] sm:$0xff] %vm1123_vm2, %v844_v7 }
 0x142   : > { %1214 = vst.msk [vmem:[#allocation2 + $0x2d0] sm:$0xff] %vm1123_vm2, %v1094_v9  ;;  %v5418_v11 = vpop.f32.mrf.mxu0  ;;  %5809 = vmatmul.mubr.msk.f32.gmra.mxu0 %vm289_vm1, %v2634_v5 }
 0x143   : > { %v5493_v12 = vpop.f32.mrf.mxu1  ;;  %5652 = vmatmul.mubr.msk.f32.gmra.mxu1 %vm289_vm1, %v1410_v6  ;;  %1167 = vst.msk [vmem:[#allocation2 + $0x158] sm:$0xff] %vm1123_vm2, %v5418_v11  ;;  %5811 = vmatprep.mubr.msk.f32.mxu0 %vm289_vm1, %v2635_v8  ;;  %v1229_v6 = vld [vmem:[#allocation2 + $0x40] sm:$0xff] }
 0x144   : > { %1217 = vst.msk [vmem:[#allocation2 + $0x2e8] sm:$0xff] %vm1123_vm2, %v5493_v12  ;;  %5654 = vmatprep.mubr.msk.f32.mxu1 %vm289_vm1, %v1411_v10  ;;  %v854_v15 = vpop.f32.mrf.mxu0 }
 0x145   : > { %v1104_v17 = vpop.f32.mrf.mxu1  ;;  %1166 = vst.msk [vmem:[#allocation2 + $0x150] sm:$0xff] %vm1123_vm2, %v854_v15 }
 0x146   : > { %1216 = vst.msk [vmem:[#allocation2 + $0x2e0] sm:$0xff] %vm1123_vm2, %v1104_v17  ;;  %v5421_v18 = vpop.f32.mrf.mxu0  ;;  %5812 = vmatmul.mubr.msk.f32.gmra.mxu0 %vm289_vm1, %v2636_v13  ;;  %v1232_v13 = vld [vmem:[#allocation2 + $0x58] sm:$0xff] }
 0x147   : > { %v5496_v19 = vpop.f32.mrf.mxu1  ;;  %5655 = vmatmul.mubr.msk.f32.gmra.mxu1 %vm289_vm1, %v1412_v14  ;;  %1169 = vst.msk [vmem:[#allocation2 + $0x168] sm:$0xff] %vm1123_vm2, %v5421_v18  ;;  %5814 = vmatprep.mubr.msk.f32.mxu0 %vm289_vm1, %v2637_v16 }
 0x148   : > { %1220 = vst.msk [vmem:[#allocation2 + $0x2f8] sm:$0xf] %vm1219_vm3, %v5496_v19  ;;  %v864_v21 = vpop.f32.mrf.mxu0 }
 0x149   : > { %v1114_v22 = vpop.f32.mrf.mxu1  ;;  %1168 = vst.msk [vmem:[#allocation2 + $0x160] sm:$0xff] %vm1123_vm2, %v864_v21  ;;  %v1231_v21 = vld [vmem:[#allocation2 + $0x50] sm:$0xff] }
 0x14a   : > { %1218 = vst.msk [vmem:[#allocation2 + $0x2f0] sm:$0xff] %vm1123_vm2, %v1114_v22  ;;  %v5424_v23 = vpop.f32.mrf.mxu0  ;;  %5815 = vmatmul.mubr.msk.f32.gmra.mxu0 %vm289_vm1, %v2638_v20 }
 0x14b   : > { %v5515_v25 = vpop.f32.mrf.mxu1  ;;  %1171 = vst.msk [vmem:[#allocation2 + $0x178] sm:$0xff] %vm1123_vm2, %v5424_v23 }
 0x14c   : > { %v2256_v26 = vadd.f32 %v5515_v25, %v1222_v24  ;;  %v874_v27 = vpop.f32.mrf.mxu0 }
 0x14d   : > { %v1776_v29 = vpop.f32.mrf.mxu1  ;;  %1170 = vst.msk [vmem:[#allocation2 + $0x170] sm:$0xff] %vm1123_vm2, %v874_v27 }
 0x14e   : > { %2352 = vst.msk [vmem:[#allocation2 + $0x8] sm:$0xff] %vm1123_vm2, %v2256_v26  ;;  %v2255_v30 = vadd.f32 %v1776_v29, %v1221_v28  ;;  %v5675_v31 = vpop.f32.mrf.mxu0 }
 0x14f   : > { %v5518_v33 = vpop.f32.mrf.mxu1 }
 0x150   : > { %2351 = vst.msk [vmem:[#allocation2] sm:$0xff] %vm1123_vm2, %v2255_v30  ;;  %v2258_v34 = vadd.f32 %v5518_v33, %v1224_v32  ;;  %v3002_v35 = vpop.f32.mrf.mxu0  ;;  %v1234_v30 = vld [vmem:[#allocation2 + $0x68] sm:$0xff] }
 0x151   : > { %v1786_v37 = vpop.f32.mrf.mxu1 }
 0x152   : > { %2354 = vst.msk [vmem:[#allocation2 + $0x18] sm:$0xff] %vm1123_vm2, %v2258_v34  ;;  %v2257_v38 = vadd.f32 %v1786_v37, %v1223_v36  ;;  %v5678_v39 = vpop.f32.mrf.mxu0 }
 0x153   : > { %v5521_v41 = vpop.f32.mrf.mxu1 }
 0x154   : > { %2353 = vst.msk [vmem:[#allocation2 + $0x10] sm:$0xff] %vm1123_vm2, %v2257_v38  ;;  %v2260_v42 = vadd.f32 %v5521_v41, %v1226_v40  ;;  %v3012_v43 = vpop.f32.mrf.mxu0 }
 0x155   : > { %v2448_v44 = vld [vmem:[#allocation2 + $0x8] sm:$0xff]  ;;  %v1796_v46 = vpop.f32.mrf.mxu1 }
 0x156   : > { %2356 = vst.msk [vmem:[#allocation2 + $0x28] sm:$0xff] %vm1123_vm2, %v2260_v42  ;;  %v3482_v47 = vadd.f32 %v5675_v31, %v2448_v44  ;;  %v2259_v48 = vadd.f32 %v1796_v46, %v1225_v45  ;;  %v5681_v49 = vpop.f32.mrf.mxu0 }
 0x157   : > { %v2447_v50 = vld [vmem:[#allocation2] sm:$0xff]  ;;  %v5524_v52 = vpop.f32.mrf.mxu1 }
 0x158   : > { %3578 = vst.msk [vmem:[#allocation2 + $0x8] sm:$0xff] %vm1123_vm2, %v3482_v47  ;;  %2355 = vst.msk [vmem:[#allocation2 + $0x20] sm:$0xff] %vm1123_vm2, %v2259_v48  ;;  %v3481_v53 = vadd.f32 %v3002_v35, %v2447_v50  ;;  %v2262_v54 = vadd.f32 %v5524_v52, %v1228_v51  ;;  %v3022_v55 = vpop.f32.mrf.mxu0  ;;  %v1236_v48 = vld [vmem:[#allocation2 + $0x78] sm:$0xff] }
 0x159   : > { %v2450_v56 = vld [vmem:[#allocation2 + $0x18] sm:$0xff]  ;;  %v1806_v58 = vpop.f32.mrf.mxu1 }
 0x15a   : > { %3577 = vst.msk [vmem:[#allocation2] sm:$0xff] %vm1123_vm2, %v3481_v53  ;;  %2358 = vst.msk [vmem:[#allocation2 + $0x38] sm:$0xff] %vm1123_vm2, %v2262_v54  ;;  %v3484_v59 = vadd.f32 %v5678_v39, %v2450_v56  ;;  %v2261_v60 = vadd.f32 %v1806_v58, %v1227_v57  ;;  %v5684_v61 = vpop.f32.mrf.mxu0  ;;  %v1233_v39 = vld [vmem:[#allocation2 + $0x60] sm:$0xff]  ;;  %v1235_v57 = vld [vmem:[#allocation2 + $0x70] sm:$0xff] }
 0x15b   : > { %v2449_v62 = vld [vmem:[#allocation2 + $0x10] sm:$0xff]  ;;  %v5527_v0 = vpop.f32.mrf.mxu1 }
 0x15c   : > { %3580 = vst.msk [vmem:[#allocation2 + $0x18] sm:$0xff] %vm1123_vm2, %v3484_v59  ;;  %2357 = vst.msk [vmem:[#allocation2 + $0x30] sm:$0xff] %vm1123_vm2, %v2261_v60  ;;  %v3483_v1 = vadd.f32 %v3012_v43, %v2449_v62  ;;  %v2264_v2 = vadd.f32 %v5527_v0, %v1230_v63  ;;  %v3032_v3 = vpop.f32.mrf.mxu0 }
 0x15d   : > { %v2452_v5 = vld [vmem:[#allocation2 + $0x28] sm:$0xff]  ;;  %v1816_v7 = vpop.f32.mrf.mxu1 }
 0x15e   : > { %3579 = vst.msk [vmem:[#allocation2 + $0x10] sm:$0xff] %vm1123_vm2, %v3483_v1  ;;  %2360 = vst.msk [vmem:[#allocation2 + $0x48] sm:$0xff] %vm1123_vm2, %v2264_v2  ;;  %v3486_v8 = vadd.f32 %v5681_v49, %v2452_v5  ;;  %v2263_v9 = vadd.f32 %v1816_v7, %v1229_v6  ;;  %v5687_v10 = vpop.f32.mrf.mxu0  ;;  %v1238_v2 = vld [vmem:[#allocation2 + $0x88] sm:$0xff] }
 0x15f   : > { %v3674_v11 = vld [vmem:[#allocation2 + $0x8] sm:$0xff]  ;;  %v2451_v12 = vld [vmem:[#allocation2 + $0x20] sm:$0xff]  ;;  %v5530_v14 = vpop.f32.mrf.mxu1 }
 0x160   : > { %v3777_v15 = vadd.f32 %v6705_v4, %v3674_v11  ;;  %3582 = vst.msk [vmem:[#allocation2 + $0x28] sm:$0xff] %vm1123_vm2, %v3486_v8  ;;  %2359 = vst.msk [vmem:[#allocation2 + $0x40] sm:$0xff] %vm1123_vm2, %v2263_v9  ;;  %v3485_v16 = vadd.f32 %v3022_v55, %v2451_v12  ;;  %v2266_v17 = vadd.f32 %v5530_v14, %v1232_v13  ;;  %v3042_v18 = vpop.f32.mrf.mxu0  ;;  %v1237_v9 = vld [vmem:[#allocation2 + $0x80] sm:$0xff] }
 0x161   : > { %v3673_v19 = vld [vmem:[#allocation2] sm:$0xff]  ;;  %v2454_v20 = vld [vmem:[#allocation2 + $0x38] sm:$0xff]  ;;  %v1826_v22 = vpop.f32.mrf.mxu1 }
 0x162   : > { %v3873_v23 = vmax.f32 %v3777_v15, 0.0  ;;  %v3776_v24 = vadd.f32 %v6705_v4, %v3673_v19  ;;  %3581 = vst.msk [vmem:[#allocation2 + $0x20] sm:$0xff] %vm1123_vm2, %v3485_v16  ;;  %2362 = vst.msk [vmem:[#allocation2 + $0x58] sm:$0xff] %vm1123_vm2, %v2266_v17  ;;  %v3488_v25 = vadd.f32 %v5684_v61, %v2454_v20  ;;  %v2265_v26 = vadd.f32 %v1826_v22, %v1231_v21  ;;  %v5690_v27 = vpop.f32.mrf.mxu0 }
 0x163   : > { %v3676_v28 = vld [vmem:[#allocation2 + $0x18] sm:$0xff]  ;;  %v2453_v29 = vld [vmem:[#allocation2 + $0x30] sm:$0xff]  ;;  %v5533_v31 = vpop.f32.mrf.mxu1 }
 0x164   : > { %3969 = vst.msk [vmem:[#allocation2 + $0x8] sm:$0xff] %vm1123_vm2, %v3873_v23  ;;  %v3872_v32 = vmax.f32 %v3776_v24, 0.0  ;;  %v3779_v33 = vadd.f32 %v6705_v4, %v3676_v28  ;;  %3584 = vst.msk [vmem:[#allocation2 + $0x38] sm:$0xff] %vm1123_vm2, %v3488_v25  ;;  %v3487_v34 = vadd.f32 %v3032_v3, %v2453_v29  ;;  %v2268_v35 = vadd.f32 %v5533_v31, %v1234_v30  ;;  %v3052_v36 = vpop.f32.mrf.mxu0  ;;  %v1240_v29 = vld [vmem:[#allocation2 + $0x98] sm:$0xff]  ;;  %v1239_v30 = vld [vmem:[#allocation2 + $0x90] sm:$0xff] }
 0x165   : > { %2361 = vst.msk [vmem:[#allocation2 + $0x50] sm:$0xff] %vm1123_vm2, %v2265_v26  ;;  %v3675_v37 = vld [vmem:[#allocation2 + $0x10] sm:$0xff]  ;;  %v2456_v38 = vld [vmem:[#allocation2 + $0x48] sm:$0xff]  ;;  %v1836_v40 = vpop.f32.mrf.mxu1 }
 0x166   : > { %3968 = vst.msk [vmem:[#allocation2] sm:$0xff] %vm1123_vm2, %v3872_v32  ;;  %v3875_v41 = vmax.f32 %v3779_v33, 0.0  ;;  %v3778_v42 = vadd.f32 %v6705_v4, %v3675_v37  ;;  %3583 = vst.msk [vmem:[#allocation2 + $0x30] sm:$0xff] %vm1123_vm2, %v3487_v34  ;;  %v3490_v43 = vadd.f32 %v5687_v10, %v2456_v38  ;;  %v2267_v44 = vadd.f32 %v1836_v40, %v1233_v39  ;;  %v5693_v45 = vpop.f32.mrf.mxu0 }
 0x167   : > { %2364 = vst.msk [vmem:[#allocation2 + $0x68] sm:$0xff] %vm1123_vm2, %v2268_v35  ;;  %v3678_v46 = vld [vmem:[#allocation2 + $0x28] sm:$0xff]  ;;  %v2455_v47 = vld [vmem:[#allocation2 + $0x40] sm:$0xff]  ;;  %v5536_v49 = vpop.f32.mrf.mxu1 }
 0x168   : > { %3971 = vst.msk [vmem:[#allocation2 + $0x18] sm:$0xff] %vm1123_vm2, %v3875_v41  ;;  %v3874_v50 = vmax.f32 %v3778_v42, 0.0  ;;  %v3781_v51 = vadd.f32 %v6705_v4, %v3678_v46  ;;  %3586 = vst.msk [vmem:[#allocation2 + $0x48] sm:$0xff] %vm1123_vm2, %v3490_v43  ;;  %v3489_v52 = vadd.f32 %v3042_v18, %v2455_v47  ;;  %v2270_v53 = vadd.f32 %v5536_v49, %v1236_v48  ;;  %v3062_v54 = vpop.f32.mrf.mxu0 }
 0x169   : > { %2363 = vst.msk [vmem:[#allocation2 + $0x60] sm:$0xff] %vm1123_vm2, %v2267_v44  ;;  %v3677_v55 = vld [vmem:[#allocation2 + $0x20] sm:$0xff]  ;;  %v2458_v56 = vld [vmem:[#allocation2 + $0x58] sm:$0xff]  ;;  %v1846_v58 = vpop.f32.mrf.mxu1 }
 0x16a   : > { %3970 = vst.msk [vmem:[#allocation2 + $0x10] sm:$0xff] %vm1123_vm2, %v3874_v50  ;;  %v3877_v59 = vmax.f32 %v3781_v51, 0.0  ;;  %v3780_v60 = vadd.f32 %v6705_v4, %v3677_v55  ;;  %3585 = vst.msk [vmem:[#allocation2 + $0x40] sm:$0xff] %vm1123_vm2, %v3489_v52  ;;  %v3492_v61 = vadd.f32 %v5690_v27, %v2458_v56  ;;  %v2269_v62 = vadd.f32 %v1846_v58, %v1235_v57  ;;  %v5696_v63 = vpop.f32.mrf.mxu0  ;;  %v1242_v51 = vld [vmem:[#allocation2 + $0xa8] sm:$0xff]  ;;  %v1241_v52 = vld [vmem:[#allocation2 + $0xa0] sm:$0xff] }
 0x16b   : > { %2366 = vst.msk [vmem:[#allocation2 + $0x78] sm:$0xff] %vm1123_vm2, %v2270_v53  ;;  %v3680_v0 = vld [vmem:[#allocation2 + $0x38] sm:$0xff]  ;;  %v5539_v3 = vpop.f32.mrf.mxu1 }
 0x16c   : > { %v2457_v1 = vld [vmem:[#allocation2 + $0x50] sm:$0xff]  ;;  %3973 = vst.msk [vmem:[#allocation2 + $0x28] sm:$0xff] %vm1123_vm2, %v3877_v59  ;;  %v3876_v5 = vmax.f32 %v3780_v60, 0.0  ;;  %v3783_v6 = vadd.f32 %v6705_v4, %v3680_v0  ;;  %3588 = vst.msk [vmem:[#allocation2 + $0x58] sm:$0xff] %vm1123_vm2, %v3492_v61  ;;  %v2272_v8 = vadd.f32 %v5539_v3, %v1238_v2  ;;  %v3072_v10 = vpop.f32.mrf.mxu0  ;;  %v1244_v3 = vld [vmem:[#allocation2 + $0xb8] sm:$0xff] }
 0x16d   : > { %2365 = vst.msk [vmem:[#allocation2 + $0x70] sm:$0xff] %vm1123_vm2, %v2269_v62  ;;  %v3491_v7 = vadd.f32 %v3052_v36, %v2457_v1  ;;  %v4064_v11 = vld [vmem:[#allocation2] ss:$2 sm:$0xff]  ;;  %v4160_v12 = vld [vmem:[#allocation2 + $0x1] ss:$2 sm:$0xff]  ;;  %v3679_v13 = vld [vmem:[#allocation2 + $0x30] sm:$0xff]  ;;  %v1856_v14 = vpop.f32.mrf.mxu1 }
 0x16e   : > { %v4255_v15 = vmax.f32 %v4064_v11, %v4160_v12  ;;  %3972 = vst.msk [vmem:[#allocation2 + $0x20] sm:$0xff] %vm1123_vm2, %v3876_v5  ;;  %v3879_v16 = vmax.f32 %v3783_v6, 0.0  ;;  %v3782_v17 = vadd.f32 %v6705_v4, %v3679_v13  ;;  %2368 = vst.msk [vmem:[#allocation2 + $0x88] sm:$0xff] %vm1123_vm2, %v2272_v8  ;;  %v2460_v18 = vld [vmem:[#allocation2 + $0x68] sm:$0xff]  ;;  %v2271_v19 = vadd.f32 %v1856_v14, %v1237_v9  ;;  %v5699_v20 = vpop.f32.mrf.mxu0  ;;  %v1243_v11 = vld [vmem:[#allocation2 + $0xb0] sm:$0xff] }
 0x16f   : > { %3587 = vst.msk [vmem:[#allocation2 + $0x50] sm:$0xff] %vm1123_vm2, %v3491_v7  ;;  %v3682_v21 = vld [vmem:[#allocation2 + $0x48] sm:$0xff]  ;;  %v3494_v22 = vadd.f32 %v5693_v45, %v2460_v18  ;;  %v5542_v24 = vpop.f32.mrf.mxu1 }
 0x170   : > { %v2459_v23 = vld [vmem:[#allocation2 + $0x60] sm:$0xff]  ;;  %v4977_v25 = vpack.c.bf16 %v4255_v15, %v4255_v15  ;;  %3975 = vst.msk [vmem:[#allocation2 + $0x38] sm:$0xff] %vm1123_vm2, %v3879_v16  ;;  %v3878_v26 = vmax.f32 %v3782_v17, 0.0  ;;  %v3785_v27 = vadd.f32 %v6705_v4, %v3682_v21  ;;  %2367 = vst.msk [vmem:[#allocation2 + $0x80] sm:$0xff] %vm1123_vm2, %v2271_v19  ;;  %v3082_v31 = vpop.f32.mrf.mxu0  ;;  %v2274_v35 = vadd.f32 %v5542_v24, %v1240_v29 }
 0x171   : > { %v3493_v28 = vadd.f32 %v3062_v54, %v2459_v23  ;;  %v4066_v32 = vld [vmem:[#allocation2 + $0x10] ss:$2 sm:$0xff]  ;;  %v4162_v33 = vld [vmem:[#allocation2 + $0x11] ss:$2 sm:$0xff]  ;;  %v3681_v34 = vld [vmem:[#allocation2 + $0x40] sm:$0xff]  ;;  %3590 = vst.msk [vmem:[#allocation2 + $0x68] sm:$0xff] %vm1123_vm2, %v3494_v22  ;;  %v1866_v36 = vpop.f32.mrf.mxu1 }
 0x172   : > { %4495 = vst.msk [vmem:[%s5942_s25] sm:$0xf] %vm1219_vm3, %v4977_v25  ;;  %v4256_v37 = vmax.f32 %v4066_v32, %v4162_v33  ;;  %v3881_v38 = vmax.f32 %v3785_v27, 0.0  ;;  %v3784_v39 = vadd.f32 %v6705_v4, %v3681_v34  ;;  %v2462_v40 = vld [vmem:[#allocation2 + $0x78] sm:$0xff]  ;;  %v2273_v41 = vadd.f32 %v1866_v36, %v1239_v30  ;;  %v5702_v42 = vpop.f32.mrf.mxu0  ;;  %v1245_v33 = vld [vmem:[#allocation2 + $0xc0] sm:$0xff] }
 0x173   : > { %3974 = vst.msk [vmem:[#allocation2 + $0x30] sm:$0xff] %vm1123_vm2, %v3878_v26  ;;  %3589 = vst.msk [vmem:[#allocation2 + $0x60] sm:$0xff] %vm1123_vm2, %v3493_v28  ;;  %v3684_v43 = vld [vmem:[#allocation2 + $0x58] sm:$0xff]  ;;  %v3496_v44 = vadd.f32 %v5696_v63, %v2462_v40  ;;  %v5545_v46 = vpop.f32.mrf.mxu1  ;;  %v1246_v26 = vld [vmem:[#allocation2 + $0xc8] sm:$0xff] }
 0x174   : > { %2370 = vst.msk [vmem:[#allocation2 + $0x98] sm:$0xff] %vm1123_vm2, %v2274_v35  ;;  %v2461_v45 = vld [vmem:[#allocation2 + $0x70] sm:$0xff]  ;;  %v4978_v47 = vpack.c.bf16 %v4256_v37, %v4256_v37  ;;  %3977 = vst.msk [vmem:[#allocation2 + $0x48] sm:$0xff] %vm1123_vm2, %v3881_v38  ;;  %v3880_v48 = vmax.f32 %v3784_v39, 0.0  ;;  %v3787_v49 = vadd.f32 %v6705_v4, %v3684_v43  ;;  %v3092_v53 = vpop.f32.mrf.mxu0  ;;  %v2276_v57 = vadd.f32 %v5545_v46, %v1242_v51 }
 0x175   : > { %2369 = vst.msk [vmem:[#allocation2 + $0x90] sm:$0xff] %vm1123_vm2, %v2273_v41  ;;  %v3495_v50 = vadd.f32 %v3072_v10, %v2461_v45  ;;  %v4068_v54 = vld [vmem:[#allocation2 + $0x20] ss:$2 sm:$0xff]  ;;  %v4164_v55 = vld [vmem:[#allocation2 + $0x21] ss:$2 sm:$0xff]  ;;  %3592 = vst.msk [vmem:[#allocation2 + $0x78] sm:$0xff] %vm1123_vm2, %v3496_v44  ;;  %v1876_v58 = vpop.f32.mrf.mxu1 }
 0x176   : > { %v3683_v56 = vld [vmem:[#allocation2 + $0x50] sm:$0xff]  ;;  %4496 = vst.msk [vmem:[%s5942_s25 + $0x4] sm:$0xf] %vm1219_vm3, %v4978_v47  ;;  %v4257_v59 = vmax.f32 %v4068_v54, %v4164_v55  ;;  %v3883_v60 = vmax.f32 %v3787_v49, 0.0  ;;  %v2464_v62 = vld [vmem:[#allocation2 + $0x88] sm:$0xff]  ;;  %v2275_v63 = vadd.f32 %v1876_v58, %v1241_v52  ;;  %v5705_v0 = vpop.f32.mrf.mxu0 }
 0x177   : > { %3976 = vst.msk [vmem:[#allocation2 + $0x40] sm:$0xff] %vm1123_vm2, %v3880_v48  ;;  %v3786_v61 = vadd.f32 %v6705_v4, %v3683_v56  ;;  %3591 = vst.msk [vmem:[#allocation2 + $0x70] sm:$0xff] %vm1123_vm2, %v3495_v50  ;;  %v3498_v1 = vadd.f32 %v5699_v20, %v2464_v62  ;;  %v2463_v2 = vld [vmem:[#allocation2 + $0x80] sm:$0xff]  ;;  %v5548_v5 = vpop.f32.mrf.mxu1  ;;  %v1248_v48 = vld [vmem:[#allocation2 + $0xd8] sm:$0xff] }
 0x178   : > { %2372 = vst.msk [vmem:[#allocation2 + $0xa8] sm:$0xff] %vm1123_vm2, %v2276_v57  ;;  %v4979_v6 = vpack.c.bf16 %v4257_v59, %v4257_v59  ;;  %3979 = vst.msk [vmem:[#allocation2 + $0x58] sm:$0xff] %vm1123_vm2, %v3883_v60  ;;  %v3686_v8 = vld [vmem:[#allocation2 + $0x68] sm:$0xff]  ;;  %v3497_v9 = vadd.f32 %v3082_v31, %v2463_v2  ;;  %v2278_v10 = vadd.f32 %v5548_v5, %v1244_v3  ;;  %v3102_v12 = vpop.f32.mrf.mxu0  ;;  %v1247_v55 = vld [vmem:[#allocation2 + $0xd0] sm:$0xff] }
 0x179   : > { %v3882_v7 = vmax.f32 %v3786_v61, 0.0  ;;  %2371 = vst.msk [vmem:[#allocation2 + $0xa0] sm:$0xff] %vm1123_vm2, %v2275_v63  ;;  %v3789_v15 = vadd.f32 %v6705_v4, %v3686_v8  ;;  %3594 = vst.msk [vmem:[#allocation2 + $0x88] sm:$0xff] %vm1123_vm2, %v3498_v1  ;;  %v1886_v17 = vpop.f32.mrf.mxu1 }
 0x17a   : > { %v4070_v13 = vld [vmem:[#allocation2 + $0x30] ss:$2 sm:$0xff]  ;;  %v4166_v14 = vld [vmem:[#allocation2 + $0x31] ss:$2 sm:$0xff]  ;;  %v3685_v16 = vld [vmem:[#allocation2 + $0x60] sm:$0xff]  ;;  %3593 = vst.msk [vmem:[#allocation2 + $0x80] sm:$0xff] %vm1123_vm2, %v3497_v9  ;;  %v2277_v21 = vadd.f32 %v1886_v17, %v1243_v11  ;;  %v5708_v22 = vpop.f32.mrf.mxu0 }
 0x17b   : > { %4497 = vst.msk [vmem:[%s5942_s25 + $0x8] sm:$0xf] %vm1219_vm3, %v4979_v6  ;;  %v4258_v18 = vmax.f32 %v4070_v13, %v4166_v14  ;;  %v3788_v19 = vadd.f32 %v6705_v4, %v3685_v16  ;;  %v2466_v20 = vld [vmem:[#allocation2 + $0x98] sm:$0xff]  ;;  %v3885_v23 = vmax.f32 %v3789_v15, 0.0  ;;  %v5551_v27 = vpop.f32.mrf.mxu1  ;;  %v1249_v14 = vld [vmem:[#allocation2 + $0xe0] sm:$0xff] }
 0x17c   : > { %3978 = vst.msk [vmem:[#allocation2 + $0x50] sm:$0xff] %vm1123_vm2, %v3882_v7  ;;  %2374 = vst.msk [vmem:[#allocation2 + $0xb8] sm:$0xff] %vm1123_vm2, %v2278_v10  ;;  %v3500_v24 = vadd.f32 %v5702_v42, %v2466_v20  ;;  %v2465_v25 = vld [vmem:[#allocation2 + $0x90] sm:$0xff]  ;;  %v3688_v30 = vld [vmem:[#allocation2 + $0x78] sm:$0xff]  ;;  %v2280_v32 = vadd.f32 %v5551_v27, %v1246_v26  ;;  %v3112_v34 = vpop.f32.mrf.mxu0 }
 0x17d   : > { %v4980_v28 = vpack.c.bf16 %v4258_v18, %v4258_v18  ;;  %v3884_v29 = vmax.f32 %v3788_v19, 0.0  ;;  %2373 = vst.msk [vmem:[#allocation2 + $0xb0] sm:$0xff] %vm1123_vm2, %v2277_v21  ;;  %v3499_v31 = vadd.f32 %v3092_v53, %v2465_v25  ;;  %3981 = vst.msk [vmem:[#allocation2 + $0x68] sm:$0xff] %vm1123_vm2, %v3885_v23  ;;  %v3791_v37 = vadd.f32 %v6705_v4, %v3688_v30  ;;  %v1896_v39 = vpop.f32.mrf.mxu1  ;;  %v1250_v7 = vld [vmem:[#allocation2 + $0xe8] sm:$0xff] }
 0x17e   : > { %v4072_v35 = vld [vmem:[#allocation2 + $0x40] ss:$2 sm:$0xff]  ;;  %v4168_v36 = vld [vmem:[#allocation2 + $0x41] ss:$2 sm:$0xff]  ;;  %v3687_v38 = vld [vmem:[#allocation2 + $0x70] sm:$0xff]  ;;  %3596 = vst.msk [vmem:[#allocation2 + $0x98] sm:$0xff] %vm1123_vm2, %v3500_v24  ;;  %v2279_v43 = vadd.f32 %v1896_v39, %v1245_v33  ;;  %v5711_v44 = vpop.f32.mrf.mxu0 }
 0x17f   : > { %4498 = vst.msk [vmem:[%s5942_s25 + $0xc] sm:$0xf] %vm1219_vm3, %v4980_v28  ;;  %v4259_v40 = vmax.f32 %v4072_v35, %v4168_v36  ;;  %v3790_v41 = vadd.f32 %v6705_v4, %v3687_v38  ;;  %v2468_v42 = vld [vmem:[#allocation2 + $0xa8] sm:$0xff]  ;;  %v3887_v45 = vmax.f32 %v3791_v37, 0.0  ;;  %v5554_v49 = vpop.f32.mrf.mxu1  ;;  %v1251_v36 = vld [vmem:[#allocation2 + $0xf0] sm:$0xff] }
 0x180   : > { %3980 = vst.msk [vmem:[#allocation2 + $0x60] sm:$0xff] %vm1123_vm2, %v3884_v29  ;;  %3595 = vst.msk [vmem:[#allocation2 + $0x90] sm:$0xff] %vm1123_vm2, %v3499_v31  ;;  %v3502_v46 = vadd.f32 %v5705_v0, %v2468_v42  ;;  %v2467_v47 = vld [vmem:[#allocation2 + $0xa0] sm:$0xff]  ;;  %v3690_v52 = vld [vmem:[#allocation2 + $0x88] sm:$0xff]  ;;  %v2282_v54 = vadd.f32 %v5554_v49, %v1248_v48  ;;  %v3122_v56 = vpop.f32.mrf.mxu0 }
 0x181   : > { %2376 = vst.msk [vmem:[#allocation2 + $0xc8] sm:$0xff] %vm1123_vm2, %v2280_v32  ;;  %v4981_v50 = vpack.c.bf16 %v4259_v40, %v4259_v40  ;;  %v3886_v51 = vmax.f32 %v3790_v41, 0.0  ;;  %2375 = vst.msk [vmem:[#allocation2 + $0xc0] sm:$0xff] %vm1123_vm2, %v2279_v43  ;;  %v3501_v53 = vadd.f32 %v3102_v12, %v2467_v47  ;;  %v3793_v59 = vadd.f32 %v6705_v4, %v3690_v52  ;;  %v3689_v60 = vld [vmem:[#allocation2 + $0x80] sm:$0xff]  ;;  %v1906_v61 = vpop.f32.mrf.mxu1  ;;  %v1252_v29 = vld [vmem:[#allocation2 + $0xf8] sm:$0xff] }
 0x182   : > { %3983 = vst.msk [vmem:[#allocation2 + $0x78] sm:$0xff] %vm1123_vm2, %v3887_v45  ;;  %3598 = vst.msk [vmem:[#allocation2 + $0xa8] sm:$0xff] %vm1123_vm2, %v3502_v46  ;;  %v3792_v63 = vadd.f32 %v6705_v4, %v3689_v60  ;;  %v2281_v1 = vadd.f32 %v1906_v61, %v1247_v55  ;;  %v5714_v2 = vpop.f32.mrf.mxu0 }
 0x183   : > { %v4074_v57 = vld [vmem:[#allocation2 + $0x50] ss:$2 sm:$0xff]  ;;  %v4170_v58 = vld [vmem:[#allocation2 + $0x51] ss:$2 sm:$0xff]  ;;  %4499 = vst.msk [vmem:[%s5942_s25 + $0x10] sm:$0xf] %vm1219_vm3, %v4981_v50  ;;  %v5557_v8 = vpop.f32.mrf.mxu1 }
 0x184   : > { %v4260_v62 = vmax.f32 %v4074_v57, %v4170_v58  ;;  %3982 = vst.msk [vmem:[#allocation2 + $0x70] sm:$0xff] %vm1123_vm2, %v3886_v51  ;;  %3597 = vst.msk [vmem:[#allocation2 + $0xa0] sm:$0xff] %vm1123_vm2, %v3501_v53  ;;  %v2470_v0 = vld [vmem:[#allocation2 + $0xb8] sm:$0xff]  ;;  %v3889_v3 = vmax.f32 %v3793_v59, 0.0  ;;  %v2469_v6 = vld [vmem:[#allocation2 + $0xb0] sm:$0xff]  ;;  %v3888_v10 = vmax.f32 %v3792_v63, 0.0  ;;  %v2284_v13 = vadd.f32 %v5557_v8, %v1250_v7  ;;  %v3132_v15 = vpop.f32.mrf.mxu0 }
 0x185   : > { %2378 = vst.msk [vmem:[#allocation2 + $0xd8] sm:$0xff] %vm1123_vm2, %v2282_v54  ;;  %v3504_v5 = vadd.f32 %v5708_v22, %v2470_v0  ;;  %v3692_v11 = vld [vmem:[#allocation2 + $0x98] sm:$0xff]  ;;  %2377 = vst.msk [vmem:[#allocation2 + $0xd0] sm:$0xff] %vm1123_vm2, %v2281_v1  ;;  %v3503_v12 = vadd.f32 %v3112_v34, %v2469_v6  ;;  %v1916_v20 = vpop.f32.mrf.mxu1  ;;  %v1254_v51 = vld [vmem:[#allocation2 + $0x108] sm:$0xff] }
 0x186   : > { %v4982_v9 = vpack.c.bf16 %v4260_v62, %v4260_v62  ;;  %3985 = vst.msk [vmem:[#allocation2 + $0x88] sm:$0xff] %vm1123_vm2, %v3889_v3  ;;  %v3795_v18 = vadd.f32 %v6705_v4, %v3692_v11  ;;  %3984 = vst.msk [vmem:[#allocation2 + $0x80] sm:$0xff] %vm1123_vm2, %v3888_v10  ;;  %v2283_v24 = vadd.f32 %v1916_v20, %v1249_v14  ;;  %v5717_v25 = vpop.f32.mrf.mxu0  ;;  %v1253_v58 = vld [vmem:[#allocation2 + $0x100] sm:$0xff]  ;;  %v1256_v10 = vld [vmem:[#allocation2 + $0x118] sm:$0xff] }
 0x187   : > { %v4076_v16 = vld [vmem:[#allocation2 + $0x60] ss:$2 sm:$0xff]  ;;  %v4172_v17 = vld [vmem:[#allocation2 + $0x61] ss:$2 sm:$0xff]  ;;  %v3691_v19 = vld [vmem:[#allocation2 + $0x90] sm:$0xff]  ;;  %3600 = vst.msk [vmem:[#allocation2 + $0xb8] sm:$0xff] %vm1123_vm2, %v3504_v5  ;;  %v5560_v30 = vpop.f32.mrf.mxu1 }
 0x188   : > { %4500 = vst.msk [vmem:[%s5942_s25 + $0x14] sm:$0xf] %vm1219_vm3, %v4982_v9  ;;  %v4261_v21 = vmax.f32 %v4076_v16, %v4172_v17  ;;  %v3794_v22 = vadd.f32 %v6705_v4, %v3691_v19  ;;  %v2472_v23 = vld [vmem:[#allocation2 + $0xc8] sm:$0xff]  ;;  %v3891_v26 = vmax.f32 %v3795_v18, 0.0  ;;  %v2471_v28 = vld [vmem:[#allocation2 + $0xc0] sm:$0xff]  ;;  %v2286_v35 = vadd.f32 %v5560_v30, %v1252_v29  ;;  %v3142_v37 = vpop.f32.mrf.mxu0  ;;  %v1255_v17 = vld [vmem:[#allocation2 + $0x110] sm:$0xff] }
 0x189   : > { %3599 = vst.msk [vmem:[#allocation2 + $0xb0] sm:$0xff] %vm1123_vm2, %v3503_v12  ;;  %2380 = vst.msk [vmem:[#allocation2 + $0xe8] sm:$0xff] %vm1123_vm2, %v2284_v13  ;;  %v3506_v27 = vadd.f32 %v5711_v44, %v2472_v23  ;;  %v3694_v33 = vld [vmem:[#allocation2 + $0xa8] sm:$0xff]  ;;  %v3505_v34 = vadd.f32 %v3122_v56, %v2471_v28  ;;  %v1926_v42 = vpop.f32.mrf.mxu1 }
 0x18a   : > { %v4983_v31 = vpack.c.bf16 %v4261_v21, %v4261_v21  ;;  %v3890_v32 = vmax.f32 %v3794_v22, 0.0  ;;  %2379 = vst.msk [vmem:[#allocation2 + $0xe0] sm:$0xff] %vm1123_vm2, %v2283_v24  ;;  %3987 = vst.msk [vmem:[#allocation2 + $0x98] sm:$0xff] %vm1123_vm2, %v3891_v26  ;;  %v3797_v40 = vadd.f32 %v6705_v4, %v3694_v33  ;;  %v2285_v46 = vadd.f32 %v1926_v42, %v1251_v36  ;;  %v5720_v47 = vpop.f32.mrf.mxu0 }
 0x18b   : > { %v4078_v38 = vld [vmem:[#allocation2 + $0x70] ss:$2 sm:$0xff]  ;;  %v4174_v39 = vld [vmem:[#allocation2 + $0x71] ss:$2 sm:$0xff]  ;;  %v3693_v41 = vld [vmem:[#allocation2 + $0xa0] sm:$0xff]  ;;  %3602 = vst.msk [vmem:[#allocation2 + $0xc8] sm:$0xff] %vm1123_vm2, %v3506_v27  ;;  %v5563_v52 = vpop.f32.mrf.mxu1 }
 0x18c   : > { %4501 = vst.msk [vmem:[%s5942_s25 + $0x18] sm:$0xf] %vm1219_vm3, %v4983_v31  ;;  %v4262_v43 = vmax.f32 %v4078_v38, %v4174_v39  ;;  %v3796_v44 = vadd.f32 %v6705_v4, %v3693_v41  ;;  %v2474_v45 = vld [vmem:[#allocation2 + $0xd8] sm:$0xff]  ;;  %v3893_v48 = vmax.f32 %v3797_v40, 0.0  ;;  %v2473_v50 = vld [vmem:[#allocation2 + $0xd0] sm:$0xff]  ;;  %v2288_v57 = vadd.f32 %v5563_v52, %v1254_v51  ;;  %v3152_v59 = vpop.f32.mrf.mxu0  ;;  %v1257_v39 = vld [vmem:[#allocation2 + $0x120] sm:$0xff] }
 0x18d   : > { %3986 = vst.msk [vmem:[#allocation2 + $0x90] sm:$0xff] %vm1123_vm2, %v3890_v32  ;;  %3601 = vst.msk [vmem:[#allocation2 + $0xc0] sm:$0xff] %vm1123_vm2, %v3505_v34  ;;  %v3508_v49 = vadd.f32 %v5714_v2, %v2474_v45  ;;  %v3507_v56 = vadd.f32 %v3132_v15, %v2473_v50  ;;  %v4080_v60 = vld [vmem:[#allocation2 + $0x80] ss:$2 sm:$0xff]  ;;  %v4176_v61 = vld [vmem:[#allocation2 + $0x81] ss:$2 sm:$0xff]  ;;  %v1936_v0 = vpop.f32.mrf.mxu1 }
 0x18e   : > { %2382 = vst.msk [vmem:[#allocation2 + $0xf8] sm:$0xff] %vm1123_vm2, %v2286_v35  ;;  %v4984_v53 = vpack.c.bf16 %v4262_v43, %v4262_v43  ;;  %v3892_v54 = vmax.f32 %v3796_v44, 0.0  ;;  %v3696_v55 = vld [vmem:[#allocation2 + $0xb8] sm:$0xff]  ;;  %2381 = vst.msk [vmem:[#allocation2 + $0xf0] sm:$0xff] %vm1123_vm2, %v2285_v46  ;;  %v4263_v1 = vmax.f32 %v4080_v60, %v4176_v61  ;;  %v2287_v5 = vadd.f32 %v1936_v0, %v1253_v58  ;;  %v5723_v6 = vpop.f32.mrf.mxu0  ;;  %v1258_v32 = vld [vmem:[#allocation2 + $0x128] sm:$0xff] }
 0x18f   : > { %3989 = vst.msk [vmem:[#allocation2 + $0xa8] sm:$0xff] %vm1123_vm2, %v3893_v48  ;;  %v3799_v62 = vadd.f32 %v6705_v4, %v3696_v55  ;;  %3604 = vst.msk [vmem:[#allocation2 + $0xd8] sm:$0xff] %vm1123_vm2, %v3508_v49  ;;  %v5566_v11 = vpop.f32.mrf.mxu1  ;;  %v1259_v61 = vld [vmem:[#allocation2 + $0x130] sm:$0xff] }
 0x190   : > { %v3695_v63 = vld [vmem:[#allocation2 + $0xb0] sm:$0xff]  ;;  %4502 = vst.msk [vmem:[%s5942_s25 + $0x1c] sm:$0xf] %vm1219_vm3, %v4984_v53  ;;  %v2476_v3 = vld [vmem:[#allocation2 + $0xe8] sm:$0xff]  ;;  %v4985_v12 = vpack.c.bf16 %v4263_v1, %v4263_v1  ;;  %v2290_v16 = vadd.f32 %v5566_v11, %v1256_v10  ;;  %v3162_v18 = vpop.f32.mrf.mxu0 }
 0x191   : > { %3988 = vst.msk [vmem:[#allocation2 + $0xa0] sm:$0xff] %vm1123_vm2, %v3892_v54  ;;  %v3798_v2 = vadd.f32 %v6705_v4, %v3695_v63  ;;  %3603 = vst.msk [vmem:[#allocation2 + $0xd0] sm:$0xff] %vm1123_vm2, %v3507_v56  ;;  %v3895_v7 = vmax.f32 %v3799_v62, 0.0  ;;  %v3510_v8 = vadd.f32 %v5717_v25, %v2476_v3  ;;  %v2475_v9 = vld [vmem:[#allocation2 + $0xe0] sm:$0xff]  ;;  %v1946_v23 = vpop.f32.mrf.mxu1  ;;  %v1260_v54 = vld [vmem:[#allocation2 + $0x138] sm:$0xff] }
 0x192   : > { %2384 = vst.msk [vmem:[#allocation2 + $0x108] sm:$0xff] %vm1123_vm2, %v2288_v57  ;;  %v3698_v14 = vld [vmem:[#allocation2 + $0xc8] sm:$0xff]  ;;  %2383 = vst.msk [vmem:[#allocation2 + $0x100] sm:$0xff] %vm1123_vm2, %v2287_v5  ;;  %v3509_v15 = vadd.f32 %v3142_v37, %v2475_v9  ;;  %v2289_v27 = vadd.f32 %v1946_v23, %v1255_v17  ;;  %v5726_v28 = vpop.f32.mrf.mxu0 }
 0x193   : > { %v3894_v13 = vmax.f32 %v3798_v2, 0.0  ;;  %3991 = vst.msk [vmem:[#allocation2 + $0xb8] sm:$0xff] %vm1123_vm2, %v3895_v7  ;;  %v3801_v21 = vadd.f32 %v6705_v4, %v3698_v14  ;;  %3606 = vst.msk [vmem:[#allocation2 + $0xe8] sm:$0xff] %vm1123_vm2, %v3510_v8  ;;  %v5569_v33 = vpop.f32.mrf.mxu1 }
 0x194   : > { %v4082_v19 = vld [vmem:[#allocation2 + $0x90] ss:$2 sm:$0xff]  ;;  %v4178_v20 = vld [vmem:[#allocation2 + $0x91] ss:$2 sm:$0xff]  ;;  %v3697_v22 = vld [vmem:[#allocation2 + $0xc0] sm:$0xff]  ;;  %3605 = vst.msk [vmem:[#allocation2 + $0xe0] sm:$0xff] %vm1123_vm2, %v3509_v15  ;;  %v2292_v38 = vadd.f32 %v5569_v33, %v1258_v32  ;;  %v3172_v40 = vpop.f32.mrf.mxu0 }
 0x195   : > { %4503 = vst.msk [vmem:[%s5942_s25 + $0x20] sm:$0xf] %vm1219_vm3, %v4985_v12  ;;  %v4264_v24 = vmax.f32 %v4082_v19, %v4178_v20  ;;  %v3800_v25 = vadd.f32 %v6705_v4, %v3697_v22  ;;  %v2478_v26 = vld [vmem:[#allocation2 + $0xf8] sm:$0xff]  ;;  %v3897_v29 = vmax.f32 %v3801_v21, 0.0  ;;  %v2477_v31 = vld [vmem:[#allocation2 + $0xf0] sm:$0xff]  ;;  %v1956_v45 = vpop.f32.mrf.mxu1  ;;  %v1261_v20 = vld [vmem:[#allocation2 + $0x140] sm:$0xff] }
 0x196   : > { %3990 = vst.msk [vmem:[#allocation2 + $0xb0] sm:$0xff] %vm1123_vm2, %v3894_v13  ;;  %2386 = vst.msk [vmem:[#allocation2 + $0x118] sm:$0xff] %vm1123_vm2, %v2290_v16  ;;  %v3512_v30 = vadd.f32 %v5720_v47, %v2478_v26  ;;  %v3700_v36 = vld [vmem:[#allocation2 + $0xd8] sm:$0xff]  ;;  %v3511_v37 = vadd.f32 %v3152_v59, %v2477_v31  ;;  %v2291_v49 = vadd.f32 %v1956_v45, %v1257_v39  ;;  %v5729_v50 = vpop.f32.mrf.mxu0  ;;  %v1262_v13 = vld [vmem:[#allocation2 + $0x148] sm:$0xff] }
 0x197   : > { %v4986_v34 = vpack.c.bf16 %v4264_v24, %v4264_v24  ;;  %v3896_v35 = vmax.f32 %v3800_v25, 0.0  ;;  %2385 = vst.msk [vmem:[#allocation2 + $0x110] sm:$0xff] %vm1123_vm2, %v2289_v27  ;;  %3993 = vst.msk [vmem:[#allocation2 + $0xc8] sm:$0xff] %vm1123_vm2, %v3897_v29  ;;  %v3803_v43 = vadd.f32 %v6705_v4, %v3700_v36  ;;  %v5572_v55 = vpop.f32.mrf.mxu1 }
 0x198   : > { %v4084_v41 = vld [vmem:[#allocation2 + $0xa0] ss:$2 sm:$0xff]  ;;  %v4180_v42 = vld [vmem:[#allocation2 + $0xa1] ss:$2 sm:$0xff]  ;;  %v3699_v44 = vld [vmem:[#allocation2 + $0xd0] sm:$0xff]  ;;  %3608 = vst.msk [vmem:[#allocation2 + $0xf8] sm:$0xff] %vm1123_vm2, %v3512_v30  ;;  %v2294_v60 = vadd.f32 %v5572_v55, %v1260_v54  ;;  %v3182_v62 = vpop.f32.mrf.mxu0 }
 0x199   : > { %4504 = vst.msk [vmem:[%s5942_s25 + $0x24] sm:$0xf] %vm1219_vm3, %v4986_v34  ;;  %v4265_v46 = vmax.f32 %v4084_v41, %v4180_v42  ;;  %v3802_v47 = vadd.f32 %v6705_v4, %v3699_v44  ;;  %v2480_v48 = vld [vmem:[#allocation2 + $0x108] sm:$0xff]  ;;  %v3899_v51 = vmax.f32 %v3803_v43, 0.0  ;;  %v2479_v53 = vld [vmem:[#allocation2 + $0x100] sm:$0xff]  ;;  %v1966_v3 = vpop.f32.mrf.mxu1  ;;  %v1263_v42 = vld [vmem:[#allocation2 + $0x150] sm:$0xff] }
 0x19a   : > { %3992 = vst.msk [vmem:[#allocation2 + $0xc0] sm:$0xff] %vm1123_vm2, %v3896_v35  ;;  %3607 = vst.msk [vmem:[#allocation2 + $0xf0] sm:$0xff] %vm1123_vm2, %v3511_v37  ;;  %v3514_v52 = vadd.f32 %v5723_v6, %v2480_v48  ;;  %v3702_v58 = vld [vmem:[#allocation2 + $0xe8] sm:$0xff]  ;;  %v3513_v59 = vadd.f32 %v3162_v18, %v2479_v53  ;;  %v2293_v8 = vadd.f32 %v1966_v3, %v1259_v61  ;;  %v5732_v9 = vpop.f32.mrf.mxu0  ;;  %v1264_v35 = vld [vmem:[#allocation2 + $0x158] sm:$0xff] }
 0x19b   : > { %2388 = vst.msk [vmem:[#allocation2 + $0x128] sm:$0xff] %vm1123_vm2, %v2292_v38  ;;  %v4987_v56 = vpack.c.bf16 %v4265_v46, %v4265_v46  ;;  %v3898_v57 = vmax.f32 %v3802_v47, 0.0  ;;  %2387 = vst.msk [vmem:[#allocation2 + $0x120] sm:$0xff] %vm1123_vm2, %v2291_v49  ;;  %v3805_v1 = vadd.f32 %v6705_v4, %v3702_v58  ;;  %v3701_v2 = vld [vmem:[#allocation2 + $0xe0] sm:$0xff]  ;;  %v5575_v14 = vpop.f32.mrf.mxu1 }
 0x19c   : > { %3995 = vst.msk [vmem:[#allocation2 + $0xd8] sm:$0xff] %vm1123_vm2, %v3899_v51  ;;  %3610 = vst.msk [vmem:[#allocation2 + $0x108] sm:$0xff] %vm1123_vm2, %v3514_v52  ;;  %v3804_v6 = vadd.f32 %v6705_v4, %v3701_v2  ;;  %v2296_v19 = vadd.f32 %v5575_v14, %v1262_v13  ;;  %v3192_v21 = vpop.f32.mrf.mxu0 }
 0x19d   : > { %v4086_v63 = vld [vmem:[#allocation2 + $0xb0] ss:$2 sm:$0xff]  ;;  %v4182_v0 = vld [vmem:[#allocation2 + $0xb1] ss:$2 sm:$0xff]  ;;  %4505 = vst.msk [vmem:[%s5942_s25 + $0x28] sm:$0xf] %vm1219_vm3, %v4987_v56  ;;  %v1976_v26 = vpop.f32.mrf.mxu1 }
 0x19e   : > { %v4266_v5 = vmax.f32 %v4086_v63, %v4182_v0  ;;  %3994 = vst.msk [vmem:[#allocation2 + $0xd0] sm:$0xff] %vm1123_vm2, %v3898_v57  ;;  %3609 = vst.msk [vmem:[#allocation2 + $0x100] sm:$0xff] %vm1123_vm2, %v3513_v59  ;;  %v2482_v7 = vld [vmem:[#allocation2 + $0x118] sm:$0xff]  ;;  %v3901_v10 = vmax.f32 %v3805_v1, 0.0  ;;  %v2481_v12 = vld [vmem:[#allocation2 + $0x110] sm:$0xff]  ;;  %v3900_v16 = vmax.f32 %v3804_v6, 0.0  ;;  %v2295_v30 = vadd.f32 %v1976_v26, %v1261_v20  ;;  %v5735_v31 = vpop.f32.mrf.mxu0 }
 0x19f   : > { %2390 = vst.msk [vmem:[#allocation2 + $0x138] sm:$0xff] %vm1123_vm2, %v2294_v60  ;;  %v3516_v11 = vadd.f32 %v5726_v28, %v2482_v7  ;;  %v3704_v17 = vld [vmem:[#allocation2 + $0xf8] sm:$0xff]  ;;  %2389 = vst.msk [vmem:[#allocation2 + $0x130] sm:$0xff] %vm1123_vm2, %v2293_v8  ;;  %v3515_v18 = vadd.f32 %v3172_v40, %v2481_v12  ;;  %v5578_v36 = vpop.f32.mrf.mxu1  ;;  %v1266_v57 = vld [vmem:[#allocation2 + $0x168] sm:$0xff] }
 0x1a0   : > { %v4988_v15 = vpack.c.bf16 %v4266_v5, %v4266_v5  ;;  %3997 = vst.msk [vmem:[#allocation2 + $0xe8] sm:$0xff] %vm1123_vm2, %v3901_v10  ;;  %v3807_v24 = vadd.f32 %v6705_v4, %v3704_v17  ;;  %3996 = vst.msk [vmem:[#allocation2 + $0xe0] sm:$0xff] %vm1123_vm2, %v3900_v16  ;;  %v2298_v41 = vadd.f32 %v5578_v36, %v1264_v35  ;;  %v3202_v43 = vpop.f32.mrf.mxu0  ;;  %v1265_v0 = vld [vmem:[#allocation2 + $0x160] sm:$0xff]  ;;  %v1268_v16 = vld [vmem:[#allocation2 + $0x178] sm:$0xff] }
 0x1a1   : > { %v4088_v22 = vld [vmem:[#allocation2 + $0xc0] ss:$2 sm:$0xff]  ;;  %v4184_v23 = vld [vmem:[#allocation2 + $0xc1] ss:$2 sm:$0xff]  ;;  %v3703_v25 = vld [vmem:[#allocation2 + $0xf0] sm:$0xff]  ;;  %3612 = vst.msk [vmem:[#allocation2 + $0x118] sm:$0xff] %vm1123_vm2, %v3516_v11  ;;  %v1986_v48 = vpop.f32.mrf.mxu1 }
 0x1a2   : > { %4506 = vst.msk [vmem:[%s5942_s25 + $0x2c] sm:$0xf] %vm1219_vm3, %v4988_v15  ;;  %v4267_v27 = vmax.f32 %v4088_v22, %v4184_v23  ;;  %v3806_v28 = vadd.f32 %v6705_v4, %v3703_v25  ;;  %v2484_v29 = vld [vmem:[#allocation2 + $0x128] sm:$0xff]  ;;  %v3903_v32 = vmax.f32 %v3807_v24, 0.0  ;;  %v2483_v34 = vld [vmem:[#allocation2 + $0x120] sm:$0xff]  ;;  %v2297_v52 = vadd.f32 %v1986_v48, %v1263_v42  ;;  %v5738_v53 = vpop.f32.mrf.mxu0  ;;  %v1267_v22 = vld [vmem:[#allocation2 + $0x170] sm:$0xff] }
 0x1a3   : > { %3611 = vst.msk [vmem:[#allocation2 + $0x110] sm:$0xff] %vm1123_vm2, %v3515_v18  ;;  %2392 = vst.msk [vmem:[#allocation2 + $0x148] sm:$0xff] %vm1123_vm2, %v2296_v19  ;;  %v3518_v33 = vadd.f32 %v5729_v50, %v2484_v29  ;;  %v3706_v39 = vld [vmem:[#allocation2 + $0x108] sm:$0xff]  ;;  %v3517_v40 = vadd.f32 %v3182_v62, %v2483_v34  ;;  %v5581_v58 = vpop.f32.mrf.mxu1  ;;  %v6881_v26 = vld [vmem:[#allocation3] ss:$0 sm:$0xff] }
 0x1a4   : > { %v4989_v37 = vpack.c.bf16 %v4267_v27, %v4267_v27  ;;  %v3902_v38 = vmax.f32 %v3806_v28, 0.0  ;;  %2391 = vst.msk [vmem:[#allocation2 + $0x140] sm:$0xff] %vm1123_vm2, %v2295_v30  ;;  %3999 = vst.msk [vmem:[#allocation2 + $0xf8] sm:$0xff] %vm1123_vm2, %v3903_v32  ;;  %v3809_v46 = vadd.f32 %v6705_v4, %v3706_v39  ;;  %v2300_v63 = vadd.f32 %v5581_v58, %v1266_v57  ;;  %v3212_v1 = vpop.f32.mrf.mxu0 }
 0x1a5   : > { %v4090_v44 = vld [vmem:[#allocation2 + $0xd0] ss:$2 sm:$0xff]  ;;  %v4186_v45 = vld [vmem:[#allocation2 + $0xd1] ss:$2 sm:$0xff]  ;;  %v3705_v47 = vld [vmem:[#allocation2 + $0x100] sm:$0xff]  ;;  %3614 = vst.msk [vmem:[#allocation2 + $0x128] sm:$0xff] %vm1123_vm2, %v3518_v33  ;;  %v1996_v7 = vpop.f32.mrf.mxu1 }
 0x1a6   : > { %4507 = vst.msk [vmem:[%s5942_s25 + $0x30] sm:$0xf] %vm1219_vm3, %v4989_v37  ;;  %v4268_v49 = vmax.f32 %v4090_v44, %v4186_v45  ;;  %v3808_v50 = vadd.f32 %v6705_v4, %v3705_v47  ;;  %v2486_v51 = vld [vmem:[#allocation2 + $0x138] sm:$0xff]  ;;  %v3905_v54 = vmax.f32 %v3809_v46, 0.0  ;;  %v2485_v56 = vld [vmem:[#allocation2 + $0x130] sm:$0xff]  ;;  %v2299_v11 = vadd.f32 %v1996_v7, %v1265_v0  ;;  %v5741_v12 = vpop.f32.mrf.mxu0  ;;  %v1269_v45 = vld [vmem:[#allocation2 + $0x180] sm:$0xff] }
 0x1a7   : > { %3998 = vst.msk [vmem:[#allocation2 + $0xf0] sm:$0xff] %vm1123_vm2, %v3902_v38  ;;  %3613 = vst.msk [vmem:[#allocation2 + $0x120] sm:$0xff] %vm1123_vm2, %v3517_v40  ;;  %v3520_v55 = vadd.f32 %v5732_v9, %v2486_v51  ;;  %v3519_v62 = vadd.f32 %v3192_v21, %v2485_v56  ;;  %v4092_v2 = vld [vmem:[#allocation2 + $0xe0] ss:$2 sm:$0xff]  ;;  %v4188_v3 = vld [vmem:[#allocation2 + $0xe1] ss:$2 sm:$0xff]  ;;  %v5584_v17 = vpop.f32.mrf.mxu1 }
 0x1a8   : > { %2394 = vst.msk [vmem:[#allocation2 + $0x158] sm:$0xff] %vm1123_vm2, %v2298_v41  ;;  %v4990_v59 = vpack.c.bf16 %v4268_v49, %v4268_v49  ;;  %v3904_v60 = vmax.f32 %v3808_v50, 0.0  ;;  %v3708_v61 = vld [vmem:[#allocation2 + $0x118] sm:$0xff]  ;;  %2393 = vst.msk [vmem:[#allocation2 + $0x150] sm:$0xff] %vm1123_vm2, %v2297_v52  ;;  %v4269_v8 = vmax.f32 %v4092_v2, %v4188_v3  ;;  %v3222_v23 = vpop.f32.mrf.mxu0  ;;  %v1270_v38 = vld [vmem:[#allocation2 + $0x188] sm:$0xff] }
 0x1a9   : > { %4001 = vst.msk [vmem:[#allocation2 + $0x108] sm:$0xff] %vm1123_vm2, %v3905_v54  ;;  %v3811_v5 = vadd.f32 %v6705_v4, %v3708_v61  ;;  %3616 = vst.msk [vmem:[#allocation2 + $0x138] sm:$0xff] %vm1123_vm2, %v3520_v55  ;;  %v2006_v29 = vpop.f32.mrf.mxu1  ;;  %v1271_v3 = vld [vmem:[#allocation2 + $0x190] sm:$0xff] }
 0x1aa   : > { %v3707_v6 = vld [vmem:[#allocation2 + $0x110] sm:$0xff]  ;;  %4508 = vst.msk [vmem:[%s5942_s25 + $0x34] sm:$0xf] %vm1219_vm3, %v4990_v59  ;;  %v2488_v10 = vld [vmem:[#allocation2 + $0x148] sm:$0xff]  ;;  %v4991_v18 = vpack.c.bf16 %v4269_v8, %v4269_v8  ;;  %v2301_v33 = vadd.f32 %v2006_v29, %v1267_v22  ;;  %v5744_v34 = vpop.f32.mrf.mxu0 }
 0x1ab   : > { %4000 = vst.msk [vmem:[#allocation2 + $0x100] sm:$0xff] %vm1123_vm2, %v3904_v60  ;;  %v3810_v9 = vadd.f32 %v6705_v4, %v3707_v6  ;;  %3615 = vst.msk [vmem:[#allocation2 + $0x130] sm:$0xff] %vm1123_vm2, %v3519_v62  ;;  %v3907_v13 = vmax.f32 %v3811_v5, 0.0  ;;  %v3522_v14 = vadd.f32 %v5735_v31, %v2488_v10  ;;  %v2487_v15 = vld [vmem:[#allocation2 + $0x140] sm:$0xff]  ;;  %v2302_v4 = vadd.f32 %v5584_v17, %v1268_v16  ;;  %v5587_v39 = vpop.f32.mrf.mxu1  ;;  %v1272_v60 = vld [vmem:[#allocation2 + $0x198] sm:$0xff] }
 0x1ac   : > { %2396 = vst.msk [vmem:[#allocation2 + $0x168] sm:$0xff] %vm1123_vm2, %v2300_v63  ;;  %v3710_v20 = vld [vmem:[#allocation2 + $0x128] sm:$0xff]  ;;  %2395 = vst.msk [vmem:[#allocation2 + $0x160] sm:$0xff] %vm1123_vm2, %v2299_v11  ;;  %v3521_v21 = vadd.f32 %v3202_v43, %v2487_v15  ;;  %v2304_v44 = vadd.f32 %v5587_v39, %v1270_v38  ;;  %v3232_v46 = vpop.f32.mrf.mxu0 }
 0x1ad   : > { %v3906_v19 = vmax.f32 %v3810_v9, 0.0  ;;  %4003 = vst.msk [vmem:[#allocation2 + $0x118] sm:$0xff] %vm1123_vm2, %v3907_v13  ;;  %v3813_v27 = vadd.f32 %v6881_v26, %v3710_v20  ;;  %3618 = vst.msk [vmem:[#allocation2 + $0x148] sm:$0xff] %vm1123_vm2, %v3522_v14  ;;  %v2016_v51 = vpop.f32.mrf.mxu1 }
 0x1ae   : > { %v4094_v24 = vld [vmem:[#allocation2 + $0xf0] ss:$2 sm:$0xff]  ;;  %v4190_v25 = vld [vmem:[#allocation2 + $0xf1] ss:$2 sm:$0xff]  ;;  %v3709_v28 = vld [vmem:[#allocation2 + $0x120] sm:$0xff]  ;;  %3617 = vst.msk [vmem:[#allocation2 + $0x140] sm:$0xff] %vm1123_vm2, %v3521_v21  ;;  %v2303_v55 = vadd.f32 %v2016_v51, %v1269_v45  ;;  %v5747_v56 = vpop.f32.mrf.mxu0 }
 0x1af   : > { %4509 = vst.msk [vmem:[%s5942_s25 + $0x38] sm:$0xf] %vm1219_vm3, %v4991_v18  ;;  %v4270_v30 = vmax.f32 %v4094_v24, %v4190_v25  ;;  %v3812_v31 = vadd.f32 %v6881_v26, %v3709_v28  ;;  %v2490_v32 = vld [vmem:[#allocation2 + $0x158] sm:$0xff]  ;;  %v3909_v35 = vmax.f32 %v3813_v27, 0.0  ;;  %v2489_v37 = vld [vmem:[#allocation2 + $0x150] sm:$0xff]  ;;  %v5590_v61 = vpop.f32.mrf.mxu1  ;;  %v1273_v25 = vld [vmem:[#allocation2 + $0x1a0] sm:$0xff] }
 0x1b0   : > { %4002 = vst.msk [vmem:[#allocation2 + $0x110] sm:$0xff] %vm1123_vm2, %v3906_v19  ;;  %2398 = vst.msk [vmem:[#allocation2 + $0x178] sm:$0xff] %vm1123_vm2, %v2302_v4  ;;  %v3524_v36 = vadd.f32 %v5738_v53, %v2490_v32  ;;  %v3712_v42 = vld [vmem:[#allocation2 + $0x138] sm:$0xff]  ;;  %v3523_v43 = vadd.f32 %v3212_v1, %v2489_v37  ;;  %v2306_v2 = vadd.f32 %v5590_v61, %v1272_v60  ;;  %v3242_v5 = vpop.f32.mrf.mxu0  ;;  %v1274_v19 = vld [vmem:[#allocation2 + $0x1a8] sm:$0xff] }
 0x1b1   : > { %v4992_v40 = vpack.c.bf16 %v4270_v30, %v4270_v30  ;;  %v3908_v41 = vmax.f32 %v3812_v31, 0.0  ;;  %2397 = vst.msk [vmem:[#allocation2 + $0x170] sm:$0xff] %vm1123_vm2, %v2301_v33  ;;  %4005 = vst.msk [vmem:[#allocation2 + $0x128] sm:$0xff] %vm1123_vm2, %v3909_v35  ;;  %v3815_v49 = vadd.f32 %v6881_v26, %v3712_v42  ;;  %v2026_v10 = vpop.f32.mrf.mxu1 }
 0x1b2   : > { %v4096_v47 = vld [vmem:[#allocation2 + $0x100] ss:$2 sm:$0xff]  ;;  %v4192_v48 = vld [vmem:[#allocation2 + $0x101] ss:$2 sm:$0xff]  ;;  %v3711_v50 = vld [vmem:[#allocation2 + $0x130] sm:$0xff]  ;;  %3620 = vst.msk [vmem:[#allocation2 + $0x158] sm:$0xff] %vm1123_vm2, %v3524_v36  ;;  %v2305_v14 = vadd.f32 %v2026_v10, %v1271_v3  ;;  %v5750_v15 = vpop.f32.mrf.mxu0 }
 0x1b3   : > { %4510 = vst.msk [vmem:[%s5942_s25 + $0x3c] sm:$0xf] %vm1219_vm3, %v4992_v40  ;;  %v4271_v52 = vmax.f32 %v4096_v47, %v4192_v48  ;;  %v3814_v53 = vadd.f32 %v6881_v26, %v3711_v50  ;;  %v2492_v54 = vld [vmem:[#allocation2 + $0x168] sm:$0xff]  ;;  %v3911_v57 = vmax.f32 %v3815_v49, 0.0  ;;  %v2491_v59 = vld [vmem:[#allocation2 + $0x160] sm:$0xff]  ;;  %v5593_v20 = vpop.f32.mrf.mxu1  ;;  %v1275_v48 = vld [vmem:[#allocation2 + $0x1b0] sm:$0xff] }
 0x1b4   : > { %4004 = vst.msk [vmem:[#allocation2 + $0x120] sm:$0xff] %vm1123_vm2, %v3908_v41  ;;  %3619 = vst.msk [vmem:[#allocation2 + $0x150] sm:$0xff] %vm1123_vm2, %v3523_v43  ;;  %v3526_v58 = vadd.f32 %v5741_v12, %v2492_v54  ;;  %v3714_v0 = vld [vmem:[#allocation2 + $0x148] sm:$0xff]  ;;  %v3525_v1 = vadd.f32 %v3222_v23, %v2491_v59  ;;  %v2308_v24 = vadd.f32 %v5593_v20, %v1274_v19  ;;  %v3252_v27 = vpop.f32.mrf.mxu0  ;;  %v1276_v41 = vld [vmem:[#allocation2 + $0x1b8] sm:$0xff] }
 0x1b5   : > { %2400 = vst.msk [vmem:[#allocation2 + $0x188] sm:$0xff] %vm1123_vm2, %v2304_v44  ;;  %v4993_v62 = vpack.c.bf16 %v4271_v52, %v4271_v52  ;;  %v3910_v63 = vmax.f32 %v3814_v53, 0.0  ;;  %2399 = vst.msk [vmem:[#allocation2 + $0x180] sm:$0xff] %vm1123_vm2, %v2303_v55  ;;  %v3817_v8 = vadd.f32 %v6881_v26, %v3714_v0  ;;  %v3713_v9 = vld [vmem:[#allocation2 + $0x140] sm:$0xff]  ;;  %v2036_v32 = vpop.f32.mrf.mxu1 }
 0x1b6   : > { %4007 = vst.msk [vmem:[#allocation2 + $0x138] sm:$0xff] %vm1123_vm2, %v3911_v57  ;;  %3622 = vst.msk [vmem:[#allocation2 + $0x168] sm:$0xff] %vm1123_vm2, %v3526_v58  ;;  %v3816_v12 = vadd.f32 %v6881_v26, %v3713_v9  ;;  %v2307_v36 = vadd.f32 %v2036_v32, %v1273_v25  ;;  %v5753_v37 = vpop.f32.mrf.mxu0 }
 0x1b7   : > { %v4098_v6 = vld [vmem:[#allocation2 + $0x110] ss:$2 sm:$0xff]  ;;  %v4194_v7 = vld [vmem:[#allocation2 + $0x111] ss:$2 sm:$0xff]  ;;  %4511 = vst.msk [vmem:[%s5942_s25 + $0x40] sm:$0xf] %vm1219_vm3, %v4993_v62  ;;  %v5596_v42 = vpop.f32.mrf.mxu1 }
 0x1b8   : > { %v4272_v11 = vmax.f32 %v4098_v6, %v4194_v7  ;;  %4006 = vst.msk [vmem:[#allocation2 + $0x130] sm:$0xff] %vm1123_vm2, %v3910_v63  ;;  %3621 = vst.msk [vmem:[#allocation2 + $0x160] sm:$0xff] %vm1123_vm2, %v3525_v1  ;;  %v2494_v13 = vld [vmem:[#allocation2 + $0x178] sm:$0xff]  ;;  %v3913_v16 = vmax.f32 %v3817_v8, 0.0  ;;  %v2493_v18 = vld [vmem:[#allocation2 + $0x170] sm:$0xff]  ;;  %v3912_v4 = vmax.f32 %v3816_v12, 0.0  ;;  %v2310_v47 = vadd.f32 %v5596_v42, %v1276_v41  ;;  %v3262_v49 = vpop.f32.mrf.mxu0 }
 0x1b9   : > { %2402 = vst.msk [vmem:[#allocation2 + $0x198] sm:$0xff] %vm1123_vm2, %v2306_v2  ;;  %v3528_v17 = vadd.f32 %v5744_v34, %v2494_v13  ;;  %v3716_v22 = vld [vmem:[#allocation2 + $0x158] sm:$0xff]  ;;  %2401 = vst.msk [vmem:[#allocation2 + $0x190] sm:$0xff] %vm1123_vm2, %v2305_v14  ;;  %v3527_v23 = vadd.f32 %v3232_v46, %v2493_v18  ;;  %v2046_v54 = vpop.f32.mrf.mxu1  ;;  %v1278_v63 = vld [vmem:[#allocation2 + $0x1c8] sm:$0xff] }
 0x1ba   : > { %v4994_v21 = vpack.c.bf16 %v4272_v11, %v4272_v11  ;;  %4009 = vst.msk [vmem:[#allocation2 + $0x148] sm:$0xff] %vm1123_vm2, %v3913_v16  ;;  %v3819_v30 = vadd.f32 %v6881_v26, %v3716_v22  ;;  %4008 = vst.msk [vmem:[#allocation2 + $0x140] sm:$0xff] %vm1123_vm2, %v3912_v4  ;;  %v2309_v58 = vadd.f32 %v2046_v54, %v1275_v48  ;;  %v5756_v59 = vpop.f32.mrf.mxu0  ;;  %v1277_v7 = vld [vmem:[#allocation2 + $0x1c0] sm:$0xff]  ;;  %v1280_v4 = vld [vmem:[#allocation2 + $0x1d8] sm:$0xff] }
 0x1bb   : > { %v4100_v28 = vld [vmem:[#allocation2 + $0x120] ss:$2 sm:$0xff]  ;;  %v4196_v29 = vld [vmem:[#allocation2 + $0x121] ss:$2 sm:$0xff]  ;;  %v3715_v31 = vld [vmem:[#allocation2 + $0x150] sm:$0xff]  ;;  %3624 = vst.msk [vmem:[#allocation2 + $0x178] sm:$0xff] %vm1123_vm2, %v3528_v17  ;;  %v5599_v0 = vpop.f32.mrf.mxu1 }
 0x1bc   : > { %4512 = vst.msk [vmem:[%s5942_s25 + $0x44] sm:$0xf] %vm1219_vm3, %v4994_v21  ;;  %v4273_v33 = vmax.f32 %v4100_v28, %v4196_v29  ;;  %v3818_v34 = vadd.f32 %v6881_v26, %v3715_v31  ;;  %v2496_v35 = vld [vmem:[#allocation2 + $0x188] sm:$0xff]  ;;  %v3915_v38 = vmax.f32 %v3819_v30, 0.0  ;;  %v2495_v40 = vld [vmem:[#allocation2 + $0x180] sm:$0xff]  ;;  %v2312_v6 = vadd.f32 %v5599_v0, %v1278_v63  ;;  %v3272_v8 = vpop.f32.mrf.mxu0  ;;  %v1279_v29 = vld [vmem:[#allocation2 + $0x1d0] sm:$0xff] }
 0x1bd   : > { %3623 = vst.msk [vmem:[#allocation2 + $0x170] sm:$0xff] %vm1123_vm2, %v3527_v23  ;;  %2404 = vst.msk [vmem:[#allocation2 + $0x1a8] sm:$0xff] %vm1123_vm2, %v2308_v24  ;;  %v3530_v39 = vadd.f32 %v5747_v56, %v2496_v35  ;;  %v3718_v45 = vld [vmem:[#allocation2 + $0x168] sm:$0xff]  ;;  %v3529_v46 = vadd.f32 %v3242_v5, %v2495_v40  ;;  %v2056_v13 = vpop.f32.mrf.mxu1 }
 0x1be   : > { %v4995_v43 = vpack.c.bf16 %v4273_v33, %v4273_v33  ;;  %v3914_v44 = vmax.f32 %v3818_v34, 0.0  ;;  %2403 = vst.msk [vmem:[#allocation2 + $0x1a0] sm:$0xff] %vm1123_vm2, %v2307_v36  ;;  %4011 = vst.msk [vmem:[#allocation2 + $0x158] sm:$0xff] %vm1123_vm2, %v3915_v38  ;;  %v3821_v52 = vadd.f32 %v6881_v26, %v3718_v45  ;;  %v2311_v17 = vadd.f32 %v2056_v13, %v1277_v7  ;;  %v5759_v18 = vpop.f32.mrf.mxu0 }
 0x1bf   : > { %v4102_v50 = vld [vmem:[#allocation2 + $0x130] ss:$2 sm:$0xff]  ;;  %v4198_v51 = vld [vmem:[#allocation2 + $0x131] ss:$2 sm:$0xff]  ;;  %v3717_v53 = vld [vmem:[#allocation2 + $0x160] sm:$0xff]  ;;  %3626 = vst.msk [vmem:[#allocation2 + $0x188] sm:$0xff] %vm1123_vm2, %v3530_v39  ;;  %v5602_v22 = vpop.f32.mrf.mxu1 }
 0x1c0   : > { %4513 = vst.msk [vmem:[%s5942_s25 + $0x48] sm:$0xf] %vm1219_vm3, %v4995_v43  ;;  %v4274_v55 = vmax.f32 %v4102_v50, %v4198_v51  ;;  %v3820_v56 = vadd.f32 %v6881_v26, %v3717_v53  ;;  %v2498_v57 = vld [vmem:[#allocation2 + $0x198] sm:$0xff]  ;;  %v3917_v60 = vmax.f32 %v3821_v52, 0.0  ;;  %v2497_v62 = vld [vmem:[#allocation2 + $0x190] sm:$0xff]  ;;  %v2314_v28 = vadd.f32 %v5602_v22, %v1280_v4  ;;  %v3282_v30 = vpop.f32.mrf.mxu0  ;;  %v1281_v51 = vld [vmem:[#allocation2 + $0x1e0] sm:$0xff] }
 0x1c1   : > { %4010 = vst.msk [vmem:[#allocation2 + $0x150] sm:$0xff] %vm1123_vm2, %v3914_v44  ;;  %3625 = vst.msk [vmem:[#allocation2 + $0x180] sm:$0xff] %vm1123_vm2, %v3529_v46  ;;  %v3532_v61 = vadd.f32 %v5750_v15, %v2498_v57  ;;  %v3531_v5 = vadd.f32 %v3252_v27, %v2497_v62  ;;  %v4104_v9 = vld [vmem:[#allocation2 + $0x140] ss:$2 sm:$0xff]  ;;  %v4200_v10 = vld [vmem:[#allocation2 + $0x141] ss:$2 sm:$0xff]  ;;  %v2066_v35 = vpop.f32.mrf.mxu1 }
 0x1c2   : > { %2406 = vst.msk [vmem:[#allocation2 + $0x1b8] sm:$0xff] %vm1123_vm2, %v2310_v47  ;;  %v4996_v1 = vpack.c.bf16 %v4274_v55, %v4274_v55  ;;  %v3916_v2 = vmax.f32 %v3820_v56, 0.0  ;;  %v3720_v3 = vld [vmem:[#allocation2 + $0x178] sm:$0xff]  ;;  %2405 = vst.msk [vmem:[#allocation2 + $0x1b0] sm:$0xff] %vm1123_vm2, %v2309_v58  ;;  %v4275_v14 = vmax.f32 %v4104_v9, %v4200_v10  ;;  %v2313_v39 = vadd.f32 %v2066_v35, %v1279_v29  ;;  %v5762_v40 = vpop.f32.mrf.mxu0  ;;  %v1282_v44 = vld [vmem:[#allocation2 + $0x1e8] sm:$0xff] }
 0x1c3   : > { %4013 = vst.msk [vmem:[#allocation2 + $0x168] sm:$0xff] %vm1123_vm2, %v3917_v60  ;;  %v3823_v11 = vadd.f32 %v6881_v26, %v3720_v3  ;;  %3628 = vst.msk [vmem:[#allocation2 + $0x198] sm:$0xff] %vm1123_vm2, %v3532_v61  ;;  %v5605_v45 = vpop.f32.mrf.mxu1  ;;  %v1283_v10 = vld [vmem:[#allocation2 + $0x1f0] sm:$0xff] }
 0x1c4   : > { %v3719_v12 = vld [vmem:[#allocation2 + $0x170] sm:$0xff]  ;;  %4514 = vst.msk [vmem:[%s5942_s25 + $0x4c] sm:$0xf] %vm1219_vm3, %v4996_v1  ;;  %v2500_v16 = vld [vmem:[#allocation2 + $0x1a8] sm:$0xff]  ;;  %v4997_v23 = vpack.c.bf16 %v4275_v14, %v4275_v14  ;;  %v2316_v50 = vadd.f32 %v5605_v45, %v1282_v44  ;;  %v3292_v52 = vpop.f32.mrf.mxu0 }
 0x1c5   : > { %4012 = vst.msk [vmem:[#allocation2 + $0x160] sm:$0xff] %vm1123_vm2, %v3916_v2  ;;  %v3822_v15 = vadd.f32 %v6881_v26, %v3719_v12  ;;  %3627 = vst.msk [vmem:[#allocation2 + $0x190] sm:$0xff] %vm1123_vm2, %v3531_v5  ;;  %v3919_v19 = vmax.f32 %v3823_v11, 0.0  ;;  %v3534_v20 = vadd.f32 %v5753_v37, %v2500_v16  ;;  %v2499_v21 = vld [vmem:[#allocation2 + $0x1a0] sm:$0xff]  ;;  %v2076_v57 = vpop.f32.mrf.mxu1  ;;  %v1284_v2 = vld [vmem:[#allocation2 + $0x1f8] sm:$0xff] }
 0x1c6   : > { %2408 = vst.msk [vmem:[#allocation2 + $0x1c8] sm:$0xff] %vm1123_vm2, %v2312_v6  ;;  %v3722_v25 = vld [vmem:[#allocation2 + $0x188] sm:$0xff]  ;;  %2407 = vst.msk [vmem:[#allocation2 + $0x1c0] sm:$0xff] %vm1123_vm2, %v2311_v17  ;;  %v3533_v27 = vadd.f32 %v3262_v49, %v2499_v21  ;;  %v2315_v61 = vadd.f32 %v2076_v57, %v1281_v51  ;;  %v5765_v62 = vpop.f32.mrf.mxu0 }
 0x1c7   : > { %v3918_v24 = vmax.f32 %v3822_v15, 0.0  ;;  %4015 = vst.msk [vmem:[#allocation2 + $0x178] sm:$0xff] %vm1123_vm2, %v3919_v19  ;;  %v3825_v33 = vadd.f32 %v6881_v26, %v3722_v25  ;;  %3630 = vst.msk [vmem:[#allocation2 + $0x1a8] sm:$0xff] %vm1123_vm2, %v3534_v20  ;;  %v5608_v3 = vpop.f32.mrf.mxu1 }
 0x1c8   : > { %v4106_v31 = vld [vmem:[#allocation2 + $0x150] ss:$2 sm:$0xff]  ;;  %v4202_v32 = vld [vmem:[#allocation2 + $0x151] ss:$2 sm:$0xff]  ;;  %v3721_v34 = vld [vmem:[#allocation2 + $0x180] sm:$0xff]  ;;  %3629 = vst.msk [vmem:[#allocation2 + $0x1a0] sm:$0xff] %vm1123_vm2, %v3533_v27  ;;  %v2318_v9 = vadd.f32 %v5608_v3, %v1284_v2  ;;  %v3302_v11 = vpop.f32.mrf.mxu0 }
 0x1c9   : > { %4515 = vst.msk [vmem:[%s5942_s25 + $0x50] sm:$0xf] %vm1219_vm3, %v4997_v23  ;;  %v4276_v36 = vmax.f32 %v4106_v31, %v4202_v32  ;;  %v3824_v37 = vadd.f32 %v6881_v26, %v3721_v34  ;;  %v2502_v38 = vld [vmem:[#allocation2 + $0x1b8] sm:$0xff]  ;;  %v3921_v41 = vmax.f32 %v3825_v33, 0.0  ;;  %v2501_v43 = vld [vmem:[#allocation2 + $0x1b0] sm:$0xff]  ;;  %v2086_v16 = vpop.f32.mrf.mxu1  ;;  %v1285_v32 = vld [vmem:[#allocation2 + $0x200] sm:$0xff] }
 0x1ca   : > { %4014 = vst.msk [vmem:[#allocation2 + $0x170] sm:$0xff] %vm1123_vm2, %v3918_v24  ;;  %2410 = vst.msk [vmem:[#allocation2 + $0x1d8] sm:$0xff] %vm1123_vm2, %v2314_v28  ;;  %v3536_v42 = vadd.f32 %v5756_v59, %v2502_v38  ;;  %v3724_v48 = vld [vmem:[#allocation2 + $0x198] sm:$0xff]  ;;  %v3535_v49 = vadd.f32 %v3272_v8, %v2501_v43  ;;  %v2317_v20 = vadd.f32 %v2086_v16, %v1283_v10  ;;  %v5768_v21 = vpop.f32.mrf.mxu0  ;;  %v1286_v24 = vld [vmem:[#allocation2 + $0x208] sm:$0xff] }
 0x1cb   : > { %v4998_v46 = vpack.c.bf16 %v4276_v36, %v4276_v36  ;;  %v3920_v47 = vmax.f32 %v3824_v37, 0.0  ;;  %2409 = vst.msk [vmem:[#allocation2 + $0x1d0] sm:$0xff] %vm1123_vm2, %v2313_v39  ;;  %4017 = vst.msk [vmem:[#allocation2 + $0x188] sm:$0xff] %vm1123_vm2, %v3921_v41  ;;  %v3827_v55 = vadd.f32 %v6881_v26, %v3724_v48  ;;  %v5611_v25 = vpop.f32.mrf.mxu1 }
 0x1cc   : > { %v4108_v53 = vld [vmem:[#allocation2 + $0x160] ss:$2 sm:$0xff]  ;;  %v4204_v54 = vld [vmem:[#allocation2 + $0x161] ss:$2 sm:$0xff]  ;;  %v3723_v56 = vld [vmem:[#allocation2 + $0x190] sm:$0xff]  ;;  %3632 = vst.msk [vmem:[#allocation2 + $0x1b8] sm:$0xff] %vm1123_vm2, %v3536_v42  ;;  %v2320_v31 = vadd.f32 %v5611_v25, %v1286_v24  ;;  %v3312_v33 = vpop.f32.mrf.mxu0 }
 0x1cd   : > { %4516 = vst.msk [vmem:[%s5942_s25 + $0x54] sm:$0xf] %vm1219_vm3, %v4998_v46  ;;  %v4277_v58 = vmax.f32 %v4108_v53, %v4204_v54  ;;  %v3826_v59 = vadd.f32 %v6881_v26, %v3723_v56  ;;  %v2504_v60 = vld [vmem:[#allocation2 + $0x1c8] sm:$0xff]  ;;  %v3923_v63 = vmax.f32 %v3827_v55, 0.0  ;;  %v2503_v1 = vld [vmem:[#allocation2 + $0x1c0] sm:$0xff]  ;;  %v2096_v38 = vpop.f32.mrf.mxu1  ;;  %v1287_v54 = vld [vmem:[#allocation2 + $0x210] sm:$0xff] }
 0x1ce   : > { %4016 = vst.msk [vmem:[#allocation2 + $0x180] sm:$0xff] %vm1123_vm2, %v3920_v47  ;;  %3631 = vst.msk [vmem:[#allocation2 + $0x1b0] sm:$0xff] %vm1123_vm2, %v3535_v49  ;;  %v3538_v0 = vadd.f32 %v5759_v18, %v2504_v60  ;;  %v3726_v7 = vld [vmem:[#allocation2 + $0x1a8] sm:$0xff]  ;;  %v3537_v8 = vadd.f32 %v3282_v30, %v2503_v1  ;;  %v2319_v42 = vadd.f32 %v2096_v38, %v1285_v32  ;;  %v5771_v43 = vpop.f32.mrf.mxu0  ;;  %v1288_v47 = vld [vmem:[#allocation2 + $0x218] sm:$0xff] }
 0x1cf   : > { %2412 = vst.msk [vmem:[#allocation2 + $0x1e8] sm:$0xff] %vm1123_vm2, %v2316_v50  ;;  %v4999_v5 = vpack.c.bf16 %v4277_v58, %v4277_v58  ;;  %v3922_v6 = vmax.f32 %v3826_v59, 0.0  ;;  %2411 = vst.msk [vmem:[#allocation2 + $0x1e0] sm:$0xff] %vm1123_vm2, %v2315_v61  ;;  %v3829_v14 = vadd.f32 %v6881_v26, %v3726_v7  ;;  %v3725_v15 = vld [vmem:[#allocation2 + $0x1a0] sm:$0xff]  ;;  %v5614_v48 = vpop.f32.mrf.mxu1 }
 0x1d0   : > { %4019 = vst.msk [vmem:[#allocation2 + $0x198] sm:$0xff] %vm1123_vm2, %v3923_v63  ;;  %3634 = vst.msk [vmem:[#allocation2 + $0x1c8] sm:$0xff] %vm1123_vm2, %v3538_v0  ;;  %v3828_v18 = vadd.f32 %v6881_v26, %v3725_v15  ;;  %v2322_v53 = vadd.f32 %v5614_v48, %v1288_v47  ;;  %v3322_v55 = vpop.f32.mrf.mxu0 }
 0x1d1   : > { %v4110_v12 = vld [vmem:[#allocation2 + $0x170] ss:$2 sm:$0xff]  ;;  %v4206_v13 = vld [vmem:[#allocation2 + $0x171] ss:$2 sm:$0xff]  ;;  %4517 = vst.msk [vmem:[%s5942_s25 + $0x58] sm:$0xf] %vm1219_vm3, %v4999_v5  ;;  %v2106_v60 = vpop.f32.mrf.mxu1 }
 0x1d2   : > { %v4278_v17 = vmax.f32 %v4110_v12, %v4206_v13  ;;  %4018 = vst.msk [vmem:[#allocation2 + $0x190] sm:$0xff] %vm1123_vm2, %v3922_v6  ;;  %3633 = vst.msk [vmem:[#allocation2 + $0x1c0] sm:$0xff] %vm1123_vm2, %v3537_v8  ;;  %v2506_v19 = vld [vmem:[#allocation2 + $0x1d8] sm:$0xff]  ;;  %v3925_v4 = vmax.f32 %v3829_v14, 0.0  ;;  %v2505_v23 = vld [vmem:[#allocation2 + $0x1d0] sm:$0xff]  ;;  %v3924_v28 = vmax.f32 %v3828_v18, 0.0  ;;  %v2321_v0 = vadd.f32 %v2106_v60, %v1287_v54  ;;  %v5774_v1 = vpop.f32.mrf.mxu0 }
 0x1d3   : > { %2414 = vst.msk [vmem:[#allocation2 + $0x1f8] sm:$0xff] %vm1123_vm2, %v2318_v9  ;;  %v3540_v22 = vadd.f32 %v5762_v40, %v2506_v19  ;;  %v3728_v29 = vld [vmem:[#allocation2 + $0x1b8] sm:$0xff]  ;;  %2413 = vst.msk [vmem:[#allocation2 + $0x1f0] sm:$0xff] %vm1123_vm2, %v2317_v20  ;;  %v3539_v30 = vadd.f32 %v3292_v52, %v2505_v23  ;;  %v1290_v6 = vld [vmem:[#allocation2 + $0x228] sm:$0xff]  ;;  %v5617_v7 = vpop.f32.mrf.mxu1 }
 0x1d4   : > { %v5000_v27 = vpack.c.bf16 %v4278_v17, %v4278_v17  ;;  %4021 = vst.msk [vmem:[#allocation2 + $0x1a8] sm:$0xff] %vm1123_vm2, %v3925_v4  ;;  %v3831_v36 = vadd.f32 %v6881_v26, %v3728_v29  ;;  %4020 = vst.msk [vmem:[#allocation2 + $0x1a0] sm:$0xff] %vm1123_vm2, %v3924_v28  ;;  %v2324_v12 = vadd.f32 %v5617_v7, %v1290_v6  ;;  %v1289_v13 = vld [vmem:[#allocation2 + $0x220] sm:$0xff]  ;;  %v3332_v14 = vpop.f32.mrf.mxu0  ;;  %v1292_v28 = vld [vmem:[#allocation2 + $0x238] sm:$0xff] }
 0x1d5   : > { %v4112_v34 = vld [vmem:[#allocation2 + $0x180] ss:$2 sm:$0xff]  ;;  %v4208_v35 = vld [vmem:[#allocation2 + $0x181] ss:$2 sm:$0xff]  ;;  %v3727_v37 = vld [vmem:[#allocation2 + $0x1b0] sm:$0xff]  ;;  %3636 = vst.msk [vmem:[#allocation2 + $0x1d8] sm:$0xff] %vm1123_vm2, %v3540_v22  ;;  %v2116_v19 = vpop.f32.mrf.mxu1 }
 0x1d6   : > { %4518 = vst.msk [vmem:[%s5942_s25 + $0x5c] sm:$0xf] %vm1219_vm3, %v5000_v27  ;;  %v4279_v39 = vmax.f32 %v4112_v34, %v4208_v35  ;;  %v3830_v40 = vadd.f32 %v6881_v26, %v3727_v37  ;;  %v2508_v41 = vld [vmem:[#allocation2 + $0x1e8] sm:$0xff]  ;;  %v3927_v44 = vmax.f32 %v3831_v36, 0.0  ;;  %v2507_v46 = vld [vmem:[#allocation2 + $0x1e0] sm:$0xff]  ;;  %v2323_v22 = vadd.f32 %v2116_v19, %v1289_v13  ;;  %v5777_v23 = vpop.f32.mrf.mxu0  ;;  %v1291_v35 = vld [vmem:[#allocation2 + $0x230] sm:$0xff] }
 0x1d7   : > { %3635 = vst.msk [vmem:[#allocation2 + $0x1d0] sm:$0xff] %vm1123_vm2, %v3539_v30  ;;  %2416 = vst.msk [vmem:[#allocation2 + $0x208] sm:$0xff] %vm1123_vm2, %v2320_v31  ;;  %v3542_v45 = vadd.f32 %v5765_v62, %v2508_v41  ;;  %v3730_v51 = vld [vmem:[#allocation2 + $0x1c8] sm:$0xff]  ;;  %v3541_v52 = vadd.f32 %v3302_v11, %v2507_v46  ;;  %v5620_v29 = vpop.f32.mrf.mxu1 }
 0x1d8   : > { %v5001_v49 = vpack.c.bf16 %v4279_v39, %v4279_v39  ;;  %v3926_v50 = vmax.f32 %v3830_v40, 0.0  ;;  %2415 = vst.msk [vmem:[#allocation2 + $0x200] sm:$0xff] %vm1123_vm2, %v2319_v42  ;;  %4023 = vst.msk [vmem:[#allocation2 + $0x1b8] sm:$0xff] %vm1123_vm2, %v3927_v44  ;;  %v3833_v58 = vadd.f32 %v6881_v26, %v3730_v51  ;;  %v2326_v34 = vadd.f32 %v5620_v29, %v1292_v28  ;;  %v3342_v36 = vpop.f32.mrf.mxu0 }
 0x1d9   : > { %v4114_v56 = vld [vmem:[#allocation2 + $0x190] ss:$2 sm:$0xff]  ;;  %v4210_v57 = vld [vmem:[#allocation2 + $0x191] ss:$2 sm:$0xff]  ;;  %v3729_v59 = vld [vmem:[#allocation2 + $0x1c0] sm:$0xff]  ;;  %3638 = vst.msk [vmem:[#allocation2 + $0x1e8] sm:$0xff] %vm1123_vm2, %v3542_v45  ;;  %v2126_v41 = vpop.f32.mrf.mxu1 }
 0x1da   : > { %4519 = vst.msk [vmem:[%s5942_s25 + $0x60] sm:$0xf] %vm1219_vm3, %v5001_v49  ;;  %v4280_v61 = vmax.f32 %v4114_v56, %v4210_v57  ;;  %v3832_v62 = vadd.f32 %v6881_v26, %v3729_v59  ;;  %v2510_v63 = vld [vmem:[#allocation2 + $0x1f8] sm:$0xff]  ;;  %v3929_v2 = vmax.f32 %v3833_v58, 0.0  ;;  %v2509_v5 = vld [vmem:[#allocation2 + $0x1f0] sm:$0xff]  ;;  %v2325_v45 = vadd.f32 %v2126_v41, %v1291_v35  ;;  %v5780_v46 = vpop.f32.mrf.mxu0  ;;  %v1293_v57 = vld [vmem:[#allocation2 + $0x240] sm:$0xff] }
 0x1db   : > { %4022 = vst.msk [vmem:[#allocation2 + $0x1b0] sm:$0xff] %vm1123_vm2, %v3926_v50  ;;  %3637 = vst.msk [vmem:[#allocation2 + $0x1e0] sm:$0xff] %vm1123_vm2, %v3541_v52  ;;  %v3544_v3 = vadd.f32 %v5768_v21, %v2510_v63  ;;  %v3543_v11 = vadd.f32 %v3312_v33, %v2509_v5  ;;  %v4116_v15 = vld [vmem:[#allocation2 + $0x1a0] ss:$2 sm:$0xff]  ;;  %v4212_v16 = vld [vmem:[#allocation2 + $0x1a1] ss:$2 sm:$0xff]  ;;  %v5623_v51 = vpop.f32.mrf.mxu1 }
 0x1dc   : > { %2418 = vst.msk [vmem:[#allocation2 + $0x218] sm:$0xff] %vm1123_vm2, %v2322_v53  ;;  %v5002_v8 = vpack.c.bf16 %v4280_v61, %v4280_v61  ;;  %v3928_v9 = vmax.f32 %v3832_v62, 0.0  ;;  %v3732_v10 = vld [vmem:[#allocation2 + $0x1d8] sm:$0xff]  ;;  %2417 = vst.msk [vmem:[#allocation2 + $0x210] sm:$0xff] %vm1123_vm2, %v2321_v0  ;;  %v4281_v20 = vmax.f32 %v4116_v15, %v4212_v16  ;;  %v1294_v50 = vld [vmem:[#allocation2 + $0x248] sm:$0xff]  ;;  %v3352_v58 = vpop.f32.mrf.mxu0 }
 0x1dd   : > { %4025 = vst.msk [vmem:[#allocation2 + $0x1c8] sm:$0xff] %vm1123_vm2, %v3929_v2  ;;  %v3835_v17 = vadd.f32 %v6881_v26, %v3732_v10  ;;  %3640 = vst.msk [vmem:[#allocation2 + $0x1f8] sm:$0xff] %vm1123_vm2, %v3544_v3  ;;  %v2328_v56 = vadd.f32 %v5623_v51, %v1294_v50  ;;  %v2136_v63 = vpop.f32.mrf.mxu1  ;;  %v1295_v16 = vld [vmem:[#allocation2 + $0x250] sm:$0xff] }
 0x1de   : > { %v3731_v18 = vld [vmem:[#allocation2 + $0x1d0] sm:$0xff]  ;;  %4520 = vst.msk [vmem:[%s5942_s25 + $0x64] sm:$0xf] %vm1219_vm3, %v5002_v8  ;;  %v2512_v4 = vld [vmem:[#allocation2 + $0x208] sm:$0xff]  ;;  %v5003_v30 = vpack.c.bf16 %v4281_v20, %v4281_v20  ;;  %v2327_v3 = vadd.f32 %v2136_v63, %v1293_v57  ;;  %v5783_v5 = vpop.f32.mrf.mxu0 }
 0x1df   : > { %4024 = vst.msk [vmem:[#allocation2 + $0x1c0] sm:$0xff] %vm1123_vm2, %v3928_v9  ;;  %v3834_v21 = vadd.f32 %v6881_v26, %v3731_v18  ;;  %3639 = vst.msk [vmem:[#allocation2 + $0x1f0] sm:$0xff] %vm1123_vm2, %v3543_v11  ;;  %v3931_v24 = vmax.f32 %v3835_v17, 0.0  ;;  %v3546_v25 = vadd.f32 %v5771_v43, %v2512_v4  ;;  %v2511_v27 = vld [vmem:[#allocation2 + $0x200] sm:$0xff]  ;;  %v1296_v9 = vld [vmem:[#allocation2 + $0x258] sm:$0xff]  ;;  %v5626_v10 = vpop.f32.mrf.mxu1 }
 0x1e0   : > { %2420 = vst.msk [vmem:[#allocation2 + $0x228] sm:$0xff] %vm1123_vm2, %v2324_v12  ;;  %v3734_v32 = vld [vmem:[#allocation2 + $0x1e8] sm:$0xff]  ;;  %2419 = vst.msk [vmem:[#allocation2 + $0x220] sm:$0xff] %vm1123_vm2, %v2323_v22  ;;  %v3545_v33 = vadd.f32 %v3322_v55, %v2511_v27  ;;  %v2330_v15 = vadd.f32 %v5626_v10, %v1296_v9  ;;  %v3362_v17 = vpop.f32.mrf.mxu0 }
 0x1e1   : > { %v3930_v31 = vmax.f32 %v3834_v21, 0.0  ;;  %4027 = vst.msk [vmem:[#allocation2 + $0x1d8] sm:$0xff] %vm1123_vm2, %v3931_v24  ;;  %v3837_v39 = vadd.f32 %v6881_v26, %v3734_v32  ;;  %3642 = vst.msk [vmem:[#allocation2 + $0x208] sm:$0xff] %vm1123_vm2, %v3546_v25  ;;  %v2146_v4 = vpop.f32.mrf.mxu1 }
 0x1e2   : > { %v4118_v37 = vld [vmem:[#allocation2 + $0x1b0] ss:$2 sm:$0xff]  ;;  %v4214_v38 = vld [vmem:[#allocation2 + $0x1b1] ss:$2 sm:$0xff]  ;;  %v3733_v40 = vld [vmem:[#allocation2 + $0x1e0] sm:$0xff]  ;;  %3641 = vst.msk [vmem:[#allocation2 + $0x200] sm:$0xff] %vm1123_vm2, %v3545_v33  ;;  %v2329_v25 = vadd.f32 %v2146_v4, %v1295_v16  ;;  %v5786_v27 = vpop.f32.mrf.mxu0 }
 0x1e3   : > { %4521 = vst.msk [vmem:[%s5942_s25 + $0x68] sm:$0xf] %vm1219_vm3, %v5003_v30  ;;  %v4282_v42 = vmax.f32 %v4118_v37, %v4214_v38  ;;  %v3836_v43 = vadd.f32 %v6881_v26, %v3733_v40  ;;  %v2514_v44 = vld [vmem:[#allocation2 + $0x218] sm:$0xff]  ;;  %v3933_v47 = vmax.f32 %v3837_v39, 0.0  ;;  %v2513_v49 = vld [vmem:[#allocation2 + $0x210] sm:$0xff]  ;;  %v5629_v32 = vpop.f32.mrf.mxu1  ;;  %v1297_v38 = vld [vmem:[#allocation2 + $0x260] sm:$0xff] }
 0x1e4   : > { %4026 = vst.msk [vmem:[#allocation2 + $0x1d0] sm:$0xff] %vm1123_vm2, %v3930_v31  ;;  %2422 = vst.msk [vmem:[#allocation2 + $0x238] sm:$0xff] %vm1123_vm2, %v2326_v34  ;;  %v3548_v48 = vadd.f32 %v5774_v1, %v2514_v44  ;;  %v3736_v54 = vld [vmem:[#allocation2 + $0x1f8] sm:$0xff]  ;;  %v3547_v55 = vadd.f32 %v3332_v14, %v2513_v49  ;;  %v1298_v31 = vld [vmem:[#allocation2 + $0x268] sm:$0xff]  ;;  %v3372_v39 = vpop.f32.mrf.mxu0 }
 0x1e5   : > { %v5004_v52 = vpack.c.bf16 %v4282_v42, %v4282_v42  ;;  %v3932_v53 = vmax.f32 %v3836_v43, 0.0  ;;  %2421 = vst.msk [vmem:[#allocation2 + $0x230] sm:$0xff] %vm1123_vm2, %v2325_v45  ;;  %4029 = vst.msk [vmem:[#allocation2 + $0x1e8] sm:$0xff] %vm1123_vm2, %v3933_v47  ;;  %v3839_v61 = vadd.f32 %v6881_v26, %v3736_v54  ;;  %v2332_v37 = vadd.f32 %v5629_v32, %v1298_v31  ;;  %v2156_v44 = vpop.f32.mrf.mxu1 }
 0x1e6   : > { %v4120_v59 = vld [vmem:[#allocation2 + $0x1c0] ss:$2 sm:$0xff]  ;;  %v4216_v60 = vld [vmem:[#allocation2 + $0x1c1] ss:$2 sm:$0xff]  ;;  %v3735_v62 = vld [vmem:[#allocation2 + $0x1f0] sm:$0xff]  ;;  %3644 = vst.msk [vmem:[#allocation2 + $0x218] sm:$0xff] %vm1123_vm2, %v3548_v48  ;;  %v2331_v48 = vadd.f32 %v2156_v44, %v1297_v38  ;;  %v5789_v49 = vpop.f32.mrf.mxu0 }
 0x1e7   : > { %4522 = vst.msk [vmem:[%s5942_s25 + $0x6c] sm:$0xf] %vm1219_vm3, %v5004_v52  ;;  %v4283_v0 = vmax.f32 %v4120_v59, %v4216_v60  ;;  %v3838_v1 = vadd.f32 %v6881_v26, %v3735_v62  ;;  %v2516_v2 = vld [vmem:[#allocation2 + $0x228] sm:$0xff]  ;;  %v3935_v6 = vmax.f32 %v3839_v61, 0.0  ;;  %v2515_v8 = vld [vmem:[#allocation2 + $0x220] sm:$0xff]  ;;  %v5632_v54 = vpop.f32.mrf.mxu1  ;;  %v1299_v60 = vld [vmem:[#allocation2 + $0x270] sm:$0xff] }
 0x1e8   : > { %4028 = vst.msk [vmem:[#allocation2 + $0x1e0] sm:$0xff] %vm1123_vm2, %v3932_v53  ;;  %3643 = vst.msk [vmem:[#allocation2 + $0x210] sm:$0xff] %vm1123_vm2, %v3547_v55  ;;  %v3550_v7 = vadd.f32 %v5777_v23, %v2516_v2  ;;  %v3738_v13 = vld [vmem:[#allocation2 + $0x208] sm:$0xff]  ;;  %v3549_v14 = vadd.f32 %v3342_v36, %v2515_v8  ;;  %v1300_v53 = vld [vmem:[#allocation2 + $0x278] sm:$0xff]  ;;  %v3382_v61 = vpop.f32.mrf.mxu0 }
 0x1e9   : > { %2424 = vst.msk [vmem:[#allocation2 + $0x248] sm:$0xff] %vm1123_vm2, %v2328_v56  ;;  %v5005_v11 = vpack.c.bf16 %v4283_v0, %v4283_v0  ;;  %v3934_v12 = vmax.f32 %v3838_v1, 0.0  ;;  %2423 = vst.msk [vmem:[#allocation2 + $0x240] sm:$0xff] %vm1123_vm2, %v2327_v3  ;;  %v3841_v20 = vadd.f32 %v6881_v26, %v3738_v13  ;;  %v3737_v21 = vld [vmem:[#allocation2 + $0x200] sm:$0xff]  ;;  %v2334_v59 = vadd.f32 %v5632_v54, %v1300_v53  ;;  %v2166_v2 = vpop.f32.mrf.mxu1 }
 0x1ea   : > { %4031 = vst.msk [vmem:[#allocation2 + $0x1f8] sm:$0xff] %vm1123_vm2, %v3935_v6  ;;  %3646 = vst.msk [vmem:[#allocation2 + $0x228] sm:$0xff] %vm1123_vm2, %v3550_v7  ;;  %v3840_v23 = vadd.f32 %v6881_v26, %v3737_v21  ;;  %v2333_v7 = vadd.f32 %v2166_v2, %v1299_v60  ;;  %v5792_v8 = vpop.f32.mrf.mxu0  ;;  %v7063_v44 = vld [vmem:[#allocation3] ss:$0 sm:$0xff] }
 0x1eb   : > { %v4122_v18 = vld [vmem:[#allocation2 + $0x1d0] ss:$2 sm:$0xff]  ;;  %v4218_v19 = vld [vmem:[#allocation2 + $0x1d1] ss:$2 sm:$0xff]  ;;  %4523 = vst.msk [vmem:[%s5942_s25 + $0x70] sm:$0xf] %vm1219_vm3, %v5005_v11  ;;  %v5635_v13 = vpop.f32.mrf.mxu1 }
 0x1ec   : > { %v4284_v22 = vmax.f32 %v4122_v18, %v4218_v19  ;;  %4030 = vst.msk [vmem:[#allocation2 + $0x1f0] sm:$0xff] %vm1123_vm2, %v3934_v12  ;;  %3645 = vst.msk [vmem:[#allocation2 + $0x220] sm:$0xff] %vm1123_vm2, %v3549_v14  ;;  %v2518_v24 = vld [vmem:[#allocation2 + $0x238] sm:$0xff]  ;;  %v3937_v28 = vmax.f32 %v3841_v20, 0.0  ;;  %v2517_v30 = vld [vmem:[#allocation2 + $0x230] sm:$0xff]  ;;  %v3936_v34 = vmax.f32 %v3840_v23, 0.0  ;;  %v3392_v20 = vpop.f32.mrf.mxu0 }
 0x1ed   : > { %2426 = vst.msk [vmem:[#allocation2 + $0x258] sm:$0xff] %vm1123_vm2, %v2330_v15  ;;  %v3552_v29 = vadd.f32 %v5780_v46, %v2518_v24  ;;  %v3740_v35 = vld [vmem:[#allocation2 + $0x218] sm:$0xff]  ;;  %2425 = vst.msk [vmem:[#allocation2 + $0x250] sm:$0xff] %vm1123_vm2, %v2329_v25  ;;  %v3551_v36 = vadd.f32 %v3352_v58, %v2517_v30  ;;  %v1302_v12 = vld [vmem:[#allocation2 + $0x288] sm:$0xff]  ;;  %v2176_v24 = vpop.f32.mrf.mxu1 }
 0x1ee   : > { %v5006_v33 = vpack.c.bf16 %v4284_v22, %v4284_v22  ;;  %4033 = vst.msk [vmem:[#allocation2 + $0x208] sm:$0xff] %vm1123_vm2, %v3937_v28  ;;  %v3843_v42 = vadd.f32 %v6881_v26, %v3740_v35  ;;  %4032 = vst.msk [vmem:[#allocation2 + $0x200] sm:$0xff] %vm1123_vm2, %v3936_v34  ;;  %v2336_v18 = vadd.f32 %v5635_v13, %v1302_v12  ;;  %v1301_v19 = vld [vmem:[#allocation2 + $0x280] sm:$0xff]  ;;  %v5795_v30 = vpop.f32.mrf.mxu0  ;;  %v1304_v34 = vld [vmem:[#allocation2 + $0x298] sm:$0xff] }
 0x1ef   : > { %v4124_v40 = vld [vmem:[#allocation2 + $0x1e0] ss:$2 sm:$0xff]  ;;  %v4220_v41 = vld [vmem:[#allocation2 + $0x1e1] ss:$2 sm:$0xff]  ;;  %v3739_v43 = vld [vmem:[#allocation2 + $0x210] sm:$0xff]  ;;  %3648 = vst.msk [vmem:[#allocation2 + $0x238] sm:$0xff] %vm1123_vm2, %v3552_v29  ;;  %v2335_v29 = vadd.f32 %v2176_v24, %v1301_v19  ;;  %v5638_v35 = vpop.f32.mrf.mxu1 }
 0x1f0   : > { %4524 = vst.msk [vmem:[%s5942_s25 + $0x74] sm:$0xf] %vm1219_vm3, %v5006_v33  ;;  %v4285_v45 = vmax.f32 %v4124_v40, %v4220_v41  ;;  %v3842_v46 = vadd.f32 %v6881_v26, %v3739_v43  ;;  %v2520_v47 = vld [vmem:[#allocation2 + $0x248] sm:$0xff]  ;;  %v3939_v50 = vmax.f32 %v3843_v42, 0.0  ;;  %v2519_v52 = vld [vmem:[#allocation2 + $0x240] sm:$0xff]  ;;  %v1303_v40 = vld [vmem:[#allocation2 + $0x290] sm:$0xff]  ;;  %v3402_v41 = vpop.f32.mrf.mxu0 }
 0x1f1   : > { %3647 = vst.msk [vmem:[#allocation2 + $0x230] sm:$0xff] %vm1123_vm2, %v3551_v36  ;;  %2428 = vst.msk [vmem:[#allocation2 + $0x268] sm:$0xff] %vm1123_vm2, %v2332_v37  ;;  %v3554_v51 = vadd.f32 %v5783_v5, %v2520_v47  ;;  %v3742_v57 = vld [vmem:[#allocation2 + $0x228] sm:$0xff]  ;;  %v3553_v58 = vadd.f32 %v3362_v17, %v2519_v52  ;;  %v2186_v47 = vpop.f32.mrf.mxu1 }
 0x1f2   : > { %v5007_v55 = vpack.c.bf16 %v4285_v45, %v4285_v45  ;;  %v3938_v56 = vmax.f32 %v3842_v46, 0.0  ;;  %2427 = vst.msk [vmem:[#allocation2 + $0x260] sm:$0xff] %vm1123_vm2, %v2331_v48  ;;  %4035 = vst.msk [vmem:[#allocation2 + $0x218] sm:$0xff] %vm1123_vm2, %v3939_v50  ;;  %v3845_v0 = vadd.f32 %v6881_v26, %v3742_v57  ;;  %v5798_v52 = vpop.f32.mrf.mxu0 }
 0x1f3   : > { %v4126_v62 = vld [vmem:[#allocation2 + $0x1f0] ss:$2 sm:$0xff]  ;;  %v4222_v63 = vld [vmem:[#allocation2 + $0x1f1] ss:$2 sm:$0xff]  ;;  %v3741_v1 = vld [vmem:[#allocation2 + $0x220] sm:$0xff]  ;;  %3650 = vst.msk [vmem:[#allocation2 + $0x248] sm:$0xff] %vm1123_vm2, %v3554_v51  ;;  %v2337_v51 = vadd.f32 %v2186_v47, %v1303_v40  ;;  %v5641_v57 = vpop.f32.mrf.mxu1 }
 0x1f4   : > { %4525 = vst.msk [vmem:[%s5942_s25 + $0x78] sm:$0xf] %vm1219_vm3, %v5007_v55  ;;  %v4286_v3 = vmax.f32 %v4126_v62, %v4222_v63  ;;  %v3844_v5 = vadd.f32 %v6881_v26, %v3741_v1  ;;  %v2522_v6 = vld [vmem:[#allocation2 + $0x258] sm:$0xff]  ;;  %v3941_v9 = vmax.f32 %v3845_v0, 0.0  ;;  %v2521_v11 = vld [vmem:[#allocation2 + $0x250] sm:$0xff]  ;;  %v1305_v63 = vld [vmem:[#allocation2 + $0x2a0] sm:$0xff]  ;;  %v3412_v0 = vpop.f32.mrf.mxu0 }
 0x1f5   : > { %4034 = vst.msk [vmem:[#allocation2 + $0x210] sm:$0xff] %vm1123_vm2, %v3938_v56  ;;  %3649 = vst.msk [vmem:[#allocation2 + $0x240] sm:$0xff] %vm1123_vm2, %v3553_v58  ;;  %v3556_v10 = vadd.f32 %v5786_v27, %v2522_v6  ;;  %v3555_v17 = vadd.f32 %v3372_v39, %v2521_v11  ;;  %v4128_v21 = vld [vmem:[#allocation2 + $0x200] ss:$2 sm:$0xff]  ;;  %v4224_v4 = vld [vmem:[#allocation2 + $0x201] ss:$2 sm:$0xff]  ;;  %v2196_v6 = vpop.f32.mrf.mxu1 }
 0x1f6   : > { %2430 = vst.msk [vmem:[#allocation2 + $0x278] sm:$0xff] %vm1123_vm2, %v2334_v59  ;;  %v5008_v14 = vpack.c.bf16 %v4286_v3, %v4286_v3  ;;  %v3940_v15 = vmax.f32 %v3844_v5, 0.0  ;;  %v3744_v16 = vld [vmem:[#allocation2 + $0x238] sm:$0xff]  ;;  %2429 = vst.msk [vmem:[#allocation2 + $0x270] sm:$0xff] %vm1123_vm2, %v2333_v7  ;;  %v4287_v25 = vmax.f32 %v4128_v21, %v4224_v4  ;;  %v1306_v56 = vld [vmem:[#allocation2 + $0x2a8] sm:$0xff]  ;;  %v5801_v11 = vpop.f32.mrf.mxu0 }
 0x1f7   : > { %4037 = vst.msk [vmem:[#allocation2 + $0x228] sm:$0xff] %vm1123_vm2, %v3941_v9  ;;  %v3847_v22 = vadd.f32 %v6881_v26, %v3744_v16  ;;  %3652 = vst.msk [vmem:[#allocation2 + $0x258] sm:$0xff] %vm1123_vm2, %v3556_v10  ;;  %v2340_v62 = vadd.f32 %v5641_v57, %v1306_v56  ;;  %v2339_v10 = vadd.f32 %v2196_v6, %v1305_v63  ;;  %v5644_v16 = vpop.f32.mrf.mxu1  ;;  %v1307_v4 = vld [vmem:[#allocation2 + $0x2b0] sm:$0xff] }
 0x1f8   : > { %v3743_v23 = vld [vmem:[#allocation2 + $0x230] sm:$0xff]  ;;  %4526 = vst.msk [vmem:[%s5942_s25 + $0x7c] sm:$0xf] %vm1219_vm3, %v5008_v14  ;;  %v2524_v28 = vld [vmem:[#allocation2 + $0x268] sm:$0xff]  ;;  %v5009_v36 = vpack.c.bf16 %v4287_v25, %v4287_v25 }
 0x1f9   : > { %4036 = vst.msk [vmem:[#allocation2 + $0x220] sm:$0xff] %vm1123_vm2, %v3940_v15  ;;  %v3846_v27 = vadd.f32 %v6881_v26, %v3743_v23  ;;  %3651 = vst.msk [vmem:[#allocation2 + $0x250] sm:$0xff] %vm1123_vm2, %v3555_v17  ;;  %v3943_v31 = vmax.f32 %v3847_v22, 0.0  ;;  %v3558_v32 = vadd.f32 %v5789_v49, %v2524_v28  ;;  %v2523_v33 = vld [vmem:[#allocation2 + $0x260] sm:$0xff]  ;;  %v2338_v26 = vadd.f32 %v5638_v35, %v1304_v34  ;;  %v1308_v15 = vld [vmem:[#allocation2 + $0x2b8] sm:$0xff]  ;;  %v3422_v22 = vpop.f32.mrf.mxu0  ;;  %v2206_v28 = vpop.f32.mrf.mxu1 }
 0x1fa   : > { %2432 = vst.msk [vmem:[#allocation2 + $0x288] sm:$0xff] %vm1123_vm2, %v2336_v18  ;;  %v3746_v38 = vld [vmem:[#allocation2 + $0x248] sm:$0xff]  ;;  %2431 = vst.msk [vmem:[#allocation2 + $0x280] sm:$0xff] %vm1123_vm2, %v2335_v29  ;;  %v3557_v39 = vadd.f32 %v3382_v61, %v2523_v33  ;;  %v2342_v21 = vadd.f32 %v5644_v16, %v1308_v15 }
 0x1fb   : > { %v3942_v37 = vmax.f32 %v3846_v27, 0.0  ;;  %4039 = vst.msk [vmem:[#allocation2 + $0x238] sm:$0xff] %vm1123_vm2, %v3943_v31  ;;  %v3849_v45 = vadd.f32 %v7063_v44, %v3746_v38  ;;  %3654 = vst.msk [vmem:[#allocation2 + $0x268] sm:$0xff] %vm1123_vm2, %v3558_v32  ;;  %v2341_v32 = vadd.f32 %v2206_v28, %v1307_v4  ;;  %v5804_v33 = vpop.f32.mrf.mxu0  ;;  %v5647_v38 = vpop.f32.mrf.mxu1 }
 0x1fc   : > { %v4130_v42 = vld [vmem:[#allocation2 + $0x210] ss:$2 sm:$0xff]  ;;  %v4226_v43 = vld [vmem:[#allocation2 + $0x211] ss:$2 sm:$0xff]  ;;  %v3745_v46 = vld [vmem:[#allocation2 + $0x240] sm:$0xff]  ;;  %3653 = vst.msk [vmem:[#allocation2 + $0x260] sm:$0xff] %vm1123_vm2, %v3557_v39 }
 0x1fd   : > { %4527 = vst.msk [vmem:[%s5942_s25 + $0x80] sm:$0xf] %vm1219_vm3, %v5009_v36  ;;  %v4288_v48 = vmax.f32 %v4130_v42, %v4226_v43  ;;  %v3848_v49 = vadd.f32 %v7063_v44, %v3745_v46  ;;  %v2526_v50 = vld [vmem:[#allocation2 + $0x278] sm:$0xff]  ;;  %v3945_v53 = vmax.f32 %v3849_v45, 0.0  ;;  %v2525_v55 = vld [vmem:[#allocation2 + $0x270] sm:$0xff]  ;;  %v1309_v43 = vld [vmem:[#allocation2 + $0x2c0] sm:$0xff]  ;;  %v3432_v45 = vpop.f32.mrf.mxu0 }
 0x1fe   : > { %4038 = vst.msk [vmem:[#allocation2 + $0x230] sm:$0xff] %vm1123_vm2, %v3942_v37  ;;  %2434 = vst.msk [vmem:[#allocation2 + $0x298] sm:$0xff] %vm1123_vm2, %v2338_v26  ;;  %v3560_v54 = vadd.f32 %v5792_v8, %v2526_v50  ;;  %v3748_v60 = vld [vmem:[#allocation2 + $0x258] sm:$0xff]  ;;  %v3559_v61 = vadd.f32 %v3392_v20, %v2525_v55  ;;  %v1310_v37 = vld [vmem:[#allocation2 + $0x2c8] sm:$0xff]  ;;  %v2216_v50 = vpop.f32.mrf.mxu1 }
 0x1ff   : > { %v5010_v58 = vpack.c.bf16 %v4288_v48, %v4288_v48  ;;  %v3944_v59 = vmax.f32 %v3848_v49, 0.0  ;;  %2433 = vst.msk [vmem:[#allocation2 + $0x290] sm:$0xff] %vm1123_vm2, %v2337_v51  ;;  %4041 = vst.msk [vmem:[#allocation2 + $0x248] sm:$0xff] %vm1123_vm2, %v3945_v53  ;;  %v3851_v3 = vadd.f32 %v7063_v44, %v3748_v60  ;;  %v2344_v42 = vadd.f32 %v5647_v38, %v1310_v37  ;;  %v5807_v55 = vpop.f32.mrf.mxu0 }
 0x200   : > { %v4132_v1 = vld [vmem:[#allocation2 + $0x220] ss:$2 sm:$0xff]  ;;  %v4228_v2 = vld [vmem:[#allocation2 + $0x221] ss:$2 sm:$0xff]  ;;  %v3747_v5 = vld [vmem:[#allocation2 + $0x250] sm:$0xff]  ;;  %3656 = vst.msk [vmem:[#allocation2 + $0x278] sm:$0xff] %vm1123_vm2, %v3560_v54  ;;  %v2343_v54 = vadd.f32 %v2216_v50, %v1309_v43  ;;  %v5650_v60 = vpop.f32.mrf.mxu1 }
 0x201   : > { %4528 = vst.msk [vmem:[%s5942_s25 + $0x84] sm:$0xf] %vm1219_vm3, %v5010_v58  ;;  %v4289_v7 = vmax.f32 %v4132_v1, %v4228_v2  ;;  %v3850_v8 = vadd.f32 %v7063_v44, %v3747_v5  ;;  %v2528_v9 = vld [vmem:[#allocation2 + $0x288] sm:$0xff]  ;;  %v3947_v12 = vmax.f32 %v3851_v3, 0.0  ;;  %v2527_v14 = vld [vmem:[#allocation2 + $0x280] sm:$0xff]  ;;  %v1311_v2 = vld [vmem:[#allocation2 + $0x2d0] sm:$0xff]  ;;  %v3442_v3 = vpop.f32.mrf.mxu0 }
 0x202   : > { %4040 = vst.msk [vmem:[#allocation2 + $0x240] sm:$0xff] %vm1123_vm2, %v3944_v59  ;;  %3655 = vst.msk [vmem:[#allocation2 + $0x270] sm:$0xff] %vm1123_vm2, %v3559_v61  ;;  %v3562_v13 = vadd.f32 %v5795_v30, %v2528_v9  ;;  %v3750_v19 = vld [vmem:[#allocation2 + $0x268] sm:$0xff]  ;;  %v3561_v20 = vadd.f32 %v3402_v41, %v2527_v14  ;;  %v1312_v59 = vld [vmem:[#allocation2 + $0x2d8] sm:$0xff]  ;;  %v2226_v9 = vpop.f32.mrf.mxu1 }
 0x203   : > { %2436 = vst.msk [vmem:[#allocation2 + $0x2a8] sm:$0xff] %vm1123_vm2, %v2340_v62  ;;  %v5011_v17 = vpack.c.bf16 %v4289_v7, %v4289_v7  ;;  %v3946_v18 = vmax.f32 %v3850_v8, 0.0  ;;  %2435 = vst.msk [vmem:[#allocation2 + $0x2a0] sm:$0xff] %vm1123_vm2, %v2339_v10  ;;  %v3853_v25 = vadd.f32 %v7063_v44, %v3750_v19  ;;  %v3749_v27 = vld [vmem:[#allocation2 + $0x260] sm:$0xff]  ;;  %v2346_v1 = vadd.f32 %v5650_v60, %v1312_v59  ;;  %v5810_v14 = vpop.f32.mrf.mxu0 }
 0x204   : > { %4043 = vst.msk [vmem:[#allocation2 + $0x258] sm:$0xff] %vm1123_vm2, %v3947_v12  ;;  %3658 = vst.msk [vmem:[#allocation2 + $0x288] sm:$0xff] %vm1123_vm2, %v3562_v13  ;;  %v3852_v30 = vadd.f32 %v7063_v44, %v3749_v27  ;;  %v2345_v13 = vadd.f32 %v2226_v9, %v1311_v2  ;;  %v5653_v19 = vpop.f32.mrf.mxu1 }
 0x205   : > { %v4134_v23 = vld [vmem:[#allocation2 + $0x230] ss:$2 sm:$0xff]  ;;  %v4230_v24 = vld [vmem:[#allocation2 + $0x231] ss:$2 sm:$0xff]  ;;  %4529 = vst.msk [vmem:[%s5942_s25 + $0x88] sm:$0xf] %vm1219_vm3, %v5011_v17 }
 0x206   : > { %v4290_v29 = vmax.f32 %v4134_v23, %v4230_v24  ;;  %4042 = vst.msk [vmem:[#allocation2 + $0x250] sm:$0xff] %vm1123_vm2, %v3946_v18  ;;  %3657 = vst.msk [vmem:[#allocation2 + $0x280] sm:$0xff] %vm1123_vm2, %v3561_v20  ;;  %v2530_v31 = vld [vmem:[#allocation2 + $0x298] sm:$0xff]  ;;  %v3949_v34 = vmax.f32 %v3853_v25, 0.0  ;;  %v2529_v36 = vld [vmem:[#allocation2 + $0x290] sm:$0xff]  ;;  %v3948_v26 = vmax.f32 %v3852_v30, 0.0  ;;  %v3452_v25 = vpop.f32.mrf.mxu0 }
 0x207   : > { %2438 = vst.msk [vmem:[#allocation2 + $0x2b8] sm:$0xff] %vm1123_vm2, %v2342_v21  ;;  %v3564_v35 = vadd.f32 %v5798_v52, %v2530_v31  ;;  %v3752_v40 = vld [vmem:[#allocation2 + $0x278] sm:$0xff]  ;;  %2437 = vst.msk [vmem:[#allocation2 + $0x2b0] sm:$0xff] %vm1123_vm2, %v2341_v32  ;;  %v3563_v41 = vadd.f32 %v3412_v0, %v2529_v36  ;;  %v1314_v18 = vld [vmem:[#allocation2 + $0x2e8] sm:$0xff]  ;;  %v2236_v31 = vpop.f32.mrf.mxu1 }
 0x208   : > { %v5012_v39 = vpack.c.bf16 %v4290_v29, %v4290_v29  ;;  %4045 = vst.msk [vmem:[#allocation2 + $0x268] sm:$0xff] %vm1123_vm2, %v3949_v34  ;;  %v3855_v48 = vadd.f32 %v7063_v44, %v3752_v40  ;;  %4044 = vst.msk [vmem:[#allocation2 + $0x260] sm:$0xff] %vm1123_vm2, %v3948_v26  ;;  %v2348_v23 = vadd.f32 %v5653_v19, %v1314_v18  ;;  %v1313_v24 = vld [vmem:[#allocation2 + $0x2e0] sm:$0xff]  ;;  %v5813_v40 = vpop.f32.mrf.mxu0 }
 0x209   : > { %v4136_v46 = vld [vmem:[#allocation2 + $0x240] ss:$2 sm:$0xff]  ;;  %v4232_v47 = vld [vmem:[#allocation2 + $0x241] ss:$2 sm:$0xff]  ;;  %v3751_v49 = vld [vmem:[#allocation2 + $0x270] sm:$0xff]  ;;  %3660 = vst.msk [vmem:[#allocation2 + $0x298] sm:$0xff] %vm1123_vm2, %v3564_v35  ;;  %v2347_v35 = vadd.f32 %v2236_v31, %v1313_v24  ;;  %v5656_v26 = vpop.f32.mrf.mxu1 }
 0x20a   : > { %4530 = vst.msk [vmem:[%s5942_s25 + $0x8c] sm:$0xf] %vm1219_vm3, %v5012_v39  ;;  %v4291_v51 = vmax.f32 %v4136_v46, %v4232_v47  ;;  %v3854_v52 = vadd.f32 %v7063_v44, %v3751_v49  ;;  %v2532_v53 = vld [vmem:[#allocation2 + $0x2a8] sm:$0xff]  ;;  %v3951_v56 = vmax.f32 %v3855_v48, 0.0  ;;  %v2531_v58 = vld [vmem:[#allocation2 + $0x2a0] sm:$0xff]  ;;  %v1315_v47 = vld [vmem:[#allocation2 + $0x2f0] sm:$0xff]  ;;  %v3462_v60 = vpop.f32.mrf.mxu0 }
 0x20b   : > { %3659 = vst.msk [vmem:[#allocation2 + $0x290] sm:$0xff] %vm1123_vm2, %v3563_v41  ;;  %2440 = vst.msk [vmem:[#allocation2 + $0x2c8] sm:$0xff] %vm1123_vm2, %v2344_v42  ;;  %v3566_v57 = vadd.f32 %v5801_v11, %v2532_v53  ;;  %v3754_v63 = vld [vmem:[#allocation2 + $0x288] sm:$0xff]  ;;  %v3565_v0 = vadd.f32 %v3422_v22, %v2531_v58  ;;  %v1316_v39 = vld [vmem:[#allocation2 + $0x2f8] sm:$0xf] }
 0x20c   : > { %v5013_v61 = vpack.c.bf16 %v4291_v51, %v4291_v51  ;;  %v3950_v62 = vmax.f32 %v3854_v52, 0.0  ;;  %2439 = vst.msk [vmem:[#allocation2 + $0x2c0] sm:$0xff] %vm1123_vm2, %v2343_v54  ;;  %4047 = vst.msk [vmem:[#allocation2 + $0x278] sm:$0xff] %vm1123_vm2, %v3951_v56  ;;  %v3857_v7 = vadd.f32 %v7063_v44, %v3754_v63  ;;  %v2350_v46 = vadd.f32 %v5656_v26, %v1316_v39  ;;  %v2246_v52 = vpop.f32.mrf.mxu1 }
 0x20d   : > { %v4138_v5 = vld [vmem:[#allocation2 + $0x250] ss:$2 sm:$0xff]  ;;  %v4234_v6 = vld [vmem:[#allocation2 + $0x251] ss:$2 sm:$0xff]  ;;  %v3753_v8 = vld [vmem:[#allocation2 + $0x280] sm:$0xff]  ;;  %3662 = vst.msk [vmem:[#allocation2 + $0x2a8] sm:$0xff] %vm1123_vm2, %v3566_v57  ;;  %v2349_v56 = vadd.f32 %v2246_v52, %v1315_v47 }
 0x20e   : > { %4531 = vst.msk [vmem:[%s5942_s25 + $0x90] sm:$0xf] %vm1219_vm3, %v5013_v61  ;;  %v4292_v10 = vmax.f32 %v4138_v5, %v4234_v6  ;;  %v3856_v11 = vadd.f32 %v7063_v44, %v3753_v8  ;;  %v2534_v12 = vld [vmem:[#allocation2 + $0x2b8] sm:$0xff]  ;;  %v3953_v15 = vmax.f32 %v3857_v7, 0.0  ;;  %v2533_v17 = vld [vmem:[#allocation2 + $0x2b0] sm:$0xff] }
 0x20f   : > { %4046 = vst.msk [vmem:[#allocation2 + $0x270] sm:$0xff] %vm1123_vm2, %v3950_v62  ;;  %3661 = vst.msk [vmem:[#allocation2 + $0x2a0] sm:$0xff] %vm1123_vm2, %v3565_v0  ;;  %v3568_v16 = vadd.f32 %v5804_v33, %v2534_v12  ;;  %v3567_v22 = vadd.f32 %v3432_v45, %v2533_v17  ;;  %v4140_v27 = vld [vmem:[#allocation2 + $0x260] ss:$2 sm:$0xff]  ;;  %v4236_v28 = vld [vmem:[#allocation2 + $0x261] ss:$2 sm:$0xff]  ;;  %v5816_v12 = vpop.f32.mrf.mxu0 }
 0x210   : > { %2442 = vst.msk [vmem:[#allocation2 + $0x2d8] sm:$0xff] %vm1123_vm2, %v2346_v1  ;;  %v5014_v20 = vpack.c.bf16 %v4292_v10, %v4292_v10  ;;  %v3952_v21 = vmax.f32 %v3856_v11, 0.0  ;;  %v3756_v4 = vld [vmem:[#allocation2 + $0x298] sm:$0xff]  ;;  %2441 = vst.msk [vmem:[#allocation2 + $0x2d0] sm:$0xff] %vm1123_vm2, %v2345_v13  ;;  %v4293_v32 = vmax.f32 %v4140_v27, %v4236_v28 }
 0x211   : > { %4049 = vst.msk [vmem:[#allocation2 + $0x288] sm:$0xff] %vm1123_vm2, %v3953_v15  ;;  %v3859_v29 = vadd.f32 %v7063_v44, %v3756_v4  ;;  %3664 = vst.msk [vmem:[#allocation2 + $0x2b8] sm:$0xff] %vm1123_vm2, %v3568_v16  ;;  %v3472_v27 = vpop.f32.mrf.mxu0 }
 0x212   : > { %v3755_v30 = vld [vmem:[#allocation2 + $0x290] sm:$0xff]  ;;  %4532 = vst.msk [vmem:[%s5942_s25 + $0x94] sm:$0xf] %vm1219_vm3, %v5014_v20  ;;  %v2536_v34 = vld [vmem:[#allocation2 + $0x2c8] sm:$0xff]  ;;  %v5015_v41 = vpack.c.bf16 %v4293_v32, %v4293_v32  ;;  %2446 = vst.msk [vmem:[#allocation2 + $0x2f8] sm:$0xf] %vm1219_vm3, %v2350_v46 }
 0x213   : > { %4048 = vst.msk [vmem:[#allocation2 + $0x280] sm:$0xff] %vm1123_vm2, %v3952_v21  ;;  %v3858_v33 = vadd.f32 %v7063_v44, %v3755_v30  ;;  %3663 = vst.msk [vmem:[#allocation2 + $0x2b0] sm:$0xff] %vm1123_vm2, %v3567_v22  ;;  %v3955_v36 = vmax.f32 %v3859_v29, 0.0  ;;  %v3570_v37 = vadd.f32 %v5807_v55, %v2536_v34  ;;  %v2535_v38 = vld [vmem:[#allocation2 + $0x2c0] sm:$0xff] }
 0x214   : > { %2444 = vst.msk [vmem:[#allocation2 + $0x2e8] sm:$0xff] %vm1123_vm2, %v2348_v23  ;;  %v3758_v43 = vld [vmem:[#allocation2 + $0x2a8] sm:$0xff]  ;;  %2443 = vst.msk [vmem:[#allocation2 + $0x2e0] sm:$0xff] %vm1123_vm2, %v2347_v35  ;;  %v3569_v45 = vadd.f32 %v3442_v3, %v2535_v38 }
 0x215   : > { %v3954_v42 = vmax.f32 %v3858_v33, 0.0  ;;  %4051 = vst.msk [vmem:[#allocation2 + $0x298] sm:$0xff] %vm1123_vm2, %v3955_v36  ;;  %v3861_v50 = vadd.f32 %v7063_v44, %v3758_v43  ;;  %3666 = vst.msk [vmem:[#allocation2 + $0x2c8] sm:$0xff] %vm1123_vm2, %v3570_v37 }
 0x216   : > { %v4142_v48 = vld [vmem:[#allocation2 + $0x270] ss:$2 sm:$0xff]  ;;  %v4238_v49 = vld [vmem:[#allocation2 + $0x271] ss:$2 sm:$0xff]  ;;  %v3757_v51 = vld [vmem:[#allocation2 + $0x2a0] sm:$0xff]  ;;  %3665 = vst.msk [vmem:[#allocation2 + $0x2c0] sm:$0xff] %vm1123_vm2, %v3569_v45 }
 0x217   : > { %4533 = vst.msk [vmem:[%s5942_s25 + $0x98] sm:$0xf] %vm1219_vm3, %v5015_v41  ;;  %v4294_v53 = vmax.f32 %v4142_v48, %v4238_v49  ;;  %v3860_v54 = vadd.f32 %v7063_v44, %v3757_v51  ;;  %v2538_v55 = vld [vmem:[#allocation2 + $0x2d8] sm:$0xff]  ;;  %v3957_v57 = vmax.f32 %v3861_v50, 0.0  ;;  %v2537_v59 = vld [vmem:[#allocation2 + $0x2d0] sm:$0xff] }
 0x218   : > { %4050 = vst.msk [vmem:[#allocation2 + $0x290] sm:$0xff] %vm1123_vm2, %v3954_v42  ;;  %v3572_v58 = vadd.f32 %v5810_v14, %v2538_v55  ;;  %v3760_v63 = vld [vmem:[#allocation2 + $0x2b8] sm:$0xff]  ;;  %2445 = vst.msk [vmem:[#allocation2 + $0x2f0] sm:$0xff] %vm1123_vm2, %v2349_v56  ;;  %v3571_v0 = vadd.f32 %v3452_v25, %v2537_v59 }
 0x219   : > { %v5016_v61 = vpack.c.bf16 %v4294_v53, %v4294_v53  ;;  %v3956_v62 = vmax.f32 %v3860_v54, 0.0  ;;  %4053 = vst.msk [vmem:[#allocation2 + $0x2a8] sm:$0xff] %vm1123_vm2, %v3957_v57  ;;  %v3863_v3 = vadd.f32 %v7063_v44, %v3760_v63  ;;  %v2542_v22 = vld [vmem:[#allocation2 + $0x2f8] sm:$0xf] }
 0x21a   : > { %v4144_v1 = vld [vmem:[#allocation2 + $0x280] ss:$2 sm:$0xff]  ;;  %v4240_v2 = vld [vmem:[#allocation2 + $0x281] ss:$2 sm:$0xff]  ;;  %v3759_v5 = vld [vmem:[#allocation2 + $0x2b0] sm:$0xff]  ;;  %3668 = vst.msk [vmem:[#allocation2 + $0x2d8] sm:$0xff] %vm1123_vm2, %v3572_v58  ;;  %v3576_v24 = vadd.f32 %v5816_v12, %v2542_v22 }
 0x21b   : > { %4534 = vst.msk [vmem:[%s5942_s25 + $0x9c] sm:$0xf] %vm1219_vm3, %v5016_v61  ;;  %v4295_v6 = vmax.f32 %v4144_v1, %v4240_v2  ;;  %v3862_v7 = vadd.f32 %v7063_v44, %v3759_v5  ;;  %v2540_v8 = vld [vmem:[#allocation2 + $0x2e8] sm:$0xff]  ;;  %v3959_v9 = vmax.f32 %v3863_v3, 0.0  ;;  %v2539_v11 = vld [vmem:[#allocation2 + $0x2e0] sm:$0xff] }
 0x21c   : > { %4052 = vst.msk [vmem:[#allocation2 + $0x2a0] sm:$0xff] %vm1123_vm2, %v3956_v62  ;;  %3667 = vst.msk [vmem:[#allocation2 + $0x2d0] sm:$0xff] %vm1123_vm2, %v3571_v0  ;;  %v3574_v10 = vadd.f32 %v5813_v40, %v2540_v8  ;;  %v3762_v15 = vld [vmem:[#allocation2 + $0x2c8] sm:$0xff]  ;;  %v3573_v16 = vadd.f32 %v3462_v60, %v2539_v11 }
 0x21d   : > { %v5017_v13 = vpack.c.bf16 %v4295_v6, %v4295_v6  ;;  %v3958_v14 = vmax.f32 %v3862_v7, 0.0  ;;  %4055 = vst.msk [vmem:[#allocation2 + $0x2b8] sm:$0xff] %vm1123_vm2, %v3959_v9  ;;  %v3865_v19 = vadd.f32 %v7063_v44, %v3762_v15  ;;  %v3761_v20 = vld [vmem:[#allocation2 + $0x2c0] sm:$0xff] }
 0x21e   : > { %3670 = vst.msk [vmem:[#allocation2 + $0x2e8] sm:$0xff] %vm1123_vm2, %v3574_v10  ;;  %v3864_v4 = vadd.f32 %v7063_v44, %v3761_v20  ;;  %3669 = vst.msk [vmem:[#allocation2 + $0x2e0] sm:$0xff] %vm1123_vm2, %v3573_v16 }
 0x21f   : > { %v4146_v17 = vld [vmem:[#allocation2 + $0x290] ss:$2 sm:$0xff]  ;;  %v4242_v18 = vld [vmem:[#allocation2 + $0x291] ss:$2 sm:$0xff]  ;;  %4535 = vst.msk [vmem:[%s5942_s25 + $0xa0] sm:$0xf] %vm1219_vm3, %v5017_v13 }
 0x220   : > { %v4296_v21 = vmax.f32 %v4146_v17, %v4242_v18  ;;  %4054 = vst.msk [vmem:[#allocation2 + $0x2b0] sm:$0xff] %vm1123_vm2, %v3958_v14  ;;  %v3961_v23 = vmax.f32 %v3865_v19, 0.0  ;;  %v2541_v25 = vld [vmem:[#allocation2 + $0x2f0] sm:$0xff]  ;;  %v3960_v29 = vmax.f32 %v3864_v4, 0.0 }
 0x221   : > { %v3764_v30 = vld [vmem:[#allocation2 + $0x2d8] sm:$0xff]  ;;  %v3575_v31 = vadd.f32 %v3472_v27, %v2541_v25  ;;  %3672 = vst.msk [vmem:[#allocation2 + $0x2f8] sm:$0xf] %vm1219_vm3, %v3576_v24 }
 0x222   : > { %v5018_v28 = vpack.c.bf16 %v4296_v21, %v4296_v21  ;;  %4057 = vst.msk [vmem:[#allocation2 + $0x2c8] sm:$0xff] %vm1123_vm2, %v3961_v23  ;;  %v3867_v34 = vadd.f32 %v7063_v44, %v3764_v30  ;;  %4056 = vst.msk [vmem:[#allocation2 + $0x2c0] sm:$0xff] %vm1123_vm2, %v3960_v29 }
 0x223   : > { %v4148_v32 = vld [vmem:[#allocation2 + $0x2a0] ss:$2 sm:$0xff]  ;;  %v4244_v33 = vld [vmem:[#allocation2 + $0x2a1] ss:$2 sm:$0xff]  ;;  %v3763_v35 = vld [vmem:[#allocation2 + $0x2d0] sm:$0xff]  ;;  %3671 = vst.msk [vmem:[#allocation2 + $0x2f0] sm:$0xff] %vm1123_vm2, %v3575_v31 }
 0x224   : > { %4536 = vst.msk [vmem:[%s5942_s25 + $0xa4] sm:$0xf] %vm1219_vm3, %v5018_v28  ;;  %v4297_v36 = vmax.f32 %v4148_v32, %v4244_v33  ;;  %v3866_v37 = vadd.f32 %v7063_v44, %v3763_v35  ;;  %v3963_v38 = vmax.f32 %v3867_v34, 0.0 }
 0x225   : > { %v3766_v40 = vld [vmem:[#allocation2 + $0x2e8] sm:$0xff]  ;;  %v3765_v45 = vld [vmem:[#allocation2 + $0x2e0] sm:$0xff] }
 0x226   : > { %v5019_v39 = vpack.c.bf16 %v4297_v36, %v4297_v36  ;;  %v3962_v26 = vmax.f32 %v3866_v37, 0.0  ;;  %4059 = vst.msk [vmem:[#allocation2 + $0x2d8] sm:$0xff] %vm1123_vm2, %v3963_v38  ;;  %v3869_v43 = vadd.f32 %v7063_v44, %v3766_v40  ;;  %v3868_v47 = vadd.f32 %v7063_v44, %v3765_v45 }
 0x227   : > { %v4150_v41 = vld [vmem:[#allocation2 + $0x2b0] ss:$2 sm:$0xff]  ;;  %v4246_v42 = vld [vmem:[#allocation2 + $0x2b1] ss:$2 sm:$0xff] }
 0x228   : > { %4537 = vst.msk [vmem:[%s5942_s25 + $0xa8] sm:$0xf] %vm1219_vm3, %v5019_v39  ;;  %v4298_v46 = vmax.f32 %v4150_v41, %v4246_v42  ;;  %v3965_v48 = vmax.f32 %v3869_v43, 0.0  ;;  %v3964_v50 = vmax.f32 %v3868_v47, 0.0  ;;  %v3768_v51 = vld [vmem:[#allocation2 + $0x2f8] sm:$0xf] }
 0x229   : > { %4058 = vst.msk [vmem:[#allocation2 + $0x2d0] sm:$0xff] %vm1123_vm2, %v3962_v26  ;;  %v4152_v52 = vld [vmem:[#allocation2 + $0x2c0] ss:$2 sm:$0xff]  ;;  %v4248_v53 = vld [vmem:[#allocation2 + $0x2c1] ss:$2 sm:$0xff]  ;;  %v3871_v54 = vadd.f32 %v7063_v44, %v3768_v51 }
 0x22a   : > { %v5020_v49 = vpack.c.bf16 %v4298_v46, %v4298_v46  ;;  %4061 = vst.msk [vmem:[#allocation2 + $0x2e8] sm:$0xff] %vm1123_vm2, %v3965_v48  ;;  %v3767_v55 = vld [vmem:[#allocation2 + $0x2f0] sm:$0xff]  ;;  %v4299_v56 = vmax.f32 %v4152_v52, %v4248_v53  ;;  %4060 = vst.msk [vmem:[#allocation2 + $0x2e0] sm:$0xff] %vm1123_vm2, %v3964_v50 }
 0x22b   : > { %v3870_v57 = vadd.f32 %v7063_v44, %v3767_v55  ;;  %v3967_v58 = vmax.f32 %v3871_v54, 0.0 }
 0x22c   : > { %4538 = vst.msk [vmem:[%s5942_s25 + $0xac] sm:$0xf] %vm1219_vm3, %v5020_v49  ;;  %v5021_v59 = vpack.c.bf16 %v4299_v56, %v4299_v56 }
 0x22d   : > { %v3966_v60 = vmax.f32 %v3870_v57, 0.0  ;;  %4063 = vst.msk [vmem:[#allocation2 + $0x2f8] sm:$0xf] %vm1219_vm3, %v3967_v58 }
 0x22e   : > { %4539 = vst.msk [vmem:[%s5942_s25 + $0xb0] sm:$0xf] %vm1219_vm3, %v5021_v59 }
 0x22f   : > { %4062 = vst.msk [vmem:[#allocation2 + $0x2f0] sm:$0xff] %vm1123_vm2, %v3966_v60 }
 0x230   : > { %v4154_v61 = vld [vmem:[#allocation2 + $0x2d0] ss:$2 sm:$0xff]  ;;  %v4250_v62 = vld [vmem:[#allocation2 + $0x2d1] ss:$2 sm:$0xff] }
 0x231   : > { %v4300_v63 = vmax.f32 %v4154_v61, %v4250_v62  ;;  %v4156_v1 = vld [vmem:[#allocation2 + $0x2e0] ss:$2 sm:$0xff]  ;;  %v4252_v2 = vld [vmem:[#allocation2 + $0x2e1] ss:$2 sm:$0xff] }
 0x232   : > { %v4301_v44 = vmax.f32 %v4156_v1, %v4252_v2 }
 0x233   : > { %v5022_v0 = vpack.c.bf16 %v4300_v63, %v4300_v63 }
 0x234   : > { %v5023_v3 = vpack.c.bf16 %v4301_v44, %v4301_v44 }
 0x235   : > { %4540 = vst.msk [vmem:[%s5942_s25 + $0xb4] sm:$0xf] %vm1219_vm3, %v5022_v0 }
 0x236   : > { %v4158_v5 = vld [vmem:[#allocation2 + $0x2f0] ss:$2 sm:$0x3f]  ;;  %v4254_v6 = vld [vmem:[#allocation2 + $0x2f1] ss:$2 sm:$0x3f] }
 0x237   : > { %4541 = vst.msk [vmem:[%s5942_s25 + $0xb8] sm:$0xf] %vm1219_vm3, %v5023_v3  ;;  %v4302_v7 = vmax.f32 %v4158_v5, %v4254_v6 }
 0x239   : > { %v5024_v8 = vpack.c.bf16 %v4302_v7, %v4302_v7 }
 0x23b   : > { %4543 = vst.msk [vmem:[%s5942_s25 + $0xbc] sm:$0x7] %vm4542_vm4, %v5024_v8 }
 0x23c PF: > { %s14_s12 = sadd.s32 1, %s5893_s12  }
 0x23d   : > { %p11_p1 = scmp.ge.s32.totalorder %s14_s12, 4  }
 0x23f   :  { %13 = sbr.rel (!%p11_p1) target bundleno = 1 (0x1), region = 164 }
 0x244   :  { %4567 = vsyncpa [#allocation4], 1 }
 0x245   :  { %4569 = vsyncpa [#allocation4 + $0x1], 1 }

// kernel: mlp_forward.3
= control target key start
LH: loop header
LB: loop body
LE: loop exit
PB: predicated region body
PF: predicated region fallthrough
CT: control target
= control target key end

     0   :  { %s13149_s0 = inlined_call_operand.vmem [shape: bf16[2,12288], index: 0, kind: input, shape index: {}]   ;;  %s13150_s1 = inlined_call_operand.hbm [shape: bf16[12288,512], index: 1, kind: input, shape index: {}]   ;;  %s13151_s2 = inlined_call_operand.hbm [shape: f32[1,512], index: 2, kind: input, shape index: {}]   ;;  %s13152_s3 = inlined_call_operand.vmem [shape: f32[512,64], index: 3, kind: input, shape index: {}]   ;;  %s13153_s4 = inlined_call_operand.hbm [shape: f32[1,64], index: 4, kind: input, shape index: {}]   ;;  %s13154_s5 = inlined_call_operand.vmem [shape: f32[64,1], index: 5, kind: input, shape index: {}]   ;;  %s13155_s6 = inlined_call_operand.<no memory space> [shape: f32[1,1], index: 6, kind: input, shape index: {}]   ;;  %s13156_s7 = inlined_call_operand.vmem [shape: f32[2,1], index: 7, kind: output, shape index: {}]  }
   0x1   :  { %v12_v0 = vstv %s13155_s6 }
   0x2   :  { %13 = vst [vmem:[#allocation3] sm:$0x1] %v12_v0 }
   0x3   :  { %14 = vsyncpa [#allocation5], 0 }
   0x4   :  { %16 = vsyncpa [#allocation5 + $0x1], 0 }
   0x5   :  { %17 = vsyncpa [#allocation7], 0  ;;  %s11425_s26 = smov 0   ;;  %s11427_s27 = smov 0  }
   0x6   :  { %s11429_s28 = smov 0   ;;  %s11431_s29 = smov 0  }
   0x7 LB: > { %s11444_s6 = sadd.s32 4294967295, %s11370_s29   ;;  %s11447_s30 = sadd.s32 1, %s11370_s29   ;;  %s11370_s29 = sphi %s11431_s29, %s13173_s29   ;;  %s11366_s28 = sphi %s11429_s28, %s13172_s28   ;;  %s11362_s27 = sphi %s11427_s27, %s13171_s27   ;;  %s11358_s26 = sphi %s11425_s26, %s13170_s26  }
   0x8   : > { %s53_s8 = ssub.s32 %s11370_s29, %s11447_s30  ;;  %s56_s9 = sadd.s32 1, %s11366_s28 }
   0x9   : > { %p54_p0 = scmp.eq.s32.totalorder %s53_s8, 0  ;;  %p63_p1 = scmp.ne.s32.totalorder %s11366_s28, %s11362_s27 }
   0xa   : > { %p64_p2 = scmp.eq.s32.totalorder %s11370_s29, 0  ;;  %p69_p3 = scmp.ne.s32.totalorder %s11362_s27, %s11358_s26 }
   0xb   : > { %s11457_s10 = scalar_select %p54_p0, %s11366_s28, %s56_s9  }
   0xc   : > { %p11459_p4 = por %p64_p2, %p63_p1  ;;  %p13157_p5 = scmp.eq.s32.totalorder %s11444_s6, 0 }
   0xd   : > { %p8496_p6 = scmp.ge.s32.totalorder %s11370_s29, 1  ;;  %p206_p7 = scmp.lt.s32.totalorder %s11370_s29, 4 }
   0xe   : > { %p11468_p8 = por %p13157_p5, %p69_p3  ;;  %s11372_s14 = smov [#allocation6]  }
   0xf   : > { %p11473_p10 = pnand %p8496_p6, %p206_p7  ;;  %s219_s15 = sshll.u32 %s11372_s14, 4  ;;  %s220_s15 = int_to_ptr.vmem [resolvable:$true] %s219_s15 }
  0x10   : > { %s13161_s12 = scalar_select %p11468_p8, 1, 0 }
  0x11   : > { %s13162_s13 = scalar_select %p11473_p10, 1, 0 }
  0x12   : > { %p9651_p11 = pneg %p11473_p10  ;;  %p9664_p12 = scmp.lt.s32.totalorder %s11370_s29, 3 }
  0x13   : > { %s11373_s17 = smov [#allocation8]   ;;  %s258_s20 = sand.u32 1, %s11366_s28  }
  0x14   : > { %p11482_p13 = pnand %p9651_p11, %p13157_p5  ;;  %s233_s18 = sshll.u32 %s11373_s17, 4  ;;  %s234_s18 = int_to_ptr.vmem [resolvable:$true] %s233_s18 }
  0x15   : > { %p11488_p0 = pnand %p9664_p12, %p11459_p4  ;;  %s11263_s21 = scalar_lea.vmem %s220_s15, 64 }
  0x16   : > { %p11254_p1 = pneg %p11482_p13  ;;  %p11264_p2 = scmp.ne.s32.totalorder %s220_s15, %s11263_s21 }
  0x17   : > { %p11271_p7 = scmp.lt.s32.totalorder %s220_s15, %s220_s15  ;;  %p11272_p11 = scmp.lt.s32.totalorder %s11263_s21, %s11263_s21 }
  0x18   : > { %p11266_p3 = pnand %p11264_p2, %p11254_p1 }
  0x19   : > { %p11273_p9 = por %p11272_p11, %p11271_p7 }
  0x1a   : > { %p11267_p6 = pneg %p11266_p3 }
  0x1c   : > { %p11274_p5 = pnand %p11273_p9, %p11267_p6 }
  0x1e   : > { %11277 = shalt.err (!%p11274_p5)
}
  0x1f   : > { %9654 = dma.hbm_to_vmem [thread:$0]  (!%p11482_p13), %s13151_s2, 64, %s220_s15, [#allocation7]  }
  0x20   : > { %s11289_s24 = scalar_lea.vmem %s234_s18, 16  ;;  %s11296_s25 = scalar_lea.vmem %s234_s18, 32 }
  0x21   : > { %p11290_p4 = scmp.ne.s32.totalorder %s234_s18, %s11289_s24  ;;  %p11297_p2 = scmp.lt.s32.totalorder %s234_s18, %s234_s18 }
  0x22   : > { %p11298_p3 = scmp.lt.s32.totalorder %s11296_s25, %s11289_s24 }
  0x23   : > { %p11292_p12 = pnand %p11290_p4, %p11254_p1 }
  0x24   : > { %p11299_p10 = por %p11298_p3, %p11297_p2 }
  0x25   : > { %p11293_p8 = pneg %p11292_p12 }
  0x27   : > { %p11300_p7 = pnand %p11299_p10, %p11293_p8 }
  0x29   : > { %11303 = shalt.err (!%p11300_p7)
}
  0x2a   : > { %9657 = dma.hbm_to_vmem [thread:$0]  (!%p11482_p13), %s13153_s4, 16, %s234_s18, [#allocation7]  }
  0x2b   : > { %s8500_s9 = sshll.u32 %s258_s20, 13  ;;  %s9542_s11 = sshll.u32 %s11370_s29, 17 }
  0x2c   : > { %s11515_s17 = scalar_lea.hbm %s13150_s1, %s9542_s11  ;;  %s262_s21 = scalar_lea.vmem [#allocation4], %s8500_s9 }
  0x2d   : > { %s270_s22 = sshll.u32 %s262_s21, 4  ;;  %s11519_s16 = scalar_lea.sflag [#allocation5], %s258_s20  ;;  %s11517_s22 = int_to_ptr.vmem [resolvable:$true] %s270_s22 }
  0x2e   : > { %s11304_s23 = scalar_lea.hbm %s11515_s17, 131072  ;;  %p11306_p8 = pneg %p11488_p0 }
  0x2f   : > { %p11305_p5 = scmp.ne.s32.totalorder %s11515_s17, %s11304_s23  ;;  %s11309_s24 = scalar_lea.hbm %s13150_s1, 393216 }
  0x30   : > { %p11310_p13 = scmp.lt.s32.totalorder %s11515_s17, %s13150_s1  ;;  %p11311_p1 = scmp.lt.s32.totalorder %s11309_s24, %s11304_s23 }
  0x31   : > { %p11307_p9 = pnand %p11306_p8, %p11305_p5 }
  0x32   : > { %p11312_p6 = por %p11311_p1, %p11310_p13 }
  0x33   : > { %p11308_p10 = pneg %p11307_p9 }
  0x35   : > { %p11313_p11 = pnand %p11312_p6, %p11308_p10 }
  0x37   : > { %11316 = shalt.err (!%p11313_p11)
}
  0x38   : > { %s11317_s20 = scalar_lea.vmem %s11517_s22, 131072  ;;  %s11374_s8 = smov [#allocation4]  }
  0x39   : > { %p11318_p4 = scmp.ne.s32.totalorder %s11517_s22, %s11317_s20  ;;  %s11322_s9 = sshll.u32 %s11374_s8, 4  ;;  %s11323_s9 = int_to_ptr.vmem [resolvable:$false] %s11322_s9 }
  0x3a   : > { %s11324_s11 = scalar_lea.vmem %s11323_s9, 262144  ;;  %p11325_p3 = scmp.lt.s32.totalorder %s11517_s22, %s11323_s9 }
  0x3b   : > { %p11320_p12 = pnand %p11318_p4, %p11306_p8  ;;  %p11326_p7 = scmp.lt.s32.totalorder %s11324_s11, %s11317_s20 }
  0x3d   : > { %p11321_p2 = pneg %p11320_p12  ;;  %p11327_p5 = por %p11326_p7, %p11325_p3 }
  0x3f   : > { %p11328_p9 = pnand %p11327_p5, %p11321_p2 }
  0x41   : > { %11331 = shalt.err (!%p11328_p9)
}
  0x42   : > { %s11375_s14 = smov 256   ;;  %s11376_s15 = smov 16  }
  0x43   : > { %9661 = dma.hbm_to_vmem [thread:$0]  (!%p11488_p0), %s11515_s17, 131072, %s11517_s22, %s11519_s16, %s11375_s14, %s11375_s14, %s11376_s15  }
  0x44   : > { %p13165_p8 = scmp.ne.s32.totalorder %s13162_s13, 0 }
  0x45   : > { %s284_s21 = sand.u32 (!%p13165_p8), 1, %s11362_s27   ;;  %p13166_p10 = scmp.ne.s32.totalorder (!%p13165_p8), %s13161_s12, 0 }
  0x46   : > { %282 = sbr.rel (%p13165_p8) target bundleno = 1788 (0x6fc), region = 48  ;;  %s8505_s23 = sshll.u32 (!%p13165_p8), %s284_s21, 13 }
  0x47   : > { %s285_s29 = scalar_lea.sflag (!%p13165_p8), [#allocation5], %s284_s21  ;;  %s11543_s18 = scalar_lea.vmem (!%p13165_p8), [#allocation4], %s8505_s23 }
  0x4b   : > { %11349 = dma.done.wait (%p13166_p10), %s285_s29, 131072  }
  0x4c   : > { %11351 = vsyncadd (%p13166_p10), %s285_s29, 4294836224  ;;  %p13167_p13 = scmp.eq.s32.totalorder %s11444_s6, 0 }
  0x4e   : > { %11353 = dma.done.wait (%p13167_p13), [#allocation7], 80   ;;  %p13168_p0 = pmov %p13167_p13 }
  0x4f   : > { %s8508_s13 = sshll.u32 %s11444_s6, 5  ;;  %p13169_p6 = scmp.ne.s32.totalorder %s11444_s6, 0 }
  0x50   : > { %11355 = vsyncadd (%p13168_p0), [#allocation7], 4294967216  ;;  %p327_p1 = scmp.lt.s32.totalorder %s8508_s13, 95 }
  0x51   : > { %335 = sbr.rel (%p13169_p6) target bundleno = 88 (0x58), region = 64 }
  0x52   : > { %s13175_s13 = smov (!%p327_p1, %s8508_s13), 95 }
  0x53   : > { %s11557_s22 = scalar_lea.vmem %s13149_s0, %s13175_s13 }
  0x56   : > { %v11377_v1 = vmov 0.0  }
  0x57   : > { %336 = vst [vmem:[#allocation2] sm:$0xff] %v11377_v1 }
  0x58 PF: > { %v9708_v2 = vld [vmem:[%s11543_s18 + $0xe4] ss:$16 sps:$4 sm:$0xff]   ;;  %v9712_v4 = vld [vmem:[%s11543_s18 + $0xe0] ss:$16 sps:$4 sm:$0xff]   ;;  %v11378_v38 = vmov 1966171168   ;;  %v1374_v40 = vlaneseq }
  0x59   : > { %v9710_v3 = vld [vmem:[%s11543_s18 + $0x2e4] ss:$16 sps:$4 sm:$0xff]   ;;  %6718 = vmatprep.subr.bf16.mxu0 %v9708_v2  ;;  %v9713_v5 = vld [vmem:[%s11543_s18 + $0x2e0] ss:$16 sps:$4 sm:$0xff]   ;;  %v1372_v39 = vunpack.c.l.s4 %v11378_v38  ;;  %p9534_p11 = scmp.ne.s32.totalorder %s11444_s6, 2 }
  0x5a   : > { %6759 = vmatprep.subr.bf16.mxu1 %v9710_v3  ;;  %v9714_v6 = vld [vmem:[%s11543_s18 + $0xc4] ss:$16 sps:$4 sm:$0xff]   ;;  %6719 = vmatpush1.bf16.msra.mxu0 %v9712_v4  ;;  %v9718_v8 = vld [vmem:[%s11543_s18 + $0xc0] ss:$16 sps:$4 sm:$0xff]   ;;  %v11600_v45 = vshrl.u32 %v1374_v40, 7 }
  0x5b   : > { %6760 = vmatpush1.bf16.msra.mxu1 %v9713_v5  ;;  %v9716_v7 = vld [vmem:[%s11543_s18 + $0x2c4] ss:$16 sps:$4 sm:$0xff]   ;;  %6720 = vmatprep.subr.bf16.mxu0 %v9714_v6  ;;  %v9719_v9 = vld [vmem:[%s11543_s18 + $0x2c0] ss:$16 sps:$4 sm:$0xff]   ;;  %v1373_v44 = vunpack.c.0.s8 %v1372_v39 }
  0x5c   : > { %6761 = vmatprep.subr.bf16.mxu1 %v9716_v7  ;;  %v9720_v10 = vld [vmem:[%s11543_s18 + $0xa4] ss:$16 sps:$4 sm:$0xff]   ;;  %v9724_v12 = vld [vmem:[%s11543_s18 + $0xa0] ss:$16 sps:$4 sm:$0xff]  }
  0x5d   : > { %v9722_v11 = vld [vmem:[%s11543_s18 + $0x2a4] ss:$16 sps:$4 sm:$0xff]   ;;  %v9725_v13 = vld [vmem:[%s11543_s18 + $0x2a0] ss:$16 sps:$4 sm:$0xff]   ;;  %v11608_v51 = vsub.s32 %v1373_v44, %v11600_v45 }
  0x5e   : > { %6721 = vmatpush1.bf16.msra.mxu0 %v9718_v8  ;;  %v9726_v14 = vld [vmem:[%s11543_s18 + $0x84] ss:$16 sps:$4 sm:$0xff]   ;;  %v9730_v16 = vld [vmem:[%s11543_s18 + $0x80] ss:$16 sps:$4 sm:$0xff]  }
  0x5f   : > { %6762 = vmatpush1.bf16.msra.mxu1 %v9719_v9  ;;  %6722 = vmatprep.subr.bf16.mxu0 %v9720_v10  ;;  %v9728_v15 = vld [vmem:[%s11543_s18 + $0x284] ss:$16 sps:$4 sm:$0xff]   ;;  %v9731_v17 = vld [vmem:[%s11543_s18 + $0x280] ss:$16 sps:$4 sm:$0xff]  }
  0x60   : > { %6763 = vmatprep.subr.bf16.mxu1 %v9722_v11  ;;  %v9732_v18 = vld [vmem:[%s11543_s18 + $0x64] ss:$16 sps:$4 sm:$0xff]   ;;  %v9736_v20 = vld [vmem:[%s11543_s18 + $0x60] ss:$16 sps:$4 sm:$0xff]  }
  0x61   : > { %v9734_v19 = vld [vmem:[%s11543_s18 + $0x264] ss:$16 sps:$4 sm:$0xff]   ;;  %v9737_v21 = vld [vmem:[%s11543_s18 + $0x260] ss:$16 sps:$4 sm:$0xff]  }
  0x62   : > { %6723 = vmatpush1.bf16.msra.mxu0 %v9724_v12  ;;  %v9738_v22 = vld [vmem:[%s11543_s18 + $0x44] ss:$16 sps:$4 sm:$0xff]   ;;  %v9742_v24 = vld [vmem:[%s11543_s18 + $0x40] ss:$16 sps:$4 sm:$0xff]  }
  0x63   : > { %6764 = vmatpush1.bf16.msra.mxu1 %v9725_v13  ;;  %6724 = vmatprep.subr.bf16.mxu0 %v9726_v14  ;;  %v9740_v23 = vld [vmem:[%s11543_s18 + $0x244] ss:$16 sps:$4 sm:$0xff]   ;;  %v9743_v25 = vld [vmem:[%s11543_s18 + $0x240] ss:$16 sps:$4 sm:$0xff]  }
  0x64   : > { %6765 = vmatprep.subr.bf16.mxu1 %v9728_v15  ;;  %v9744_v26 = vld [vmem:[%s11543_s18 + $0x24] ss:$16 sps:$4 sm:$0xff]   ;;  %v9748_v28 = vld [vmem:[%s11543_s18 + $0x20] ss:$16 sps:$4 sm:$0xff]  }
  0x65   : > { %v9746_v27 = vld [vmem:[%s11543_s18 + $0x224] ss:$16 sps:$4 sm:$0xff]   ;;  %v9749_v29 = vld [vmem:[%s11543_s18 + $0x220] ss:$16 sps:$4 sm:$0xff]  }
  0x66   : > { %6725 = vmatpush1.bf16.msra.mxu0 %v9730_v16  ;;  %v9750_v30 = vld [vmem:[%s11543_s18 + $0x4] ss:$16 sps:$4 sm:$0xff]   ;;  %v9754_v32 = vld [vmem:[%s11543_s18] ss:$16 sps:$4 sm:$0xff]  }
  0x67   : > { %6766 = vmatpush1.bf16.msra.mxu1 %v9731_v17  ;;  %6726 = vmatprep.subr.bf16.mxu0 %v9732_v18  ;;  %v9752_v31 = vld [vmem:[%s11543_s18 + $0x204] ss:$16 sps:$4 sm:$0xff]   ;;  %v9755_v33 = vld [vmem:[%s11543_s18 + $0x200] ss:$16 sps:$4 sm:$0xff]  }
  0x68   : > { %6767 = vmatprep.subr.bf16.mxu1 %v9734_v19  ;;  %v9756_v34 = vld [vmem:[%s11543_s18 + $0x1e4] ss:$16 sps:$4 sm:$0xff]   ;;  %v9760_v36 = vld [vmem:[%s11543_s18 + $0x1e0] ss:$16 sps:$4 sm:$0xff]  }
  0x69   : > { %v9758_v35 = vld [vmem:[%s11543_s18 + $0x3e4] ss:$16 sps:$4 sm:$0xff]   ;;  %v9761_v37 = vld [vmem:[%s11543_s18 + $0x3e0] ss:$16 sps:$4 sm:$0xff]  }
  0x6a   : > { %6727 = vmatpush1.bf16.msra.mxu0 %v9736_v20  ;;  %v9762_v41 = vld [vmem:[%s11543_s18 + $0x1c4] ss:$16 sps:$4 sm:$0xff]   ;;  %v9766_v43 = vld [vmem:[%s11543_s18 + $0x1c0] ss:$16 sps:$4 sm:$0xff]  }
  0x6b   : > { %6768 = vmatpush1.bf16.msra.mxu1 %v9737_v21  ;;  %6728 = vmatprep.subr.bf16.mxu0 %v9738_v22  ;;  %v9764_v42 = vld [vmem:[%s11543_s18 + $0x3c4] ss:$16 sps:$4 sm:$0xff]   ;;  %v9767_v46 = vld [vmem:[%s11543_s18 + $0x3c0] ss:$16 sps:$4 sm:$0xff]  }
  0x6c   : > { %6769 = vmatprep.subr.bf16.mxu1 %v9740_v23  ;;  %v9768_v47 = vld [vmem:[%s11543_s18 + $0x1a4] ss:$16 sps:$4 sm:$0xff]   ;;  %v9772_v49 = vld [vmem:[%s11543_s18 + $0x1a0] ss:$16 sps:$4 sm:$0xff]  }
  0x6d   : > { %v9770_v48 = vld [vmem:[%s11543_s18 + $0x3a4] ss:$16 sps:$4 sm:$0xff]   ;;  %v9773_v50 = vld [vmem:[%s11543_s18 + $0x3a0] ss:$16 sps:$4 sm:$0xff]  }
  0x6e   : > { %6729 = vmatpush1.bf16.msra.mxu0 %v9742_v24  ;;  %v9774_v52 = vld [vmem:[%s11543_s18 + $0x184] ss:$16 sps:$4 sm:$0xff]   ;;  %v9778_v55 = vld [vmem:[%s11543_s18 + $0x180] ss:$16 sps:$4 sm:$0xff]  }
  0x6f   : > { %6770 = vmatpush1.bf16.msra.mxu1 %v9743_v25  ;;  %6730 = vmatprep.subr.bf16.mxu0 %v9744_v26  ;;  %v9776_v53 = vld [vmem:[%s11543_s18 + $0x384] ss:$16 sps:$4 sm:$0xff]   ;;  %v9779_v57 = vld [vmem:[%s11543_s18 + $0x380] ss:$16 sps:$4 sm:$0xff]  }
  0x70   : > { %6771 = vmatprep.subr.bf16.mxu1 %v9746_v27  ;;  %v338_v54 = vld [vmem:[%s11557_s22] sm:$0xff]  ;;  %v9784_v61 = vld [vmem:[%s11543_s18 + $0x160] ss:$16 sps:$4 sm:$0xff]  }
  0x71   : > { %v1377_v56 = vrot.slane %v338_v54, %v11608_v51  ;;  %v9780_v58 = vld [vmem:[%s11543_s18 + $0x164] ss:$16 sps:$4 sm:$0xff]   ;;  %v9785_v63 = vld [vmem:[%s11543_s18 + $0x360] ss:$16 sps:$4 sm:$0xff]   ;;  %v1370_v3 = vcombine.high %v338_v54, %v338_v54 }
  0x72   : > { %6731 = vmatpush1.bf16.msra.mxu0 %v9748_v28  ;;  %v9782_v59 = vld [vmem:[%s11543_s18 + $0x364] ss:$16 sps:$4 sm:$0xff]   ;;  %v9790_v4 = vld [vmem:[%s11543_s18 + $0x140] ss:$16 sps:$4 sm:$0xff]  }
  0x73   : > { %6772 = vmatpush1.bf16.msra.mxu1 %v9749_v29  ;;  %6732 = vmatprep.subr.bf16.mxu0 %v9750_v30  ;;  %v1385_v60 = vcombine.high %v1377_v56, %v1377_v56  ;;  %v9786_v0 = vld [vmem:[%s11543_s18 + $0x144] ss:$16 sps:$4 sm:$0xff]   ;;  %v9791_v5 = vld [vmem:[%s11543_s18 + $0x340] ss:$16 sps:$4 sm:$0xff]   ;;  %v11636_v8 = vrot.slane %v1370_v3, %v11608_v51  ;;  %v11646_v15 = vrot.slane %v1377_v56, %v11608_v51 }
  0x74   : > { %6773 = vmatprep.subr.bf16.mxu1 %v9752_v31  ;;  %v9788_v1 = vld [vmem:[%s11543_s18 + $0x344] ss:$16 sps:$4 sm:$0xff]   ;;  %v9796_v9 = vld [vmem:[%s11543_s18 + $0x120] ss:$16 sps:$4 sm:$0xff]  }
  0x75   : > { %v11620_v62 = vrot.slane %v1385_v60, %v11608_v51  ;;  %v9792_v6 = vld [vmem:[%s11543_s18 + $0x124] ss:$16 sps:$4 sm:$0xff]   ;;  %v9797_v10 = vld [vmem:[%s11543_s18 + $0x320] ss:$16 sps:$4 sm:$0xff]   ;;  %v1386_v13 = vcombine.high %v11636_v8, %v11636_v8  ;;  %v11656_v20 = vcombine.high %v11646_v15, %v11646_v15 }
  0x76   : > { %6733 = vmatpush1.bf16.msra.mxu0 %v9754_v32  ;;  %v9794_v7 = vld [vmem:[%s11543_s18 + $0x324] ss:$16 sps:$4 sm:$0xff]   ;;  %v9802_v14 = vld [vmem:[%s11543_s18 + $0x100] ss:$16 sps:$4 sm:$0xff]  }
  0x77   : > { %6774 = vmatpush1.bf16.msra.mxu1 %v9755_v33  ;;  %6734 = vmatprep.subr.bf16.mxu0 %v9756_v34  ;;  %v11627_v2 = vcombine.high %v11620_v62, %v11620_v62  ;;  %v9798_v11 = vld [vmem:[%s11543_s18 + $0x104] ss:$16 sps:$4 sm:$0xff]   ;;  %v9803_v16 = vld [vmem:[%s11543_s18 + $0x300] ss:$16 sps:$4 sm:$0xff]   ;;  %v11652_v19 = vrot.slane %v1386_v13, %v11608_v51 }
  0x78   : > { %6775 = vmatprep.subr.bf16.mxu1 %v9758_v35  ;;  %6750 = vmatprep.mubr.bf16.mxu0 %v11620_v62  ;;  %v9800_v12 = vld [vmem:[%s11543_s18 + $0x304] ss:$16 sps:$4 sm:$0xff]   ;;  %v9804_v21 = vld [vmem:[%s11543_s18 + $0x4e0] ss:$16 sps:$4 sm:$0xff]  }
  0x79   : > { %6791 = vmatprep.mubr.bf16.mxu1 %v11627_v2  ;;  %v9806_v17 = vld [vmem:[%s11543_s18 + $0x4e4] ss:$16 sps:$4 sm:$0xff]   ;;  %v9807_v22 = vld [vmem:[%s11543_s18 + $0x6e0] ss:$16 sps:$4 sm:$0xff]   ;;  %v11664_v25 = vcombine.high %v11652_v19, %v11652_v19 }
  0x7a   : > { %6735 = vmatpush2.bf16.msra.mxu0 %v9760_v36  ;;  %v9809_v18 = vld [vmem:[%s11543_s18 + $0x6e4] ss:$16 sps:$4 sm:$0xff]   ;;  %v9810_v26 = vld [vmem:[%s11543_s18 + $0x4c0] ss:$16 sps:$4 sm:$0xff]  }
  0x7b   : > { %6776 = vmatpush2.bf16.msra.mxu1 %v9761_v37  ;;  %6736 = vmatprep.subr.bf16.mxu0 %v9762_v41  ;;  %v9812_v23 = vld [vmem:[%s11543_s18 + $0x4c4] ss:$16 sps:$4 sm:$0xff]   ;;  %v9813_v27 = vld [vmem:[%s11543_s18 + $0x6c0] ss:$16 sps:$4 sm:$0xff]  }
  0x7c   : > { %6777 = vmatprep.subr.bf16.mxu1 %v9764_v42  ;;  %v9815_v24 = vld [vmem:[%s11543_s18 + $0x6c4] ss:$16 sps:$4 sm:$0xff]   ;;  %v9816_v30 = vld [vmem:[%s11543_s18 + $0x4a0] ss:$16 sps:$4 sm:$0xff]  }
  0x7d   : > { %v9818_v28 = vld [vmem:[%s11543_s18 + $0x4a4] ss:$16 sps:$4 sm:$0xff]   ;;  %v9819_v31 = vld [vmem:[%s11543_s18 + $0x6a0] ss:$16 sps:$4 sm:$0xff]  }
  0x7e   : > { %6737 = vmatpush2.bf16.msra.mxu0 %v9766_v43  ;;  %v9821_v29 = vld [vmem:[%s11543_s18 + $0x6a4] ss:$16 sps:$4 sm:$0xff]   ;;  %v9822_v34 = vld [vmem:[%s11543_s18 + $0x480] ss:$16 sps:$4 sm:$0xff]  }
  0x7f   : > { %6778 = vmatpush2.bf16.msra.mxu1 %v9767_v46  ;;  %6738 = vmatprep.subr.bf16.mxu0 %v9768_v47  ;;  %v9824_v32 = vld [vmem:[%s11543_s18 + $0x484] ss:$16 sps:$4 sm:$0xff]   ;;  %v9825_v35 = vld [vmem:[%s11543_s18 + $0x680] ss:$16 sps:$4 sm:$0xff]  }
  0x80   : > { %6779 = vmatprep.subr.bf16.mxu1 %v9770_v48  ;;  %v9827_v33 = vld [vmem:[%s11543_s18 + $0x684] ss:$16 sps:$4 sm:$0xff]   ;;  %v9828_v38 = vld [vmem:[%s11543_s18 + $0x460] ss:$16 sps:$4 sm:$0xff]  }
  0x81   : > { %v9830_v36 = vld [vmem:[%s11543_s18 + $0x464] ss:$16 sps:$4 sm:$0xff]   ;;  %v9831_v39 = vld [vmem:[%s11543_s18 + $0x660] ss:$16 sps:$4 sm:$0xff]  }
  0x82   : > { %6739 = vmatpush2.bf16.msra.mxu0 %v9772_v49  ;;  %v9833_v37 = vld [vmem:[%s11543_s18 + $0x664] ss:$16 sps:$4 sm:$0xff]   ;;  %v9834_v42 = vld [vmem:[%s11543_s18 + $0x440] ss:$16 sps:$4 sm:$0xff]  }
  0x83   : > { %6780 = vmatpush2.bf16.msra.mxu1 %v9773_v50  ;;  %6740 = vmatprep.subr.bf16.mxu0 %v9774_v52  ;;  %v9836_v40 = vld [vmem:[%s11543_s18 + $0x444] ss:$16 sps:$4 sm:$0xff]   ;;  %v9837_v43 = vld [vmem:[%s11543_s18 + $0x640] ss:$16 sps:$4 sm:$0xff]  }
  0x84   : > { %6781 = vmatprep.subr.bf16.mxu1 %v9776_v53  ;;  %v9839_v41 = vld [vmem:[%s11543_s18 + $0x644] ss:$16 sps:$4 sm:$0xff]   ;;  %v9840_v47 = vld [vmem:[%s11543_s18 + $0x420] ss:$16 sps:$4 sm:$0xff]  }
  0x85   : > { %v9842_v44 = vld [vmem:[%s11543_s18 + $0x424] ss:$16 sps:$4 sm:$0xff]   ;;  %v9843_v48 = vld [vmem:[%s11543_s18 + $0x620] ss:$16 sps:$4 sm:$0xff]  }
  0x86   : > { %6741 = vmatpush2.bf16.msra.mxu0 %v9778_v55  ;;  %v9845_v46 = vld [vmem:[%s11543_s18 + $0x624] ss:$16 sps:$4 sm:$0xff]   ;;  %v9846_v52 = vld [vmem:[%s11543_s18 + $0x400] ss:$16 sps:$4 sm:$0xff]  }
  0x87   : > { %6782 = vmatpush2.bf16.msra.mxu1 %v9779_v57  ;;  %6742 = vmatprep.subr.bf16.mxu0 %v9780_v58  ;;  %v9848_v49 = vld [vmem:[%s11543_s18 + $0x404] ss:$16 sps:$4 sm:$0xff]   ;;  %v9849_v53 = vld [vmem:[%s11543_s18 + $0x600] ss:$16 sps:$4 sm:$0xff]  }
  0x88   : > { %6783 = vmatprep.subr.bf16.mxu1 %v9782_v59  ;;  %v9851_v50 = vld [vmem:[%s11543_s18 + $0x604] ss:$16 sps:$4 sm:$0xff]   ;;  %v9852_v56 = vld [vmem:[%s11543_s18 + $0x5e0] ss:$16 sps:$4 sm:$0xff]  }
  0x89   : > { %v9854_v54 = vld [vmem:[%s11543_s18 + $0x5e4] ss:$16 sps:$4 sm:$0xff]   ;;  %v9855_v57 = vld [vmem:[%s11543_s18 + $0x7e0] ss:$16 sps:$4 sm:$0xff]  }
  0x8a   : > { %6743 = vmatpush2.bf16.msra.mxu0 %v9784_v61  ;;  %v9857_v55 = vld [vmem:[%s11543_s18 + $0x7e4] ss:$16 sps:$4 sm:$0xff]   ;;  %v9858_v60 = vld [vmem:[%s11543_s18 + $0x5c0] ss:$16 sps:$4 sm:$0xff]  }
  0x8b   : > { %6784 = vmatpush2.bf16.msra.mxu1 %v9785_v63  ;;  %6744 = vmatprep.subr.bf16.mxu0 %v9786_v0  ;;  %v9860_v58 = vld [vmem:[%s11543_s18 + $0x5c4] ss:$16 sps:$4 sm:$0xff]   ;;  %v9861_v61 = vld [vmem:[%s11543_s18 + $0x7c0] ss:$16 sps:$4 sm:$0xff]  }
  0x8c   : > { %6785 = vmatprep.subr.bf16.mxu1 %v9788_v1  ;;  %v9863_v59 = vld [vmem:[%s11543_s18 + $0x7c4] ss:$16 sps:$4 sm:$0xff]   ;;  %v9864_v1 = vld [vmem:[%s11543_s18 + $0x5a0] ss:$16 sps:$4 sm:$0xff]  }
  0x8d   : > { %v9866_v63 = vld [vmem:[%s11543_s18 + $0x5a4] ss:$16 sps:$4 sm:$0xff]   ;;  %v9867_v3 = vld [vmem:[%s11543_s18 + $0x7a0] ss:$16 sps:$4 sm:$0xff]  }
  0x8e   : > { %6745 = vmatpush2.bf16.msra.mxu0 %v9790_v4  ;;  %v9869_v0 = vld [vmem:[%s11543_s18 + $0x7a4] ss:$16 sps:$4 sm:$0xff]  }
  0x8f   : > { %6786 = vmatpush2.bf16.msra.mxu1 %v9791_v5  ;;  %6746 = vmatprep.subr.bf16.mxu0 %v9792_v6  ;;  %v9872_v4 = vld [vmem:[%s11543_s18 + $0x584] ss:$16 sps:$4 sm:$0xff]   ;;  %v9870_v6 = vld [vmem:[%s11543_s18 + $0x580] ss:$16 sps:$4 sm:$0xff]  }
  0x90   : > { %6787 = vmatprep.subr.bf16.mxu1 %v9794_v7  ;;  %v9875_v5 = vld [vmem:[%s11543_s18 + $0x784] ss:$16 sps:$4 sm:$0xff]   ;;  %v9873_v7 = vld [vmem:[%s11543_s18 + $0x780] ss:$16 sps:$4 sm:$0xff]  }
  0x91   : > { %v9884_v13 = vld [vmem:[%s11543_s18 + $0x544] ss:$16 sps:$4 sm:$0xff]  }
  0x92   : > { %6747 = vmatpush2.bf16.msra.mxu0 %v9796_v9  ;;  %v9878_v9 = vld [vmem:[%s11543_s18 + $0x564] ss:$16 sps:$4 sm:$0xff]  }
  0x93   : > { %6788 = vmatpush2.bf16.msra.mxu1 %v9797_v10  ;;  %6748 = vmatprep.subr.bf16.mxu0 %v9798_v11  ;;  %v9881_v10 = vld [vmem:[%s11543_s18 + $0x764] ss:$16 sps:$4 sm:$0xff]   ;;  %v9876_v11 = vld [vmem:[%s11543_s18 + $0x560] ss:$16 sps:$4 sm:$0xff]  }
  0x94   : > { %6789 = vmatprep.subr.bf16.mxu1 %v9800_v12  ;;  %v9879_v12 = vld [vmem:[%s11543_s18 + $0x760] ss:$16 sps:$4 sm:$0xff]  }
  0x96   : > { %6749 = vmatpush2.bf16.msra.mxu0 %v9802_v14  ;;  %v9887_v14 = vld [vmem:[%s11543_s18 + $0x744] ss:$16 sps:$4 sm:$0xff]  }
  0x97   : > { %6790 = vmatpush2.bf16.msra.mxu1 %v9803_v16  ;;  %6800 = vmatprep.subr.bf16.mxu0 %v9806_v17  ;;  %v9882_v16 = vld [vmem:[%s11543_s18 + $0x540] ss:$16 sps:$4 sm:$0xff]  }
  0x98   : > { %6841 = vmatprep.subr.bf16.mxu1 %v9809_v18  ;;  %v9885_v17 = vld [vmem:[%s11543_s18 + $0x740] ss:$16 sps:$4 sm:$0xff]   ;;  %v9890_v18 = vld [vmem:[%s11543_s18 + $0x524] ss:$16 sps:$4 sm:$0xff]  }
  0x99   : > { %6751 = vmatmul.mubr.bf16.vlgmr.msra.gmra.mxu0 %v11646_v15 }
  0x9a   : > { %6792 = vmatmul.mubr.bf16.vlgmr.msra.gmra.mxu1 %v11656_v20  ;;  %6801 = vmatpush1.bf16.msra.mxu0 %v9804_v21  ;;  %v9893_v21 = vld [vmem:[%s11543_s18 + $0x724] ss:$16 sps:$4 sm:$0xff]  }
  0x9b   : > { %6842 = vmatpush1.bf16.msra.mxu1 %v9807_v22  ;;  %6802 = vmatprep.subr.bf16.mxu0 %v9812_v23  ;;  %v9888_v22 = vld [vmem:[%s11543_s18 + $0x520] ss:$16 sps:$4 sm:$0xff]  }
  0x9c   : > { %6843 = vmatprep.subr.bf16.mxu1 %v9815_v24  ;;  %6832 = vmatprep.mubr.bf16.mxu0 %v11652_v19  ;;  %v9891_v23 = vld [vmem:[%s11543_s18 + $0x720] ss:$16 sps:$4 sm:$0xff]   ;;  %v9896_v24 = vld [vmem:[%s11543_s18 + $0x504] ss:$16 sps:$4 sm:$0xff]  }
  0x9d   : > { %6873 = vmatprep.mubr.bf16.mxu1 %v11664_v25 }
  0x9e   : > { %6803 = vmatpush1.bf16.msra.mxu0 %v9810_v26  ;;  %v9899_v26 = vld [vmem:[%s11543_s18 + $0x704] ss:$16 sps:$4 sm:$0xff]  }
  0x9f   : > { %6844 = vmatpush1.bf16.msra.mxu1 %v9813_v27  ;;  %6804 = vmatprep.subr.bf16.mxu0 %v9818_v28  ;;  %v9894_v27 = vld [vmem:[%s11543_s18 + $0x500] ss:$16 sps:$4 sm:$0xff]   ;;  %v11729_v28 = vrot.slane %v11636_v8, %v11608_v51 }
  0xa0   : > { %6845 = vmatprep.subr.bf16.mxu1 %v9821_v29  ;;  %v9897_v29 = vld [vmem:[%s11543_s18 + $0x700] ss:$16 sps:$4 sm:$0xff]  }
  0xa1   : > { %v9904_v8 = vld [vmem:[%s11543_s18 + $0xae0] ss:$16 sps:$4 sm:$0xff]  }
  0xa2   : > { %6805 = vmatpush1.bf16.msra.mxu0 %v9816_v30  ;;  %v9903_v30 = vld [vmem:[%s11543_s18 + $0x8e4] ss:$16 sps:$4 sm:$0xff]  }
  0xa3   : > { %6846 = vmatpush1.bf16.msra.mxu1 %v9819_v31  ;;  %6806 = vmatprep.subr.bf16.mxu0 %v9824_v32  ;;  %v9906_v31 = vld [vmem:[%s11543_s18 + $0xae4] ss:$16 sps:$4 sm:$0xff]   ;;  %v11736_v32 = vcombine.high %v11729_v28, %v11729_v28 }
  0xa4   : > { %6847 = vmatprep.subr.bf16.mxu1 %v9827_v33  ;;  %v9901_v33 = vld [vmem:[%s11543_s18 + $0x8e0] ss:$16 sps:$4 sm:$0xff]  }
  0xa6   : > { %6807 = vmatpush1.bf16.msra.mxu0 %v9822_v34  ;;  %v11741_v34 = vld [vmem:[%s11557_s22 + $0x8] sm:$0xff] }
  0xa7   : > { %6848 = vmatpush1.bf16.msra.mxu1 %v9825_v35  ;;  %6808 = vmatprep.subr.bf16.mxu0 %v9830_v36  ;;  %v9909_v35 = vld [vmem:[%s11543_s18 + $0x8c4] ss:$16 sps:$4 sm:$0xff]  }
  0xa8   : > { %6849 = vmatprep.subr.bf16.mxu1 %v9833_v37  ;;  %v9912_v36 = vld [vmem:[%s11543_s18 + $0xac4] ss:$16 sps:$4 sm:$0xff]   ;;  %v11747_v37 = vrot.slane %v11741_v34, %v11608_v51 }
  0xaa   : > { %6809 = vmatpush1.bf16.msra.mxu0 %v9828_v38  ;;  %v1434_v38 = vcombine.high %v11747_v37, %v11747_v37 }
  0xab   : > { %6850 = vmatpush1.bf16.msra.mxu1 %v9831_v39  ;;  %6810 = vmatprep.subr.bf16.mxu0 %v9836_v40  ;;  %v9907_v39 = vld [vmem:[%s11543_s18 + $0x8c0] ss:$16 sps:$4 sm:$0xff]  }
  0xac   : > { %6851 = vmatprep.subr.bf16.mxu1 %v9839_v41  ;;  %v9910_v40 = vld [vmem:[%s11543_s18 + $0xac0] ss:$16 sps:$4 sm:$0xff]   ;;  %v9915_v41 = vld [vmem:[%s11543_s18 + $0x8a4] ss:$16 sps:$4 sm:$0xff]  }
  0xae   : > { %6811 = vmatpush1.bf16.msra.mxu0 %v9834_v42  ;;  %v9918_v42 = vld [vmem:[%s11543_s18 + $0xaa4] ss:$16 sps:$4 sm:$0xff]  }
  0xaf   : > { %6852 = vmatpush1.bf16.msra.mxu1 %v9837_v43  ;;  %6812 = vmatprep.subr.bf16.mxu0 %v9842_v44  ;;  %v11758_v43 = vrot.slane %v1434_v38, %v11608_v51  ;;  %v9979_v38 = vld [vmem:[%s11543_s18 + $0x940] ss:$16 sps:$4 sm:$0xff]  }
  0xb0   : > { %6853 = vmatprep.subr.bf16.mxu1 %v9845_v46  ;;  %v9913_v46 = vld [vmem:[%s11543_s18 + $0x8a0] ss:$16 sps:$4 sm:$0xff]  }
  0xb1   : > { %v11763_v44 = vcombine.high %v11758_v43, %v11758_v43 }
  0xb2   : > { %6813 = vmatpush1.bf16.msra.mxu0 %v9840_v47  ;;  %v9916_v47 = vld [vmem:[%s11543_s18 + $0xaa0] ss:$16 sps:$4 sm:$0xff]  }
  0xb3   : > { %6854 = vmatpush1.bf16.msra.mxu1 %v9843_v48  ;;  %6814 = vmatprep.subr.bf16.mxu0 %v9848_v49  ;;  %v9921_v48 = vld [vmem:[%s11543_s18 + $0x884] ss:$16 sps:$4 sm:$0xff]  }
  0xb4   : > { %6855 = vmatprep.subr.bf16.mxu1 %v9851_v50  ;;  %v9924_v49 = vld [vmem:[%s11543_s18 + $0xa84] ss:$16 sps:$4 sm:$0xff]   ;;  %v9919_v50 = vld [vmem:[%s11543_s18 + $0x880] ss:$16 sps:$4 sm:$0xff]  }
  0xb6   : > { %6815 = vmatpush1.bf16.msra.mxu0 %v9846_v52  ;;  %v9922_v52 = vld [vmem:[%s11543_s18 + $0xa80] ss:$16 sps:$4 sm:$0xff]  }
  0xb7   : > { %6856 = vmatpush1.bf16.msra.mxu1 %v9849_v53  ;;  %6816 = vmatprep.subr.bf16.mxu0 %v9854_v54  ;;  %v9927_v53 = vld [vmem:[%s11543_s18 + $0x864] ss:$16 sps:$4 sm:$0xff]  }
  0xb8   : > { %6857 = vmatprep.subr.bf16.mxu1 %v9857_v55  ;;  %v9930_v54 = vld [vmem:[%s11543_s18 + $0xa64] ss:$16 sps:$4 sm:$0xff]   ;;  %v9925_v55 = vld [vmem:[%s11543_s18 + $0x860] ss:$16 sps:$4 sm:$0xff]  }
  0xba   : > { %6817 = vmatpush2.bf16.msra.mxu0 %v9852_v56  ;;  %v9928_v56 = vld [vmem:[%s11543_s18 + $0xa60] ss:$16 sps:$4 sm:$0xff]  }
  0xbb   : > { %6858 = vmatpush2.bf16.msra.mxu1 %v9855_v57  ;;  %6818 = vmatprep.subr.bf16.mxu0 %v9860_v58  ;;  %v9933_v57 = vld [vmem:[%s11543_s18 + $0x844] ss:$16 sps:$4 sm:$0xff]  }
  0xbc   : > { %6859 = vmatprep.subr.bf16.mxu1 %v9863_v59  ;;  %v9936_v58 = vld [vmem:[%s11543_s18 + $0xa44] ss:$16 sps:$4 sm:$0xff]   ;;  %v9931_v59 = vld [vmem:[%s11543_s18 + $0x840] ss:$16 sps:$4 sm:$0xff]  }
  0xbe   : > { %6819 = vmatpush2.bf16.msra.mxu0 %v9858_v60  ;;  %v9934_v60 = vld [vmem:[%s11543_s18 + $0xa40] ss:$16 sps:$4 sm:$0xff]  }
  0xbf   : > { %6860 = vmatpush2.bf16.msra.mxu1 %v9861_v61  ;;  %6820 = vmatprep.subr.bf16.mxu0 %v9866_v63  ;;  %v9939_v61 = vld [vmem:[%s11543_s18 + $0x824] ss:$16 sps:$4 sm:$0xff]  }
  0xc0   : > { %6861 = vmatprep.subr.bf16.mxu1 %v9869_v0  ;;  %v9942_v63 = vld [vmem:[%s11543_s18 + $0xa24] ss:$16 sps:$4 sm:$0xff]   ;;  %v9937_v0 = vld [vmem:[%s11543_s18 + $0x820] ss:$16 sps:$4 sm:$0xff]  }
  0xc2   : > { %6821 = vmatpush2.bf16.msra.mxu0 %v9864_v1  ;;  %v9940_v1 = vld [vmem:[%s11543_s18 + $0xa20] ss:$16 sps:$4 sm:$0xff]  }
  0xc3   : > { %6862 = vmatpush2.bf16.msra.mxu1 %v9867_v3  ;;  %6822 = vmatprep.subr.bf16.mxu0 %v9872_v4  ;;  %v9945_v3 = vld [vmem:[%s11543_s18 + $0x804] ss:$16 sps:$4 sm:$0xff]  }
  0xc4   : > { %6863 = vmatprep.subr.bf16.mxu1 %v9875_v5  ;;  %v9948_v4 = vld [vmem:[%s11543_s18 + $0xa04] ss:$16 sps:$4 sm:$0xff]   ;;  %v9943_v5 = vld [vmem:[%s11543_s18 + $0x800] ss:$16 sps:$4 sm:$0xff]  }
  0xc6   : > { %6823 = vmatpush2.bf16.msra.mxu0 %v9870_v6  ;;  %v9946_v6 = vld [vmem:[%s11543_s18 + $0xa00] ss:$16 sps:$4 sm:$0xff]  }
  0xc7   : > { %6864 = vmatpush2.bf16.msra.mxu1 %v9873_v7  ;;  %6824 = vmatprep.subr.bf16.mxu0 %v9878_v9  ;;  %v9951_v7 = vld [vmem:[%s11543_s18 + $0x9e4] ss:$16 sps:$4 sm:$0xff]  }
  0xc8   : > { %6865 = vmatprep.subr.bf16.mxu1 %v9881_v10  ;;  %v9954_v9 = vld [vmem:[%s11543_s18 + $0xbe4] ss:$16 sps:$4 sm:$0xff]   ;;  %v9949_v10 = vld [vmem:[%s11543_s18 + $0x9e0] ss:$16 sps:$4 sm:$0xff]  }
  0xca   : > { %6825 = vmatpush2.bf16.msra.mxu0 %v9876_v11  ;;  %v9952_v11 = vld [vmem:[%s11543_s18 + $0xbe0] ss:$16 sps:$4 sm:$0xff]  }
  0xcb   : > { %6866 = vmatpush2.bf16.msra.mxu1 %v9879_v12  ;;  %6826 = vmatprep.subr.bf16.mxu0 %v9884_v13  ;;  %v9957_v12 = vld [vmem:[%s11543_s18 + $0x9c4] ss:$16 sps:$4 sm:$0xff]  }
  0xcc   : > { %6867 = vmatprep.subr.bf16.mxu1 %v9887_v14  ;;  %v9960_v13 = vld [vmem:[%s11543_s18 + $0xbc4] ss:$16 sps:$4 sm:$0xff]   ;;  %v9955_v14 = vld [vmem:[%s11543_s18 + $0x9c0] ss:$16 sps:$4 sm:$0xff]  }
  0xce   : > { %6827 = vmatpush2.bf16.msra.mxu0 %v9882_v16  ;;  %v9958_v16 = vld [vmem:[%s11543_s18 + $0xbc0] ss:$16 sps:$4 sm:$0xff]  }
  0xcf   : > { %6868 = vmatpush2.bf16.msra.mxu1 %v9885_v17  ;;  %6828 = vmatprep.subr.bf16.mxu0 %v9890_v18  ;;  %v9963_v17 = vld [vmem:[%s11543_s18 + $0x9a4] ss:$16 sps:$4 sm:$0xff]  }
  0xd0   : > { %6869 = vmatprep.subr.bf16.mxu1 %v9893_v21  ;;  %v9966_v18 = vld [vmem:[%s11543_s18 + $0xba4] ss:$16 sps:$4 sm:$0xff]   ;;  %v9961_v21 = vld [vmem:[%s11543_s18 + $0x9a0] ss:$16 sps:$4 sm:$0xff]  }
  0xd2   : > { %6829 = vmatpush2.bf16.msra.mxu0 %v9888_v22  ;;  %v9964_v22 = vld [vmem:[%s11543_s18 + $0xba0] ss:$16 sps:$4 sm:$0xff]  }
  0xd3   : > { %6870 = vmatpush2.bf16.msra.mxu1 %v9891_v23  ;;  %6830 = vmatprep.subr.bf16.mxu0 %v9896_v24  ;;  %v9969_v23 = vld [vmem:[%s11543_s18 + $0x984] ss:$16 sps:$4 sm:$0xff]  }
  0xd4   : > { %6871 = vmatprep.subr.bf16.mxu1 %v9899_v26  ;;  %v9972_v24 = vld [vmem:[%s11543_s18 + $0xb84] ss:$16 sps:$4 sm:$0xff]   ;;  %v9967_v26 = vld [vmem:[%s11543_s18 + $0x980] ss:$16 sps:$4 sm:$0xff]  }
  0xd6   : > { %6831 = vmatpush2.bf16.msra.mxu0 %v9894_v27  ;;  %v9970_v27 = vld [vmem:[%s11543_s18 + $0xb80] ss:$16 sps:$4 sm:$0xff]  }
  0xd7   : > { %6872 = vmatpush2.bf16.msra.mxu1 %v9897_v29  ;;  %6882 = vmatprep.subr.bf16.mxu0 %v9903_v30  ;;  %v9975_v29 = vld [vmem:[%s11543_s18 + $0x964] ss:$16 sps:$4 sm:$0xff]  }
  0xd8   : > { %6923 = vmatprep.subr.bf16.mxu1 %v9906_v31  ;;  %v9978_v30 = vld [vmem:[%s11543_s18 + $0xb64] ss:$16 sps:$4 sm:$0xff]   ;;  %v9973_v31 = vld [vmem:[%s11543_s18 + $0x960] ss:$16 sps:$4 sm:$0xff]  }
  0xd9   : > { %6833 = vmatmul.mubr.bf16.vlgmr.msra.gmra.mxu0 %v11729_v28 }
  0xda   : > { %6874 = vmatmul.mubr.bf16.vlgmr.msra.gmra.mxu1 %v11736_v32  ;;  %6883 = vmatpush1.bf16.msra.mxu0 %v9901_v33  ;;  %v9976_v33 = vld [vmem:[%s11543_s18 + $0xb60] ss:$16 sps:$4 sm:$0xff]  }
  0xdb   : > { %6924 = vmatpush1.bf16.msra.mxu1 %v9904_v8  ;;  %6884 = vmatprep.subr.bf16.mxu0 %v9909_v35  ;;  %v9981_v8 = vld [vmem:[%s11543_s18 + $0x944] ss:$16 sps:$4 sm:$0xff]  }
  0xdc   : > { %6925 = vmatprep.subr.bf16.mxu1 %v9912_v36  ;;  %6914 = vmatprep.mubr.bf16.mxu0 %v11758_v43  ;;  %v9984_v35 = vld [vmem:[%s11543_s18 + $0xb44] ss:$16 sps:$4 sm:$0xff]   ;;  %v1419_v36 = vcombine.high %v11741_v34, %v11741_v34  ;;  %v9985_v34 = vld [vmem:[%s11543_s18 + $0x920] ss:$16 sps:$4 sm:$0xff]  }
  0xdd   : > { %6955 = vmatprep.mubr.bf16.mxu1 %v11763_v44 }
  0xde   : > { %6885 = vmatpush1.bf16.msra.mxu0 %v9907_v39  ;;  %v9982_v39 = vld [vmem:[%s11543_s18 + $0xb40] ss:$16 sps:$4 sm:$0xff]  }
  0xdf   : > { %6926 = vmatpush1.bf16.msra.mxu1 %v9910_v40  ;;  %6886 = vmatprep.subr.bf16.mxu0 %v9915_v41  ;;  %v9987_v40 = vld [vmem:[%s11543_s18 + $0x924] ss:$16 sps:$4 sm:$0xff]  }
  0xe0   : > { %6927 = vmatprep.subr.bf16.mxu1 %v9918_v42  ;;  %v9990_v41 = vld [vmem:[%s11543_s18 + $0xb24] ss:$16 sps:$4 sm:$0xff]   ;;  %v11817_v42 = vrot.slane %v1419_v36, %v11608_v51  ;;  %v10048_v36 = vld [vmem:[%s11543_s18 + $0xfe0] ss:$16 sps:$4 sm:$0xff]  }
  0xe2   : > { %6887 = vmatpush1.bf16.msra.mxu0 %v9913_v46  ;;  %v9988_v46 = vld [vmem:[%s11543_s18 + $0xb20] ss:$16 sps:$4 sm:$0xff]  }
  0xe3   : > { %6928 = vmatpush1.bf16.msra.mxu1 %v9916_v47  ;;  %6888 = vmatprep.subr.bf16.mxu0 %v9921_v48  ;;  %v9993_v47 = vld [vmem:[%s11543_s18 + $0x904] ss:$16 sps:$4 sm:$0xff]  }
  0xe4   : > { %6929 = vmatprep.subr.bf16.mxu1 %v9924_v49  ;;  %v9996_v48 = vld [vmem:[%s11543_s18 + $0xb04] ss:$16 sps:$4 sm:$0xff]   ;;  %v1435_v49 = vcombine.high %v11817_v42, %v11817_v42 }
  0xe6   : > { %6889 = vmatpush1.bf16.msra.mxu0 %v9919_v50  ;;  %v11827_v50 = vrot.slane %v11747_v37, %v11608_v51  ;;  %v9997_v37 = vld [vmem:[%s11543_s18 + $0xce0] ss:$16 sps:$4 sm:$0xff]  }
  0xe7   : > { %6930 = vmatpush1.bf16.msra.mxu1 %v9922_v52  ;;  %6890 = vmatprep.subr.bf16.mxu0 %v9927_v53  ;;  %v9991_v52 = vld [vmem:[%s11543_s18 + $0x900] ss:$16 sps:$4 sm:$0xff]  }
  0xe8   : > { %6931 = vmatprep.subr.bf16.mxu1 %v9930_v54  ;;  %v9994_v53 = vld [vmem:[%s11543_s18 + $0xb00] ss:$16 sps:$4 sm:$0xff]   ;;  %v9999_v54 = vld [vmem:[%s11543_s18 + $0xce4] ss:$16 sps:$4 sm:$0xff]  }
  0xea   : > { %6891 = vmatpush1.bf16.msra.mxu0 %v9925_v55  ;;  %v10002_v55 = vld [vmem:[%s11543_s18 + $0xee4] ss:$16 sps:$4 sm:$0xff]  }
  0xeb   : > { %6932 = vmatpush1.bf16.msra.mxu1 %v9928_v56  ;;  %6892 = vmatprep.subr.bf16.mxu0 %v9933_v57  ;;  %v11834_v56 = vrot.slane %v1435_v49, %v11608_v51  ;;  %v11838_v57 = vcombine.high %v11827_v50, %v11827_v50  ;;  %v10065_v49 = vld [vmem:[%s11543_s18 + $0xd84] ss:$16 sps:$4 sm:$0xff]  }
  0xec   : > { %6933 = vmatprep.subr.bf16.mxu1 %v9936_v58  ;;  %v10000_v58 = vld [vmem:[%s11543_s18 + $0xee0] ss:$16 sps:$4 sm:$0xff]  }
  0xee   : > { %6893 = vmatpush1.bf16.msra.mxu0 %v9931_v59  ;;  %v10005_v59 = vld [vmem:[%s11543_s18 + $0xcc4] ss:$16 sps:$4 sm:$0xff]  }
  0xef   : > { %6934 = vmatpush1.bf16.msra.mxu1 %v9934_v60  ;;  %6894 = vmatprep.subr.bf16.mxu0 %v9939_v61  ;;  %v10008_v60 = vld [vmem:[%s11543_s18 + $0xec4] ss:$16 sps:$4 sm:$0xff]   ;;  %v11846_v61 = vcombine.high %v11834_v56, %v11834_v56 }
  0xf0   : > { %6935 = vmatprep.subr.bf16.mxu1 %v9942_v63  ;;  %v10003_v63 = vld [vmem:[%s11543_s18 + $0xcc0] ss:$16 sps:$4 sm:$0xff]  }
  0xf2   : > { %6895 = vmatpush1.bf16.msra.mxu0 %v9937_v0  ;;  %v10006_v0 = vld [vmem:[%s11543_s18 + $0xec0] ss:$16 sps:$4 sm:$0xff]  }
  0xf3   : > { %6936 = vmatpush1.bf16.msra.mxu1 %v9940_v1  ;;  %6896 = vmatprep.subr.bf16.mxu0 %v9945_v3  ;;  %v10011_v1 = vld [vmem:[%s11543_s18 + $0xca4] ss:$16 sps:$4 sm:$0xff]  }
  0xf4   : > { %6937 = vmatprep.subr.bf16.mxu1 %v9948_v4  ;;  %v10014_v3 = vld [vmem:[%s11543_s18 + $0xea4] ss:$16 sps:$4 sm:$0xff]   ;;  %v10009_v4 = vld [vmem:[%s11543_s18 + $0xca0] ss:$16 sps:$4 sm:$0xff]  }
  0xf6   : > { %6897 = vmatpush1.bf16.msra.mxu0 %v9943_v5  ;;  %v10012_v5 = vld [vmem:[%s11543_s18 + $0xea0] ss:$16 sps:$4 sm:$0xff]  }
  0xf7   : > { %6938 = vmatpush1.bf16.msra.mxu1 %v9946_v6  ;;  %6898 = vmatprep.subr.bf16.mxu0 %v9951_v7  ;;  %v10017_v6 = vld [vmem:[%s11543_s18 + $0xc84] ss:$16 sps:$4 sm:$0xff]  }
  0xf8   : > { %6939 = vmatprep.subr.bf16.mxu1 %v9954_v9  ;;  %v10020_v7 = vld [vmem:[%s11543_s18 + $0xe84] ss:$16 sps:$4 sm:$0xff]   ;;  %v10015_v9 = vld [vmem:[%s11543_s18 + $0xc80] ss:$16 sps:$4 sm:$0xff]  }
  0xfa   : > { %6899 = vmatpush2.bf16.msra.mxu0 %v9949_v10  ;;  %v10018_v10 = vld [vmem:[%s11543_s18 + $0xe80] ss:$16 sps:$4 sm:$0xff]  }
  0xfb   : > { %6940 = vmatpush2.bf16.msra.mxu1 %v9952_v11  ;;  %6900 = vmatprep.subr.bf16.mxu0 %v9957_v12  ;;  %v10023_v11 = vld [vmem:[%s11543_s18 + $0xc64] ss:$16 sps:$4 sm:$0xff]  }
  0xfc   : > { %6941 = vmatprep.subr.bf16.mxu1 %v9960_v13  ;;  %v10026_v12 = vld [vmem:[%s11543_s18 + $0xe64] ss:$16 sps:$4 sm:$0xff]   ;;  %v10021_v13 = vld [vmem:[%s11543_s18 + $0xc60] ss:$16 sps:$4 sm:$0xff]  }
  0xfe   : > { %6901 = vmatpush2.bf16.msra.mxu0 %v9955_v14  ;;  %v10024_v14 = vld [vmem:[%s11543_s18 + $0xe60] ss:$16 sps:$4 sm:$0xff]  }
  0xff   : > { %6942 = vmatpush2.bf16.msra.mxu1 %v9958_v16  ;;  %6902 = vmatprep.subr.bf16.mxu0 %v9963_v17  ;;  %v10029_v16 = vld [vmem:[%s11543_s18 + $0xc44] ss:$16 sps:$4 sm:$0xff]  }
 0x100   : > { %6943 = vmatprep.subr.bf16.mxu1 %v9966_v18  ;;  %v10032_v17 = vld [vmem:[%s11543_s18 + $0xe44] ss:$16 sps:$4 sm:$0xff]   ;;  %v10027_v18 = vld [vmem:[%s11543_s18 + $0xc40] ss:$16 sps:$4 sm:$0xff]  }
 0x102   : > { %6903 = vmatpush2.bf16.msra.mxu0 %v9961_v21  ;;  %v10030_v21 = vld [vmem:[%s11543_s18 + $0xe40] ss:$16 sps:$4 sm:$0xff]  }
 0x103   : > { %6944 = vmatpush2.bf16.msra.mxu1 %v9964_v22  ;;  %6904 = vmatprep.subr.bf16.mxu0 %v9969_v23  ;;  %v10035_v22 = vld [vmem:[%s11543_s18 + $0xc24] ss:$16 sps:$4 sm:$0xff]  }
 0x104   : > { %6945 = vmatprep.subr.bf16.mxu1 %v9972_v24  ;;  %v10038_v23 = vld [vmem:[%s11543_s18 + $0xe24] ss:$16 sps:$4 sm:$0xff]   ;;  %v10033_v24 = vld [vmem:[%s11543_s18 + $0xc20] ss:$16 sps:$4 sm:$0xff]  }
 0x106   : > { %6905 = vmatpush2.bf16.msra.mxu0 %v9967_v26  ;;  %v10036_v26 = vld [vmem:[%s11543_s18 + $0xe20] ss:$16 sps:$4 sm:$0xff]  }
 0x107   : > { %6946 = vmatpush2.bf16.msra.mxu1 %v9970_v27  ;;  %6906 = vmatprep.subr.bf16.mxu0 %v9975_v29  ;;  %v10041_v27 = vld [vmem:[%s11543_s18 + $0xc04] ss:$16 sps:$4 sm:$0xff]  }
 0x108   : > { %6947 = vmatprep.subr.bf16.mxu1 %v9978_v30  ;;  %v10044_v29 = vld [vmem:[%s11543_s18 + $0xe04] ss:$16 sps:$4 sm:$0xff]   ;;  %v10039_v30 = vld [vmem:[%s11543_s18 + $0xc00] ss:$16 sps:$4 sm:$0xff]  }
 0x10a   : > { %6907 = vmatpush2.bf16.msra.mxu0 %v9973_v31  ;;  %v10042_v31 = vld [vmem:[%s11543_s18 + $0xe00] ss:$16 sps:$4 sm:$0xff]  }
 0x10b   : > { %6948 = vmatpush2.bf16.msra.mxu1 %v9976_v33  ;;  %6908 = vmatprep.subr.bf16.mxu0 %v9981_v8  ;;  %v10047_v33 = vld [vmem:[%s11543_s18 + $0xde4] ss:$16 sps:$4 sm:$0xff]  }
 0x10c   : > { %6949 = vmatprep.subr.bf16.mxu1 %v9984_v35  ;;  %v10050_v8 = vld [vmem:[%s11543_s18 + $0xfe4] ss:$16 sps:$4 sm:$0xff]   ;;  %v10045_v35 = vld [vmem:[%s11543_s18 + $0xde0] ss:$16 sps:$4 sm:$0xff]  }
 0x10e   : > { %6909 = vmatpush2.bf16.msra.mxu0 %v9979_v38  ;;  %v10053_v38 = vld [vmem:[%s11543_s18 + $0xdc4] ss:$16 sps:$4 sm:$0xff]  }
 0x10f   : > { %6950 = vmatpush2.bf16.msra.mxu1 %v9982_v39  ;;  %6910 = vmatprep.subr.bf16.mxu0 %v9987_v40  ;;  %v10056_v39 = vld [vmem:[%s11543_s18 + $0xfc4] ss:$16 sps:$4 sm:$0xff]   ;;  %v10051_v40 = vld [vmem:[%s11543_s18 + $0xdc0] ss:$16 sps:$4 sm:$0xff]  }
 0x110   : > { %6951 = vmatprep.subr.bf16.mxu1 %v9990_v41  ;;  %v10054_v41 = vld [vmem:[%s11543_s18 + $0xfc0] ss:$16 sps:$4 sm:$0xff]  }
 0x112   : > { %6911 = vmatpush2.bf16.msra.mxu0 %v9985_v34  ;;  %v10059_v34 = vld [vmem:[%s11543_s18 + $0xda4] ss:$16 sps:$4 sm:$0xff]  }
 0x113   : > { %6952 = vmatpush2.bf16.msra.mxu1 %v9988_v46  ;;  %6912 = vmatprep.subr.bf16.mxu0 %v9993_v47  ;;  %v10062_v46 = vld [vmem:[%s11543_s18 + $0xfa4] ss:$16 sps:$4 sm:$0xff]   ;;  %v10057_v47 = vld [vmem:[%s11543_s18 + $0xda0] ss:$16 sps:$4 sm:$0xff]  }
 0x114   : > { %6953 = vmatprep.subr.bf16.mxu1 %v9996_v48  ;;  %v10060_v48 = vld [vmem:[%s11543_s18 + $0xfa0] ss:$16 sps:$4 sm:$0xff]  }
 0x116   : > { %6913 = vmatpush2.bf16.msra.mxu0 %v9991_v52  ;;  %v10068_v52 = vld [vmem:[%s11543_s18 + $0xf84] ss:$16 sps:$4 sm:$0xff]  }
 0x117   : > { %6954 = vmatpush2.bf16.msra.mxu1 %v9994_v53  ;;  %6964 = vmatprep.subr.bf16.mxu0 %v9999_v54  ;;  %v10063_v53 = vld [vmem:[%s11543_s18 + $0xd80] ss:$16 sps:$4 sm:$0xff]  }
 0x118   : > { %7005 = vmatprep.subr.bf16.mxu1 %v10002_v55  ;;  %v10066_v54 = vld [vmem:[%s11543_s18 + $0xf80] ss:$16 sps:$4 sm:$0xff]   ;;  %v10071_v55 = vld [vmem:[%s11543_s18 + $0xd64] ss:$16 sps:$4 sm:$0xff]  }
 0x119   : > { %6915 = vmatmul.mubr.bf16.vlgmr.msra.gmra.mxu0 %v11827_v50 }
 0x11a   : > { %6956 = vmatmul.mubr.bf16.vlgmr.msra.gmra.mxu1 %v11838_v57  ;;  %6965 = vmatpush1.bf16.msra.mxu0 %v9997_v37  ;;  %v10074_v37 = vld [vmem:[%s11543_s18 + $0xf64] ss:$16 sps:$4 sm:$0xff]  }
 0x11b   : > { %7006 = vmatpush1.bf16.msra.mxu1 %v10000_v58  ;;  %6966 = vmatprep.subr.bf16.mxu0 %v10005_v59  ;;  %v10069_v58 = vld [vmem:[%s11543_s18 + $0xd60] ss:$16 sps:$4 sm:$0xff]  }
 0x11c   : > { %7007 = vmatprep.subr.bf16.mxu1 %v10008_v60  ;;  %6996 = vmatprep.mubr.bf16.mxu0 %v11834_v56  ;;  %v10072_v59 = vld [vmem:[%s11543_s18 + $0xf60] ss:$16 sps:$4 sm:$0xff]   ;;  %v10077_v60 = vld [vmem:[%s11543_s18 + $0xd44] ss:$16 sps:$4 sm:$0xff]  }
 0x11d   : > { %7037 = vmatprep.mubr.bf16.mxu1 %v11846_v61 }
 0x11e   : > { %6967 = vmatpush1.bf16.msra.mxu0 %v10003_v63  ;;  %v10080_v63 = vld [vmem:[%s11543_s18 + $0xf44] ss:$16 sps:$4 sm:$0xff]  }
 0x11f   : > { %7008 = vmatpush1.bf16.msra.mxu1 %v10006_v0  ;;  %6968 = vmatprep.subr.bf16.mxu0 %v10011_v1  ;;  %v10075_v0 = vld [vmem:[%s11543_s18 + $0xd40] ss:$16 sps:$4 sm:$0xff]   ;;  %v11902_v1 = vld [vmem:[%s11557_s22 + $0x10] sm:$0xff] }
 0x120   : > { %7009 = vmatprep.subr.bf16.mxu1 %v10014_v3  ;;  %v10078_v3 = vld [vmem:[%s11543_s18 + $0xf40] ss:$16 sps:$4 sm:$0xff]  }
 0x122   : > { %6969 = vmatpush1.bf16.msra.mxu0 %v10009_v4  ;;  %v10083_v4 = vld [vmem:[%s11543_s18 + $0xd24] ss:$16 sps:$4 sm:$0xff]  }
 0x123   : > { %7010 = vmatpush1.bf16.msra.mxu1 %v10012_v5  ;;  %6970 = vmatprep.subr.bf16.mxu0 %v10017_v6  ;;  %v10086_v5 = vld [vmem:[%s11543_s18 + $0xf24] ss:$16 sps:$4 sm:$0xff]   ;;  %v11909_v6 = vrot.slane %v11902_v1, %v11608_v51 }
 0x124   : > { %7011 = vmatprep.subr.bf16.mxu1 %v10020_v7  ;;  %v10081_v7 = vld [vmem:[%s11543_s18 + $0xd20] ss:$16 sps:$4 sm:$0xff]  }
 0x126   : > { %6971 = vmatpush1.bf16.msra.mxu0 %v10015_v9  ;;  %v10084_v9 = vld [vmem:[%s11543_s18 + $0xf20] ss:$16 sps:$4 sm:$0xff]  }
 0x127   : > { %7012 = vmatpush1.bf16.msra.mxu1 %v10018_v10  ;;  %6972 = vmatprep.subr.bf16.mxu0 %v10023_v11  ;;  %v10089_v10 = vld [vmem:[%s11543_s18 + $0xd04] ss:$16 sps:$4 sm:$0xff]  }
 0x128   : > { %7013 = vmatprep.subr.bf16.mxu1 %v10026_v12  ;;  %v10092_v11 = vld [vmem:[%s11543_s18 + $0xf04] ss:$16 sps:$4 sm:$0xff]   ;;  %v1483_v12 = vcombine.high %v11909_v6, %v11909_v6 }
 0x12a   : > { %6973 = vmatpush1.bf16.msra.mxu0 %v10021_v13  ;;  %v10087_v13 = vld [vmem:[%s11543_s18 + $0xd00] ss:$16 sps:$4 sm:$0xff]  }
 0x12b   : > { %7014 = vmatpush1.bf16.msra.mxu1 %v10024_v14  ;;  %6974 = vmatprep.subr.bf16.mxu0 %v10029_v16  ;;  %v11920_v14 = vrot.slane %v11817_v42, %v11608_v51  ;;  %v10090_v16 = vld [vmem:[%s11543_s18 + $0xf00] ss:$16 sps:$4 sm:$0xff]  }
 0x12c   : > { %7015 = vmatprep.subr.bf16.mxu1 %v10032_v17  ;;  %v10096_v17 = vld [vmem:[%s11543_s18 + $0x10e4] ss:$16 sps:$4 sm:$0xff]   ;;  %v10097_v42 = vld [vmem:[%s11543_s18 + $0x12e0] ss:$16 sps:$4 sm:$0xff]  }
 0x12e   : > { %6975 = vmatpush1.bf16.msra.mxu0 %v10027_v18  ;;  %v10099_v18 = vld [vmem:[%s11543_s18 + $0x12e4] ss:$16 sps:$4 sm:$0xff]  }
 0x12f   : > { %7016 = vmatpush1.bf16.msra.mxu1 %v10030_v21  ;;  %6976 = vmatprep.subr.bf16.mxu0 %v10035_v22  ;;  %v11926_v21 = vrot.slane %v1483_v12, %v11608_v51  ;;  %v11930_v22 = vcombine.high %v11920_v14, %v11920_v14  ;;  %v10141_v12 = vld [vmem:[%s11543_s18 + $0x1204] ss:$16 sps:$4 sm:$0xff]  }
 0x130   : > { %7017 = vmatprep.subr.bf16.mxu1 %v10038_v23  ;;  %v10094_v23 = vld [vmem:[%s11543_s18 + $0x10e0] ss:$16 sps:$4 sm:$0xff]  }
 0x132   : > { %6977 = vmatpush1.bf16.msra.mxu0 %v10033_v24  ;;  %v10102_v24 = vld [vmem:[%s11543_s18 + $0x10c4] ss:$16 sps:$4 sm:$0xff]  }
 0x133   : > { %7018 = vmatpush1.bf16.msra.mxu1 %v10036_v26  ;;  %6978 = vmatprep.subr.bf16.mxu0 %v10041_v27  ;;  %v10105_v26 = vld [vmem:[%s11543_s18 + $0x12c4] ss:$16 sps:$4 sm:$0xff]   ;;  %v11938_v27 = vcombine.high %v11926_v21, %v11926_v21 }
 0x134   : > { %7019 = vmatprep.subr.bf16.mxu1 %v10044_v29 }
 0x136   : > { %6979 = vmatpush1.bf16.msra.mxu0 %v10039_v30 }
 0x137   : > { %7020 = vmatpush1.bf16.msra.mxu1 %v10042_v31  ;;  %6980 = vmatprep.subr.bf16.mxu0 %v10047_v33  ;;  %v10100_v31 = vld [vmem:[%s11543_s18 + $0x10c0] ss:$16 sps:$4 sm:$0xff]  }
 0x138   : > { %7021 = vmatprep.subr.bf16.mxu1 %v10050_v8  ;;  %v10103_v33 = vld [vmem:[%s11543_s18 + $0x12c0] ss:$16 sps:$4 sm:$0xff]  }
 0x13a   : > { %6981 = vmatpush2.bf16.msra.mxu0 %v10045_v35 }
 0x13b   : > { %7022 = vmatpush2.bf16.msra.mxu1 %v10048_v36  ;;  %6982 = vmatprep.subr.bf16.mxu0 %v10053_v38  ;;  %v10108_v38 = vld [vmem:[%s11543_s18 + $0x10a4] ss:$16 sps:$4 sm:$0xff]  }
 0x13c   : > { %7023 = vmatprep.subr.bf16.mxu1 %v10056_v39  ;;  %v10111_v39 = vld [vmem:[%s11543_s18 + $0x12a4] ss:$16 sps:$4 sm:$0xff]  }
 0x13e   : > { %6983 = vmatpush2.bf16.msra.mxu0 %v10051_v40 }
 0x13f   : > { %7024 = vmatpush2.bf16.msra.mxu1 %v10054_v41  ;;  %6984 = vmatprep.subr.bf16.mxu0 %v10059_v34  ;;  %v10106_v41 = vld [vmem:[%s11543_s18 + $0x10a0] ss:$16 sps:$4 sm:$0xff]  }
 0x140   : > { %7025 = vmatprep.subr.bf16.mxu1 %v10062_v46  ;;  %v10109_v34 = vld [vmem:[%s11543_s18 + $0x12a0] ss:$16 sps:$4 sm:$0xff]  }
 0x142   : > { %6985 = vmatpush2.bf16.msra.mxu0 %v10057_v47 }
 0x143   : > { %7026 = vmatpush2.bf16.msra.mxu1 %v10060_v48  ;;  %6986 = vmatprep.subr.bf16.mxu0 %v10065_v49 }
 0x144   : > { %7027 = vmatprep.subr.bf16.mxu1 %v10068_v52  ;;  %v10114_v52 = vld [vmem:[%s11543_s18 + $0x1084] ss:$16 sps:$4 sm:$0xff]  }
 0x146   : > { %6987 = vmatpush2.bf16.msra.mxu0 %v10063_v53  ;;  %v10117_v53 = vld [vmem:[%s11543_s18 + $0x1284] ss:$16 sps:$4 sm:$0xff]  }
 0x147   : > { %7028 = vmatpush2.bf16.msra.mxu1 %v10066_v54  ;;  %6988 = vmatprep.subr.bf16.mxu0 %v10071_v55  ;;  %v10112_v54 = vld [vmem:[%s11543_s18 + $0x1080] ss:$16 sps:$4 sm:$0xff]  }
 0x148   : > { %7029 = vmatprep.subr.bf16.mxu1 %v10074_v37  ;;  %v10115_v55 = vld [vmem:[%s11543_s18 + $0x1280] ss:$16 sps:$4 sm:$0xff]   ;;  %v10120_v37 = vld [vmem:[%s11543_s18 + $0x1064] ss:$16 sps:$4 sm:$0xff]  }
 0x14a   : > { %6989 = vmatpush2.bf16.msra.mxu0 %v10069_v58  ;;  %v10123_v58 = vld [vmem:[%s11543_s18 + $0x1264] ss:$16 sps:$4 sm:$0xff]  }
 0x14b   : > { %7030 = vmatpush2.bf16.msra.mxu1 %v10072_v59  ;;  %6990 = vmatprep.subr.bf16.mxu0 %v10077_v60  ;;  %v10118_v59 = vld [vmem:[%s11543_s18 + $0x1060] ss:$16 sps:$4 sm:$0xff]  }
 0x14c   : > { %7031 = vmatprep.subr.bf16.mxu1 %v10080_v63  ;;  %v10121_v60 = vld [vmem:[%s11543_s18 + $0x1260] ss:$16 sps:$4 sm:$0xff]   ;;  %v10126_v63 = vld [vmem:[%s11543_s18 + $0x1044] ss:$16 sps:$4 sm:$0xff]  }
 0x14e   : > { %6991 = vmatpush2.bf16.msra.mxu0 %v10075_v0  ;;  %v10129_v0 = vld [vmem:[%s11543_s18 + $0x1244] ss:$16 sps:$4 sm:$0xff]  }
 0x14f   : > { %7032 = vmatpush2.bf16.msra.mxu1 %v10078_v3  ;;  %6992 = vmatprep.subr.bf16.mxu0 %v10083_v4  ;;  %v10124_v3 = vld [vmem:[%s11543_s18 + $0x1040] ss:$16 sps:$4 sm:$0xff]  }
 0x150   : > { %7033 = vmatprep.subr.bf16.mxu1 %v10086_v5  ;;  %v10127_v4 = vld [vmem:[%s11543_s18 + $0x1240] ss:$16 sps:$4 sm:$0xff]   ;;  %v10132_v5 = vld [vmem:[%s11543_s18 + $0x1024] ss:$16 sps:$4 sm:$0xff]  }
 0x152   : > { %6993 = vmatpush2.bf16.msra.mxu0 %v10081_v7  ;;  %v10135_v7 = vld [vmem:[%s11543_s18 + $0x1224] ss:$16 sps:$4 sm:$0xff]  }
 0x153   : > { %7034 = vmatpush2.bf16.msra.mxu1 %v10084_v9  ;;  %6994 = vmatprep.subr.bf16.mxu0 %v10089_v10  ;;  %v10130_v9 = vld [vmem:[%s11543_s18 + $0x1020] ss:$16 sps:$4 sm:$0xff]  }
 0x154   : > { %7035 = vmatprep.subr.bf16.mxu1 %v10092_v11  ;;  %v10133_v10 = vld [vmem:[%s11543_s18 + $0x1220] ss:$16 sps:$4 sm:$0xff]   ;;  %v10138_v11 = vld [vmem:[%s11543_s18 + $0x1004] ss:$16 sps:$4 sm:$0xff]  }
 0x156   : > { %6995 = vmatpush2.bf16.msra.mxu0 %v10087_v13  ;;  %v10136_v13 = vld [vmem:[%s11543_s18 + $0x1000] ss:$16 sps:$4 sm:$0xff]  }
 0x157   : > { %7036 = vmatpush2.bf16.msra.mxu1 %v10090_v16  ;;  %7046 = vmatprep.subr.bf16.mxu0 %v10096_v17  ;;  %v10139_v16 = vld [vmem:[%s11543_s18 + $0x1200] ss:$16 sps:$4 sm:$0xff]   ;;  %v10144_v17 = vld [vmem:[%s11543_s18 + $0x11e4] ss:$16 sps:$4 sm:$0xff]  }
 0x158   : > { %7087 = vmatprep.subr.bf16.mxu1 %v10099_v18  ;;  %v10147_v18 = vld [vmem:[%s11543_s18 + $0x13e4] ss:$16 sps:$4 sm:$0xff]  }
 0x159   : > { %v6752_v29 = vpop.f32.mrf.mxu0  ;;  %6997 = vmatmul.mubr.bf16.vlgmr.msra.gmra.mxu0 %v11920_v14 }
 0x15a   : > { %v6793_v30 = vpop.f32.mrf.mxu1  ;;  %7038 = vmatmul.mubr.bf16.vlgmr.msra.gmra.mxu1 %v11930_v22  ;;  %7047 = vmatpush1.bf16.msra.mxu0 %v10094_v23  ;;  %v10142_v23 = vld [vmem:[%s11543_s18 + $0x11e0] ss:$16 sps:$4 sm:$0xff]  }
 0x15b   : > { %v11944_v8 = vadd.f32 %v6793_v30, %v6752_v29  ;;  %7088 = vmatpush1.bf16.msra.mxu1 %v10097_v42  ;;  %v6754_v35 = vpop.f32.mrf.mxu0  ;;  %7048 = vmatprep.subr.bf16.mxu0 %v10102_v24  ;;  %v10145_v42 = vld [vmem:[%s11543_s18 + $0x13e0] ss:$16 sps:$4 sm:$0xff]   ;;  %v10150_v24 = vld [vmem:[%s11543_s18 + $0x11c4] ss:$16 sps:$4 sm:$0xff]  }
 0x15c   : > { %v6795_v36 = vpop.f32.mrf.mxu1  ;;  %7089 = vmatprep.subr.bf16.mxu1 %v10105_v26  ;;  %7078 = vmatprep.mubr.bf16.mxu0 %v11926_v21  ;;  %v10153_v26 = vld [vmem:[%s11543_s18 + $0x13c4] ss:$16 sps:$4 sm:$0xff]   ;;  %v10148_v29 = vld [vmem:[%s11543_s18 + $0x11c0] ss:$16 sps:$4 sm:$0xff]  }
 0x15d   : > { %v11948_v40 = vadd.f32 %v6795_v36, %v6754_v35  ;;  %7119 = vmatprep.mubr.bf16.mxu1 %v11938_v27  ;;  %v6756_v46 = vpop.f32.mrf.mxu0  ;;  %v10151_v30 = vld [vmem:[%s11543_s18 + $0x13c0] ss:$16 sps:$4 sm:$0xff]  }
 0x15e   : > { %v6797_v47 = vpop.f32.mrf.mxu1  ;;  %7049 = vmatpush1.bf16.msra.mxu0 %v10100_v31  ;;  %v10156_v31 = vld [vmem:[%s11543_s18 + $0x11a4] ss:$16 sps:$4 sm:$0xff]   ;;  %v10154_v35 = vld [vmem:[%s11543_s18 + $0x11a0] ss:$16 sps:$4 sm:$0xff]  }
 0x15f   : > { %7090 = vmatpush1.bf16.msra.mxu1 %v10103_v33  ;;  %v6757_v48 = vpop.f32.mrf.mxu0  ;;  %7050 = vmatprep.subr.bf16.mxu0 %v10108_v38  ;;  %v10159_v33 = vld [vmem:[%s11543_s18 + $0x13a4] ss:$16 sps:$4 sm:$0xff]   ;;  %v10157_v36 = vld [vmem:[%s11543_s18 + $0x13a0] ss:$16 sps:$4 sm:$0xff]  }
 0x160   : > { %v6798_v49 = vpop.f32.mrf.mxu1  ;;  %7091 = vmatprep.subr.bf16.mxu1 %v10111_v39  ;;  %v10162_v38 = vld [vmem:[%s11543_s18 + $0x1184] ss:$16 sps:$4 sm:$0xff]   ;;  %v10166_v48 = vld [vmem:[%s11543_s18 + $0x1160] ss:$16 sps:$4 sm:$0xff]  }
 0x161   : > { %v10165_v39 = vld [vmem:[%s11543_s18 + $0x1384] ss:$16 sps:$4 sm:$0xff]   ;;  %v10169_v49 = vld [vmem:[%s11543_s18 + $0x1360] ss:$16 sps:$4 sm:$0xff]  }
 0x162   : > { %7051 = vmatpush1.bf16.msra.mxu0 %v10106_v41  ;;  %v10160_v41 = vld [vmem:[%s11543_s18 + $0x1180] ss:$16 sps:$4 sm:$0xff]   ;;  %v10168_v46 = vld [vmem:[%s11543_s18 + $0x1164] ss:$16 sps:$4 sm:$0xff]  }
 0x163   : > { %7092 = vmatpush1.bf16.msra.mxu1 %v10109_v34  ;;  %7052 = vmatprep.subr.bf16.mxu0 %v10114_v52  ;;  %v10163_v34 = vld [vmem:[%s11543_s18 + $0x1380] ss:$16 sps:$4 sm:$0xff]   ;;  %v10171_v47 = vld [vmem:[%s11543_s18 + $0x1364] ss:$16 sps:$4 sm:$0xff]  }
 0x164   : > { %7093 = vmatprep.subr.bf16.mxu1 %v10117_v53  ;;  %v10174_v52 = vld [vmem:[%s11543_s18 + $0x1144] ss:$16 sps:$4 sm:$0xff]  }
 0x165   : > { %v10177_v53 = vld [vmem:[%s11543_s18 + $0x1344] ss:$16 sps:$4 sm:$0xff]  }
 0x166   : > { %7053 = vmatpush1.bf16.msra.mxu0 %v10112_v54  ;;  %v1468_v54 = vcombine.high %v11902_v1, %v11902_v1  ;;  %v10178_v1 = vld [vmem:[%s11543_s18 + $0x1120] ss:$16 sps:$4 sm:$0xff]  }
 0x167   : > { %7094 = vmatpush1.bf16.msra.mxu1 %v10115_v55  ;;  %7054 = vmatprep.subr.bf16.mxu0 %v10120_v37  ;;  %v10172_v55 = vld [vmem:[%s11543_s18 + $0x1140] ss:$16 sps:$4 sm:$0xff]  }
 0x168   : > { %7095 = vmatprep.subr.bf16.mxu1 %v10123_v58  ;;  %v10175_v37 = vld [vmem:[%s11543_s18 + $0x1340] ss:$16 sps:$4 sm:$0xff]   ;;  %v10180_v58 = vld [vmem:[%s11543_s18 + $0x1124] ss:$16 sps:$4 sm:$0xff]  }
 0x16a   : > { %7055 = vmatpush1.bf16.msra.mxu0 %v10118_v59  ;;  %v10183_v59 = vld [vmem:[%s11543_s18 + $0x1324] ss:$16 sps:$4 sm:$0xff]  }
 0x16b   : > { %7096 = vmatpush1.bf16.msra.mxu1 %v10121_v60  ;;  %7056 = vmatprep.subr.bf16.mxu0 %v10126_v63  ;;  %v12003_v60 = vrot.slane %v1468_v54, %v11608_v51  ;;  %v10181_v63 = vld [vmem:[%s11543_s18 + $0x1320] ss:$16 sps:$4 sm:$0xff]  }
 0x16c   : > { %7097 = vmatprep.subr.bf16.mxu1 %v10129_v0  ;;  %v10186_v0 = vld [vmem:[%s11543_s18 + $0x1104] ss:$16 sps:$4 sm:$0xff]   ;;  %v10211_v54 = vld [vmem:[%s11543_s18 + $0x1680] ss:$16 sps:$4 sm:$0xff]  }
 0x16e   : > { %7057 = vmatpush1.bf16.msra.mxu0 %v10124_v3  ;;  %v10189_v3 = vld [vmem:[%s11543_s18 + $0x1304] ss:$16 sps:$4 sm:$0xff]  }
 0x16f   : > { %7098 = vmatpush1.bf16.msra.mxu1 %v10127_v4  ;;  %7058 = vmatprep.subr.bf16.mxu0 %v10132_v5  ;;  %v1484_v4 = vcombine.high %v12003_v60, %v12003_v60  ;;  %v12013_v5 = vrot.slane %v11909_v6, %v11608_v51 }
 0x170   : > { %7099 = vmatprep.subr.bf16.mxu1 %v10135_v7  ;;  %v10184_v7 = vld [vmem:[%s11543_s18 + $0x1100] ss:$16 sps:$4 sm:$0xff]  }
 0x171   : > { %v12026_v6 = vcombine.high %v12013_v5, %v12013_v5 }
 0x172   : > { %7059 = vmatpush1.bf16.msra.mxu0 %v10130_v9  ;;  %v10187_v9 = vld [vmem:[%s11543_s18 + $0x1300] ss:$16 sps:$4 sm:$0xff]  }
 0x173   : > { %7100 = vmatpush1.bf16.msra.mxu1 %v10133_v10  ;;  %7060 = vmatprep.subr.bf16.mxu0 %v10138_v11  ;;  %v10192_v10 = vld [vmem:[%s11543_s18 + $0x14e4] ss:$16 sps:$4 sm:$0xff]  }
 0x174   : > { %7101 = vmatprep.subr.bf16.mxu1 %v10141_v12  ;;  %v10195_v11 = vld [vmem:[%s11543_s18 + $0x16e4] ss:$16 sps:$4 sm:$0xff]   ;;  %v10190_v12 = vld [vmem:[%s11543_s18 + $0x14e0] ss:$16 sps:$4 sm:$0xff]  }
 0x176   : > { %7061 = vmatpush1.bf16.msra.mxu0 %v10136_v13  ;;  %v10193_v13 = vld [vmem:[%s11543_s18 + $0x16e0] ss:$16 sps:$4 sm:$0xff]  }
 0x177   : > { %7102 = vmatpush1.bf16.msra.mxu1 %v10139_v16  ;;  %7062 = vmatprep.subr.bf16.mxu0 %v10144_v17  ;;  %v12022_v16 = vrot.slane %v1484_v4, %v11608_v51  ;;  %v10198_v17 = vld [vmem:[%s11543_s18 + $0x14c4] ss:$16 sps:$4 sm:$0xff]  }
 0x178   : > { %7103 = vmatprep.subr.bf16.mxu1 %v10147_v18  ;;  %v10201_v18 = vld [vmem:[%s11543_s18 + $0x16c4] ss:$16 sps:$4 sm:$0xff]  }
 0x179   : > { %v10228_v4 = vld [vmem:[%s11543_s18 + $0x1424] ss:$16 sps:$4 sm:$0xff]  }
 0x17a   : > { %7063 = vmatpush2.bf16.msra.mxu0 %v10142_v23  ;;  %v10196_v23 = vld [vmem:[%s11543_s18 + $0x14c0] ss:$16 sps:$4 sm:$0xff]  }
 0x17b   : > { %7104 = vmatpush2.bf16.msra.mxu1 %v10145_v42  ;;  %7064 = vmatprep.subr.bf16.mxu0 %v10150_v24  ;;  %v10199_v42 = vld [vmem:[%s11543_s18 + $0x16c0] ss:$16 sps:$4 sm:$0xff]   ;;  %v12034_v24 = vcombine.high %v12022_v16, %v12022_v16 }
 0x17c   : > { %7105 = vmatprep.subr.bf16.mxu1 %v10153_v26 }
 0x17e   : > { %7065 = vmatpush2.bf16.msra.mxu0 %v10148_v29 }
 0x17f   : > { %7106 = vmatpush2.bf16.msra.mxu1 %v10151_v30  ;;  %7066 = vmatprep.subr.bf16.mxu0 %v10156_v31 }
 0x180   : > { %7107 = vmatprep.subr.bf16.mxu1 %v10159_v33 }
 0x182   : > { %7067 = vmatpush2.bf16.msra.mxu0 %v10154_v35  ;;  %v10204_v35 = vld [vmem:[%s11543_s18 + $0x14a4] ss:$16 sps:$4 sm:$0xff]  }
 0x183   : > { %7108 = vmatpush2.bf16.msra.mxu1 %v10157_v36  ;;  %7068 = vmatprep.subr.bf16.mxu0 %v10162_v38  ;;  %v10207_v36 = vld [vmem:[%s11543_s18 + $0x16a4] ss:$16 sps:$4 sm:$0xff]  }
 0x184   : > { %7109 = vmatprep.subr.bf16.mxu1 %v10165_v39 }
 0x186   : > { %7069 = vmatpush2.bf16.msra.mxu0 %v10160_v41  ;;  %v10202_v41 = vld [vmem:[%s11543_s18 + $0x14a0] ss:$16 sps:$4 sm:$0xff]  }
 0x187   : > { %7110 = vmatpush2.bf16.msra.mxu1 %v10163_v34  ;;  %7070 = vmatprep.subr.bf16.mxu0 %v10168_v46  ;;  %v10205_v34 = vld [vmem:[%s11543_s18 + $0x16a0] ss:$16 sps:$4 sm:$0xff]  }
 0x188   : > { %7111 = vmatprep.subr.bf16.mxu1 %v10171_v47 }
 0x18a   : > { %7071 = vmatpush2.bf16.msra.mxu0 %v10166_v48 }
 0x18b   : > { %7112 = vmatpush2.bf16.msra.mxu1 %v10169_v49  ;;  %7072 = vmatprep.subr.bf16.mxu0 %v10174_v52  ;;  %v10213_v52 = vld [vmem:[%s11543_s18 + $0x1684] ss:$16 sps:$4 sm:$0xff]  }
 0x18c   : > { %7113 = vmatprep.subr.bf16.mxu1 %v10177_v53  ;;  %v10208_v53 = vld [vmem:[%s11543_s18 + $0x1480] ss:$16 sps:$4 sm:$0xff]  }
 0x18e   : > { %7073 = vmatpush2.bf16.msra.mxu0 %v10172_v55  ;;  %v10216_v55 = vld [vmem:[%s11543_s18 + $0x1464] ss:$16 sps:$4 sm:$0xff]  }
 0x18f   : > { %7114 = vmatpush2.bf16.msra.mxu1 %v10175_v37  ;;  %7074 = vmatprep.subr.bf16.mxu0 %v10180_v58  ;;  %v10219_v37 = vld [vmem:[%s11543_s18 + $0x1664] ss:$16 sps:$4 sm:$0xff]   ;;  %v10214_v58 = vld [vmem:[%s11543_s18 + $0x1460] ss:$16 sps:$4 sm:$0xff]  }
 0x190   : > { %7115 = vmatprep.subr.bf16.mxu1 %v10183_v59  ;;  %v10217_v59 = vld [vmem:[%s11543_s18 + $0x1660] ss:$16 sps:$4 sm:$0xff]  }
 0x192   : > { %7075 = vmatpush2.bf16.msra.mxu0 %v10178_v1  ;;  %v10222_v1 = vld [vmem:[%s11543_s18 + $0x1444] ss:$16 sps:$4 sm:$0xff]  }
 0x193   : > { %7116 = vmatpush2.bf16.msra.mxu1 %v10181_v63  ;;  %7076 = vmatprep.subr.bf16.mxu0 %v10186_v0  ;;  %v10225_v63 = vld [vmem:[%s11543_s18 + $0x1644] ss:$16 sps:$4 sm:$0xff]   ;;  %v10220_v0 = vld [vmem:[%s11543_s18 + $0x1440] ss:$16 sps:$4 sm:$0xff]  }
 0x194   : > { %7117 = vmatprep.subr.bf16.mxu1 %v10189_v3  ;;  %v10223_v3 = vld [vmem:[%s11543_s18 + $0x1640] ss:$16 sps:$4 sm:$0xff]  }
 0x196   : > { %7077 = vmatpush2.bf16.msra.mxu0 %v10184_v7  ;;  %v10231_v7 = vld [vmem:[%s11543_s18 + $0x1624] ss:$16 sps:$4 sm:$0xff]  }
 0x197   : > { %7118 = vmatpush2.bf16.msra.mxu1 %v10187_v9  ;;  %7128 = vmatprep.subr.bf16.mxu0 %v10192_v10  ;;  %v10226_v9 = vld [vmem:[%s11543_s18 + $0x1420] ss:$16 sps:$4 sm:$0xff]  }
 0x198   : > { %7169 = vmatprep.subr.bf16.mxu1 %v10195_v11  ;;  %v10229_v10 = vld [vmem:[%s11543_s18 + $0x1620] ss:$16 sps:$4 sm:$0xff]   ;;  %v10234_v11 = vld [vmem:[%s11543_s18 + $0x1404] ss:$16 sps:$4 sm:$0xff]  }
 0x199   : > { %v6834_v26 = vpop.f32.mrf.mxu0  ;;  %7079 = vmatmul.mubr.bf16.vlgmr.msra.gmra.mxu0 %v12013_v5 }
 0x19a   : > { %v6875_v29 = vpop.f32.mrf.mxu1  ;;  %7120 = vmatmul.mubr.bf16.vlgmr.msra.gmra.mxu1 %v12026_v6  ;;  %v6835_v30 = vadd.f32 %v6834_v26, %v11944_v8  ;;  %7129 = vmatpush1.bf16.msra.mxu0 %v10190_v12  ;;  %v10237_v12 = vld [vmem:[%s11543_s18 + $0x1604] ss:$16 sps:$4 sm:$0xff]   ;;  %v10241_v26 = vld [vmem:[%s11543_s18 + $0x17e0] ss:$16 sps:$4 sm:$0xff]  }
 0x19b   : > { %7170 = vmatpush1.bf16.msra.mxu1 %v10193_v13  ;;  %v6836_v31 = vpop.f32.mrf.mxu0  ;;  %7130 = vmatprep.subr.bf16.mxu0 %v10198_v17  ;;  %v10232_v13 = vld [vmem:[%s11543_s18 + $0x1400] ss:$16 sps:$4 sm:$0xff]  }
 0x19c   : > { %v6877_v33 = vpop.f32.mrf.mxu1  ;;  %7171 = vmatprep.subr.bf16.mxu1 %v10201_v18  ;;  %v12041_v38 = vadd.f32 %v6875_v29, %v6835_v30  ;;  %v6837_v39 = vadd.f32 %v6836_v31, %v11948_v40  ;;  %7160 = vmatprep.mubr.bf16.mxu0 %v12022_v16  ;;  %v10210_v40 = vld [vmem:[%s11543_s18 + $0x1484] ss:$16 sps:$4 sm:$0xff]   ;;  %v10235_v17 = vld [vmem:[%s11543_s18 + $0x1600] ss:$16 sps:$4 sm:$0xff]  }
 0x19d   : > { %7201 = vmatprep.mubr.bf16.mxu1 %v12034_v24  ;;  %v6838_v8 = vpop.f32.mrf.mxu0  ;;  %v10240_v18 = vld [vmem:[%s11543_s18 + $0x15e4] ss:$16 sps:$4 sm:$0xff]   ;;  %v10244_v31 = vld [vmem:[%s11543_s18 + $0x15c0] ss:$16 sps:$4 sm:$0xff]  }
 0x19e   : > { %v6879_v46 = vpop.f32.mrf.mxu1  ;;  %v12048_v47 = vadd.f32 %v6877_v33, %v6837_v39  ;;  %7131 = vmatpush1.bf16.msra.mxu0 %v10196_v23  ;;  %v10243_v23 = vld [vmem:[%s11543_s18 + $0x17e4] ss:$16 sps:$4 sm:$0xff]   ;;  %v10247_v33 = vld [vmem:[%s11543_s18 + $0x17c0] ss:$16 sps:$4 sm:$0xff]  }
 0x19f   : > { %7172 = vmatpush1.bf16.msra.mxu1 %v10199_v42  ;;  %v6839_v48 = vpop.f32.mrf.mxu0  ;;  %7132 = vmatprep.subr.bf16.mxu0 %v10204_v35  ;;  %v10238_v42 = vld [vmem:[%s11543_s18 + $0x15e0] ss:$16 sps:$4 sm:$0xff]   ;;  %v10246_v29 = vld [vmem:[%s11543_s18 + $0x15c4] ss:$16 sps:$4 sm:$0xff]  }
 0x1a0   : > { %v6880_v49 = vpop.f32.mrf.mxu1  ;;  %7173 = vmatprep.subr.bf16.mxu1 %v10207_v36  ;;  %v10249_v30 = vld [vmem:[%s11543_s18 + $0x17c4] ss:$16 sps:$4 sm:$0xff]   ;;  %v10250_v39 = vld [vmem:[%s11543_s18 + $0x15a0] ss:$16 sps:$4 sm:$0xff]  }
 0x1a1   : > { %v10252_v35 = vld [vmem:[%s11543_s18 + $0x15a4] ss:$16 sps:$4 sm:$0xff]   ;;  %v10256_v46 = vld [vmem:[%s11543_s18 + $0x1580] ss:$16 sps:$4 sm:$0xff]  }
 0x1a2   : > { %7133 = vmatpush1.bf16.msra.mxu0 %v10202_v41  ;;  %v10255_v36 = vld [vmem:[%s11543_s18 + $0x17a4] ss:$16 sps:$4 sm:$0xff]   ;;  %v10253_v41 = vld [vmem:[%s11543_s18 + $0x17a0] ss:$16 sps:$4 sm:$0xff]  }
 0x1a3   : > { %7174 = vmatpush1.bf16.msra.mxu1 %v10205_v34  ;;  %7134 = vmatprep.subr.bf16.mxu0 %v10210_v40  ;;  %v10258_v34 = vld [vmem:[%s11543_s18 + $0x1584] ss:$16 sps:$4 sm:$0xff]   ;;  %v10259_v48 = vld [vmem:[%s11543_s18 + $0x1780] ss:$16 sps:$4 sm:$0xff]  }
 0x1a4   : > { %7175 = vmatprep.subr.bf16.mxu1 %v10213_v52  ;;  %v10261_v8 = vld [vmem:[%s11543_s18 + $0x1784] ss:$16 sps:$4 sm:$0xff]   ;;  %v10262_v52 = vld [vmem:[%s11543_s18 + $0x1560] ss:$16 sps:$4 sm:$0xff]  }
 0x1a5   : > { %v10264_v49 = vld [vmem:[%s11543_s18 + $0x1564] ss:$16 sps:$4 sm:$0xff]  }
 0x1a6   : > { %7135 = vmatpush1.bf16.msra.mxu0 %v10208_v53  ;;  %v10267_v40 = vld [vmem:[%s11543_s18 + $0x1764] ss:$16 sps:$4 sm:$0xff]   ;;  %v10265_v53 = vld [vmem:[%s11543_s18 + $0x1760] ss:$16 sps:$4 sm:$0xff]  }
 0x1a7   : > { %7176 = vmatpush1.bf16.msra.mxu1 %v10211_v54  ;;  %7136 = vmatprep.subr.bf16.mxu0 %v10216_v55  ;;  %v10270_v54 = vld [vmem:[%s11543_s18 + $0x1544] ss:$16 sps:$4 sm:$0xff]  }
 0x1a8   : > { %7177 = vmatprep.subr.bf16.mxu1 %v10219_v37  ;;  %v10273_v55 = vld [vmem:[%s11543_s18 + $0x1744] ss:$16 sps:$4 sm:$0xff]  }
 0x1a9   : > { %v12093_v37 = vld [vmem:[%s11557_s22 + $0x18] sm:$0xff] }
 0x1aa   : > { %7137 = vmatpush1.bf16.msra.mxu0 %v10214_v58  ;;  %v10268_v58 = vld [vmem:[%s11543_s18 + $0x1540] ss:$16 sps:$4 sm:$0xff]  }
 0x1ab   : > { %7178 = vmatpush1.bf16.msra.mxu1 %v10217_v59  ;;  %7138 = vmatprep.subr.bf16.mxu0 %v10222_v1  ;;  %v10271_v59 = vld [vmem:[%s11543_s18 + $0x1740] ss:$16 sps:$4 sm:$0xff]   ;;  %v10276_v1 = vld [vmem:[%s11543_s18 + $0x1524] ss:$16 sps:$4 sm:$0xff]  }
 0x1ac   : > { %7179 = vmatprep.subr.bf16.mxu1 %v10225_v63  ;;  %v10279_v63 = vld [vmem:[%s11543_s18 + $0x1724] ss:$16 sps:$4 sm:$0xff]  }
 0x1ae   : > { %7139 = vmatpush1.bf16.msra.mxu0 %v10220_v0  ;;  %v12101_v0 = vrot.slane %v12093_v37, %v11608_v51 }
 0x1af   : > { %7180 = vmatpush1.bf16.msra.mxu1 %v10223_v3  ;;  %7140 = vmatprep.subr.bf16.mxu0 %v10228_v4  ;;  %v10274_v3 = vld [vmem:[%s11543_s18 + $0x1520] ss:$16 sps:$4 sm:$0xff]  }
 0x1b0   : > { %7181 = vmatprep.subr.bf16.mxu1 %v10231_v7  ;;  %v10277_v4 = vld [vmem:[%s11543_s18 + $0x1720] ss:$16 sps:$4 sm:$0xff]   ;;  %v10282_v7 = vld [vmem:[%s11543_s18 + $0x1504] ss:$16 sps:$4 sm:$0xff]  }
 0x1b2   : > { %7141 = vmatpush1.bf16.msra.mxu0 %v10226_v9  ;;  %v10285_v9 = vld [vmem:[%s11543_s18 + $0x1704] ss:$16 sps:$4 sm:$0xff]  }
 0x1b3   : > { %7182 = vmatpush1.bf16.msra.mxu1 %v10229_v10  ;;  %7142 = vmatprep.subr.bf16.mxu0 %v10234_v11  ;;  %v1532_v10 = vcombine.high %v12101_v0, %v12101_v0  ;;  %v12111_v11 = vrot.slane %v12003_v60, %v11608_v51 }
 0x1b4   : > { %7183 = vmatprep.subr.bf16.mxu1 %v10237_v12  ;;  %v10280_v12 = vld [vmem:[%s11543_s18 + $0x1500] ss:$16 sps:$4 sm:$0xff]  }
 0x1b5   : > { %v12124_v60 = vcombine.high %v12111_v11, %v12111_v11 }
 0x1b6   : > { %7143 = vmatpush1.bf16.msra.mxu0 %v10232_v13  ;;  %v10283_v13 = vld [vmem:[%s11543_s18 + $0x1700] ss:$16 sps:$4 sm:$0xff]  }
 0x1b7   : > { %7184 = vmatpush1.bf16.msra.mxu1 %v10235_v17  ;;  %7144 = vmatprep.subr.bf16.mxu0 %v10240_v18  ;;  %v10289_v17 = vld [vmem:[%s11543_s18 + $0x18e4] ss:$16 sps:$4 sm:$0xff]  }
 0x1b8   : > { %7185 = vmatprep.subr.bf16.mxu1 %v10243_v23  ;;  %v10292_v18 = vld [vmem:[%s11543_s18 + $0x1ae4] ss:$16 sps:$4 sm:$0xff]   ;;  %v10287_v23 = vld [vmem:[%s11543_s18 + $0x18e0] ss:$16 sps:$4 sm:$0xff]  }
 0x1ba   : > { %7145 = vmatpush2.bf16.msra.mxu0 %v10238_v42  ;;  %v10290_v42 = vld [vmem:[%s11543_s18 + $0x1ae0] ss:$16 sps:$4 sm:$0xff]  }
 0x1bb   : > { %7186 = vmatpush2.bf16.msra.mxu1 %v10241_v26  ;;  %7146 = vmatprep.subr.bf16.mxu0 %v10246_v29  ;;  %v12120_v26 = vrot.slane %v1532_v10, %v11608_v51  ;;  %v10295_v29 = vld [vmem:[%s11543_s18 + $0x18c4] ss:$16 sps:$4 sm:$0xff]   ;;  %v10314_v10 = vld [vmem:[%s11543_s18 + $0x1a60] ss:$16 sps:$4 sm:$0xff]  }
 0x1bc   : > { %7187 = vmatprep.subr.bf16.mxu1 %v10249_v30  ;;  %v10298_v30 = vld [vmem:[%s11543_s18 + $0x1ac4] ss:$16 sps:$4 sm:$0xff]  }
 0x1be   : > { %7147 = vmatpush2.bf16.msra.mxu0 %v10244_v31  ;;  %v10293_v31 = vld [vmem:[%s11543_s18 + $0x18c0] ss:$16 sps:$4 sm:$0xff]  }
 0x1bf   : > { %7188 = vmatpush2.bf16.msra.mxu1 %v10247_v33  ;;  %7148 = vmatprep.subr.bf16.mxu0 %v10252_v35  ;;  %v10296_v33 = vld [vmem:[%s11543_s18 + $0x1ac0] ss:$16 sps:$4 sm:$0xff]   ;;  %v12132_v35 = vcombine.high %v12120_v26, %v12120_v26 }
 0x1c0   : > { %7189 = vmatprep.subr.bf16.mxu1 %v10255_v36 }
 0x1c2   : > { %7149 = vmatpush2.bf16.msra.mxu0 %v10250_v39 }
 0x1c3   : > { %7190 = vmatpush2.bf16.msra.mxu1 %v10253_v41  ;;  %7150 = vmatprep.subr.bf16.mxu0 %v10258_v34 }
 0x1c4   : > { %7191 = vmatprep.subr.bf16.mxu1 %v10261_v8 }
 0x1c6   : > { %7151 = vmatpush2.bf16.msra.mxu0 %v10256_v46  ;;  %v10301_v46 = vld [vmem:[%s11543_s18 + $0x18a4] ss:$16 sps:$4 sm:$0xff]  }
 0x1c7   : > { %7192 = vmatpush2.bf16.msra.mxu1 %v10259_v48  ;;  %7152 = vmatprep.subr.bf16.mxu0 %v10264_v49  ;;  %v10304_v48 = vld [vmem:[%s11543_s18 + $0x1aa4] ss:$16 sps:$4 sm:$0xff]  }
 0x1c8   : > { %7193 = vmatprep.subr.bf16.mxu1 %v10267_v40 }
 0x1ca   : > { %7153 = vmatpush2.bf16.msra.mxu0 %v10262_v52  ;;  %v10299_v52 = vld [vmem:[%s11543_s18 + $0x18a0] ss:$16 sps:$4 sm:$0xff]  }
 0x1cb   : > { %7194 = vmatpush2.bf16.msra.mxu1 %v10265_v53  ;;  %7154 = vmatprep.subr.bf16.mxu0 %v10270_v54  ;;  %v10302_v53 = vld [vmem:[%s11543_s18 + $0x1aa0] ss:$16 sps:$4 sm:$0xff]  }
 0x1cc   : > { %7195 = vmatprep.subr.bf16.mxu1 %v10273_v55 }
 0x1ce   : > { %7155 = vmatpush2.bf16.msra.mxu0 %v10268_v58 }
 0x1cf   : > { %7196 = vmatpush2.bf16.msra.mxu1 %v10271_v59  ;;  %7156 = vmatprep.subr.bf16.mxu0 %v10276_v1  ;;  %v10310_v1 = vld [vmem:[%s11543_s18 + $0x1a84] ss:$16 sps:$4 sm:$0xff]  }
 0x1d0   : > { %7197 = vmatprep.subr.bf16.mxu1 %v10279_v63  ;;  %v10305_v63 = vld [vmem:[%s11543_s18 + $0x1880] ss:$16 sps:$4 sm:$0xff]  }
 0x1d2   : > { %7157 = vmatpush2.bf16.msra.mxu0 %v10274_v3  ;;  %v10308_v3 = vld [vmem:[%s11543_s18 + $0x1a80] ss:$16 sps:$4 sm:$0xff]  }
 0x1d3   : > { %7198 = vmatpush2.bf16.msra.mxu1 %v10277_v4  ;;  %7158 = vmatprep.subr.bf16.mxu0 %v10282_v7  ;;  %v10313_v4 = vld [vmem:[%s11543_s18 + $0x1864] ss:$16 sps:$4 sm:$0xff]  }
 0x1d4   : > { %7199 = vmatprep.subr.bf16.mxu1 %v10285_v9  ;;  %v10316_v7 = vld [vmem:[%s11543_s18 + $0x1a64] ss:$16 sps:$4 sm:$0xff]   ;;  %v10311_v9 = vld [vmem:[%s11543_s18 + $0x1860] ss:$16 sps:$4 sm:$0xff]  }
 0x1d6   : > { %7159 = vmatpush2.bf16.msra.mxu0 %v10280_v12  ;;  %v10319_v12 = vld [vmem:[%s11543_s18 + $0x1844] ss:$16 sps:$4 sm:$0xff]  }
 0x1d7   : > { %7200 = vmatpush2.bf16.msra.mxu1 %v10283_v13  ;;  %7210 = vmatprep.subr.bf16.mxu0 %v10289_v17  ;;  %v10322_v13 = vld [vmem:[%s11543_s18 + $0x1a44] ss:$16 sps:$4 sm:$0xff]   ;;  %v10317_v17 = vld [vmem:[%s11543_s18 + $0x1840] ss:$16 sps:$4 sm:$0xff]  }
 0x1d8   : > { %7251 = vmatprep.subr.bf16.mxu1 %v10292_v18  ;;  %v10320_v18 = vld [vmem:[%s11543_s18 + $0x1a40] ss:$16 sps:$4 sm:$0xff]  }
 0x1d9   : > { %v6916_v36 = vpop.f32.mrf.mxu0  ;;  %7161 = vmatmul.mubr.bf16.vlgmr.msra.gmra.mxu0 %v12111_v11 }
 0x1da   : > { %v6957_v39 = vpop.f32.mrf.mxu1  ;;  %7202 = vmatmul.mubr.bf16.vlgmr.msra.gmra.mxu1 %v12124_v60  ;;  %v6917_v41 = vadd.f32 %v6916_v36, %v12041_v38  ;;  %7211 = vmatpush1.bf16.msra.mxu0 %v10287_v23  ;;  %v10325_v23 = vld [vmem:[%s11543_s18 + $0x1824] ss:$16 sps:$4 sm:$0xff]   ;;  %v10329_v36 = vld [vmem:[%s11543_s18 + $0x1800] ss:$16 sps:$4 sm:$0xff]  }
 0x1db   : > { %7252 = vmatpush1.bf16.msra.mxu1 %v10290_v42  ;;  %v6918_v34 = vpop.f32.mrf.mxu0  ;;  %7212 = vmatprep.subr.bf16.mxu0 %v10295_v29  ;;  %v10328_v42 = vld [vmem:[%s11543_s18 + $0x1a24] ss:$16 sps:$4 sm:$0xff]   ;;  %v10323_v29 = vld [vmem:[%s11543_s18 + $0x1820] ss:$16 sps:$4 sm:$0xff]  }
 0x1dc   : > { %v6959_v8 = vpop.f32.mrf.mxu1  ;;  %7253 = vmatprep.subr.bf16.mxu1 %v10298_v30  ;;  %v12139_v49 = vadd.f32 %v6957_v39, %v6917_v41  ;;  %v6919_v40 = vadd.f32 %v6918_v34, %v12048_v47  ;;  %7242 = vmatprep.mubr.bf16.mxu0 %v12120_v26  ;;  %v10307_v47 = vld [vmem:[%s11543_s18 + $0x1884] ss:$16 sps:$4 sm:$0xff]   ;;  %v10326_v30 = vld [vmem:[%s11543_s18 + $0x1a20] ss:$16 sps:$4 sm:$0xff]  }
 0x1dd   : > { %7283 = vmatprep.mubr.bf16.mxu1 %v12132_v35  ;;  %v6920_v38 = vpop.f32.mrf.mxu0  ;;  %v10332_v39 = vld [vmem:[%s11543_s18 + $0x1a00] ss:$16 sps:$4 sm:$0xff]   ;;  %v10337_v41 = vld [vmem:[%s11543_s18 + $0x19e4] ss:$16 sps:$4 sm:$0xff]  }
 0x1de   : > { %v6961_v54 = vpop.f32.mrf.mxu1  ;;  %v12146_v55 = vadd.f32 %v6959_v8, %v6919_v40  ;;  %7213 = vmatpush1.bf16.msra.mxu0 %v10293_v31  ;;  %v10331_v31 = vld [vmem:[%s11543_s18 + $0x1804] ss:$16 sps:$4 sm:$0xff]   ;;  %v10335_v8 = vld [vmem:[%s11543_s18 + $0x19e0] ss:$16 sps:$4 sm:$0xff]  }
 0x1df   : > { %7254 = vmatpush1.bf16.msra.mxu1 %v10296_v33  ;;  %v6921_v58 = vpop.f32.mrf.mxu0  ;;  %7214 = vmatprep.subr.bf16.mxu0 %v10301_v46  ;;  %v10334_v33 = vld [vmem:[%s11543_s18 + $0x1a04] ss:$16 sps:$4 sm:$0xff]   ;;  %v10338_v46 = vld [vmem:[%s11543_s18 + $0x1be0] ss:$16 sps:$4 sm:$0xff]  }
 0x1e0   : > { %v6962_v59 = vpop.f32.mrf.mxu1  ;;  %7255 = vmatprep.subr.bf16.mxu1 %v10304_v48  ;;  %v10340_v34 = vld [vmem:[%s11543_s18 + $0x1be4] ss:$16 sps:$4 sm:$0xff]   ;;  %v10347_v58 = vld [vmem:[%s11543_s18 + $0x19a0] ss:$16 sps:$4 sm:$0xff]  }
 0x1e1   : > { %v10343_v48 = vld [vmem:[%s11543_s18 + $0x19c4] ss:$16 sps:$4 sm:$0xff]   ;;  %v10350_v59 = vld [vmem:[%s11543_s18 + $0x1ba0] ss:$16 sps:$4 sm:$0xff]  }
 0x1e2   : > { %7215 = vmatpush1.bf16.msra.mxu0 %v10299_v52  ;;  %v10346_v40 = vld [vmem:[%s11543_s18 + $0x1bc4] ss:$16 sps:$4 sm:$0xff]   ;;  %v10341_v52 = vld [vmem:[%s11543_s18 + $0x19c0] ss:$16 sps:$4 sm:$0xff]  }
 0x1e3   : > { %7256 = vmatpush1.bf16.msra.mxu1 %v10302_v53  ;;  %7216 = vmatprep.subr.bf16.mxu0 %v10307_v47  ;;  %v10344_v53 = vld [vmem:[%s11543_s18 + $0x1bc0] ss:$16 sps:$4 sm:$0xff]   ;;  %v10349_v38 = vld [vmem:[%s11543_s18 + $0x19a4] ss:$16 sps:$4 sm:$0xff]  }
 0x1e4   : > { %7257 = vmatprep.subr.bf16.mxu1 %v10310_v1  ;;  %v10352_v54 = vld [vmem:[%s11543_s18 + $0x1ba4] ss:$16 sps:$4 sm:$0xff]  }
 0x1e5   : > { %v10355_v47 = vld [vmem:[%s11543_s18 + $0x1984] ss:$16 sps:$4 sm:$0xff]  }
 0x1e6   : > { %7217 = vmatpush1.bf16.msra.mxu0 %v10305_v63  ;;  %v10358_v1 = vld [vmem:[%s11543_s18 + $0x1b84] ss:$16 sps:$4 sm:$0xff]   ;;  %v10353_v63 = vld [vmem:[%s11543_s18 + $0x1980] ss:$16 sps:$4 sm:$0xff]  }
 0x1e7   : > { %7258 = vmatpush1.bf16.msra.mxu1 %v10308_v3  ;;  %7218 = vmatprep.subr.bf16.mxu0 %v10313_v4  ;;  %v10356_v3 = vld [vmem:[%s11543_s18 + $0x1b80] ss:$16 sps:$4 sm:$0xff]   ;;  %v10361_v4 = vld [vmem:[%s11543_s18 + $0x1964] ss:$16 sps:$4 sm:$0xff]  }
 0x1e8   : > { %7259 = vmatprep.subr.bf16.mxu1 %v10316_v7  ;;  %v10364_v7 = vld [vmem:[%s11543_s18 + $0x1b64] ss:$16 sps:$4 sm:$0xff]  }
 0x1ea   : > { %7219 = vmatpush1.bf16.msra.mxu0 %v10311_v9  ;;  %v10359_v9 = vld [vmem:[%s11543_s18 + $0x1960] ss:$16 sps:$4 sm:$0xff]  }
 0x1eb   : > { %7260 = vmatpush1.bf16.msra.mxu1 %v10314_v10  ;;  %7220 = vmatprep.subr.bf16.mxu0 %v10319_v12  ;;  %v10362_v10 = vld [vmem:[%s11543_s18 + $0x1b60] ss:$16 sps:$4 sm:$0xff]   ;;  %v10367_v12 = vld [vmem:[%s11543_s18 + $0x1944] ss:$16 sps:$4 sm:$0xff]  }
 0x1ec   : > { %7261 = vmatprep.subr.bf16.mxu1 %v10322_v13  ;;  %v10370_v13 = vld [vmem:[%s11543_s18 + $0x1b44] ss:$16 sps:$4 sm:$0xff]  }
 0x1ee   : > { %7221 = vmatpush1.bf16.msra.mxu0 %v10317_v17  ;;  %v1517_v17 = vcombine.high %v12093_v37, %v12093_v37  ;;  %v10371_v37 = vld [vmem:[%s11543_s18 + $0x1920] ss:$16 sps:$4 sm:$0xff]  }
 0x1ef   : > { %7262 = vmatpush1.bf16.msra.mxu1 %v10320_v18  ;;  %7222 = vmatprep.subr.bf16.mxu0 %v10325_v23  ;;  %v10365_v18 = vld [vmem:[%s11543_s18 + $0x1940] ss:$16 sps:$4 sm:$0xff]  }
 0x1f0   : > { %7263 = vmatprep.subr.bf16.mxu1 %v10328_v42  ;;  %v10368_v23 = vld [vmem:[%s11543_s18 + $0x1b40] ss:$16 sps:$4 sm:$0xff]   ;;  %v10373_v42 = vld [vmem:[%s11543_s18 + $0x1924] ss:$16 sps:$4 sm:$0xff]  }
 0x1f2   : > { %7223 = vmatpush1.bf16.msra.mxu0 %v10323_v29  ;;  %v10376_v29 = vld [vmem:[%s11543_s18 + $0x1b24] ss:$16 sps:$4 sm:$0xff]  }
 0x1f3   : > { %7264 = vmatpush1.bf16.msra.mxu1 %v10326_v30  ;;  %7224 = vmatprep.subr.bf16.mxu0 %v10331_v31  ;;  %v12197_v30 = vrot.slane %v1517_v17, %v11608_v51  ;;  %v10374_v31 = vld [vmem:[%s11543_s18 + $0x1b20] ss:$16 sps:$4 sm:$0xff]  }
 0x1f4   : > { %7265 = vmatprep.subr.bf16.mxu1 %v10334_v33  ;;  %v10379_v33 = vld [vmem:[%s11543_s18 + $0x1904] ss:$16 sps:$4 sm:$0xff]   ;;  %v10395_v17 = vld [vmem:[%s11543_s18 + $0x1ca0] ss:$16 sps:$4 sm:$0xff]  }
 0x1f6   : > { %7225 = vmatpush1.bf16.msra.mxu0 %v10329_v36  ;;  %v10382_v36 = vld [vmem:[%s11543_s18 + $0x1b04] ss:$16 sps:$4 sm:$0xff]  }
 0x1f7   : > { %7266 = vmatpush1.bf16.msra.mxu1 %v10332_v39  ;;  %7226 = vmatprep.subr.bf16.mxu0 %v10337_v41  ;;  %v1533_v39 = vcombine.high %v12197_v30, %v12197_v30  ;;  %v12207_v41 = vrot.slane %v12101_v0, %v11608_v51 }
 0x1f8   : > { %7267 = vmatprep.subr.bf16.mxu1 %v10340_v34  ;;  %v10377_v34 = vld [vmem:[%s11543_s18 + $0x1900] ss:$16 sps:$4 sm:$0xff]  }
 0x1f9   : > { %v12220_v0 = vcombine.high %v12207_v41, %v12207_v41 }
 0x1fa   : > { %7227 = vmatpush2.bf16.msra.mxu0 %v10335_v8  ;;  %v10380_v8 = vld [vmem:[%s11543_s18 + $0x1b00] ss:$16 sps:$4 sm:$0xff]  }
 0x1fb   : > { %7268 = vmatpush2.bf16.msra.mxu1 %v10338_v46  ;;  %7228 = vmatprep.subr.bf16.mxu0 %v10343_v48  ;;  %v10385_v46 = vld [vmem:[%s11543_s18 + $0x1ce4] ss:$16 sps:$4 sm:$0xff]  }
 0x1fc   : > { %7269 = vmatprep.subr.bf16.mxu1 %v10346_v40  ;;  %v10388_v48 = vld [vmem:[%s11543_s18 + $0x1ee4] ss:$16 sps:$4 sm:$0xff]   ;;  %v10383_v40 = vld [vmem:[%s11543_s18 + $0x1ce0] ss:$16 sps:$4 sm:$0xff]  }
 0x1fe   : > { %7229 = vmatpush2.bf16.msra.mxu0 %v10341_v52  ;;  %v10386_v52 = vld [vmem:[%s11543_s18 + $0x1ee0] ss:$16 sps:$4 sm:$0xff]  }
 0x1ff   : > { %7270 = vmatpush2.bf16.msra.mxu1 %v10344_v53  ;;  %7230 = vmatprep.subr.bf16.mxu0 %v10349_v38  ;;  %v12216_v53 = vrot.slane %v1533_v39, %v11608_v51  ;;  %v10391_v38 = vld [vmem:[%s11543_s18 + $0x1cc4] ss:$16 sps:$4 sm:$0xff]  }
 0x200   : > { %7271 = vmatprep.subr.bf16.mxu1 %v10352_v54  ;;  %v10394_v54 = vld [vmem:[%s11543_s18 + $0x1ec4] ss:$16 sps:$4 sm:$0xff]  }
 0x201   : > { %v10409_v39 = vld [vmem:[%s11543_s18 + $0x1c64] ss:$16 sps:$4 sm:$0xff]  }
 0x202   : > { %7231 = vmatpush2.bf16.msra.mxu0 %v10347_v58  ;;  %v10389_v58 = vld [vmem:[%s11543_s18 + $0x1cc0] ss:$16 sps:$4 sm:$0xff]  }
 0x203   : > { %7272 = vmatpush2.bf16.msra.mxu1 %v10350_v59  ;;  %7232 = vmatprep.subr.bf16.mxu0 %v10355_v47  ;;  %v10392_v59 = vld [vmem:[%s11543_s18 + $0x1ec0] ss:$16 sps:$4 sm:$0xff]   ;;  %v12228_v47 = vcombine.high %v12216_v53, %v12216_v53 }
 0x204   : > { %7273 = vmatprep.subr.bf16.mxu1 %v10358_v1 }
 0x206   : > { %7233 = vmatpush2.bf16.msra.mxu0 %v10353_v63 }
 0x207   : > { %7274 = vmatpush2.bf16.msra.mxu1 %v10356_v3  ;;  %7234 = vmatprep.subr.bf16.mxu0 %v10361_v4 }
 0x208   : > { %7275 = vmatprep.subr.bf16.mxu1 %v10364_v7 }
 0x20a   : > { %7235 = vmatpush2.bf16.msra.mxu0 %v10359_v9  ;;  %v10397_v9 = vld [vmem:[%s11543_s18 + $0x1ca4] ss:$16 sps:$4 sm:$0xff]  }
 0x20b   : > { %7276 = vmatpush2.bf16.msra.mxu1 %v10362_v10  ;;  %7236 = vmatprep.subr.bf16.mxu0 %v10367_v12  ;;  %v10400_v10 = vld [vmem:[%s11543_s18 + $0x1ea4] ss:$16 sps:$4 sm:$0xff]  }
 0x20c   : > { %7277 = vmatprep.subr.bf16.mxu1 %v10370_v13 }
 0x20e   : > { %7237 = vmatpush2.bf16.msra.mxu0 %v10365_v18  ;;  %v10398_v18 = vld [vmem:[%s11543_s18 + $0x1ea0] ss:$16 sps:$4 sm:$0xff]  }
 0x20f   : > { %7278 = vmatpush2.bf16.msra.mxu1 %v10368_v23  ;;  %7238 = vmatprep.subr.bf16.mxu0 %v10373_v42 }
 0x210   : > { %7279 = vmatprep.subr.bf16.mxu1 %v10376_v29 }
 0x212   : > { %7239 = vmatpush2.bf16.msra.mxu0 %v10371_v37 }
 0x213   : > { %7280 = vmatpush2.bf16.msra.mxu1 %v10374_v31  ;;  %7240 = vmatprep.subr.bf16.mxu0 %v10379_v33  ;;  %v10406_v31 = vld [vmem:[%s11543_s18 + $0x1e84] ss:$16 sps:$4 sm:$0xff]   ;;  %v10401_v33 = vld [vmem:[%s11543_s18 + $0x1c80] ss:$16 sps:$4 sm:$0xff]  }
 0x214   : > { %7281 = vmatprep.subr.bf16.mxu1 %v10382_v36  ;;  %v10404_v36 = vld [vmem:[%s11543_s18 + $0x1e80] ss:$16 sps:$4 sm:$0xff]  }
 0x216   : > { %7241 = vmatpush2.bf16.msra.mxu0 %v10377_v34  ;;  %v10412_v34 = vld [vmem:[%s11543_s18 + $0x1e64] ss:$16 sps:$4 sm:$0xff]  }
 0x217   : > { %7282 = vmatpush2.bf16.msra.mxu1 %v10380_v8  ;;  %7292 = vmatprep.subr.bf16.mxu0 %v10385_v46  ;;  %v10407_v8 = vld [vmem:[%s11543_s18 + $0x1c60] ss:$16 sps:$4 sm:$0xff]  }
 0x218   : > { %7333 = vmatprep.subr.bf16.mxu1 %v10388_v48  ;;  %v10410_v46 = vld [vmem:[%s11543_s18 + $0x1e60] ss:$16 sps:$4 sm:$0xff]   ;;  %v10415_v48 = vld [vmem:[%s11543_s18 + $0x1c44] ss:$16 sps:$4 sm:$0xff]  }
 0x219   : > { %v6998_v1 = vpop.f32.mrf.mxu0  ;;  %7243 = vmatmul.mubr.bf16.vlgmr.msra.gmra.mxu0 %v12207_v41 }
 0x21a   : > { %v7039_v63 = vpop.f32.mrf.mxu1  ;;  %7284 = vmatmul.mubr.bf16.vlgmr.msra.gmra.mxu1 %v12220_v0  ;;  %v6999_v3 = vadd.f32 %v6998_v1, %v12139_v49  ;;  %7293 = vmatpush1.bf16.msra.mxu0 %v10383_v40  ;;  %v10418_v40 = vld [vmem:[%s11543_s18 + $0x1e44] ss:$16 sps:$4 sm:$0xff]   ;;  %v10422_v1 = vld [vmem:[%s11543_s18 + $0x1e20] ss:$16 sps:$4 sm:$0xff]  }
 0x21b   : > { %7334 = vmatpush1.bf16.msra.mxu1 %v10386_v52  ;;  %v7000_v4 = vpop.f32.mrf.mxu0  ;;  %7294 = vmatprep.subr.bf16.mxu0 %v10391_v38  ;;  %v10413_v52 = vld [vmem:[%s11543_s18 + $0x1c40] ss:$16 sps:$4 sm:$0xff]  }
 0x21c   : > { %v7041_v7 = vpop.f32.mrf.mxu1  ;;  %7335 = vmatprep.subr.bf16.mxu1 %v10394_v54  ;;  %v12235_v12 = vadd.f32 %v7039_v63, %v6999_v3  ;;  %v7001_v13 = vadd.f32 %v7000_v4, %v12146_v55  ;;  %7324 = vmatprep.mubr.bf16.mxu0 %v12216_v53  ;;  %v10403_v55 = vld [vmem:[%s11543_s18 + $0x1c84] ss:$16 sps:$4 sm:$0xff]   ;;  %v10416_v38 = vld [vmem:[%s11543_s18 + $0x1e40] ss:$16 sps:$4 sm:$0xff]  }
 0x21d   : > { %7365 = vmatprep.mubr.bf16.mxu1 %v12228_v47  ;;  %v7002_v49 = vpop.f32.mrf.mxu0  ;;  %v10421_v54 = vld [vmem:[%s11543_s18 + $0x1c24] ss:$16 sps:$4 sm:$0xff]   ;;  %v10425_v4 = vld [vmem:[%s11543_s18 + $0x1c00] ss:$16 sps:$4 sm:$0xff]  }
 0x21e   : > { %v7043_v23 = vpop.f32.mrf.mxu1  ;;  %v12242_v42 = vadd.f32 %v7041_v7, %v7001_v13  ;;  %7295 = vmatpush1.bf16.msra.mxu0 %v10389_v58  ;;  %v10424_v58 = vld [vmem:[%s11543_s18 + $0x1e24] ss:$16 sps:$4 sm:$0xff]   ;;  %v10428_v7 = vld [vmem:[%s11543_s18 + $0x1e00] ss:$16 sps:$4 sm:$0xff]  }
 0x21f   : > { %7336 = vmatpush1.bf16.msra.mxu1 %v10392_v59  ;;  %v7003_v29 = vpop.f32.mrf.mxu0  ;;  %7296 = vmatprep.subr.bf16.mxu0 %v10397_v9  ;;  %v10419_v59 = vld [vmem:[%s11543_s18 + $0x1c20] ss:$16 sps:$4 sm:$0xff]   ;;  %v10427_v63 = vld [vmem:[%s11543_s18 + $0x1c04] ss:$16 sps:$4 sm:$0xff]  }
 0x220   : > { %v7044_v37 = vpop.f32.mrf.mxu1  ;;  %7337 = vmatprep.subr.bf16.mxu1 %v10400_v10  ;;  %v10430_v3 = vld [vmem:[%s11543_s18 + $0x1e04] ss:$16 sps:$4 sm:$0xff]   ;;  %v10431_v13 = vld [vmem:[%s11543_s18 + $0x1de0] ss:$16 sps:$4 sm:$0xff]  }
 0x221   : > { %v10433_v9 = vld [vmem:[%s11543_s18 + $0x1de4] ss:$16 sps:$4 sm:$0xff]   ;;  %v10437_v23 = vld [vmem:[%s11543_s18 + $0x1dc0] ss:$16 sps:$4 sm:$0xff]  }
 0x222   : > { %7297 = vmatpush1.bf16.msra.mxu0 %v10395_v17  ;;  %v10436_v10 = vld [vmem:[%s11543_s18 + $0x1fe4] ss:$16 sps:$4 sm:$0xff]   ;;  %v10434_v17 = vld [vmem:[%s11543_s18 + $0x1fe0] ss:$16 sps:$4 sm:$0xff]  }
 0x223   : > { %7338 = vmatpush1.bf16.msra.mxu1 %v10398_v18  ;;  %7298 = vmatprep.subr.bf16.mxu0 %v10403_v55  ;;  %v10439_v18 = vld [vmem:[%s11543_s18 + $0x1dc4] ss:$16 sps:$4 sm:$0xff]   ;;  %v10440_v29 = vld [vmem:[%s11543_s18 + $0x1fc0] ss:$16 sps:$4 sm:$0xff]  }
 0x224   : > { %7339 = vmatprep.subr.bf16.mxu1 %v10406_v31  ;;  %v10442_v49 = vld [vmem:[%s11543_s18 + $0x1fc4] ss:$16 sps:$4 sm:$0xff]   ;;  %v10443_v31 = vld [vmem:[%s11543_s18 + $0x1da0] ss:$16 sps:$4 sm:$0xff]  }
 0x225   : > { %v10445_v37 = vld [vmem:[%s11543_s18 + $0x1da4] ss:$16 sps:$4 sm:$0xff]  }
 0x226   : > { %7299 = vmatpush1.bf16.msra.mxu0 %v10401_v33  ;;  %v10448_v55 = vld [vmem:[%s11543_s18 + $0x1fa4] ss:$16 sps:$4 sm:$0xff]   ;;  %v10446_v33 = vld [vmem:[%s11543_s18 + $0x1fa0] ss:$16 sps:$4 sm:$0xff]  }
 0x227   : > { %7340 = vmatpush1.bf16.msra.mxu1 %v10404_v36  ;;  %7300 = vmatprep.subr.bf16.mxu0 %v10409_v39  ;;  %v10451_v36 = vld [vmem:[%s11543_s18 + $0x1d84] ss:$16 sps:$4 sm:$0xff]  }
 0x228   : > { %7341 = vmatprep.subr.bf16.mxu1 %v10412_v34  ;;  %v10454_v39 = vld [vmem:[%s11543_s18 + $0x1f84] ss:$16 sps:$4 sm:$0xff]   ;;  %v10449_v34 = vld [vmem:[%s11543_s18 + $0x1d80] ss:$16 sps:$4 sm:$0xff]  }
 0x22a   : > { %7301 = vmatpush1.bf16.msra.mxu0 %v10407_v8  ;;  %v10452_v8 = vld [vmem:[%s11543_s18 + $0x1f80] ss:$16 sps:$4 sm:$0xff]  }
 0x22b   : > { %7342 = vmatpush1.bf16.msra.mxu1 %v10410_v46  ;;  %7302 = vmatprep.subr.bf16.mxu0 %v10415_v48  ;;  %v10457_v46 = vld [vmem:[%s11543_s18 + $0x1d64] ss:$16 sps:$4 sm:$0xff]  }
 0x22c   : > { %7343 = vmatprep.subr.bf16.mxu1 %v10418_v40  ;;  %v10460_v48 = vld [vmem:[%s11543_s18 + $0x1f64] ss:$16 sps:$4 sm:$0xff]   ;;  %v10455_v40 = vld [vmem:[%s11543_s18 + $0x1d60] ss:$16 sps:$4 sm:$0xff]  }
 0x22e   : > { %7303 = vmatpush1.bf16.msra.mxu0 %v10413_v52  ;;  %v10458_v52 = vld [vmem:[%s11543_s18 + $0x1f60] ss:$16 sps:$4 sm:$0xff]  }
 0x22f   : > { %7344 = vmatpush1.bf16.msra.mxu1 %v10416_v38  ;;  %7304 = vmatprep.subr.bf16.mxu0 %v10421_v54  ;;  %v10463_v38 = vld [vmem:[%s11543_s18 + $0x1d44] ss:$16 sps:$4 sm:$0xff]  }
 0x230   : > { %7345 = vmatprep.subr.bf16.mxu1 %v10424_v58  ;;  %v10466_v54 = vld [vmem:[%s11543_s18 + $0x1f44] ss:$16 sps:$4 sm:$0xff]   ;;  %v10461_v58 = vld [vmem:[%s11543_s18 + $0x1d40] ss:$16 sps:$4 sm:$0xff]  }
 0x232   : > { %7305 = vmatpush1.bf16.msra.mxu0 %v10419_v59  ;;  %v10464_v59 = vld [vmem:[%s11543_s18 + $0x1f40] ss:$16 sps:$4 sm:$0xff]  }
 0x233   : > { %7346 = vmatpush1.bf16.msra.mxu1 %v10422_v1  ;;  %7306 = vmatprep.subr.bf16.mxu0 %v10427_v63  ;;  %v10469_v1 = vld [vmem:[%s11543_s18 + $0x1d24] ss:$16 sps:$4 sm:$0xff]  }
 0x234   : > { %7347 = vmatprep.subr.bf16.mxu1 %v10430_v3  ;;  %v10472_v63 = vld [vmem:[%s11543_s18 + $0x1f24] ss:$16 sps:$4 sm:$0xff]   ;;  %v10467_v3 = vld [vmem:[%s11543_s18 + $0x1d20] ss:$16 sps:$4 sm:$0xff]  }
 0x236   : > { %7307 = vmatpush1.bf16.msra.mxu0 %v10425_v4  ;;  %v10470_v4 = vld [vmem:[%s11543_s18 + $0x1f20] ss:$16 sps:$4 sm:$0xff]  }
 0x237   : > { %7348 = vmatpush1.bf16.msra.mxu1 %v10428_v7  ;;  %7308 = vmatprep.subr.bf16.mxu0 %v10433_v9  ;;  %v10475_v7 = vld [vmem:[%s11543_s18 + $0x1d04] ss:$16 sps:$4 sm:$0xff]  }
 0x238   : > { %7349 = vmatprep.subr.bf16.mxu1 %v10436_v10  ;;  %v10478_v9 = vld [vmem:[%s11543_s18 + $0x1f04] ss:$16 sps:$4 sm:$0xff]   ;;  %v12296_v10 = vrot.slane %v12197_v30, %v11608_v51  ;;  %v10488_v51 = vld [vmem:[%s11543_s18 + $0xcc] ss:$16 sps:$4 sm:$0xff]  }
 0x239   : > { %v10491_v30 = vld [vmem:[%s11543_s18 + $0x2cc] ss:$16 sps:$4 sm:$0xff]  }
 0x23a   : > { %7309 = vmatpush2.bf16.msra.mxu0 %v10431_v13  ;;  %v10473_v13 = vld [vmem:[%s11543_s18 + $0x1d00] ss:$16 sps:$4 sm:$0xff]  }
 0x23b   : > { %7350 = vmatpush2.bf16.msra.mxu1 %v10434_v17  ;;  %7310 = vmatprep.subr.bf16.mxu0 %v10439_v18  ;;  %v10476_v17 = vld [vmem:[%s11543_s18 + $0x1f00] ss:$16 sps:$4 sm:$0xff]   ;;  %v10482_v18 = vld [vmem:[%s11543_s18 + $0xec] ss:$16 sps:$4 sm:$0xff]  }
 0x23c   : > { %7351 = vmatprep.subr.bf16.mxu1 %v10442_v49  ;;  %v10485_v49 = vld [vmem:[%s11543_s18 + $0x2ec] ss:$16 sps:$4 sm:$0xff]  }
 0x23e   : > { %7311 = vmatpush2.bf16.msra.mxu0 %v10437_v23  ;;  %v10480_v23 = vld [vmem:[%s11543_s18 + $0xe8] ss:$16 sps:$4 sm:$0xff]  }
 0x23f   : > { %7352 = vmatpush2.bf16.msra.mxu1 %v10440_v29  ;;  %7312 = vmatprep.subr.bf16.mxu0 %v10445_v37  ;;  %v10483_v29 = vld [vmem:[%s11543_s18 + $0x2e8] ss:$16 sps:$4 sm:$0xff]   ;;  %v12306_v37 = vcombine.high %v12296_v10, %v12296_v10 }
 0x240   : > { %7353 = vmatprep.subr.bf16.mxu1 %v10448_v55  ;;  %v10486_v55 = vld [vmem:[%s11543_s18 + $0xc8] ss:$16 sps:$4 sm:$0xff]  }
 0x242   : > { %7313 = vmatpush2.bf16.msra.mxu0 %v10443_v31  ;;  %v10489_v31 = vld [vmem:[%s11543_s18 + $0x2c8] ss:$16 sps:$4 sm:$0xff]  }
 0x243   : > { %7354 = vmatpush2.bf16.msra.mxu1 %v10446_v33  ;;  %7314 = vmatprep.subr.bf16.mxu0 %v10451_v36 }
 0x244   : > { %7355 = vmatprep.subr.bf16.mxu1 %v10454_v39 }
 0x246   : > { %7315 = vmatpush2.bf16.msra.mxu0 %v10449_v34 }
 0x247   : > { %7356 = vmatpush2.bf16.msra.mxu1 %v10452_v8  ;;  %7316 = vmatprep.subr.bf16.mxu0 %v10457_v46  ;;  %v10494_v46 = vld [vmem:[%s11543_s18 + $0xac] ss:$16 sps:$4 sm:$0xff]  }
 0x248   : > { %7357 = vmatprep.subr.bf16.mxu1 %v10460_v48  ;;  %v10497_v48 = vld [vmem:[%s11543_s18 + $0x2ac] ss:$16 sps:$4 sm:$0xff]  }
 0x24a   : > { %7317 = vmatpush2.bf16.msra.mxu0 %v10455_v40 }
 0x24b   : > { %7358 = vmatpush2.bf16.msra.mxu1 %v10458_v52  ;;  %7318 = vmatprep.subr.bf16.mxu0 %v10463_v38  ;;  %v10492_v38 = vld [vmem:[%s11543_s18 + $0xa8] ss:$16 sps:$4 sm:$0xff]  }
 0x24c   : > { %7359 = vmatprep.subr.bf16.mxu1 %v10466_v54  ;;  %v10495_v54 = vld [vmem:[%s11543_s18 + $0x2a8] ss:$16 sps:$4 sm:$0xff]  }
 0x24e   : > { %7319 = vmatpush2.bf16.msra.mxu0 %v10461_v58 }
 0x24f   : > { %7360 = vmatpush2.bf16.msra.mxu1 %v10464_v59  ;;  %7320 = vmatprep.subr.bf16.mxu0 %v10469_v1 }
 0x250   : > { %7361 = vmatprep.subr.bf16.mxu1 %v10472_v63 }
 0x252   : > { %7321 = vmatpush2.bf16.msra.mxu0 %v10467_v3  ;;  %v10501_v3 = vld [vmem:[%s11543_s18 + $0x288] ss:$16 sps:$4 sm:$0xff]  }
 0x253   : > { %7362 = vmatpush2.bf16.msra.mxu1 %v10470_v4  ;;  %7322 = vmatprep.subr.bf16.mxu0 %v10475_v7  ;;  %v10506_v4 = vld [vmem:[%s11543_s18 + $0x6c] ss:$16 sps:$4 sm:$0xff]  }
 0x254   : > { %7363 = vmatprep.subr.bf16.mxu1 %v10478_v9  ;;  %v10509_v7 = vld [vmem:[%s11543_s18 + $0x26c] ss:$16 sps:$4 sm:$0xff]   ;;  %v10504_v9 = vld [vmem:[%s11543_s18 + $0x68] ss:$16 sps:$4 sm:$0xff]  }
 0x256   : > { %7323 = vmatpush2.bf16.msra.mxu0 %v10473_v13  ;;  %v10507_v13 = vld [vmem:[%s11543_s18 + $0x268] ss:$16 sps:$4 sm:$0xff]  }
 0x257   : > { %7364 = vmatpush2.bf16.msra.mxu1 %v10476_v17  ;;  %7374 = vmatprep.subr.bf16.mxu0 %v10482_v18  ;;  %v10512_v17 = vld [vmem:[%s11543_s18 + $0x4c] ss:$16 sps:$4 sm:$0xff]  }
 0x258   : > { %7415 = vmatprep.subr.bf16.mxu1 %v10485_v49  ;;  %v10515_v18 = vld [vmem:[%s11543_s18 + $0x24c] ss:$16 sps:$4 sm:$0xff]   ;;  %v10510_v49 = vld [vmem:[%s11543_s18 + $0x48] ss:$16 sps:$4 sm:$0xff]  }
 0x259   : > { %v7080_v33 = vpop.f32.mrf.mxu0  ;;  %7325 = vmatmul.mubr.bf16.vlgmr.msra.gmra.mxu0 %v12296_v10 }
 0x25a   : > { %v7121_v36 = vpop.f32.mrf.mxu1  ;;  %7366 = vmatmul.mubr.bf16.vlgmr.msra.gmra.mxu1 %v12306_v37  ;;  %v7081_v39 = vadd.f32 %v7080_v33, %v12235_v12  ;;  %7375 = vmatpush1.bf16.msra.mxu0 %v10480_v23  ;;  %v10513_v23 = vld [vmem:[%s11543_s18 + $0x248] ss:$16 sps:$4 sm:$0xff]   ;;  %v10527_v33 = vld [vmem:[%s11543_s18 + $0x20c] ss:$16 sps:$4 sm:$0xff]  }
 0x25b   : > { %7416 = vmatpush1.bf16.msra.mxu1 %v10483_v29  ;;  %v7082_v34 = vpop.f32.mrf.mxu0  ;;  %7376 = vmatprep.subr.bf16.mxu0 %v10488_v51  ;;  %v10518_v29 = vld [vmem:[%s11543_s18 + $0x2c] ss:$16 sps:$4 sm:$0xff]  }
 0x25c   : > { %v7123_v8 = vpop.f32.mrf.mxu1  ;;  %7417 = vmatprep.subr.bf16.mxu1 %v10491_v30  ;;  %v12317_v40 = vadd.f32 %v7121_v36, %v7081_v39  ;;  %v7083_v52 = vadd.f32 %v7082_v34, %v12242_v42  ;;  %7406 = vmatprep.mubr.bf16.mxu0 %v11620_v62  ;;  %v10500_v42 = vld [vmem:[%s11543_s18 + $0x8c] ss:$16 sps:$4 sm:$0xff]   ;;  %v10516_v30 = vld [vmem:[%s11543_s18 + $0x28] ss:$16 sps:$4 sm:$0xff]  }
 0x25d   : > { %7447 = vmatprep.mubr.bf16.mxu1 %v11627_v2  ;;  %v7084_v12 = vpop.f32.mrf.mxu0  ;;  %v10503_v62 = vld [vmem:[%s11543_s18 + $0x28c] ss:$16 sps:$4 sm:$0xff]   ;;  %v10498_v2 = vld [vmem:[%s11543_s18 + $0x88] ss:$16 sps:$4 sm:$0xff]  }
 0x25e   : > { %v7125_v58 = vpop.f32.mrf.mxu1  ;;  %v12324_v59 = vadd.f32 %v7123_v8, %v7083_v52  ;;  %7377 = vmatpush1.bf16.msra.mxu0 %v10486_v55  ;;  %v10521_v51 = vld [vmem:[%s11543_s18 + $0x22c] ss:$16 sps:$4 sm:$0xff]   ;;  %v10519_v55 = vld [vmem:[%s11543_s18 + $0x228] ss:$16 sps:$4 sm:$0xff]  }
 0x25f   : > { %7418 = vmatpush1.bf16.msra.mxu1 %v10489_v31  ;;  %v7085_v1 = vpop.f32.mrf.mxu0  ;;  %7378 = vmatprep.subr.bf16.mxu0 %v10494_v46  ;;  %v10524_v31 = vld [vmem:[%s11543_s18 + $0xc] ss:$16 sps:$4 sm:$0xff]   ;;  %v10522_v36 = vld [vmem:[%s11543_s18 + $0x8] ss:$16 sps:$4 sm:$0xff]  }
 0x260   : > { %v7126_v63 = vpop.f32.mrf.mxu1  ;;  %7419 = vmatprep.subr.bf16.mxu1 %v10497_v48  ;;  %v10525_v39 = vld [vmem:[%s11543_s18 + $0x208] ss:$16 sps:$4 sm:$0xff]   ;;  %v10530_v34 = vld [vmem:[%s11543_s18 + $0x1ec] ss:$16 sps:$4 sm:$0xff]  }
 0x261   : > { %v10533_v8 = vld [vmem:[%s11543_s18 + $0x3ec] ss:$16 sps:$4 sm:$0xff]   ;;  %v10528_v46 = vld [vmem:[%s11543_s18 + $0x1e8] ss:$16 sps:$4 sm:$0xff]  }
 0x262   : > { %7379 = vmatpush1.bf16.msra.mxu0 %v10492_v38  ;;  %v10531_v48 = vld [vmem:[%s11543_s18 + $0x3e8] ss:$16 sps:$4 sm:$0xff]   ;;  %v10536_v52 = vld [vmem:[%s11543_s18 + $0x1cc] ss:$16 sps:$4 sm:$0xff]  }
 0x263   : > { %7420 = vmatpush1.bf16.msra.mxu1 %v10495_v54  ;;  %7380 = vmatprep.subr.bf16.mxu0 %v10500_v42  ;;  %v10539_v38 = vld [vmem:[%s11543_s18 + $0x3cc] ss:$16 sps:$4 sm:$0xff]   ;;  %v10534_v54 = vld [vmem:[%s11543_s18 + $0x1c8] ss:$16 sps:$4 sm:$0xff]  }
 0x264   : > { %7421 = vmatprep.subr.bf16.mxu1 %v10503_v62  ;;  %v10537_v12 = vld [vmem:[%s11543_s18 + $0x3c8] ss:$16 sps:$4 sm:$0xff]   ;;  %v10542_v58 = vld [vmem:[%s11543_s18 + $0x1ac] ss:$16 sps:$4 sm:$0xff]  }
 0x265   : > { %v10545_v1 = vld [vmem:[%s11543_s18 + $0x3ac] ss:$16 sps:$4 sm:$0xff]   ;;  %v10540_v63 = vld [vmem:[%s11543_s18 + $0x1a8] ss:$16 sps:$4 sm:$0xff]  }
 0x266   : > { %7381 = vmatpush1.bf16.msra.mxu0 %v10498_v2  ;;  %v10543_v42 = vld [vmem:[%s11543_s18 + $0x3a8] ss:$16 sps:$4 sm:$0xff]   ;;  %v10548_v62 = vld [vmem:[%s11543_s18 + $0x18c] ss:$16 sps:$4 sm:$0xff]  }
 0x267   : > { %7422 = vmatpush1.bf16.msra.mxu1 %v10501_v3  ;;  %7382 = vmatprep.subr.bf16.mxu0 %v10506_v4  ;;  %v10551_v2 = vld [vmem:[%s11543_s18 + $0x38c] ss:$16 sps:$4 sm:$0xff]   ;;  %v10546_v3 = vld [vmem:[%s11543_s18 + $0x188] ss:$16 sps:$4 sm:$0xff]  }
 0x268   : > { %7423 = vmatprep.subr.bf16.mxu1 %v10509_v7  ;;  %v10549_v4 = vld [vmem:[%s11543_s18 + $0x388] ss:$16 sps:$4 sm:$0xff]   ;;  %v10554_v7 = vld [vmem:[%s11543_s18 + $0x16c] ss:$16 sps:$4 sm:$0xff]  }
 0x26a   : > { %7383 = vmatpush1.bf16.msra.mxu0 %v10504_v9  ;;  %v10557_v9 = vld [vmem:[%s11543_s18 + $0x36c] ss:$16 sps:$4 sm:$0xff]  }
 0x26b   : > { %7424 = vmatpush1.bf16.msra.mxu1 %v10507_v13  ;;  %7384 = vmatprep.subr.bf16.mxu0 %v10512_v17  ;;  %v10552_v13 = vld [vmem:[%s11543_s18 + $0x168] ss:$16 sps:$4 sm:$0xff]  }
 0x26c   : > { %7425 = vmatprep.subr.bf16.mxu1 %v10515_v18  ;;  %v10555_v17 = vld [vmem:[%s11543_s18 + $0x368] ss:$16 sps:$4 sm:$0xff]   ;;  %v10560_v18 = vld [vmem:[%s11543_s18 + $0x14c] ss:$16 sps:$4 sm:$0xff]  }
 0x26e   : > { %7385 = vmatpush1.bf16.msra.mxu0 %v10510_v49  ;;  %v10563_v49 = vld [vmem:[%s11543_s18 + $0x34c] ss:$16 sps:$4 sm:$0xff]  }
 0x26f   : > { %7426 = vmatpush1.bf16.msra.mxu1 %v10513_v23  ;;  %7386 = vmatprep.subr.bf16.mxu0 %v10518_v29  ;;  %v10558_v23 = vld [vmem:[%s11543_s18 + $0x148] ss:$16 sps:$4 sm:$0xff]  }
 0x270   : > { %7427 = vmatprep.subr.bf16.mxu1 %v10521_v51  ;;  %v10561_v29 = vld [vmem:[%s11543_s18 + $0x348] ss:$16 sps:$4 sm:$0xff]   ;;  %v10566_v51 = vld [vmem:[%s11543_s18 + $0x12c] ss:$16 sps:$4 sm:$0xff]  }
 0x272   : > { %7387 = vmatpush1.bf16.msra.mxu0 %v10516_v30  ;;  %v10569_v30 = vld [vmem:[%s11543_s18 + $0x32c] ss:$16 sps:$4 sm:$0xff]  }
 0x273   : > { %7428 = vmatpush1.bf16.msra.mxu1 %v10519_v55  ;;  %7388 = vmatprep.subr.bf16.mxu0 %v10524_v31  ;;  %v10564_v55 = vld [vmem:[%s11543_s18 + $0x128] ss:$16 sps:$4 sm:$0xff]  }
 0x274   : > { %7429 = vmatprep.subr.bf16.mxu1 %v10527_v33  ;;  %v10567_v31 = vld [vmem:[%s11543_s18 + $0x328] ss:$16 sps:$4 sm:$0xff]   ;;  %v10572_v33 = vld [vmem:[%s11543_s18 + $0x10c] ss:$16 sps:$4 sm:$0xff]  }
 0x276   : > { %7389 = vmatpush1.bf16.msra.mxu0 %v10522_v36  ;;  %v10575_v36 = vld [vmem:[%s11543_s18 + $0x30c] ss:$16 sps:$4 sm:$0xff]  }
 0x277   : > { %7430 = vmatpush1.bf16.msra.mxu1 %v10525_v39  ;;  %7390 = vmatprep.subr.bf16.mxu0 %v10530_v34  ;;  %v10570_v39 = vld [vmem:[%s11543_s18 + $0x108] ss:$16 sps:$4 sm:$0xff]  }
 0x278   : > { %7431 = vmatprep.subr.bf16.mxu1 %v10533_v8  ;;  %v10573_v34 = vld [vmem:[%s11543_s18 + $0x308] ss:$16 sps:$4 sm:$0xff]   ;;  %v10578_v8 = vld [vmem:[%s11543_s18 + $0x4ec] ss:$16 sps:$4 sm:$0xff]  }
 0x27a   : > { %7391 = vmatpush2.bf16.msra.mxu0 %v10528_v46  ;;  %v10581_v46 = vld [vmem:[%s11543_s18 + $0x6ec] ss:$16 sps:$4 sm:$0xff]  }
 0x27b   : > { %7432 = vmatpush2.bf16.msra.mxu1 %v10531_v48  ;;  %7392 = vmatprep.subr.bf16.mxu0 %v10536_v52  ;;  %v10576_v48 = vld [vmem:[%s11543_s18 + $0x4e8] ss:$16 sps:$4 sm:$0xff]  }
 0x27c   : > { %7433 = vmatprep.subr.bf16.mxu1 %v10539_v38  ;;  %v10579_v52 = vld [vmem:[%s11543_s18 + $0x6e8] ss:$16 sps:$4 sm:$0xff]   ;;  %v10584_v38 = vld [vmem:[%s11543_s18 + $0x4cc] ss:$16 sps:$4 sm:$0xff]  }
 0x27e   : > { %7393 = vmatpush2.bf16.msra.mxu0 %v10534_v54  ;;  %v10587_v54 = vld [vmem:[%s11543_s18 + $0x6cc] ss:$16 sps:$4 sm:$0xff]  }
 0x27f   : > { %7434 = vmatpush2.bf16.msra.mxu1 %v10537_v12  ;;  %7394 = vmatprep.subr.bf16.mxu0 %v10542_v58 }
 0x280   : > { %7435 = vmatprep.subr.bf16.mxu1 %v10545_v1 }
 0x282   : > { %7395 = vmatpush2.bf16.msra.mxu0 %v10540_v63  ;;  %v10582_v63 = vld [vmem:[%s11543_s18 + $0x4c8] ss:$16 sps:$4 sm:$0xff]  }
 0x283   : > { %7436 = vmatpush2.bf16.msra.mxu1 %v10543_v42  ;;  %7396 = vmatprep.subr.bf16.mxu0 %v10548_v62  ;;  %v10585_v42 = vld [vmem:[%s11543_s18 + $0x6c8] ss:$16 sps:$4 sm:$0xff]  }
 0x284   : > { %7437 = vmatprep.subr.bf16.mxu1 %v10551_v2 }
 0x286   : > { %7397 = vmatpush2.bf16.msra.mxu0 %v10546_v3  ;;  %v10590_v3 = vld [vmem:[%s11543_s18 + $0x4ac] ss:$16 sps:$4 sm:$0xff]  }
 0x287   : > { %7438 = vmatpush2.bf16.msra.mxu1 %v10549_v4  ;;  %7398 = vmatprep.subr.bf16.mxu0 %v10554_v7  ;;  %v10593_v4 = vld [vmem:[%s11543_s18 + $0x6ac] ss:$16 sps:$4 sm:$0xff]  }
 0x288   : > { %7439 = vmatprep.subr.bf16.mxu1 %v10557_v9 }
 0x28a   : > { %7399 = vmatpush2.bf16.msra.mxu0 %v10552_v13  ;;  %v10588_v13 = vld [vmem:[%s11543_s18 + $0x4a8] ss:$16 sps:$4 sm:$0xff]  }
 0x28b   : > { %7440 = vmatpush2.bf16.msra.mxu1 %v10555_v17  ;;  %7400 = vmatprep.subr.bf16.mxu0 %v10560_v18  ;;  %v10591_v17 = vld [vmem:[%s11543_s18 + $0x6a8] ss:$16 sps:$4 sm:$0xff]  }
 0x28c   : > { %7441 = vmatprep.subr.bf16.mxu1 %v10563_v49 }
 0x28e   : > { %7401 = vmatpush2.bf16.msra.mxu0 %v10558_v23  ;;  %v10597_v23 = vld [vmem:[%s11543_s18 + $0x688] ss:$16 sps:$4 sm:$0xff]  }
 0x28f   : > { %7442 = vmatpush2.bf16.msra.mxu1 %v10561_v29  ;;  %7402 = vmatprep.subr.bf16.mxu0 %v10566_v51  ;;  %v10602_v29 = vld [vmem:[%s11543_s18 + $0x46c] ss:$16 sps:$4 sm:$0xff]  }
 0x290   : > { %7443 = vmatprep.subr.bf16.mxu1 %v10569_v30  ;;  %v10605_v51 = vld [vmem:[%s11543_s18 + $0x66c] ss:$16 sps:$4 sm:$0xff]   ;;  %v10600_v30 = vld [vmem:[%s11543_s18 + $0x468] ss:$16 sps:$4 sm:$0xff]  }
 0x292   : > { %7403 = vmatpush2.bf16.msra.mxu0 %v10564_v55  ;;  %v10603_v55 = vld [vmem:[%s11543_s18 + $0x668] ss:$16 sps:$4 sm:$0xff]  }
 0x293   : > { %7444 = vmatpush2.bf16.msra.mxu1 %v10567_v31  ;;  %7404 = vmatprep.subr.bf16.mxu0 %v10572_v33  ;;  %v10608_v31 = vld [vmem:[%s11543_s18 + $0x44c] ss:$16 sps:$4 sm:$0xff]  }
 0x294   : > { %7445 = vmatprep.subr.bf16.mxu1 %v10575_v36  ;;  %v10611_v33 = vld [vmem:[%s11543_s18 + $0x64c] ss:$16 sps:$4 sm:$0xff]   ;;  %v10606_v36 = vld [vmem:[%s11543_s18 + $0x448] ss:$16 sps:$4 sm:$0xff]  }
 0x296   : > { %7405 = vmatpush2.bf16.msra.mxu0 %v10570_v39  ;;  %v10609_v39 = vld [vmem:[%s11543_s18 + $0x648] ss:$16 sps:$4 sm:$0xff]  }
 0x297   : > { %7446 = vmatpush2.bf16.msra.mxu1 %v10573_v34  ;;  %7456 = vmatprep.subr.bf16.mxu0 %v10578_v8  ;;  %v10614_v34 = vld [vmem:[%s11543_s18 + $0x42c] ss:$16 sps:$4 sm:$0xff]  }
 0x298   : > { %7497 = vmatprep.subr.bf16.mxu1 %v10581_v46  ;;  %v10617_v8 = vld [vmem:[%s11543_s18 + $0x62c] ss:$16 sps:$4 sm:$0xff]   ;;  %v10612_v46 = vld [vmem:[%s11543_s18 + $0x428] ss:$16 sps:$4 sm:$0xff]  }
 0x299   : > { %v7162_v12 = vpop.f32.mrf.mxu0  ;;  %7407 = vmatmul.mubr.bf16.vlgmr.msra.gmra.mxu0 %v11646_v15 }
 0x29a   : > { %v7203_v58 = vpop.f32.mrf.mxu1  ;;  %7448 = vmatmul.mubr.bf16.vlgmr.msra.gmra.mxu1 %v11656_v20  ;;  %v7163_v1 = vadd.f32 %v7162_v12, %v12317_v40  ;;  %7457 = vmatpush1.bf16.msra.mxu0 %v10576_v48  ;;  %v10615_v48 = vld [vmem:[%s11543_s18 + $0x628] ss:$16 sps:$4 sm:$0xff]  }
 0x29b   : > { %7498 = vmatpush1.bf16.msra.mxu1 %v10579_v52  ;;  %v7164_v62 = vpop.f32.mrf.mxu0  ;;  %7458 = vmatprep.subr.bf16.mxu0 %v10584_v38  ;;  %v10620_v52 = vld [vmem:[%s11543_s18 + $0x40c] ss:$16 sps:$4 sm:$0xff]   ;;  %v10621_v12 = vld [vmem:[%s11543_s18 + $0x608] ss:$16 sps:$4 sm:$0xff]  }
 0x29c   : > { %v7205_v2 = vpop.f32.mrf.mxu1  ;;  %7499 = vmatprep.subr.bf16.mxu1 %v10587_v54  ;;  %v12391_v7 = vadd.f32 %v7203_v58, %v7163_v1  ;;  %v7165_v15 = vadd.f32 %v7164_v62, %v12324_v59  ;;  %7488 = vmatprep.mubr.bf16.mxu0 %v11652_v19  ;;  %v10596_v19 = vld [vmem:[%s11543_s18 + $0x48c] ss:$16 sps:$4 sm:$0xff]   ;;  %v10594_v59 = vld [vmem:[%s11543_s18 + $0x488] ss:$16 sps:$4 sm:$0xff]  }
 0x29d   : > { %7529 = vmatprep.mubr.bf16.mxu1 %v11664_v25  ;;  %v7166_v20 = vpop.f32.mrf.mxu0  ;;  %v10599_v25 = vld [vmem:[%s11543_s18 + $0x68c] ss:$16 sps:$4 sm:$0xff]   ;;  %v10618_v54 = vld [vmem:[%s11543_s18 + $0x408] ss:$16 sps:$4 sm:$0xff]  }
 0x29e   : > { %v7207_v40 = vpop.f32.mrf.mxu1  ;;  %v12396_v9 = vadd.f32 %v7205_v2, %v7165_v15  ;;  %7459 = vmatpush1.bf16.msra.mxu0 %v10582_v63  ;;  %v10623_v38 = vld [vmem:[%s11543_s18 + $0x60c] ss:$16 sps:$4 sm:$0xff]   ;;  %v10624_v63 = vld [vmem:[%s11543_s18 + $0x5e8] ss:$16 sps:$4 sm:$0xff]  }
 0x29f   : > { %7500 = vmatpush1.bf16.msra.mxu1 %v10585_v42  ;;  %v7167_v18 = vpop.f32.mrf.mxu0  ;;  %7460 = vmatprep.subr.bf16.mxu0 %v10590_v3  ;;  %v10626_v58 = vld [vmem:[%s11543_s18 + $0x5ec] ss:$16 sps:$4 sm:$0xff]   ;;  %v10627_v42 = vld [vmem:[%s11543_s18 + $0x7e8] ss:$16 sps:$4 sm:$0xff]  }
 0x2a0   : > { %v7208_v49 = vpop.f32.mrf.mxu1  ;;  %7501 = vmatprep.subr.bf16.mxu1 %v10593_v4  ;;  %v10629_v1 = vld [vmem:[%s11543_s18 + $0x7ec] ss:$16 sps:$4 sm:$0xff]   ;;  %v10630_v3 = vld [vmem:[%s11543_s18 + $0x5c8] ss:$16 sps:$4 sm:$0xff]  }
 0x2a1   : > { %v10632_v62 = vld [vmem:[%s11543_s18 + $0x5cc] ss:$16 sps:$4 sm:$0xff]   ;;  %v10633_v4 = vld [vmem:[%s11543_s18 + $0x7c8] ss:$16 sps:$4 sm:$0xff]  }
 0x2a2   : > { %7461 = vmatpush1.bf16.msra.mxu0 %v10588_v13  ;;  %v10635_v2 = vld [vmem:[%s11543_s18 + $0x7cc] ss:$16 sps:$4 sm:$0xff]   ;;  %v10636_v40 = vld [vmem:[%s11543_s18 + $0x5a8] ss:$16 sps:$4 sm:$0xff]  }
 0x2a3   : > { %7502 = vmatpush1.bf16.msra.mxu1 %v10591_v17  ;;  %7462 = vmatprep.subr.bf16.mxu0 %v10596_v19  ;;  %v10638_v15 = vld [vmem:[%s11543_s18 + $0x5ac] ss:$16 sps:$4 sm:$0xff]   ;;  %v10639_v13 = vld [vmem:[%s11543_s18 + $0x7a8] ss:$16 sps:$4 sm:$0xff]  }
 0x2a4   : > { %7503 = vmatprep.subr.bf16.mxu1 %v10599_v25  ;;  %v10641_v20 = vld [vmem:[%s11543_s18 + $0x7ac] ss:$16 sps:$4 sm:$0xff]   ;;  %v10642_v49 = vld [vmem:[%s11543_s18 + $0x588] ss:$16 sps:$4 sm:$0xff]  }
 0x2a5   : > { %v10644_v17 = vld [vmem:[%s11543_s18 + $0x58c] ss:$16 sps:$4 sm:$0xff]   ;;  %v10645_v19 = vld [vmem:[%s11543_s18 + $0x788] ss:$16 sps:$4 sm:$0xff]  }
 0x2a6   : > { %7463 = vmatpush1.bf16.msra.mxu0 %v10594_v59  ;;  %v10647_v18 = vld [vmem:[%s11543_s18 + $0x78c] ss:$16 sps:$4 sm:$0xff]  }
 0x2a7   : > { %7504 = vmatpush1.bf16.msra.mxu1 %v10597_v23  ;;  %7464 = vmatprep.subr.bf16.mxu0 %v10602_v29  ;;  %v10650_v25 = vld [vmem:[%s11543_s18 + $0x56c] ss:$16 sps:$4 sm:$0xff]   ;;  %v10648_v23 = vld [vmem:[%s11543_s18 + $0x568] ss:$16 sps:$4 sm:$0xff]  }
 0x2a8   : > { %7505 = vmatprep.subr.bf16.mxu1 %v10605_v51  ;;  %v10653_v59 = vld [vmem:[%s11543_s18 + $0x76c] ss:$16 sps:$4 sm:$0xff]   ;;  %v10651_v29 = vld [vmem:[%s11543_s18 + $0x768] ss:$16 sps:$4 sm:$0xff]  }
 0x2a9   : > { %v10656_v51 = vld [vmem:[%s11543_s18 + $0x54c] ss:$16 sps:$4 sm:$0xff]  }
 0x2aa   : > { %7465 = vmatpush1.bf16.msra.mxu0 %v10600_v30  ;;  %v10659_v30 = vld [vmem:[%s11543_s18 + $0x74c] ss:$16 sps:$4 sm:$0xff]  }
 0x2ab   : > { %7506 = vmatpush1.bf16.msra.mxu1 %v10603_v55  ;;  %7466 = vmatprep.subr.bf16.mxu0 %v10608_v31  ;;  %v10654_v55 = vld [vmem:[%s11543_s18 + $0x548] ss:$16 sps:$4 sm:$0xff]  }
 0x2ac   : > { %7507 = vmatprep.subr.bf16.mxu1 %v10611_v33  ;;  %v10657_v31 = vld [vmem:[%s11543_s18 + $0x748] ss:$16 sps:$4 sm:$0xff]   ;;  %v10662_v33 = vld [vmem:[%s11543_s18 + $0x52c] ss:$16 sps:$4 sm:$0xff]  }
 0x2ae   : > { %7467 = vmatpush1.bf16.msra.mxu0 %v10606_v36  ;;  %v10665_v36 = vld [vmem:[%s11543_s18 + $0x72c] ss:$16 sps:$4 sm:$0xff]  }
 0x2af   : > { %7508 = vmatpush1.bf16.msra.mxu1 %v10609_v39  ;;  %7468 = vmatprep.subr.bf16.mxu0 %v10614_v34  ;;  %v10660_v39 = vld [vmem:[%s11543_s18 + $0x528] ss:$16 sps:$4 sm:$0xff]  }
 0x2b0   : > { %7509 = vmatprep.subr.bf16.mxu1 %v10617_v8  ;;  %v10663_v34 = vld [vmem:[%s11543_s18 + $0x728] ss:$16 sps:$4 sm:$0xff]   ;;  %v10668_v8 = vld [vmem:[%s11543_s18 + $0x50c] ss:$16 sps:$4 sm:$0xff]  }
 0x2b2   : > { %7469 = vmatpush1.bf16.msra.mxu0 %v10612_v46  ;;  %v10671_v46 = vld [vmem:[%s11543_s18 + $0x70c] ss:$16 sps:$4 sm:$0xff]  }
 0x2b3   : > { %7510 = vmatpush1.bf16.msra.mxu1 %v10615_v48  ;;  %7470 = vmatprep.subr.bf16.mxu0 %v10620_v52  ;;  %v10666_v48 = vld [vmem:[%s11543_s18 + $0x508] ss:$16 sps:$4 sm:$0xff]  }
 0x2b4   : > { %7511 = vmatprep.subr.bf16.mxu1 %v10623_v38  ;;  %v10669_v52 = vld [vmem:[%s11543_s18 + $0x708] ss:$16 sps:$4 sm:$0xff]   ;;  %v10674_v38 = vld [vmem:[%s11543_s18 + $0x8ec] ss:$16 sps:$4 sm:$0xff]  }
 0x2b6   : > { %7471 = vmatpush1.bf16.msra.mxu0 %v10618_v54  ;;  %v10677_v54 = vld [vmem:[%s11543_s18 + $0xaec] ss:$16 sps:$4 sm:$0xff]  }
 0x2b7   : > { %7512 = vmatpush1.bf16.msra.mxu1 %v10621_v12  ;;  %7472 = vmatprep.subr.bf16.mxu0 %v10626_v58  ;;  %v10672_v12 = vld [vmem:[%s11543_s18 + $0x8e8] ss:$16 sps:$4 sm:$0xff]  }
 0x2b8   : > { %7513 = vmatprep.subr.bf16.mxu1 %v10629_v1  ;;  %v10675_v58 = vld [vmem:[%s11543_s18 + $0xae8] ss:$16 sps:$4 sm:$0xff]   ;;  %v10680_v1 = vld [vmem:[%s11543_s18 + $0x8cc] ss:$16 sps:$4 sm:$0xff]  }
 0x2ba   : > { %7473 = vmatpush2.bf16.msra.mxu0 %v10624_v63  ;;  %v10683_v63 = vld [vmem:[%s11543_s18 + $0xacc] ss:$16 sps:$4 sm:$0xff]  }
 0x2bb   : > { %7514 = vmatpush2.bf16.msra.mxu1 %v10627_v42  ;;  %7474 = vmatprep.subr.bf16.mxu0 %v10632_v62 }
 0x2bc   : > { %7515 = vmatprep.subr.bf16.mxu1 %v10635_v2 }
 0x2be   : > { %7475 = vmatpush2.bf16.msra.mxu0 %v10630_v3  ;;  %v10678_v3 = vld [vmem:[%s11543_s18 + $0x8c8] ss:$16 sps:$4 sm:$0xff]  }
 0x2bf   : > { %7516 = vmatpush2.bf16.msra.mxu1 %v10633_v4  ;;  %7476 = vmatprep.subr.bf16.mxu0 %v10638_v15  ;;  %v10681_v4 = vld [vmem:[%s11543_s18 + $0xac8] ss:$16 sps:$4 sm:$0xff]  }
 0x2c0   : > { %7517 = vmatprep.subr.bf16.mxu1 %v10641_v20 }
 0x2c2   : > { %7477 = vmatpush2.bf16.msra.mxu0 %v10636_v40  ;;  %v10686_v40 = vld [vmem:[%s11543_s18 + $0x8ac] ss:$16 sps:$4 sm:$0xff]  }
 0x2c3   : > { %7518 = vmatpush2.bf16.msra.mxu1 %v10639_v13  ;;  %7478 = vmatprep.subr.bf16.mxu0 %v10644_v17  ;;  %v10689_v13 = vld [vmem:[%s11543_s18 + $0xaac] ss:$16 sps:$4 sm:$0xff]  }
 0x2c4   : > { %7519 = vmatprep.subr.bf16.mxu1 %v10647_v18 }
 0x2c6   : > { %7479 = vmatpush2.bf16.msra.mxu0 %v10642_v49  ;;  %v10684_v49 = vld [vmem:[%s11543_s18 + $0x8a8] ss:$16 sps:$4 sm:$0xff]  }
 0x2c7   : > { %7520 = vmatpush2.bf16.msra.mxu1 %v10645_v19  ;;  %7480 = vmatprep.subr.bf16.mxu0 %v10650_v25  ;;  %v10687_v19 = vld [vmem:[%s11543_s18 + $0xaa8] ss:$16 sps:$4 sm:$0xff]  }
 0x2c8   : > { %7521 = vmatprep.subr.bf16.mxu1 %v10653_v59 }
 0x2ca   : > { %7481 = vmatpush2.bf16.msra.mxu0 %v10648_v23  ;;  %v10693_v23 = vld [vmem:[%s11543_s18 + $0xa88] ss:$16 sps:$4 sm:$0xff]  }
 0x2cb   : > { %7522 = vmatpush2.bf16.msra.mxu1 %v10651_v29  ;;  %7482 = vmatprep.subr.bf16.mxu0 %v10656_v51  ;;  %v10698_v29 = vld [vmem:[%s11543_s18 + $0x86c] ss:$16 sps:$4 sm:$0xff]  }
 0x2cc   : > { %7523 = vmatprep.subr.bf16.mxu1 %v10659_v30  ;;  %v10701_v51 = vld [vmem:[%s11543_s18 + $0xa6c] ss:$16 sps:$4 sm:$0xff]   ;;  %v10696_v30 = vld [vmem:[%s11543_s18 + $0x868] ss:$16 sps:$4 sm:$0xff]  }
 0x2ce   : > { %7483 = vmatpush2.bf16.msra.mxu0 %v10654_v55  ;;  %v10699_v55 = vld [vmem:[%s11543_s18 + $0xa68] ss:$16 sps:$4 sm:$0xff]  }
 0x2cf   : > { %7524 = vmatpush2.bf16.msra.mxu1 %v10657_v31  ;;  %7484 = vmatprep.subr.bf16.mxu0 %v10662_v33  ;;  %v10704_v31 = vld [vmem:[%s11543_s18 + $0x84c] ss:$16 sps:$4 sm:$0xff]  }
 0x2d0   : > { %7525 = vmatprep.subr.bf16.mxu1 %v10665_v36  ;;  %v10707_v33 = vld [vmem:[%s11543_s18 + $0xa4c] ss:$16 sps:$4 sm:$0xff]   ;;  %v10702_v36 = vld [vmem:[%s11543_s18 + $0x848] ss:$16 sps:$4 sm:$0xff]  }
 0x2d2   : > { %7485 = vmatpush2.bf16.msra.mxu0 %v10660_v39  ;;  %v10705_v39 = vld [vmem:[%s11543_s18 + $0xa48] ss:$16 sps:$4 sm:$0xff]  }
 0x2d3   : > { %7526 = vmatpush2.bf16.msra.mxu1 %v10663_v34  ;;  %7486 = vmatprep.subr.bf16.mxu0 %v10668_v8  ;;  %v10710_v34 = vld [vmem:[%s11543_s18 + $0x82c] ss:$16 sps:$4 sm:$0xff]  }
 0x2d4   : > { %7527 = vmatprep.subr.bf16.mxu1 %v10671_v46  ;;  %v10713_v8 = vld [vmem:[%s11543_s18 + $0xa2c] ss:$16 sps:$4 sm:$0xff]   ;;  %v10708_v46 = vld [vmem:[%s11543_s18 + $0x828] ss:$16 sps:$4 sm:$0xff]  }
 0x2d6   : > { %7487 = vmatpush2.bf16.msra.mxu0 %v10666_v48  ;;  %v10711_v48 = vld [vmem:[%s11543_s18 + $0xa28] ss:$16 sps:$4 sm:$0xff]  }
 0x2d7   : > { %7528 = vmatpush2.bf16.msra.mxu1 %v10669_v52  ;;  %7538 = vmatprep.subr.bf16.mxu0 %v10674_v38  ;;  %v10716_v52 = vld [vmem:[%s11543_s18 + $0x80c] ss:$16 sps:$4 sm:$0xff]  }
 0x2d8   : > { %7579 = vmatprep.subr.bf16.mxu1 %v10677_v54  ;;  %v10719_v38 = vld [vmem:[%s11543_s18 + $0xa0c] ss:$16 sps:$4 sm:$0xff]   ;;  %v10714_v54 = vld [vmem:[%s11543_s18 + $0x808] ss:$16 sps:$4 sm:$0xff]  }
 0x2d9   : > { %v7244_v42 = vpop.f32.mrf.mxu0  ;;  %7489 = vmatmul.mubr.bf16.vlgmr.msra.gmra.mxu0 %v11729_v28 }
 0x2da   : > { %v7285_v62 = vpop.f32.mrf.mxu1  ;;  %7530 = vmatmul.mubr.bf16.vlgmr.msra.gmra.mxu1 %v11736_v32  ;;  %v7245_v2 = vadd.f32 %v7244_v42, %v12391_v7  ;;  %7539 = vmatpush1.bf16.msra.mxu0 %v10672_v12  ;;  %v10717_v12 = vld [vmem:[%s11543_s18 + $0xa08] ss:$16 sps:$4 sm:$0xff]  }
 0x2db   : > { %7580 = vmatpush1.bf16.msra.mxu1 %v10675_v58  ;;  %v7246_v15 = vpop.f32.mrf.mxu0  ;;  %7540 = vmatprep.subr.bf16.mxu0 %v10680_v1  ;;  %v10722_v58 = vld [vmem:[%s11543_s18 + $0x9ec] ss:$16 sps:$4 sm:$0xff]   ;;  %v10723_v42 = vld [vmem:[%s11543_s18 + $0xbe8] ss:$16 sps:$4 sm:$0xff]  }
 0x2dc   : > { %v7287_v20 = vpop.f32.mrf.mxu1  ;;  %7581 = vmatprep.subr.bf16.mxu1 %v10683_v63  ;;  %v12465_v17 = vadd.f32 %v7285_v62, %v7245_v2  ;;  %v7247_v28 = vadd.f32 %v7246_v15, %v12396_v9  ;;  %7570 = vmatprep.mubr.bf16.mxu0 %v11758_v43  ;;  %v10692_v43 = vld [vmem:[%s11543_s18 + $0x88c] ss:$16 sps:$4 sm:$0xff]   ;;  %v10690_v9 = vld [vmem:[%s11543_s18 + $0x888] ss:$16 sps:$4 sm:$0xff]  }
 0x2dd   : > { %7611 = vmatprep.mubr.bf16.mxu1 %v11763_v44  ;;  %v7248_v32 = vpop.f32.mrf.mxu0  ;;  %v10695_v44 = vld [vmem:[%s11543_s18 + $0xa8c] ss:$16 sps:$4 sm:$0xff]   ;;  %v10720_v63 = vld [vmem:[%s11543_s18 + $0x9e8] ss:$16 sps:$4 sm:$0xff]  }
 0x2de   : > { %v7289_v7 = vpop.f32.mrf.mxu1  ;;  %v12470_v18 = vadd.f32 %v7287_v20, %v7247_v28  ;;  %7541 = vmatpush1.bf16.msra.mxu0 %v10678_v3  ;;  %v10725_v1 = vld [vmem:[%s11543_s18 + $0xbec] ss:$16 sps:$4 sm:$0xff]   ;;  %v10726_v3 = vld [vmem:[%s11543_s18 + $0x9c8] ss:$16 sps:$4 sm:$0xff]  }
 0x2df   : > { %7582 = vmatpush1.bf16.msra.mxu1 %v10681_v4  ;;  %v7249_v25 = vpop.f32.mrf.mxu0  ;;  %7542 = vmatprep.subr.bf16.mxu0 %v10686_v40  ;;  %v10728_v62 = vld [vmem:[%s11543_s18 + $0x9cc] ss:$16 sps:$4 sm:$0xff]   ;;  %v10729_v4 = vld [vmem:[%s11543_s18 + $0xbc8] ss:$16 sps:$4 sm:$0xff]  }
 0x2e0   : > { %v7290_v59 = vpop.f32.mrf.mxu1  ;;  %7583 = vmatprep.subr.bf16.mxu1 %v10689_v13  ;;  %v10731_v2 = vld [vmem:[%s11543_s18 + $0xbcc] ss:$16 sps:$4 sm:$0xff]   ;;  %v10732_v40 = vld [vmem:[%s11543_s18 + $0x9a8] ss:$16 sps:$4 sm:$0xff]  }
 0x2e1   : > { %v10734_v15 = vld [vmem:[%s11543_s18 + $0x9ac] ss:$16 sps:$4 sm:$0xff]   ;;  %v10735_v13 = vld [vmem:[%s11543_s18 + $0xba8] ss:$16 sps:$4 sm:$0xff]  }
 0x2e2   : > { %7543 = vmatpush1.bf16.msra.mxu0 %v10684_v49  ;;  %v10737_v20 = vld [vmem:[%s11543_s18 + $0xbac] ss:$16 sps:$4 sm:$0xff]   ;;  %v10738_v7 = vld [vmem:[%s11543_s18 + $0x988] ss:$16 sps:$4 sm:$0xff]  }
 0x2e3   : > { %7584 = vmatpush1.bf16.msra.mxu1 %v10687_v19  ;;  %7544 = vmatprep.subr.bf16.mxu0 %v10692_v43  ;;  %v10740_v28 = vld [vmem:[%s11543_s18 + $0x98c] ss:$16 sps:$4 sm:$0xff]   ;;  %v10741_v49 = vld [vmem:[%s11543_s18 + $0xb88] ss:$16 sps:$4 sm:$0xff]  }
 0x2e4   : > { %7585 = vmatprep.subr.bf16.mxu1 %v10695_v44  ;;  %v10743_v32 = vld [vmem:[%s11543_s18 + $0xb8c] ss:$16 sps:$4 sm:$0xff]   ;;  %v10744_v59 = vld [vmem:[%s11543_s18 + $0x968] ss:$16 sps:$4 sm:$0xff]  }
 0x2e5   : > { %v10746_v19 = vld [vmem:[%s11543_s18 + $0x96c] ss:$16 sps:$4 sm:$0xff]   ;;  %v10747_v43 = vld [vmem:[%s11543_s18 + $0xb68] ss:$16 sps:$4 sm:$0xff]  }
 0x2e6   : > { %7545 = vmatpush1.bf16.msra.mxu0 %v10690_v9  ;;  %v10749_v25 = vld [vmem:[%s11543_s18 + $0xb6c] ss:$16 sps:$4 sm:$0xff]  }
 0x2e7   : > { %7586 = vmatpush1.bf16.msra.mxu1 %v10693_v23  ;;  %7546 = vmatprep.subr.bf16.mxu0 %v10698_v29  ;;  %v10752_v44 = vld [vmem:[%s11543_s18 + $0x94c] ss:$16 sps:$4 sm:$0xff]   ;;  %v10750_v23 = vld [vmem:[%s11543_s18 + $0x948] ss:$16 sps:$4 sm:$0xff]  }
 0x2e8   : > { %7587 = vmatprep.subr.bf16.mxu1 %v10701_v51  ;;  %v10755_v9 = vld [vmem:[%s11543_s18 + $0xb4c] ss:$16 sps:$4 sm:$0xff]   ;;  %v10753_v29 = vld [vmem:[%s11543_s18 + $0xb48] ss:$16 sps:$4 sm:$0xff]  }
 0x2e9   : > { %v10758_v51 = vld [vmem:[%s11543_s18 + $0x92c] ss:$16 sps:$4 sm:$0xff]  }
 0x2ea   : > { %7547 = vmatpush1.bf16.msra.mxu0 %v10696_v30  ;;  %v10761_v30 = vld [vmem:[%s11543_s18 + $0xb2c] ss:$16 sps:$4 sm:$0xff]  }
 0x2eb   : > { %7588 = vmatpush1.bf16.msra.mxu1 %v10699_v55  ;;  %7548 = vmatprep.subr.bf16.mxu0 %v10704_v31  ;;  %v10756_v55 = vld [vmem:[%s11543_s18 + $0x928] ss:$16 sps:$4 sm:$0xff]  }
 0x2ec   : > { %7589 = vmatprep.subr.bf16.mxu1 %v10707_v33  ;;  %v10759_v31 = vld [vmem:[%s11543_s18 + $0xb28] ss:$16 sps:$4 sm:$0xff]   ;;  %v10764_v33 = vld [vmem:[%s11543_s18 + $0x90c] ss:$16 sps:$4 sm:$0xff]  }
 0x2ee   : > { %7549 = vmatpush1.bf16.msra.mxu0 %v10702_v36  ;;  %v10767_v36 = vld [vmem:[%s11543_s18 + $0xb0c] ss:$16 sps:$4 sm:$0xff]  }
 0x2ef   : > { %7590 = vmatpush1.bf16.msra.mxu1 %v10705_v39  ;;  %7550 = vmatprep.subr.bf16.mxu0 %v10710_v34  ;;  %v10762_v39 = vld [vmem:[%s11543_s18 + $0x908] ss:$16 sps:$4 sm:$0xff]  }
 0x2f0   : > { %7591 = vmatprep.subr.bf16.mxu1 %v10713_v8  ;;  %v10765_v34 = vld [vmem:[%s11543_s18 + $0xb08] ss:$16 sps:$4 sm:$0xff]   ;;  %v10770_v8 = vld [vmem:[%s11543_s18 + $0xcec] ss:$16 sps:$4 sm:$0xff]  }
 0x2f2   : > { %7551 = vmatpush1.bf16.msra.mxu0 %v10708_v46  ;;  %v10773_v46 = vld [vmem:[%s11543_s18 + $0xeec] ss:$16 sps:$4 sm:$0xff]  }
 0x2f3   : > { %7592 = vmatpush1.bf16.msra.mxu1 %v10711_v48  ;;  %7552 = vmatprep.subr.bf16.mxu0 %v10716_v52  ;;  %v10768_v48 = vld [vmem:[%s11543_s18 + $0xce8] ss:$16 sps:$4 sm:$0xff]  }
 0x2f4   : > { %7593 = vmatprep.subr.bf16.mxu1 %v10719_v38  ;;  %v10771_v52 = vld [vmem:[%s11543_s18 + $0xee8] ss:$16 sps:$4 sm:$0xff]   ;;  %v10776_v38 = vld [vmem:[%s11543_s18 + $0xccc] ss:$16 sps:$4 sm:$0xff]  }
 0x2f6   : > { %7553 = vmatpush1.bf16.msra.mxu0 %v10714_v54  ;;  %v10779_v54 = vld [vmem:[%s11543_s18 + $0xecc] ss:$16 sps:$4 sm:$0xff]  }
 0x2f7   : > { %7594 = vmatpush1.bf16.msra.mxu1 %v10717_v12  ;;  %7554 = vmatprep.subr.bf16.mxu0 %v10722_v58 }
 0x2f8   : > { %7595 = vmatprep.subr.bf16.mxu1 %v10725_v1 }
 0x2fa   : > { %7555 = vmatpush2.bf16.msra.mxu0 %v10720_v63  ;;  %v10774_v63 = vld [vmem:[%s11543_s18 + $0xcc8] ss:$16 sps:$4 sm:$0xff]  }
 0x2fb   : > { %7596 = vmatpush2.bf16.msra.mxu1 %v10723_v42  ;;  %7556 = vmatprep.subr.bf16.mxu0 %v10728_v62  ;;  %v10777_v42 = vld [vmem:[%s11543_s18 + $0xec8] ss:$16 sps:$4 sm:$0xff]  }
 0x2fc   : > { %7597 = vmatprep.subr.bf16.mxu1 %v10731_v2 }
 0x2fe   : > { %7557 = vmatpush2.bf16.msra.mxu0 %v10726_v3  ;;  %v10782_v3 = vld [vmem:[%s11543_s18 + $0xcac] ss:$16 sps:$4 sm:$0xff]  }
 0x2ff   : > { %7598 = vmatpush2.bf16.msra.mxu1 %v10729_v4  ;;  %7558 = vmatprep.subr.bf16.mxu0 %v10734_v15  ;;  %v10785_v4 = vld [vmem:[%s11543_s18 + $0xeac] ss:$16 sps:$4 sm:$0xff]  }
 0x300   : > { %7599 = vmatprep.subr.bf16.mxu1 %v10737_v20 }
 0x302   : > { %7559 = vmatpush2.bf16.msra.mxu0 %v10732_v40  ;;  %v10780_v40 = vld [vmem:[%s11543_s18 + $0xca8] ss:$16 sps:$4 sm:$0xff]  }
 0x303   : > { %7600 = vmatpush2.bf16.msra.mxu1 %v10735_v13  ;;  %7560 = vmatprep.subr.bf16.mxu0 %v10740_v28  ;;  %v10783_v13 = vld [vmem:[%s11543_s18 + $0xea8] ss:$16 sps:$4 sm:$0xff]  }
 0x304   : > { %7601 = vmatprep.subr.bf16.mxu1 %v10743_v32 }
 0x306   : > { %7561 = vmatpush2.bf16.msra.mxu0 %v10738_v7  ;;  %v10786_v7 = vld [vmem:[%s11543_s18 + $0xc88] ss:$16 sps:$4 sm:$0xff]  }
 0x307   : > { %7602 = vmatpush2.bf16.msra.mxu1 %v10741_v49  ;;  %7562 = vmatprep.subr.bf16.mxu0 %v10746_v19  ;;  %v10789_v49 = vld [vmem:[%s11543_s18 + $0xe88] ss:$16 sps:$4 sm:$0xff]   ;;  %v10794_v19 = vld [vmem:[%s11543_s18 + $0xc6c] ss:$16 sps:$4 sm:$0xff]  }
 0x308   : > { %7603 = vmatprep.subr.bf16.mxu1 %v10749_v25  ;;  %v10797_v25 = vld [vmem:[%s11543_s18 + $0xe6c] ss:$16 sps:$4 sm:$0xff]  }
 0x30a   : > { %7563 = vmatpush2.bf16.msra.mxu0 %v10744_v59  ;;  %v10792_v59 = vld [vmem:[%s11543_s18 + $0xc68] ss:$16 sps:$4 sm:$0xff]  }
 0x30b   : > { %7604 = vmatpush2.bf16.msra.mxu1 %v10747_v43  ;;  %7564 = vmatprep.subr.bf16.mxu0 %v10752_v44  ;;  %v10795_v43 = vld [vmem:[%s11543_s18 + $0xe68] ss:$16 sps:$4 sm:$0xff]   ;;  %v10800_v44 = vld [vmem:[%s11543_s18 + $0xc4c] ss:$16 sps:$4 sm:$0xff]  }
 0x30c   : > { %7605 = vmatprep.subr.bf16.mxu1 %v10755_v9  ;;  %v10803_v9 = vld [vmem:[%s11543_s18 + $0xe4c] ss:$16 sps:$4 sm:$0xff]  }
 0x30e   : > { %7565 = vmatpush2.bf16.msra.mxu0 %v10750_v23  ;;  %v10798_v23 = vld [vmem:[%s11543_s18 + $0xc48] ss:$16 sps:$4 sm:$0xff]  }
 0x30f   : > { %7606 = vmatpush2.bf16.msra.mxu1 %v10753_v29  ;;  %7566 = vmatprep.subr.bf16.mxu0 %v10758_v51  ;;  %v10801_v29 = vld [vmem:[%s11543_s18 + $0xe48] ss:$16 sps:$4 sm:$0xff]   ;;  %v10806_v51 = vld [vmem:[%s11543_s18 + $0xc2c] ss:$16 sps:$4 sm:$0xff]  }
 0x310   : > { %7607 = vmatprep.subr.bf16.mxu1 %v10761_v30  ;;  %v10809_v30 = vld [vmem:[%s11543_s18 + $0xe2c] ss:$16 sps:$4 sm:$0xff]  }
 0x312   : > { %7567 = vmatpush2.bf16.msra.mxu0 %v10756_v55  ;;  %v10804_v55 = vld [vmem:[%s11543_s18 + $0xc28] ss:$16 sps:$4 sm:$0xff]  }
 0x313   : > { %7608 = vmatpush2.bf16.msra.mxu1 %v10759_v31  ;;  %7568 = vmatprep.subr.bf16.mxu0 %v10764_v33  ;;  %v10807_v31 = vld [vmem:[%s11543_s18 + $0xe28] ss:$16 sps:$4 sm:$0xff]   ;;  %v10812_v33 = vld [vmem:[%s11543_s18 + $0xc0c] ss:$16 sps:$4 sm:$0xff]  }
 0x314   : > { %7609 = vmatprep.subr.bf16.mxu1 %v10767_v36  ;;  %v10815_v36 = vld [vmem:[%s11543_s18 + $0xe0c] ss:$16 sps:$4 sm:$0xff]  }
 0x316   : > { %7569 = vmatpush2.bf16.msra.mxu0 %v10762_v39  ;;  %v10810_v39 = vld [vmem:[%s11543_s18 + $0xc08] ss:$16 sps:$4 sm:$0xff]  }
 0x317   : > { %7610 = vmatpush2.bf16.msra.mxu1 %v10765_v34  ;;  %7620 = vmatprep.subr.bf16.mxu0 %v10770_v8  ;;  %v10813_v34 = vld [vmem:[%s11543_s18 + $0xe08] ss:$16 sps:$4 sm:$0xff]   ;;  %v10818_v8 = vld [vmem:[%s11543_s18 + $0xdec] ss:$16 sps:$4 sm:$0xff]  }
 0x318   : > { %7661 = vmatprep.subr.bf16.mxu1 %v10773_v46  ;;  %v10821_v46 = vld [vmem:[%s11543_s18 + $0xfec] ss:$16 sps:$4 sm:$0xff]  }
 0x319   : > { %v7326_v12 = vpop.f32.mrf.mxu0  ;;  %7571 = vmatmul.mubr.bf16.vlgmr.msra.gmra.mxu0 %v11827_v50 }
 0x31a   : > { %v7367_v58 = vpop.f32.mrf.mxu1  ;;  %7612 = vmatmul.mubr.bf16.vlgmr.msra.gmra.mxu1 %v11838_v57  ;;  %v7327_v1 = vadd.f32 %v7326_v12, %v12465_v17  ;;  %7621 = vmatpush1.bf16.msra.mxu0 %v10768_v48  ;;  %v10816_v48 = vld [vmem:[%s11543_s18 + $0xde8] ss:$16 sps:$4 sm:$0xff]  }
 0x31b   : > { %7662 = vmatpush1.bf16.msra.mxu1 %v10771_v52  ;;  %v7328_v62 = vpop.f32.mrf.mxu0  ;;  %7622 = vmatprep.subr.bf16.mxu0 %v10776_v38  ;;  %v10819_v52 = vld [vmem:[%s11543_s18 + $0xfe8] ss:$16 sps:$4 sm:$0xff]   ;;  %v10824_v38 = vld [vmem:[%s11543_s18 + $0xdcc] ss:$16 sps:$4 sm:$0xff]  }
 0x31c   : > { %v7369_v2 = vpop.f32.mrf.mxu1  ;;  %7663 = vmatprep.subr.bf16.mxu1 %v10779_v54  ;;  %v12539_v15 = vadd.f32 %v7367_v58, %v7327_v1  ;;  %v7329_v50 = vadd.f32 %v7328_v62, %v12470_v18  ;;  %7652 = vmatprep.mubr.bf16.mxu0 %v11834_v56  ;;  %v10788_v56 = vld [vmem:[%s11543_s18 + $0xc8c] ss:$16 sps:$4 sm:$0xff]   ;;  %v10822_v12 = vld [vmem:[%s11543_s18 + $0xdc8] ss:$16 sps:$4 sm:$0xff]  }
 0x31d   : > { %7693 = vmatprep.mubr.bf16.mxu1 %v11846_v61  ;;  %v7330_v57 = vpop.f32.mrf.mxu0  ;;  %v10791_v61 = vld [vmem:[%s11543_s18 + $0xe8c] ss:$16 sps:$4 sm:$0xff]   ;;  %v10825_v58 = vld [vmem:[%s11543_s18 + $0xfc8] ss:$16 sps:$4 sm:$0xff]  }
 0x31e   : > { %v7371_v17 = vpop.f32.mrf.mxu1  ;;  %v12544_v20 = vadd.f32 %v7369_v2, %v7329_v50  ;;  %7623 = vmatpush1.bf16.msra.mxu0 %v10774_v63  ;;  %v10827_v54 = vld [vmem:[%s11543_s18 + $0xfcc] ss:$16 sps:$4 sm:$0xff]   ;;  %v10831_v62 = vld [vmem:[%s11543_s18 + $0xfa8] ss:$16 sps:$4 sm:$0xff]  }
 0x31f   : > { %7664 = vmatpush1.bf16.msra.mxu1 %v10777_v42  ;;  %v7331_v28 = vpop.f32.mrf.mxu0  ;;  %7624 = vmatprep.subr.bf16.mxu0 %v10782_v3  ;;  %v10830_v1 = vld [vmem:[%s11543_s18 + $0xdac] ss:$16 sps:$4 sm:$0xff]   ;;  %v10828_v42 = vld [vmem:[%s11543_s18 + $0xda8] ss:$16 sps:$4 sm:$0xff]  }
 0x320   : > { %v7372_v32 = vpop.f32.mrf.mxu1  ;;  %7665 = vmatprep.subr.bf16.mxu1 %v10785_v4  ;;  %v8034_v18 = vcombine.low %v12539_v15, %v12544_v20  ;;  %v10833_v63 = vld [vmem:[%s11543_s18 + $0xfac] ss:$16 sps:$4 sm:$0xff]   ;;  %v10834_v4 = vld [vmem:[%s11543_s18 + $0xd88] ss:$16 sps:$4 sm:$0xff]  }
 0x321   : > { %v10836_v2 = vld [vmem:[%s11543_s18 + $0xd8c] ss:$16 sps:$4 sm:$0xff]   ;;  %v10837_v50 = vld [vmem:[%s11543_s18 + $0xf88] ss:$16 sps:$4 sm:$0xff]  }
 0x322   : > { %7625 = vmatpush1.bf16.msra.mxu0 %v10780_v40  ;;  %v10839_v3 = vld [vmem:[%s11543_s18 + $0xf8c] ss:$16 sps:$4 sm:$0xff]   ;;  %v10840_v40 = vld [vmem:[%s11543_s18 + $0xd68] ss:$16 sps:$4 sm:$0xff]  }
 0x323   : > { %7666 = vmatpush1.bf16.msra.mxu1 %v10783_v13  ;;  %7626 = vmatprep.subr.bf16.mxu0 %v10788_v56  ;;  %v10842_v57 = vld [vmem:[%s11543_s18 + $0xd6c] ss:$16 sps:$4 sm:$0xff]   ;;  %v10843_v13 = vld [vmem:[%s11543_s18 + $0xf68] ss:$16 sps:$4 sm:$0xff]  }
 0x324   : > { %7667 = vmatprep.subr.bf16.mxu1 %v10791_v61  ;;  %v10845_v17 = vld [vmem:[%s11543_s18 + $0xf6c] ss:$16 sps:$4 sm:$0xff]   ;;  %v10846_v56 = vld [vmem:[%s11543_s18 + $0xd48] ss:$16 sps:$4 sm:$0xff]  }
 0x325   : > { %v10848_v28 = vld [vmem:[%s11543_s18 + $0xd4c] ss:$16 sps:$4 sm:$0xff]   ;;  %v10849_v61 = vld [vmem:[%s11543_s18 + $0xf48] ss:$16 sps:$4 sm:$0xff]  }
 0x326   : > { %7627 = vmatpush1.bf16.msra.mxu0 %v10786_v7  ;;  %v10851_v32 = vld [vmem:[%s11543_s18 + $0xf4c] ss:$16 sps:$4 sm:$0xff]  }
 0x327   : > { %7668 = vmatpush1.bf16.msra.mxu1 %v10789_v49  ;;  %7628 = vmatprep.subr.bf16.mxu0 %v10794_v19  ;;  %v10854_v7 = vld [vmem:[%s11543_s18 + $0xd2c] ss:$16 sps:$4 sm:$0xff]   ;;  %v10852_v19 = vld [vmem:[%s11543_s18 + $0xd28] ss:$16 sps:$4 sm:$0xff]  }
 0x328   : > { %7669 = vmatprep.subr.bf16.mxu1 %v10797_v25  ;;  %v10857_v49 = vld [vmem:[%s11543_s18 + $0xf2c] ss:$16 sps:$4 sm:$0xff]   ;;  %v10855_v25 = vld [vmem:[%s11543_s18 + $0xf28] ss:$16 sps:$4 sm:$0xff]  }
 0x32a   : > { %7629 = vmatpush1.bf16.msra.mxu0 %v10792_v59  ;;  %v10860_v59 = vld [vmem:[%s11543_s18 + $0xd0c] ss:$16 sps:$4 sm:$0xff]  }
 0x32b   : > { %7670 = vmatpush1.bf16.msra.mxu1 %v10795_v43  ;;  %7630 = vmatprep.subr.bf16.mxu0 %v10800_v44  ;;  %v10863_v43 = vld [vmem:[%s11543_s18 + $0xf0c] ss:$16 sps:$4 sm:$0xff]   ;;  %v10858_v44 = vld [vmem:[%s11543_s18 + $0xd08] ss:$16 sps:$4 sm:$0xff]  }
 0x32c   : > { %7671 = vmatprep.subr.bf16.mxu1 %v10803_v9  ;;  %v10861_v9 = vld [vmem:[%s11543_s18 + $0xf08] ss:$16 sps:$4 sm:$0xff]  }
 0x32e   : > { %7631 = vmatpush1.bf16.msra.mxu0 %v10798_v23  ;;  %v10866_v23 = vld [vmem:[%s11543_s18 + $0x10ec] ss:$16 sps:$4 sm:$0xff]  }
 0x32f   : > { %7672 = vmatpush1.bf16.msra.mxu1 %v10801_v29  ;;  %7632 = vmatprep.subr.bf16.mxu0 %v10806_v51  ;;  %v10869_v29 = vld [vmem:[%s11543_s18 + $0x12ec] ss:$16 sps:$4 sm:$0xff]   ;;  %v10864_v51 = vld [vmem:[%s11543_s18 + $0x10e8] ss:$16 sps:$4 sm:$0xff]  }
 0x330   : > { %7673 = vmatprep.subr.bf16.mxu1 %v10809_v30  ;;  %v10867_v30 = vld [vmem:[%s11543_s18 + $0x12e8] ss:$16 sps:$4 sm:$0xff]  }
 0x332   : > { %7633 = vmatpush1.bf16.msra.mxu0 %v10804_v55  ;;  %v10872_v55 = vld [vmem:[%s11543_s18 + $0x10cc] ss:$16 sps:$4 sm:$0xff]  }
 0x333   : > { %7674 = vmatpush1.bf16.msra.mxu1 %v10807_v31  ;;  %7634 = vmatprep.subr.bf16.mxu0 %v10812_v33  ;;  %v10875_v31 = vld [vmem:[%s11543_s18 + $0x12cc] ss:$16 sps:$4 sm:$0xff]  }
 0x334   : > { %7675 = vmatprep.subr.bf16.mxu1 %v10815_v36 }
 0x336   : > { %7635 = vmatpush1.bf16.msra.mxu0 %v10810_v39 }
 0x337   : > { %7676 = vmatpush1.bf16.msra.mxu1 %v10813_v34  ;;  %7636 = vmatprep.subr.bf16.mxu0 %v10818_v8  ;;  %v10870_v34 = vld [vmem:[%s11543_s18 + $0x10c8] ss:$16 sps:$4 sm:$0xff]  }
 0x338   : > { %7677 = vmatprep.subr.bf16.mxu1 %v10821_v46  ;;  %v10873_v8 = vld [vmem:[%s11543_s18 + $0x12c8] ss:$16 sps:$4 sm:$0xff]  }
 0x33a   : > { %7637 = vmatpush2.bf16.msra.mxu0 %v10816_v48 }
 0x33b   : > { %7678 = vmatpush2.bf16.msra.mxu1 %v10819_v52  ;;  %7638 = vmatprep.subr.bf16.mxu0 %v10824_v38  ;;  %v10878_v52 = vld [vmem:[%s11543_s18 + $0x10ac] ss:$16 sps:$4 sm:$0xff]  }
 0x33c   : > { %7679 = vmatprep.subr.bf16.mxu1 %v10827_v54  ;;  %v10881_v38 = vld [vmem:[%s11543_s18 + $0x12ac] ss:$16 sps:$4 sm:$0xff]  }
 0x33e   : > { %7639 = vmatpush2.bf16.msra.mxu0 %v10822_v12  ;;  %v10876_v12 = vld [vmem:[%s11543_s18 + $0x10a8] ss:$16 sps:$4 sm:$0xff]  }
 0x33f   : > { %7680 = vmatpush2.bf16.msra.mxu1 %v10825_v58  ;;  %7640 = vmatprep.subr.bf16.mxu0 %v10830_v1  ;;  %v10879_v58 = vld [vmem:[%s11543_s18 + $0x12a8] ss:$16 sps:$4 sm:$0xff]  }
 0x340   : > { %7681 = vmatprep.subr.bf16.mxu1 %v10833_v63 }
 0x342   : > { %7641 = vmatpush2.bf16.msra.mxu0 %v10828_v42  ;;  %v10884_v42 = vld [vmem:[%s11543_s18 + $0x108c] ss:$16 sps:$4 sm:$0xff]  }
 0x343   : > { %7682 = vmatpush2.bf16.msra.mxu1 %v10831_v62  ;;  %7642 = vmatprep.subr.bf16.mxu0 %v10836_v2  ;;  %v10885_v62 = vld [vmem:[%s11543_s18 + $0x1288] ss:$16 sps:$4 sm:$0xff]   ;;  %v10890_v2 = vld [vmem:[%s11543_s18 + $0x106c] ss:$16 sps:$4 sm:$0xff]  }
 0x344   : > { %7683 = vmatprep.subr.bf16.mxu1 %v10839_v3  ;;  %v10893_v3 = vld [vmem:[%s11543_s18 + $0x126c] ss:$16 sps:$4 sm:$0xff]  }
 0x346   : > { %7643 = vmatpush2.bf16.msra.mxu0 %v10834_v4  ;;  %v10888_v4 = vld [vmem:[%s11543_s18 + $0x1068] ss:$16 sps:$4 sm:$0xff]  }
 0x347   : > { %7684 = vmatpush2.bf16.msra.mxu1 %v10837_v50  ;;  %7644 = vmatprep.subr.bf16.mxu0 %v10842_v57  ;;  %v10891_v50 = vld [vmem:[%s11543_s18 + $0x1268] ss:$16 sps:$4 sm:$0xff]   ;;  %v10896_v57 = vld [vmem:[%s11543_s18 + $0x104c] ss:$16 sps:$4 sm:$0xff]  }
 0x348   : > { %7685 = vmatprep.subr.bf16.mxu1 %v10845_v17  ;;  %v10899_v17 = vld [vmem:[%s11543_s18 + $0x124c] ss:$16 sps:$4 sm:$0xff]  }
 0x34a   : > { %7645 = vmatpush2.bf16.msra.mxu0 %v10840_v40  ;;  %v10894_v40 = vld [vmem:[%s11543_s18 + $0x1048] ss:$16 sps:$4 sm:$0xff]  }
 0x34b   : > { %7686 = vmatpush2.bf16.msra.mxu1 %v10843_v13  ;;  %7646 = vmatprep.subr.bf16.mxu0 %v10848_v28  ;;  %v10897_v13 = vld [vmem:[%s11543_s18 + $0x1248] ss:$16 sps:$4 sm:$0xff]   ;;  %v10902_v28 = vld [vmem:[%s11543_s18 + $0x102c] ss:$16 sps:$4 sm:$0xff]  }
 0x34c   : > { %7687 = vmatprep.subr.bf16.mxu1 %v10851_v32  ;;  %v10905_v32 = vld [vmem:[%s11543_s18 + $0x122c] ss:$16 sps:$4 sm:$0xff]  }
 0x34e   : > { %7647 = vmatpush2.bf16.msra.mxu0 %v10846_v56  ;;  %v10900_v56 = vld [vmem:[%s11543_s18 + $0x1028] ss:$16 sps:$4 sm:$0xff]  }
 0x34f   : > { %7688 = vmatpush2.bf16.msra.mxu1 %v10849_v61  ;;  %7648 = vmatprep.subr.bf16.mxu0 %v10854_v7  ;;  %v10903_v61 = vld [vmem:[%s11543_s18 + $0x1228] ss:$16 sps:$4 sm:$0xff]   ;;  %v10908_v7 = vld [vmem:[%s11543_s18 + $0x100c] ss:$16 sps:$4 sm:$0xff]  }
 0x350   : > { %7689 = vmatprep.subr.bf16.mxu1 %v10857_v49  ;;  %v10911_v49 = vld [vmem:[%s11543_s18 + $0x120c] ss:$16 sps:$4 sm:$0xff]  }
 0x352   : > { %7649 = vmatpush2.bf16.msra.mxu0 %v10852_v19  ;;  %v10906_v19 = vld [vmem:[%s11543_s18 + $0x1008] ss:$16 sps:$4 sm:$0xff]  }
 0x353   : > { %7690 = vmatpush2.bf16.msra.mxu1 %v10855_v25  ;;  %7650 = vmatprep.subr.bf16.mxu0 %v10860_v59  ;;  %v10909_v25 = vld [vmem:[%s11543_s18 + $0x1208] ss:$16 sps:$4 sm:$0xff]   ;;  %v10914_v59 = vld [vmem:[%s11543_s18 + $0x11ec] ss:$16 sps:$4 sm:$0xff]  }
 0x354   : > { %7691 = vmatprep.subr.bf16.mxu1 %v10863_v43  ;;  %v10917_v43 = vld [vmem:[%s11543_s18 + $0x13ec] ss:$16 sps:$4 sm:$0xff]  }
 0x356   : > { %7651 = vmatpush2.bf16.msra.mxu0 %v10858_v44  ;;  %v10912_v44 = vld [vmem:[%s11543_s18 + $0x11e8] ss:$16 sps:$4 sm:$0xff]  }
 0x357   : > { %7692 = vmatpush2.bf16.msra.mxu1 %v10861_v9  ;;  %7702 = vmatprep.subr.bf16.mxu0 %v10866_v23  ;;  %v10915_v9 = vld [vmem:[%s11543_s18 + $0x13e8] ss:$16 sps:$4 sm:$0xff]   ;;  %v10920_v23 = vld [vmem:[%s11543_s18 + $0x11cc] ss:$16 sps:$4 sm:$0xff]  }
 0x358   : > { %7743 = vmatprep.subr.bf16.mxu1 %v10869_v29  ;;  %v10923_v29 = vld [vmem:[%s11543_s18 + $0x13cc] ss:$16 sps:$4 sm:$0xff]  }
 0x359   : > { %v7408_v33 = vpop.f32.mrf.mxu0  ;;  %7653 = vmatmul.mubr.bf16.vlgmr.msra.gmra.mxu0 %v11920_v14 }
 0x35a   : > { %v7449_v36 = vpop.f32.mrf.mxu1  ;;  %7694 = vmatmul.mubr.bf16.vlgmr.msra.gmra.mxu1 %v11930_v22  ;;  %7703 = vmatpush1.bf16.msra.mxu0 %v10864_v51  ;;  %v10918_v51 = vld [vmem:[%s11543_s18 + $0x11c8] ss:$16 sps:$4 sm:$0xff]  }
 0x35b   : > { %v12610_v39 = vadd.f32 %v7449_v36, %v7408_v33  ;;  %7744 = vmatpush1.bf16.msra.mxu1 %v10867_v30  ;;  %v7410_v46 = vpop.f32.mrf.mxu0  ;;  %7704 = vmatprep.subr.bf16.mxu0 %v10872_v55  ;;  %v10921_v30 = vld [vmem:[%s11543_s18 + $0x13c8] ss:$16 sps:$4 sm:$0xff]   ;;  %v10926_v55 = vld [vmem:[%s11543_s18 + $0x11ac] ss:$16 sps:$4 sm:$0xff]  }
 0x35c   : > { %v7451_v48 = vpop.f32.mrf.mxu1  ;;  %7745 = vmatprep.subr.bf16.mxu1 %v10875_v31  ;;  %7734 = vmatprep.mubr.bf16.mxu0 %v11926_v21  ;;  %v10887_v21 = vld [vmem:[%s11543_s18 + $0x128c] ss:$16 sps:$4 sm:$0xff]   ;;  %v10924_v33 = vld [vmem:[%s11543_s18 + $0x11a8] ss:$16 sps:$4 sm:$0xff]  }
 0x35d   : > { %v12616_v54 = vadd.f32 %v7451_v48, %v7410_v46  ;;  %7775 = vmatprep.mubr.bf16.mxu1 %v11938_v27  ;;  %v7412_v14 = vpop.f32.mrf.mxu0  ;;  %v10882_v27 = vld [vmem:[%s11543_s18 + $0x1088] ss:$16 sps:$4 sm:$0xff]   ;;  %v10929_v31 = vld [vmem:[%s11543_s18 + $0x13ac] ss:$16 sps:$4 sm:$0xff]  }
 0x35e   : > { %v7453_v22 = vpop.f32.mrf.mxu1  ;;  %7705 = vmatpush1.bf16.msra.mxu0 %v10870_v34  ;;  %v10927_v36 = vld [vmem:[%s11543_s18 + $0x13a8] ss:$16 sps:$4 sm:$0xff]   ;;  %v10932_v34 = vld [vmem:[%s11543_s18 + $0x118c] ss:$16 sps:$4 sm:$0xff]  }
 0x35f   : > { %7746 = vmatpush1.bf16.msra.mxu1 %v10873_v8  ;;  %v7413_v1 = vpop.f32.mrf.mxu0  ;;  %7706 = vmatprep.subr.bf16.mxu0 %v10878_v52  ;;  %v10935_v8 = vld [vmem:[%s11543_s18 + $0x138c] ss:$16 sps:$4 sm:$0xff]   ;;  %v10930_v46 = vld [vmem:[%s11543_s18 + $0x1188] ss:$16 sps:$4 sm:$0xff]  }
 0x360   : > { %v7454_v63 = vpop.f32.mrf.mxu1  ;;  %7747 = vmatprep.subr.bf16.mxu1 %v10881_v38  ;;  %v10933_v48 = vld [vmem:[%s11543_s18 + $0x1388] ss:$16 sps:$4 sm:$0xff]   ;;  %v10938_v52 = vld [vmem:[%s11543_s18 + $0x116c] ss:$16 sps:$4 sm:$0xff]  }
 0x361   : > { %v10941_v38 = vld [vmem:[%s11543_s18 + $0x136c] ss:$16 sps:$4 sm:$0xff]   ;;  %v10936_v14 = vld [vmem:[%s11543_s18 + $0x1168] ss:$16 sps:$4 sm:$0xff]  }
 0x362   : > { %7707 = vmatpush1.bf16.msra.mxu0 %v10876_v12  ;;  %v10939_v22 = vld [vmem:[%s11543_s18 + $0x1368] ss:$16 sps:$4 sm:$0xff]   ;;  %v10944_v12 = vld [vmem:[%s11543_s18 + $0x114c] ss:$16 sps:$4 sm:$0xff]  }
 0x363   : > { %7748 = vmatpush1.bf16.msra.mxu1 %v10879_v58  ;;  %7708 = vmatprep.subr.bf16.mxu0 %v10884_v42  ;;  %v10947_v58 = vld [vmem:[%s11543_s18 + $0x134c] ss:$16 sps:$4 sm:$0xff]   ;;  %v10942_v1 = vld [vmem:[%s11543_s18 + $0x1148] ss:$16 sps:$4 sm:$0xff]  }
 0x364   : > { %7749 = vmatprep.subr.bf16.mxu1 %v10887_v21  ;;  %v10945_v63 = vld [vmem:[%s11543_s18 + $0x1348] ss:$16 sps:$4 sm:$0xff]   ;;  %v10950_v42 = vld [vmem:[%s11543_s18 + $0x112c] ss:$16 sps:$4 sm:$0xff]  }
 0x365   : > { %v10953_v21 = vld [vmem:[%s11543_s18 + $0x132c] ss:$16 sps:$4 sm:$0xff]  }
 0x366   : > { %7709 = vmatpush1.bf16.msra.mxu0 %v10882_v27  ;;  %v10948_v27 = vld [vmem:[%s11543_s18 + $0x1128] ss:$16 sps:$4 sm:$0xff]  }
 0x367   : > { %7750 = vmatpush1.bf16.msra.mxu1 %v10885_v62  ;;  %7710 = vmatprep.subr.bf16.mxu0 %v10890_v2  ;;  %v10951_v62 = vld [vmem:[%s11543_s18 + $0x1328] ss:$16 sps:$4 sm:$0xff]   ;;  %v10956_v2 = vld [vmem:[%s11543_s18 + $0x110c] ss:$16 sps:$4 sm:$0xff]  }
 0x368   : > { %7751 = vmatprep.subr.bf16.mxu1 %v10893_v3  ;;  %v10959_v3 = vld [vmem:[%s11543_s18 + $0x130c] ss:$16 sps:$4 sm:$0xff]  }
 0x36a   : > { %7711 = vmatpush1.bf16.msra.mxu0 %v10888_v4  ;;  %v10954_v4 = vld [vmem:[%s11543_s18 + $0x1108] ss:$16 sps:$4 sm:$0xff]  }
 0x36b   : > { %7752 = vmatpush1.bf16.msra.mxu1 %v10891_v50  ;;  %7712 = vmatprep.subr.bf16.mxu0 %v10896_v57  ;;  %v10957_v50 = vld [vmem:[%s11543_s18 + $0x1308] ss:$16 sps:$4 sm:$0xff]   ;;  %v10962_v57 = vld [vmem:[%s11543_s18 + $0x14ec] ss:$16 sps:$4 sm:$0xff]  }
 0x36c   : > { %7753 = vmatprep.subr.bf16.mxu1 %v10899_v17  ;;  %v10965_v17 = vld [vmem:[%s11543_s18 + $0x16ec] ss:$16 sps:$4 sm:$0xff]  }
 0x36e   : > { %7713 = vmatpush1.bf16.msra.mxu0 %v10894_v40  ;;  %v10960_v40 = vld [vmem:[%s11543_s18 + $0x14e8] ss:$16 sps:$4 sm:$0xff]  }
 0x36f   : > { %7754 = vmatpush1.bf16.msra.mxu1 %v10897_v13  ;;  %7714 = vmatprep.subr.bf16.mxu0 %v10902_v28  ;;  %v10963_v13 = vld [vmem:[%s11543_s18 + $0x16e8] ss:$16 sps:$4 sm:$0xff]   ;;  %v10968_v28 = vld [vmem:[%s11543_s18 + $0x14cc] ss:$16 sps:$4 sm:$0xff]  }
 0x370   : > { %7755 = vmatprep.subr.bf16.mxu1 %v10905_v32  ;;  %v10971_v32 = vld [vmem:[%s11543_s18 + $0x16cc] ss:$16 sps:$4 sm:$0xff]  }
 0x372   : > { %7715 = vmatpush1.bf16.msra.mxu0 %v10900_v56 }
 0x373   : > { %7756 = vmatpush1.bf16.msra.mxu1 %v10903_v61  ;;  %7716 = vmatprep.subr.bf16.mxu0 %v10908_v7 }
 0x374   : > { %7757 = vmatprep.subr.bf16.mxu1 %v10911_v49  ;;  %v10966_v49 = vld [vmem:[%s11543_s18 + $0x14c8] ss:$16 sps:$4 sm:$0xff]  }
 0x376   : > { %7717 = vmatpush1.bf16.msra.mxu0 %v10906_v19  ;;  %v10969_v19 = vld [vmem:[%s11543_s18 + $0x16c8] ss:$16 sps:$4 sm:$0xff]  }
 0x377   : > { %7758 = vmatpush1.bf16.msra.mxu1 %v10909_v25  ;;  %7718 = vmatprep.subr.bf16.mxu0 %v10914_v59 }
 0x378   : > { %7759 = vmatprep.subr.bf16.mxu1 %v10917_v43  ;;  %v10974_v43 = vld [vmem:[%s11543_s18 + $0x14ac] ss:$16 sps:$4 sm:$0xff]  }
 0x37a   : > { %7719 = vmatpush2.bf16.msra.mxu0 %v10912_v44  ;;  %v10977_v44 = vld [vmem:[%s11543_s18 + $0x16ac] ss:$16 sps:$4 sm:$0xff]  }
 0x37b   : > { %7760 = vmatpush2.bf16.msra.mxu1 %v10915_v9  ;;  %7720 = vmatprep.subr.bf16.mxu0 %v10920_v23 }
 0x37c   : > { %7761 = vmatprep.subr.bf16.mxu1 %v10923_v29  ;;  %v10972_v29 = vld [vmem:[%s11543_s18 + $0x14a8] ss:$16 sps:$4 sm:$0xff]  }
 0x37e   : > { %7721 = vmatpush2.bf16.msra.mxu0 %v10918_v51  ;;  %v10975_v51 = vld [vmem:[%s11543_s18 + $0x16a8] ss:$16 sps:$4 sm:$0xff]  }
 0x37f   : > { %7762 = vmatpush2.bf16.msra.mxu1 %v10921_v30  ;;  %7722 = vmatprep.subr.bf16.mxu0 %v10926_v55 }
 0x380   : > { %7763 = vmatprep.subr.bf16.mxu1 %v10929_v31  ;;  %v10981_v31 = vld [vmem:[%s11543_s18 + $0x1688] ss:$16 sps:$4 sm:$0xff]  }
 0x382   : > { %7723 = vmatpush2.bf16.msra.mxu0 %v10924_v33  ;;  %v10986_v33 = vld [vmem:[%s11543_s18 + $0x146c] ss:$16 sps:$4 sm:$0xff]  }
 0x383   : > { %7764 = vmatpush2.bf16.msra.mxu1 %v10927_v36  ;;  %7724 = vmatprep.subr.bf16.mxu0 %v10932_v34  ;;  %v10989_v36 = vld [vmem:[%s11543_s18 + $0x166c] ss:$16 sps:$4 sm:$0xff]   ;;  %v10984_v34 = vld [vmem:[%s11543_s18 + $0x1468] ss:$16 sps:$4 sm:$0xff]  }
 0x384   : > { %7765 = vmatprep.subr.bf16.mxu1 %v10935_v8  ;;  %v10987_v8 = vld [vmem:[%s11543_s18 + $0x1668] ss:$16 sps:$4 sm:$0xff]  }
 0x386   : > { %7725 = vmatpush2.bf16.msra.mxu0 %v10930_v46  ;;  %v10992_v46 = vld [vmem:[%s11543_s18 + $0x144c] ss:$16 sps:$4 sm:$0xff]  }
 0x387   : > { %7766 = vmatpush2.bf16.msra.mxu1 %v10933_v48  ;;  %7726 = vmatprep.subr.bf16.mxu0 %v10938_v52  ;;  %v10995_v48 = vld [vmem:[%s11543_s18 + $0x164c] ss:$16 sps:$4 sm:$0xff]   ;;  %v10990_v52 = vld [vmem:[%s11543_s18 + $0x1448] ss:$16 sps:$4 sm:$0xff]  }
 0x388   : > { %7767 = vmatprep.subr.bf16.mxu1 %v10941_v38  ;;  %v10993_v38 = vld [vmem:[%s11543_s18 + $0x1648] ss:$16 sps:$4 sm:$0xff]  }
 0x38a   : > { %7727 = vmatpush2.bf16.msra.mxu0 %v10936_v14  ;;  %v10998_v14 = vld [vmem:[%s11543_s18 + $0x142c] ss:$16 sps:$4 sm:$0xff]  }
 0x38b   : > { %7768 = vmatpush2.bf16.msra.mxu1 %v10939_v22  ;;  %7728 = vmatprep.subr.bf16.mxu0 %v10944_v12  ;;  %v11001_v22 = vld [vmem:[%s11543_s18 + $0x162c] ss:$16 sps:$4 sm:$0xff]   ;;  %v10996_v12 = vld [vmem:[%s11543_s18 + $0x1428] ss:$16 sps:$4 sm:$0xff]  }
 0x38c   : > { %7769 = vmatprep.subr.bf16.mxu1 %v10947_v58  ;;  %v10999_v58 = vld [vmem:[%s11543_s18 + $0x1628] ss:$16 sps:$4 sm:$0xff]  }
 0x38e   : > { %7729 = vmatpush2.bf16.msra.mxu0 %v10942_v1  ;;  %v11004_v1 = vld [vmem:[%s11543_s18 + $0x140c] ss:$16 sps:$4 sm:$0xff]  }
 0x38f   : > { %7770 = vmatpush2.bf16.msra.mxu1 %v10945_v63  ;;  %7730 = vmatprep.subr.bf16.mxu0 %v10950_v42  ;;  %v11007_v63 = vld [vmem:[%s11543_s18 + $0x160c] ss:$16 sps:$4 sm:$0xff]   ;;  %v11002_v42 = vld [vmem:[%s11543_s18 + $0x1408] ss:$16 sps:$4 sm:$0xff]  }
 0x390   : > { %7771 = vmatprep.subr.bf16.mxu1 %v10953_v21  ;;  %v11005_v21 = vld [vmem:[%s11543_s18 + $0x1608] ss:$16 sps:$4 sm:$0xff]  }
 0x392   : > { %7731 = vmatpush2.bf16.msra.mxu0 %v10948_v27  ;;  %v11010_v27 = vld [vmem:[%s11543_s18 + $0x15ec] ss:$16 sps:$4 sm:$0xff]  }
 0x393   : > { %7772 = vmatpush2.bf16.msra.mxu1 %v10951_v62  ;;  %7732 = vmatprep.subr.bf16.mxu0 %v10956_v2  ;;  %v11013_v62 = vld [vmem:[%s11543_s18 + $0x17ec] ss:$16 sps:$4 sm:$0xff]   ;;  %v11008_v2 = vld [vmem:[%s11543_s18 + $0x15e8] ss:$16 sps:$4 sm:$0xff]  }
 0x394   : > { %7773 = vmatprep.subr.bf16.mxu1 %v10959_v3  ;;  %v11011_v3 = vld [vmem:[%s11543_s18 + $0x17e8] ss:$16 sps:$4 sm:$0xff]  }
 0x396   : > { %7733 = vmatpush2.bf16.msra.mxu0 %v10954_v4  ;;  %v11016_v4 = vld [vmem:[%s11543_s18 + $0x15cc] ss:$16 sps:$4 sm:$0xff]  }
 0x397   : > { %7774 = vmatpush2.bf16.msra.mxu1 %v10957_v50  ;;  %7784 = vmatprep.subr.bf16.mxu0 %v10962_v57  ;;  %v11019_v50 = vld [vmem:[%s11543_s18 + $0x17cc] ss:$16 sps:$4 sm:$0xff]   ;;  %v11014_v57 = vld [vmem:[%s11543_s18 + $0x15c8] ss:$16 sps:$4 sm:$0xff]  }
 0x398   : > { %7825 = vmatprep.subr.bf16.mxu1 %v10965_v17  ;;  %v11017_v17 = vld [vmem:[%s11543_s18 + $0x17c8] ss:$16 sps:$4 sm:$0xff]  }
 0x399   : > { %v7490_v56 = vpop.f32.mrf.mxu0  ;;  %7735 = vmatmul.mubr.bf16.vlgmr.msra.gmra.mxu0 %v12013_v5 }
 0x39a   : > { %v7531_v61 = vpop.f32.mrf.mxu1  ;;  %7776 = vmatmul.mubr.bf16.vlgmr.msra.gmra.mxu1 %v12026_v6  ;;  %v7491_v7 = vadd.f32 %v7490_v56, %v12610_v39  ;;  %7785 = vmatpush1.bf16.msra.mxu0 %v10960_v40  ;;  %v11022_v40 = vld [vmem:[%s11543_s18 + $0x15ac] ss:$16 sps:$4 sm:$0xff]  }
 0x39b   : > { %7826 = vmatpush1.bf16.msra.mxu1 %v10963_v13  ;;  %v7492_v25 = vpop.f32.mrf.mxu0  ;;  %7786 = vmatprep.subr.bf16.mxu0 %v10968_v28  ;;  %v11025_v13 = vld [vmem:[%s11543_s18 + $0x17ac] ss:$16 sps:$4 sm:$0xff]   ;;  %v11020_v28 = vld [vmem:[%s11543_s18 + $0x15a8] ss:$16 sps:$4 sm:$0xff]  }
 0x39c   : > { %v7533_v59 = vpop.f32.mrf.mxu1  ;;  %7827 = vmatprep.subr.bf16.mxu1 %v10971_v32  ;;  %v12687_v9 = vadd.f32 %v7531_v61, %v7491_v7  ;;  %v7493_v5 = vadd.f32 %v7492_v25, %v12616_v54  ;;  %7816 = vmatprep.mubr.bf16.mxu0 %v12022_v16  ;;  %v10980_v16 = vld [vmem:[%s11543_s18 + $0x148c] ss:$16 sps:$4 sm:$0xff]   ;;  %v10978_v54 = vld [vmem:[%s11543_s18 + $0x1488] ss:$16 sps:$4 sm:$0xff]  }
 0x39d   : > { %7857 = vmatprep.mubr.bf16.mxu1 %v12034_v24  ;;  %v7494_v6 = vpop.f32.mrf.mxu0  ;;  %v10983_v24 = vld [vmem:[%s11543_s18 + $0x168c] ss:$16 sps:$4 sm:$0xff]   ;;  %v11023_v32 = vld [vmem:[%s11543_s18 + $0x17a8] ss:$16 sps:$4 sm:$0xff]  }
 0x39e   : > { %v7535_v39 = vpop.f32.mrf.mxu1  ;;  %v12692_v23 = vadd.f32 %v7533_v59, %v7493_v5  ;;  %7787 = vmatpush1.bf16.msra.mxu0 %v10966_v49  ;;  %v11028_v56 = vld [vmem:[%s11543_s18 + $0x158c] ss:$16 sps:$4 sm:$0xff]   ;;  %v11026_v7 = vld [vmem:[%s11543_s18 + $0x1588] ss:$16 sps:$4 sm:$0xff]  }
 0x39f   : > { %7828 = vmatpush1.bf16.msra.mxu1 %v10969_v19  ;;  %v7495_v30 = vpop.f32.mrf.mxu0  ;;  %7788 = vmatprep.subr.bf16.mxu0 %v10974_v43  ;;  %v11031_v61 = vld [vmem:[%s11543_s18 + $0x178c] ss:$16 sps:$4 sm:$0xff]   ;;  %v11029_v49 = vld [vmem:[%s11543_s18 + $0x1788] ss:$16 sps:$4 sm:$0xff]  }
 0x3a0   : > { %v7536_v55 = vpop.f32.mrf.mxu1  ;;  %7829 = vmatprep.subr.bf16.mxu1 %v10977_v44  ;;  %v11034_v19 = vld [vmem:[%s11543_s18 + $0x156c] ss:$16 sps:$4 sm:$0xff]   ;;  %v11032_v59 = vld [vmem:[%s11543_s18 + $0x1568] ss:$16 sps:$4 sm:$0xff]  }
 0x3a1   : > { %v11037_v25 = vld [vmem:[%s11543_s18 + $0x176c] ss:$16 sps:$4 sm:$0xff]   ;;  %v11035_v43 = vld [vmem:[%s11543_s18 + $0x1768] ss:$16 sps:$4 sm:$0xff]  }
 0x3a2   : > { %7789 = vmatpush1.bf16.msra.mxu0 %v10972_v29  ;;  %v11040_v44 = vld [vmem:[%s11543_s18 + $0x154c] ss:$16 sps:$4 sm:$0xff]   ;;  %v11038_v6 = vld [vmem:[%s11543_s18 + $0x1548] ss:$16 sps:$4 sm:$0xff]  }
 0x3a3   : > { %7830 = vmatpush1.bf16.msra.mxu1 %v10975_v51  ;;  %7790 = vmatprep.subr.bf16.mxu0 %v10980_v16  ;;  %v11043_v5 = vld [vmem:[%s11543_s18 + $0x174c] ss:$16 sps:$4 sm:$0xff]   ;;  %v11041_v39 = vld [vmem:[%s11543_s18 + $0x1748] ss:$16 sps:$4 sm:$0xff]  }
 0x3a4   : > { %7831 = vmatprep.subr.bf16.mxu1 %v10983_v24  ;;  %v11046_v29 = vld [vmem:[%s11543_s18 + $0x152c] ss:$16 sps:$4 sm:$0xff]   ;;  %v11044_v30 = vld [vmem:[%s11543_s18 + $0x1528] ss:$16 sps:$4 sm:$0xff]  }
 0x3a5   : > { %v11049_v51 = vld [vmem:[%s11543_s18 + $0x172c] ss:$16 sps:$4 sm:$0xff]   ;;  %v11047_v55 = vld [vmem:[%s11543_s18 + $0x1728] ss:$16 sps:$4 sm:$0xff]  }
 0x3a6   : > { %7791 = vmatpush1.bf16.msra.mxu0 %v10978_v54  ;;  %v11052_v16 = vld [vmem:[%s11543_s18 + $0x150c] ss:$16 sps:$4 sm:$0xff]   ;;  %v11050_v54 = vld [vmem:[%s11543_s18 + $0x1508] ss:$16 sps:$4 sm:$0xff]  }
 0x3a7   : > { %7832 = vmatpush1.bf16.msra.mxu1 %v10981_v31  ;;  %7792 = vmatprep.subr.bf16.mxu0 %v10986_v33  ;;  %v11055_v24 = vld [vmem:[%s11543_s18 + $0x170c] ss:$16 sps:$4 sm:$0xff]   ;;  %v11053_v31 = vld [vmem:[%s11543_s18 + $0x1708] ss:$16 sps:$4 sm:$0xff]  }
 0x3a8   : > { %7833 = vmatprep.subr.bf16.mxu1 %v10989_v36  ;;  %v11058_v33 = vld [vmem:[%s11543_s18 + $0x18ec] ss:$16 sps:$4 sm:$0xff]  }
 0x3a9   : > { %v11061_v36 = vld [vmem:[%s11543_s18 + $0x1aec] ss:$16 sps:$4 sm:$0xff]  }
 0x3aa   : > { %7793 = vmatpush1.bf16.msra.mxu0 %v10984_v34  ;;  %v11056_v34 = vld [vmem:[%s11543_s18 + $0x18e8] ss:$16 sps:$4 sm:$0xff]  }
 0x3ab   : > { %7834 = vmatpush1.bf16.msra.mxu1 %v10987_v8  ;;  %7794 = vmatprep.subr.bf16.mxu0 %v10992_v46  ;;  %v11059_v8 = vld [vmem:[%s11543_s18 + $0x1ae8] ss:$16 sps:$4 sm:$0xff]   ;;  %v11064_v46 = vld [vmem:[%s11543_s18 + $0x18cc] ss:$16 sps:$4 sm:$0xff]  }
 0x3ac   : > { %7835 = vmatprep.subr.bf16.mxu1 %v10995_v48  ;;  %v11067_v48 = vld [vmem:[%s11543_s18 + $0x1acc] ss:$16 sps:$4 sm:$0xff]  }
 0x3ae   : > { %7795 = vmatpush1.bf16.msra.mxu0 %v10990_v52 }
 0x3af   : > { %7836 = vmatpush1.bf16.msra.mxu1 %v10993_v38  ;;  %7796 = vmatprep.subr.bf16.mxu0 %v10998_v14 }
 0x3b0   : > { %7837 = vmatprep.subr.bf16.mxu1 %v11001_v22  ;;  %v11062_v22 = vld [vmem:[%s11543_s18 + $0x18c8] ss:$16 sps:$4 sm:$0xff]  }
 0x3b2   : > { %7797 = vmatpush1.bf16.msra.mxu0 %v10996_v12  ;;  %v11065_v12 = vld [vmem:[%s11543_s18 + $0x1ac8] ss:$16 sps:$4 sm:$0xff]  }
 0x3b3   : > { %7838 = vmatpush1.bf16.msra.mxu1 %v10999_v58  ;;  %7798 = vmatprep.subr.bf16.mxu0 %v11004_v1 }
 0x3b4   : > { %7839 = vmatprep.subr.bf16.mxu1 %v11007_v63  ;;  %v11070_v63 = vld [vmem:[%s11543_s18 + $0x18ac] ss:$16 sps:$4 sm:$0xff]  }
 0x3b6   : > { %7799 = vmatpush1.bf16.msra.mxu0 %v11002_v42  ;;  %v11073_v42 = vld [vmem:[%s11543_s18 + $0x1aac] ss:$16 sps:$4 sm:$0xff]  }
 0x3b7   : > { %7840 = vmatpush1.bf16.msra.mxu1 %v11005_v21  ;;  %7800 = vmatprep.subr.bf16.mxu0 %v11010_v27 }
 0x3b8   : > { %7841 = vmatprep.subr.bf16.mxu1 %v11013_v62  ;;  %v11068_v62 = vld [vmem:[%s11543_s18 + $0x18a8] ss:$16 sps:$4 sm:$0xff]  }
 0x3ba   : > { %7801 = vmatpush2.bf16.msra.mxu0 %v11008_v2  ;;  %v11071_v2 = vld [vmem:[%s11543_s18 + $0x1aa8] ss:$16 sps:$4 sm:$0xff]  }
 0x3bb   : > { %7842 = vmatpush2.bf16.msra.mxu1 %v11011_v3  ;;  %7802 = vmatprep.subr.bf16.mxu0 %v11016_v4 }
 0x3bc   : > { %7843 = vmatprep.subr.bf16.mxu1 %v11019_v50  ;;  %v11077_v50 = vld [vmem:[%s11543_s18 + $0x1a88] ss:$16 sps:$4 sm:$0xff]  }
 0x3be   : > { %7803 = vmatpush2.bf16.msra.mxu0 %v11014_v57  ;;  %v11082_v57 = vld [vmem:[%s11543_s18 + $0x186c] ss:$16 sps:$4 sm:$0xff]  }
 0x3bf   : > { %7844 = vmatpush2.bf16.msra.mxu1 %v11017_v17  ;;  %7804 = vmatprep.subr.bf16.mxu0 %v11022_v40  ;;  %v11085_v17 = vld [vmem:[%s11543_s18 + $0x1a6c] ss:$16 sps:$4 sm:$0xff]   ;;  %v11080_v40 = vld [vmem:[%s11543_s18 + $0x1868] ss:$16 sps:$4 sm:$0xff]  }
 0x3c0   : > { %7845 = vmatprep.subr.bf16.mxu1 %v11025_v13  ;;  %v11083_v13 = vld [vmem:[%s11543_s18 + $0x1a68] ss:$16 sps:$4 sm:$0xff]  }
 0x3c2   : > { %7805 = vmatpush2.bf16.msra.mxu0 %v11020_v28  ;;  %v11088_v28 = vld [vmem:[%s11543_s18 + $0x184c] ss:$16 sps:$4 sm:$0xff]  }
 0x3c3   : > { %7846 = vmatpush2.bf16.msra.mxu1 %v11023_v32  ;;  %7806 = vmatprep.subr.bf16.mxu0 %v11028_v56  ;;  %v11091_v32 = vld [vmem:[%s11543_s18 + $0x1a4c] ss:$16 sps:$4 sm:$0xff]   ;;  %v11086_v56 = vld [vmem:[%s11543_s18 + $0x1848] ss:$16 sps:$4 sm:$0xff]  }
 0x3c4   : > { %7847 = vmatprep.subr.bf16.mxu1 %v11031_v61  ;;  %v11089_v61 = vld [vmem:[%s11543_s18 + $0x1a48] ss:$16 sps:$4 sm:$0xff]  }
 0x3c6   : > { %7807 = vmatpush2.bf16.msra.mxu0 %v11026_v7  ;;  %v11094_v7 = vld [vmem:[%s11543_s18 + $0x182c] ss:$16 sps:$4 sm:$0xff]  }
 0x3c7   : > { %7848 = vmatpush2.bf16.msra.mxu1 %v11029_v49  ;;  %7808 = vmatprep.subr.bf16.mxu0 %v11034_v19  ;;  %v11097_v49 = vld [vmem:[%s11543_s18 + $0x1a2c] ss:$16 sps:$4 sm:$0xff]   ;;  %v11092_v19 = vld [vmem:[%s11543_s18 + $0x1828] ss:$16 sps:$4 sm:$0xff]  }
 0x3c8   : > { %7849 = vmatprep.subr.bf16.mxu1 %v11037_v25  ;;  %v11095_v25 = vld [vmem:[%s11543_s18 + $0x1a28] ss:$16 sps:$4 sm:$0xff]  }
 0x3ca   : > { %7809 = vmatpush2.bf16.msra.mxu0 %v11032_v59  ;;  %v11100_v59 = vld [vmem:[%s11543_s18 + $0x180c] ss:$16 sps:$4 sm:$0xff]  }
 0x3cb   : > { %7850 = vmatpush2.bf16.msra.mxu1 %v11035_v43  ;;  %7810 = vmatprep.subr.bf16.mxu0 %v11040_v44  ;;  %v11103_v43 = vld [vmem:[%s11543_s18 + $0x1a0c] ss:$16 sps:$4 sm:$0xff]   ;;  %v11098_v44 = vld [vmem:[%s11543_s18 + $0x1808] ss:$16 sps:$4 sm:$0xff]  }
 0x3cc   : > { %7851 = vmatprep.subr.bf16.mxu1 %v11043_v5  ;;  %v11101_v5 = vld [vmem:[%s11543_s18 + $0x1a08] ss:$16 sps:$4 sm:$0xff]  }
 0x3ce   : > { %7811 = vmatpush2.bf16.msra.mxu0 %v11038_v6  ;;  %v11106_v6 = vld [vmem:[%s11543_s18 + $0x19ec] ss:$16 sps:$4 sm:$0xff]  }
 0x3cf   : > { %7852 = vmatpush2.bf16.msra.mxu1 %v11041_v39  ;;  %7812 = vmatprep.subr.bf16.mxu0 %v11046_v29  ;;  %v11109_v39 = vld [vmem:[%s11543_s18 + $0x1bec] ss:$16 sps:$4 sm:$0xff]   ;;  %v11104_v29 = vld [vmem:[%s11543_s18 + $0x19e8] ss:$16 sps:$4 sm:$0xff]  }
 0x3d0   : > { %7853 = vmatprep.subr.bf16.mxu1 %v11049_v51  ;;  %v11107_v51 = vld [vmem:[%s11543_s18 + $0x1be8] ss:$16 sps:$4 sm:$0xff]  }
 0x3d2   : > { %7813 = vmatpush2.bf16.msra.mxu0 %v11044_v30  ;;  %v11112_v30 = vld [vmem:[%s11543_s18 + $0x19cc] ss:$16 sps:$4 sm:$0xff]  }
 0x3d3   : > { %7854 = vmatpush2.bf16.msra.mxu1 %v11047_v55  ;;  %7814 = vmatprep.subr.bf16.mxu0 %v11052_v16  ;;  %v11115_v55 = vld [vmem:[%s11543_s18 + $0x1bcc] ss:$16 sps:$4 sm:$0xff]   ;;  %v11110_v16 = vld [vmem:[%s11543_s18 + $0x19c8] ss:$16 sps:$4 sm:$0xff]  }
 0x3d4   : > { %7855 = vmatprep.subr.bf16.mxu1 %v11055_v24  ;;  %v11113_v24 = vld [vmem:[%s11543_s18 + $0x1bc8] ss:$16 sps:$4 sm:$0xff]  }
 0x3d6   : > { %7815 = vmatpush2.bf16.msra.mxu0 %v11050_v54  ;;  %v11118_v54 = vld [vmem:[%s11543_s18 + $0x19ac] ss:$16 sps:$4 sm:$0xff]  }
 0x3d7   : > { %7856 = vmatpush2.bf16.msra.mxu1 %v11053_v31  ;;  %7866 = vmatprep.subr.bf16.mxu0 %v11058_v33  ;;  %v11121_v31 = vld [vmem:[%s11543_s18 + $0x1bac] ss:$16 sps:$4 sm:$0xff]   ;;  %v11116_v33 = vld [vmem:[%s11543_s18 + $0x19a8] ss:$16 sps:$4 sm:$0xff]  }
 0x3d8   : > { %7907 = vmatprep.subr.bf16.mxu1 %v11061_v36  ;;  %v11119_v36 = vld [vmem:[%s11543_s18 + $0x1ba8] ss:$16 sps:$4 sm:$0xff]  }
 0x3d9   : > { %v7572_v52 = vpop.f32.mrf.mxu0  ;;  %7817 = vmatmul.mubr.bf16.vlgmr.msra.gmra.mxu0 %v12111_v11 }
 0x3da   : > { %v7613_v38 = vpop.f32.mrf.mxu1  ;;  %7858 = vmatmul.mubr.bf16.vlgmr.msra.gmra.mxu1 %v12124_v60  ;;  %v7573_v14 = vadd.f32 %v7572_v52, %v12687_v9  ;;  %7867 = vmatpush1.bf16.msra.mxu0 %v11056_v34  ;;  %v11124_v34 = vld [vmem:[%s11543_s18 + $0x198c] ss:$16 sps:$4 sm:$0xff]  }
 0x3db   : > { %7908 = vmatpush1.bf16.msra.mxu1 %v11059_v8  ;;  %v7574_v58 = vpop.f32.mrf.mxu0  ;;  %7868 = vmatprep.subr.bf16.mxu0 %v11064_v46  ;;  %v11127_v8 = vld [vmem:[%s11543_s18 + $0x1b8c] ss:$16 sps:$4 sm:$0xff]   ;;  %v11122_v46 = vld [vmem:[%s11543_s18 + $0x1988] ss:$16 sps:$4 sm:$0xff]  }
 0x3dc   : > { %v7615_v1 = vpop.f32.mrf.mxu1  ;;  %7909 = vmatprep.subr.bf16.mxu1 %v11067_v48  ;;  %v12761_v21 = vadd.f32 %v7613_v38, %v7573_v14  ;;  %v7575_v11 = vadd.f32 %v7574_v58, %v12692_v23  ;;  %7898 = vmatprep.mubr.bf16.mxu0 %v12120_v26  ;;  %v11076_v26 = vld [vmem:[%s11543_s18 + $0x188c] ss:$16 sps:$4 sm:$0xff]   ;;  %v11074_v23 = vld [vmem:[%s11543_s18 + $0x1888] ss:$16 sps:$4 sm:$0xff]  }
 0x3dd   : > { %7939 = vmatprep.mubr.bf16.mxu1 %v12132_v35  ;;  %v7576_v60 = vpop.f32.mrf.mxu0  ;;  %v11079_v35 = vld [vmem:[%s11543_s18 + $0x1a8c] ss:$16 sps:$4 sm:$0xff]   ;;  %v11125_v48 = vld [vmem:[%s11543_s18 + $0x1b88] ss:$16 sps:$4 sm:$0xff]  }
 0x3de   : > { %v7617_v9 = vpop.f32.mrf.mxu1  ;;  %v12766_v27 = vadd.f32 %v7615_v1, %v7575_v11  ;;  %7869 = vmatpush1.bf16.msra.mxu0 %v11062_v22  ;;  %v11130_v52 = vld [vmem:[%s11543_s18 + $0x196c] ss:$16 sps:$4 sm:$0xff]   ;;  %v11128_v14 = vld [vmem:[%s11543_s18 + $0x1968] ss:$16 sps:$4 sm:$0xff]  }
 0x3df   : > { %7910 = vmatpush1.bf16.msra.mxu1 %v11065_v12  ;;  %v7577_v3 = vpop.f32.mrf.mxu0  ;;  %7870 = vmatprep.subr.bf16.mxu0 %v11070_v63  ;;  %v11133_v38 = vld [vmem:[%s11543_s18 + $0x1b6c] ss:$16 sps:$4 sm:$0xff]   ;;  %v11131_v22 = vld [vmem:[%s11543_s18 + $0x1b68] ss:$16 sps:$4 sm:$0xff]  }
 0x3e0   : > { %v7618_v4 = vpop.f32.mrf.mxu1  ;;  %7911 = vmatprep.subr.bf16.mxu1 %v11073_v42  ;;  %v11136_v12 = vld [vmem:[%s11543_s18 + $0x194c] ss:$16 sps:$4 sm:$0xff]   ;;  %v11134_v1 = vld [vmem:[%s11543_s18 + $0x1948] ss:$16 sps:$4 sm:$0xff]  }
 0x3e1   : > { %v11139_v58 = vld [vmem:[%s11543_s18 + $0x1b4c] ss:$16 sps:$4 sm:$0xff]   ;;  %v11137_v63 = vld [vmem:[%s11543_s18 + $0x1b48] ss:$16 sps:$4 sm:$0xff]  }
 0x3e2   : > { %7871 = vmatpush1.bf16.msra.mxu0 %v11068_v62  ;;  %v11142_v42 = vld [vmem:[%s11543_s18 + $0x192c] ss:$16 sps:$4 sm:$0xff]   ;;  %v11140_v60 = vld [vmem:[%s11543_s18 + $0x1928] ss:$16 sps:$4 sm:$0xff]  }
 0x3e3   : > { %7912 = vmatpush1.bf16.msra.mxu1 %v11071_v2  ;;  %7872 = vmatprep.subr.bf16.mxu0 %v11076_v26  ;;  %v11145_v11 = vld [vmem:[%s11543_s18 + $0x1b2c] ss:$16 sps:$4 sm:$0xff]   ;;  %v11143_v9 = vld [vmem:[%s11543_s18 + $0x1b28] ss:$16 sps:$4 sm:$0xff]  }
 0x3e4   : > { %7913 = vmatprep.subr.bf16.mxu1 %v11079_v35  ;;  %v11148_v62 = vld [vmem:[%s11543_s18 + $0x190c] ss:$16 sps:$4 sm:$0xff]   ;;  %v11146_v3 = vld [vmem:[%s11543_s18 + $0x1908] ss:$16 sps:$4 sm:$0xff]  }
 0x3e5   : > { %v11151_v2 = vld [vmem:[%s11543_s18 + $0x1b0c] ss:$16 sps:$4 sm:$0xff]   ;;  %v11149_v4 = vld [vmem:[%s11543_s18 + $0x1b08] ss:$16 sps:$4 sm:$0xff]  }
 0x3e6   : > { %7873 = vmatpush1.bf16.msra.mxu0 %v11074_v23  ;;  %v11154_v26 = vld [vmem:[%s11543_s18 + $0x1cec] ss:$16 sps:$4 sm:$0xff]   ;;  %v11152_v23 = vld [vmem:[%s11543_s18 + $0x1ce8] ss:$16 sps:$4 sm:$0xff]  }
 0x3e7   : > { %7914 = vmatpush1.bf16.msra.mxu1 %v11077_v50  ;;  %7874 = vmatprep.subr.bf16.mxu0 %v11082_v57  ;;  %v11157_v35 = vld [vmem:[%s11543_s18 + $0x1eec] ss:$16 sps:$4 sm:$0xff]   ;;  %v11155_v50 = vld [vmem:[%s11543_s18 + $0x1ee8] ss:$16 sps:$4 sm:$0xff]  }
 0x3e8   : > { %7915 = vmatprep.subr.bf16.mxu1 %v11085_v17  ;;  %v11160_v57 = vld [vmem:[%s11543_s18 + $0x1ccc] ss:$16 sps:$4 sm:$0xff]  }
 0x3e9   : > { %v11163_v17 = vld [vmem:[%s11543_s18 + $0x1ecc] ss:$16 sps:$4 sm:$0xff]  }
 0x3ea   : > { %7875 = vmatpush1.bf16.msra.mxu0 %v11080_v40 }
 0x3eb   : > { %7916 = vmatpush1.bf16.msra.mxu1 %v11083_v13  ;;  %7876 = vmatprep.subr.bf16.mxu0 %v11088_v28 }
 0x3ec   : > { %7917 = vmatprep.subr.bf16.mxu1 %v11091_v32  ;;  %v11158_v32 = vld [vmem:[%s11543_s18 + $0x1cc8] ss:$16 sps:$4 sm:$0xff]  }
 0x3ee   : > { %7877 = vmatpush1.bf16.msra.mxu0 %v11086_v56  ;;  %v11161_v56 = vld [vmem:[%s11543_s18 + $0x1ec8] ss:$16 sps:$4 sm:$0xff]  }
 0x3ef   : > { %7918 = vmatpush1.bf16.msra.mxu1 %v11089_v61  ;;  %7878 = vmatprep.subr.bf16.mxu0 %v11094_v7 }
 0x3f0   : > { %7919 = vmatprep.subr.bf16.mxu1 %v11097_v49  ;;  %v11166_v49 = vld [vmem:[%s11543_s18 + $0x1cac] ss:$16 sps:$4 sm:$0xff]  }
 0x3f2   : > { %7879 = vmatpush1.bf16.msra.mxu0 %v11092_v19  ;;  %v11169_v19 = vld [vmem:[%s11543_s18 + $0x1eac] ss:$16 sps:$4 sm:$0xff]  }
 0x3f3   : > { %7920 = vmatpush1.bf16.msra.mxu1 %v11095_v25  ;;  %7880 = vmatprep.subr.bf16.mxu0 %v11100_v59 }
 0x3f4   : > { %7921 = vmatprep.subr.bf16.mxu1 %v11103_v43  ;;  %v11164_v43 = vld [vmem:[%s11543_s18 + $0x1ca8] ss:$16 sps:$4 sm:$0xff]  }
 0x3f6   : > { %7881 = vmatpush1.bf16.msra.mxu0 %v11098_v44  ;;  %v11167_v44 = vld [vmem:[%s11543_s18 + $0x1ea8] ss:$16 sps:$4 sm:$0xff]  }
 0x3f7   : > { %7922 = vmatpush1.bf16.msra.mxu1 %v11101_v5  ;;  %7882 = vmatprep.subr.bf16.mxu0 %v11106_v6 }
 0x3f8   : > { %7923 = vmatprep.subr.bf16.mxu1 %v11109_v39  ;;  %v11173_v39 = vld [vmem:[%s11543_s18 + $0x1e88] ss:$16 sps:$4 sm:$0xff]  }
 0x3fa   : > { %7883 = vmatpush2.bf16.msra.mxu0 %v11104_v29  ;;  %v11178_v29 = vld [vmem:[%s11543_s18 + $0x1c6c] ss:$16 sps:$4 sm:$0xff]  }
 0x3fb   : > { %7924 = vmatpush2.bf16.msra.mxu1 %v11107_v51  ;;  %7884 = vmatprep.subr.bf16.mxu0 %v11112_v30  ;;  %v11181_v51 = vld [vmem:[%s11543_s18 + $0x1e6c] ss:$16 sps:$4 sm:$0xff]   ;;  %v11176_v30 = vld [vmem:[%s11543_s18 + $0x1c68] ss:$16 sps:$4 sm:$0xff]  }
 0x3fc   : > { %7925 = vmatprep.subr.bf16.mxu1 %v11115_v55  ;;  %v11179_v55 = vld [vmem:[%s11543_s18 + $0x1e68] ss:$16 sps:$4 sm:$0xff]  }
 0x3fe   : > { %7885 = vmatpush2.bf16.msra.mxu0 %v11110_v16  ;;  %v11184_v16 = vld [vmem:[%s11543_s18 + $0x1c4c] ss:$16 sps:$4 sm:$0xff]  }
 0x3ff   : > { %7926 = vmatpush2.bf16.msra.mxu1 %v11113_v24  ;;  %7886 = vmatprep.subr.bf16.mxu0 %v11118_v54  ;;  %v11187_v24 = vld [vmem:[%s11543_s18 + $0x1e4c] ss:$16 sps:$4 sm:$0xff]   ;;  %v11182_v54 = vld [vmem:[%s11543_s18 + $0x1c48] ss:$16 sps:$4 sm:$0xff]  }
 0x400   : > { %7927 = vmatprep.subr.bf16.mxu1 %v11121_v31  ;;  %v11185_v31 = vld [vmem:[%s11543_s18 + $0x1e48] ss:$16 sps:$4 sm:$0xff]  }
 0x402   : > { %7887 = vmatpush2.bf16.msra.mxu0 %v11116_v33  ;;  %v11190_v33 = vld [vmem:[%s11543_s18 + $0x1c2c] ss:$16 sps:$4 sm:$0xff]  }
 0x403   : > { %7928 = vmatpush2.bf16.msra.mxu1 %v11119_v36  ;;  %7888 = vmatprep.subr.bf16.mxu0 %v11124_v34  ;;  %v11193_v36 = vld [vmem:[%s11543_s18 + $0x1e2c] ss:$16 sps:$4 sm:$0xff]   ;;  %v11188_v34 = vld [vmem:[%s11543_s18 + $0x1c28] ss:$16 sps:$4 sm:$0xff]  }
 0x404   : > { %7929 = vmatprep.subr.bf16.mxu1 %v11127_v8  ;;  %v11191_v8 = vld [vmem:[%s11543_s18 + $0x1e28] ss:$16 sps:$4 sm:$0xff]  }
 0x406   : > { %7889 = vmatpush2.bf16.msra.mxu0 %v11122_v46  ;;  %v11196_v46 = vld [vmem:[%s11543_s18 + $0x1c0c] ss:$16 sps:$4 sm:$0xff]  }
 0x407   : > { %7930 = vmatpush2.bf16.msra.mxu1 %v11125_v48  ;;  %7890 = vmatprep.subr.bf16.mxu0 %v11130_v52  ;;  %v11199_v48 = vld [vmem:[%s11543_s18 + $0x1e0c] ss:$16 sps:$4 sm:$0xff]   ;;  %v11194_v52 = vld [vmem:[%s11543_s18 + $0x1c08] ss:$16 sps:$4 sm:$0xff]  }
 0x408   : > { %7931 = vmatprep.subr.bf16.mxu1 %v11133_v38  ;;  %v11197_v38 = vld [vmem:[%s11543_s18 + $0x1e08] ss:$16 sps:$4 sm:$0xff]  }
 0x40a   : > { %7891 = vmatpush2.bf16.msra.mxu0 %v11128_v14  ;;  %v11202_v14 = vld [vmem:[%s11543_s18 + $0x1dec] ss:$16 sps:$4 sm:$0xff]  }
 0x40b   : > { %7932 = vmatpush2.bf16.msra.mxu1 %v11131_v22  ;;  %7892 = vmatprep.subr.bf16.mxu0 %v11136_v12  ;;  %v11205_v22 = vld [vmem:[%s11543_s18 + $0x1fec] ss:$16 sps:$4 sm:$0xff]   ;;  %v11200_v12 = vld [vmem:[%s11543_s18 + $0x1de8] ss:$16 sps:$4 sm:$0xff]  }
 0x40c   : > { %7933 = vmatprep.subr.bf16.mxu1 %v11139_v58  ;;  %v11203_v58 = vld [vmem:[%s11543_s18 + $0x1fe8] ss:$16 sps:$4 sm:$0xff]  }
 0x40e   : > { %7893 = vmatpush2.bf16.msra.mxu0 %v11134_v1  ;;  %v11208_v1 = vld [vmem:[%s11543_s18 + $0x1dcc] ss:$16 sps:$4 sm:$0xff]  }
 0x40f   : > { %7934 = vmatpush2.bf16.msra.mxu1 %v11137_v63  ;;  %7894 = vmatprep.subr.bf16.mxu0 %v11142_v42  ;;  %v11211_v63 = vld [vmem:[%s11543_s18 + $0x1fcc] ss:$16 sps:$4 sm:$0xff]   ;;  %v11206_v42 = vld [vmem:[%s11543_s18 + $0x1dc8] ss:$16 sps:$4 sm:$0xff]  }
 0x410   : > { %7935 = vmatprep.subr.bf16.mxu1 %v11145_v11  ;;  %v11209_v11 = vld [vmem:[%s11543_s18 + $0x1fc8] ss:$16 sps:$4 sm:$0xff]  }
 0x412   : > { %7895 = vmatpush2.bf16.msra.mxu0 %v11140_v60  ;;  %v11214_v60 = vld [vmem:[%s11543_s18 + $0x1dac] ss:$16 sps:$4 sm:$0xff]  }
 0x413   : > { %7936 = vmatpush2.bf16.msra.mxu1 %v11143_v9  ;;  %7896 = vmatprep.subr.bf16.mxu0 %v11148_v62  ;;  %v11217_v9 = vld [vmem:[%s11543_s18 + $0x1fac] ss:$16 sps:$4 sm:$0xff]   ;;  %v11212_v62 = vld [vmem:[%s11543_s18 + $0x1da8] ss:$16 sps:$4 sm:$0xff]  }
 0x414   : > { %7937 = vmatprep.subr.bf16.mxu1 %v11151_v2  ;;  %v11215_v2 = vld [vmem:[%s11543_s18 + $0x1fa8] ss:$16 sps:$4 sm:$0xff]  }
 0x416   : > { %7897 = vmatpush2.bf16.msra.mxu0 %v11146_v3  ;;  %v11220_v3 = vld [vmem:[%s11543_s18 + $0x1d8c] ss:$16 sps:$4 sm:$0xff]  }
 0x417   : > { %7938 = vmatpush2.bf16.msra.mxu1 %v11149_v4  ;;  %7948 = vmatprep.subr.bf16.mxu0 %v11154_v26  ;;  %v11223_v4 = vld [vmem:[%s11543_s18 + $0x1f8c] ss:$16 sps:$4 sm:$0xff]   ;;  %v11218_v26 = vld [vmem:[%s11543_s18 + $0x1d88] ss:$16 sps:$4 sm:$0xff]  }
 0x418   : > { %7989 = vmatprep.subr.bf16.mxu1 %v11157_v35  ;;  %v11221_v35 = vld [vmem:[%s11543_s18 + $0x1f88] ss:$16 sps:$4 sm:$0xff]  }
 0x419   : > { %v7654_v40 = vpop.f32.mrf.mxu0  ;;  %7899 = vmatmul.mubr.bf16.vlgmr.msra.gmra.mxu0 %v12207_v41 }
 0x41a   : > { %v7695_v13 = vpop.f32.mrf.mxu1  ;;  %7940 = vmatmul.mubr.bf16.vlgmr.msra.gmra.mxu1 %v12220_v0  ;;  %v7655_v28 = vadd.f32 %v7654_v40, %v12761_v21  ;;  %7949 = vmatpush1.bf16.msra.mxu0 %v11152_v23  ;;  %v11226_v23 = vld [vmem:[%s11543_s18 + $0x1d6c] ss:$16 sps:$4 sm:$0xff]  }
 0x41b   : > { %7990 = vmatpush1.bf16.msra.mxu1 %v11155_v50  ;;  %v7656_v61 = vpop.f32.mrf.mxu0  ;;  %7950 = vmatprep.subr.bf16.mxu0 %v11160_v57  ;;  %v11229_v50 = vld [vmem:[%s11543_s18 + $0x1f6c] ss:$16 sps:$4 sm:$0xff]   ;;  %v11224_v57 = vld [vmem:[%s11543_s18 + $0x1d68] ss:$16 sps:$4 sm:$0xff]  }
 0x41c   : > { %v7697_v7 = vpop.f32.mrf.mxu1  ;;  %7991 = vmatprep.subr.bf16.mxu1 %v11163_v17  ;;  %v12835_v25 = vadd.f32 %v7695_v13, %v7655_v28  ;;  %v7657_v41 = vadd.f32 %v7656_v61, %v12766_v27  ;;  %7980 = vmatprep.mubr.bf16.mxu0 %v12216_v53  ;;  %v11172_v53 = vld [vmem:[%s11543_s18 + $0x1c8c] ss:$16 sps:$4 sm:$0xff]   ;;  %v11170_v27 = vld [vmem:[%s11543_s18 + $0x1c88] ss:$16 sps:$4 sm:$0xff]  }
 0x41d   : > { %8021 = vmatprep.mubr.bf16.mxu1 %v12228_v47  ;;  %v7658_v0 = vpop.f32.mrf.mxu0  ;;  %v11175_v47 = vld [vmem:[%s11543_s18 + $0x1e8c] ss:$16 sps:$4 sm:$0xff]   ;;  %v11227_v17 = vld [vmem:[%s11543_s18 + $0x1f68] ss:$16 sps:$4 sm:$0xff]  }
 0x41e   : > { %v7699_v21 = vpop.f32.mrf.mxu1  ;;  %v12840_v59 = vadd.f32 %v7697_v7, %v7657_v41  ;;  %7951 = vmatpush1.bf16.msra.mxu0 %v11158_v32  ;;  %v11232_v40 = vld [vmem:[%s11543_s18 + $0x1d4c] ss:$16 sps:$4 sm:$0xff]   ;;  %v11230_v28 = vld [vmem:[%s11543_s18 + $0x1d48] ss:$16 sps:$4 sm:$0xff]  }
 0x41f   : > { %7992 = vmatpush1.bf16.msra.mxu1 %v11161_v56  ;;  %v7659_v5 = vpop.f32.mrf.mxu0  ;;  %7952 = vmatprep.subr.bf16.mxu0 %v11166_v49  ;;  %v11235_v13 = vld [vmem:[%s11543_s18 + $0x1f4c] ss:$16 sps:$4 sm:$0xff]   ;;  %v11233_v32 = vld [vmem:[%s11543_s18 + $0x1f48] ss:$16 sps:$4 sm:$0xff]  }
 0x420   : > { %v7700_v6 = vpop.f32.mrf.mxu1  ;;  %7993 = vmatprep.subr.bf16.mxu1 %v11169_v19  ;;  %v11238_v56 = vld [vmem:[%s11543_s18 + $0x1d2c] ss:$16 sps:$4 sm:$0xff]   ;;  %v11236_v7 = vld [vmem:[%s11543_s18 + $0x1d28] ss:$16 sps:$4 sm:$0xff]  }
 0x421   : > { %v11241_v61 = vld [vmem:[%s11543_s18 + $0x1f2c] ss:$16 sps:$4 sm:$0xff]   ;;  %v11239_v49 = vld [vmem:[%s11543_s18 + $0x1f28] ss:$16 sps:$4 sm:$0xff]  }
 0x422   : > { %7953 = vmatpush1.bf16.msra.mxu0 %v11164_v43  ;;  %v11244_v19 = vld [vmem:[%s11543_s18 + $0x1d0c] ss:$16 sps:$4 sm:$0xff]   ;;  %v11242_v0 = vld [vmem:[%s11543_s18 + $0x1d08] ss:$16 sps:$4 sm:$0xff]  }
 0x423   : > { %7994 = vmatpush1.bf16.msra.mxu1 %v11167_v44  ;;  %7954 = vmatprep.subr.bf16.mxu0 %v11172_v53  ;;  %v11247_v41 = vld [vmem:[%s11543_s18 + $0x1f0c] ss:$16 sps:$4 sm:$0xff]   ;;  %v11245_v21 = vld [vmem:[%s11543_s18 + $0x1f08] ss:$16 sps:$4 sm:$0xff]  }
 0x424   : > { %7995 = vmatprep.subr.bf16.mxu1 %v11175_v47 }
 0x426   : > { %7955 = vmatpush1.bf16.msra.mxu0 %v11170_v27 }
 0x427   : > { %7996 = vmatpush1.bf16.msra.mxu1 %v11173_v39  ;;  %7956 = vmatprep.subr.bf16.mxu0 %v11178_v29 }
 0x428   : > { %7997 = vmatprep.subr.bf16.mxu1 %v11181_v51 }
 0x42a   : > { %7957 = vmatpush1.bf16.msra.mxu0 %v11176_v30 }
 0x42b   : > { %7998 = vmatpush1.bf16.msra.mxu1 %v11179_v55  ;;  %7958 = vmatprep.subr.bf16.mxu0 %v11184_v16 }
 0x42c   : > { %7999 = vmatprep.subr.bf16.mxu1 %v11187_v24 }
 0x42e   : > { %7959 = vmatpush1.bf16.msra.mxu0 %v11182_v54 }
 0x42f   : > { %8000 = vmatpush1.bf16.msra.mxu1 %v11185_v31  ;;  %7960 = vmatprep.subr.bf16.mxu0 %v11190_v33 }
 0x430   : > { %8001 = vmatprep.subr.bf16.mxu1 %v11193_v36 }
 0x432   : > { %7961 = vmatpush1.bf16.msra.mxu0 %v11188_v34 }
 0x433   : > { %8002 = vmatpush1.bf16.msra.mxu1 %v11191_v8  ;;  %7962 = vmatprep.subr.bf16.mxu0 %v11196_v46 }
 0x434   : > { %8003 = vmatprep.subr.bf16.mxu1 %v11199_v48 }
 0x436   : > { %7963 = vmatpush1.bf16.msra.mxu0 %v11194_v52 }
 0x437   : > { %8004 = vmatpush1.bf16.msra.mxu1 %v11197_v38  ;;  %7964 = vmatprep.subr.bf16.mxu0 %v11202_v14 }
 0x438   : > { %8005 = vmatprep.subr.bf16.mxu1 %v11205_v22 }
 0x43a   : > { %7965 = vmatpush2.bf16.msra.mxu0 %v11200_v12 }
 0x43b   : > { %8006 = vmatpush2.bf16.msra.mxu1 %v11203_v58  ;;  %7966 = vmatprep.subr.bf16.mxu0 %v11208_v1 }
 0x43c   : > { %8007 = vmatprep.subr.bf16.mxu1 %v11211_v63 }
 0x43e   : > { %7967 = vmatpush2.bf16.msra.mxu0 %v11206_v42  ;;  %v11379_v42 = vmov 1983009808  }
 0x43f   : > { %8008 = vmatpush2.bf16.msra.mxu1 %v11209_v11  ;;  %7968 = vmatprep.subr.bf16.mxu0 %v11214_v60  ;;  %v8037_v11 = vunpack.c.l.s4 %v11379_v42 }
 0x440   : > { %8009 = vmatprep.subr.bf16.mxu1 %v11217_v9 }
 0x442   : > { %7969 = vmatpush2.bf16.msra.mxu0 %v11212_v62 }
 0x443   : > { %8010 = vmatpush2.bf16.msra.mxu1 %v11215_v2  ;;  %7970 = vmatprep.subr.bf16.mxu0 %v11220_v3  ;;  %v8038_v2 = vunpack.c.0.s8 %v8037_v11 }
 0x444   : > { %8011 = vmatprep.subr.bf16.mxu1 %v11223_v4 }
 0x446   : > { %7971 = vmatpush2.bf16.msra.mxu0 %v11218_v26 }
 0x447   : > { %8012 = vmatpush2.bf16.msra.mxu1 %v11221_v35  ;;  %7972 = vmatprep.subr.bf16.mxu0 %v11226_v23 }
 0x448   : > { %8013 = vmatprep.subr.bf16.mxu1 %v11229_v50 }
 0x44a   : > { %7973 = vmatpush2.bf16.msra.mxu0 %v11224_v57 }
 0x44b   : > { %8014 = vmatpush2.bf16.msra.mxu1 %v11227_v17  ;;  %7974 = vmatprep.subr.bf16.mxu0 %v11232_v40  ;;  %v12901_v17 = vsub.s32 %v8038_v2, %v11600_v45 }
 0x44c   : > { %8015 = vmatprep.subr.bf16.mxu1 %v11235_v13 }
 0x44e   : > { %7975 = vmatpush2.bf16.msra.mxu0 %v11230_v28 }
 0x44f   : > { %8016 = vmatpush2.bf16.msra.mxu1 %v11233_v32  ;;  %7976 = vmatprep.subr.bf16.mxu0 %v11238_v56 }
 0x450   : > { %8017 = vmatprep.subr.bf16.mxu1 %v11241_v61  ;;  %v8042_v61 = vrot.slane %v8034_v18, %v12901_v17 }
 0x452   : > { %7977 = vmatpush2.bf16.msra.mxu0 %v11236_v7 }
 0x453   : > { %8018 = vmatpush2.bf16.msra.mxu1 %v11239_v49  ;;  %7978 = vmatprep.subr.bf16.mxu0 %v11244_v19  ;;  %v337_v49 = vld [vmem:[#allocation2] sm:$0xff] }
 0x454   : > { %8019 = vmatprep.subr.bf16.mxu1 %v11247_v41 }
 0x456   : > { %7979 = vmatpush2.bf16.msra.mxu0 %v11242_v0 }
 0x457   : > { %8020 = vmatpush2.bf16.msra.mxu1 %v11245_v21 }
 0x459   : > { %v7736_v43 = vpop.f32.mrf.mxu0  ;;  %7981 = vmatmul.mubr.bf16.vlgmr.msra.gmra.mxu0 %v12296_v10 }
 0x45a   : > { %v7777_v44 = vpop.f32.mrf.mxu1  ;;  %8022 = vmatmul.mubr.bf16.vlgmr.msra.gmra.mxu1 %v12306_v37  ;;  %v7737_v5 = vadd.f32 %v7736_v43, %v12835_v25 }
 0x45b   : > { %v7738_v6 = vpop.f32.mrf.mxu0 }
 0x45c   : > { %v7779_v53 = vpop.f32.mrf.mxu1  ;;  %v7778_v47 = vadd.f32 %v7777_v44, %v7737_v5  ;;  %v7739_v27 = vadd.f32 %v7738_v6, %v12840_v59 }
 0x45d   : > { %v7740_v39 = vpop.f32.mrf.mxu0 }
 0x45e   : > { %v7781_v29 = vpop.f32.mrf.mxu1  ;;  %v7780_v51 = vadd.f32 %v7779_v53, %v7739_v27 }
 0x45f   : > { %v7741_v30 = vpop.f32.mrf.mxu0 }
 0x460   : > { %v7782_v55 = vpop.f32.mrf.mxu1 }
 0x499   : > { %v7818_v16 = vpop.f32.mrf.mxu0 }
 0x49a   : > { %v7859_v24 = vpop.f32.mrf.mxu1  ;;  %v7819_v54 = vadd.f32 %v7818_v16, %v7778_v47 }
 0x49b   : > { %v7820_v31 = vpop.f32.mrf.mxu0 }
 0x49c   : > { %v7861_v33 = vpop.f32.mrf.mxu1  ;;  %v7860_v10 = vadd.f32 %v7859_v24, %v7819_v54  ;;  %v7821_v36 = vadd.f32 %v7820_v31, %v7780_v51 }
 0x49d   : > { %v7822_v37 = vpop.f32.mrf.mxu0 }
 0x49e   : > { %v7863_v34 = vpop.f32.mrf.mxu1  ;;  %v7862_v25 = vadd.f32 %v7861_v33, %v7821_v36 }
 0x49f   : > { %v7823_v8 = vpop.f32.mrf.mxu0 }
 0x4a0   : > { %v7864_v46 = vpop.f32.mrf.mxu1 }
 0x4d9   : > { %v7900_v48 = vpop.f32.mrf.mxu0 }
 0x4da   : > { %v7941_v52 = vpop.f32.mrf.mxu1  ;;  %v7901_v59 = vadd.f32 %v7900_v48, %v7860_v10 }
 0x4db   : > { %v7902_v38 = vpop.f32.mrf.mxu0 }
 0x4dc   : > { %v7943_v14 = vpop.f32.mrf.mxu1  ;;  %v7942_v22 = vadd.f32 %v7941_v52, %v7901_v59  ;;  %v7903_v60 = vadd.f32 %v7902_v38, %v7862_v25 }
 0x4dd   : > { %v7904_v12 = vpop.f32.mrf.mxu0 }
 0x4de   : > { %v7945_v58 = vpop.f32.mrf.mxu1  ;;  %v7944_v3 = vadd.f32 %v7943_v14, %v7903_v60 }
 0x4df   : > { %v7905_v1 = vpop.f32.mrf.mxu0 }
 0x4e0   : > { %v7946_v63 = vpop.f32.mrf.mxu1 }
 0x519   : > { %v7982_v9 = vpop.f32.mrf.mxu0 }
 0x51a   : > { %v8023_v62 = vpop.f32.mrf.mxu1  ;;  %v7983_v4 = vadd.f32 %v7982_v9, %v7942_v22 }
 0x51b   : > { %v7984_v26 = vpop.f32.mrf.mxu0 }
 0x51c   : > { %v8025_v35 = vpop.f32.mrf.mxu1  ;;  %v7985_v23 = vadd.f32 %v7984_v26, %v7944_v3  ;;  %v8024_v40 = vadd.f32 %v8023_v62, %v7983_v4 }
 0x51d   : > { %v7986_v50 = vpop.f32.mrf.mxu0 }
 0x51e   : > { %v8027_v57 = vpop.f32.mrf.mxu1  ;;  %v8026_v13 = vadd.f32 %v8025_v35, %v7985_v23 }
 0x51f   : > { %v7987_v28 = vpop.f32.mrf.mxu0 }
 0x520   : > { %v8028_v32 = vpop.f32.mrf.mxu1  ;;  %v8035_v56 = vcombine.low %v8024_v40, %v8026_v13 }
 0x522   : > { %v8049_v7 = vrot.slane %v8035_v56, %v12901_v17 }
 0x524   : > { %v8050_v19 = vcombine.low %v8042_v61, %v8049_v7  ;;  %8057 = sbr.rel (%p9534_p11) target bundleno = 1788 (0x6fc), region = 68 }
 0x526   : > { %v8052_v41 = vadd.f32 %v8050_v19, %v337_v49 }
 0x528   : > { %8053 = vst [vmem:[#allocation2] sm:$0xff] %v8052_v41 }
 0x529   : > { %v8128_v0 = vld [vmem:[%s13152_s3 + $0xf8] sm:$0xff]  ;;  %v8127_v18 = vld [vmem:[%s13152_s3 + $0xf0] sm:$0xff]  ;;  %v8126_v6 = vld [vmem:[%s13152_s3 + $0xe8] sm:$0xff]  ;;  %v8063_v9 = vsub.s32 0, %v11600_v45  ;;  %v8067_v62 = vsub.s32 1, %v11600_v45  ;;  %v8071_v2 = vsub.s32 2, %v11600_v45 }
 0x52a   : > { %v8160_v21 = vld [vmem:[%s13152_s3 + $0x1f8] sm:$0xff]  ;;  %9543 = vmatprep.subr.mxu0 %v8128_v0  ;;  %v8159_v43 = vld [vmem:[%s13152_s3 + $0x1f0] sm:$0xff]  ;;  %v8158_v53 = vld [vmem:[%s13152_s3 + $0x1e8] sm:$0xff]  ;;  %v8075_v26 = vsub.s32 3, %v11600_v45  ;;  %vm11381_vm0 = vmmov 0   ;;  %vm8346_vm1 = vcmask 523264  }
 0x52b   : > { %v8112_v15 = vld [vmem:[%s13152_s3 + $0x78] sm:$0xff]  ;;  %9578 = vmatprep.subr.mxu1 %v8160_v21  ;;  %v8111_v44 = vld [vmem:[%s13152_s3 + $0x70] sm:$0xff]  ;;  %v8110_v47 = vld [vmem:[%s13152_s3 + $0x68] sm:$0xff]  ;;  %vm8426_vm2 = vcmask 1024  }
 0x52c   : > { %v8144_v20 = vld [vmem:[%s13152_s3 + $0x178] sm:$0xff]  ;;  %9544 = vmatpush3.msra.mxu0 %v8112_v15  ;;  %v8143_v5 = vld [vmem:[%s13152_s3 + $0x170] sm:$0xff]  ;;  %v8142_v27 = vld [vmem:[%s13152_s3 + $0x168] sm:$0xff] }
 0x52d   : > { %9579 = vmatpush3.msra.mxu1 %v8144_v20  ;;  %9545 = vmatprep.subr.mxu0 %v8127_v18  ;;  %v8125_v39 = vld [vmem:[%s13152_s3 + $0xe0] sm:$0xff]  ;;  %v8124_v55 = vld [vmem:[%s13152_s3 + $0xd8] sm:$0xff]  ;;  %v8123_v31 = vld [vmem:[%s13152_s3 + $0xd0] sm:$0xff] }
 0x52e   : > { %9580 = vmatprep.subr.mxu1 %v8159_v43  ;;  %9546 = vmatpush3.msra.mxu0 %v8111_v44  ;;  %v8157_v29 = vld [vmem:[%s13152_s3 + $0x1e0] sm:$0xff]  ;;  %v8156_v16 = vld [vmem:[%s13152_s3 + $0x1d8] sm:$0xff]  ;;  %v8155_v33 = vld [vmem:[%s13152_s3 + $0x1d0] sm:$0xff] }
 0x52f   : > { %9581 = vmatpush3.msra.mxu1 %v8143_v5  ;;  %9547 = vmatprep.subr.mxu0 %v8126_v6  ;;  %v8109_v51 = vld [vmem:[%s13152_s3 + $0x60] sm:$0xff]  ;;  %v8108_v24 = vld [vmem:[%s13152_s3 + $0x58] sm:$0xff]  ;;  %v8107_v10 = vld [vmem:[%s13152_s3 + $0x50] sm:$0xff] }
 0x530   : > { %9582 = vmatprep.subr.mxu1 %v8158_v53  ;;  %v8141_v30 = vld [vmem:[%s13152_s3 + $0x160] sm:$0xff]  ;;  %9548 = vmatpush3.msra.mxu0 %v8110_v47  ;;  %v8140_v54 = vld [vmem:[%s13152_s3 + $0x158] sm:$0xff]  ;;  %v8139_v36 = vld [vmem:[%s13152_s3 + $0x150] sm:$0xff] }
 0x531   : > { %9583 = vmatpush3.msra.mxu1 %v8142_v27  ;;  %9549 = vmatprep.subr.mxu0 %v8125_v39  ;;  %v8122_v37 = vld [vmem:[%s13152_s3 + $0xc8] sm:$0xff]  ;;  %v8121_v46 = vld [vmem:[%s13152_s3 + $0xc0] sm:$0xff]  ;;  %v8120_v38 = vld [vmem:[%s13152_s3 + $0xb8] sm:$0xff] }
 0x532   : > { %9584 = vmatprep.subr.mxu1 %v8157_v29  ;;  %9550 = vmatpush3.msra.mxu0 %v8109_v51  ;;  %v8154_v34 = vld [vmem:[%s13152_s3 + $0x1c8] sm:$0xff]  ;;  %v8153_v48 = vld [vmem:[%s13152_s3 + $0x1c0] sm:$0xff]  ;;  %v8152_v14 = vld [vmem:[%s13152_s3 + $0x1b8] sm:$0xff] }
 0x533   : > { %9585 = vmatpush3.msra.mxu1 %v8141_v30  ;;  %9551 = vmatprep.subr.mxu0 %v8124_v55  ;;  %v8106_v25 = vld [vmem:[%s13152_s3 + $0x48] sm:$0xff]  ;;  %v8105_v52 = vld [vmem:[%s13152_s3 + $0x40] sm:$0xff]  ;;  %v8104_v22 = vld [vmem:[%s13152_s3 + $0x38] sm:$0xff] }
 0x534   : > { %9586 = vmatprep.subr.mxu1 %v8156_v16  ;;  %9552 = vmatpush3.msra.mxu0 %v8108_v24  ;;  %v8138_v8 = vld [vmem:[%s13152_s3 + $0x148] sm:$0xff]  ;;  %v8137_v59 = vld [vmem:[%s13152_s3 + $0x140] sm:$0xff]  ;;  %v8136_v12 = vld [vmem:[%s13152_s3 + $0x138] sm:$0xff]  ;;  %v11380_v24 = vmov 0.0  }
 0x535   : > { %9587 = vmatpush3.msra.mxu1 %v8140_v54  ;;  %9553 = vmatprep.subr.mxu0 %v8123_v31  ;;  %v8119_v58 = vld [vmem:[%s13152_s3 + $0xb0] sm:$0xff]  ;;  %v8118_v11 = vld [vmem:[%s13152_s3 + $0xa8] sm:$0xff]  ;;  %v8117_v35 = vld [vmem:[%s13152_s3 + $0xa0] sm:$0xff] }
 0x536   : > { %9588 = vmatprep.subr.mxu1 %v8155_v33  ;;  %9554 = vmatpush3.msra.mxu0 %v8107_v10  ;;  %v8151_v1 = vld [vmem:[%s13152_s3 + $0x1b0] sm:$0xff]  ;;  %v8150_v60 = vld [vmem:[%s13152_s3 + $0x1a8] sm:$0xff]  ;;  %v8149_v23 = vld [vmem:[%s13152_s3 + $0x1a0] sm:$0xff] }
 0x537   : > { %9589 = vmatpush3.msra.mxu1 %v8139_v36  ;;  %9555 = vmatprep.subr.mxu0 %v8122_v37  ;;  %v8103_v63 = vld [vmem:[%s13152_s3 + $0x30] sm:$0xff]  ;;  %v8102_v3 = vld [vmem:[%s13152_s3 + $0x28] sm:$0xff]  ;;  %v8101_v50 = vld [vmem:[%s13152_s3 + $0x20] sm:$0xff] }
 0x538   : > { %9590 = vmatprep.subr.mxu1 %v8154_v34  ;;  %9556 = vmatpush3.msra.mxu0 %v8106_v25  ;;  %v8135_v42 = vld [vmem:[%s13152_s3 + $0x130] sm:$0xff]  ;;  %v8134_v4 = vld [vmem:[%s13152_s3 + $0x128] sm:$0xff]  ;;  %v8133_v45 = vld [vmem:[%s13152_s3 + $0x120] sm:$0xff] }
 0x539   : > { %9591 = vmatpush3.msra.mxu1 %v8138_v8  ;;  %9557 = vmatprep.subr.mxu0 %v8121_v46  ;;  %v8059_v57 = vld [vmem:[#allocation6] sm:$0xf]  ;;  %v8116_v40 = vld [vmem:[%s13152_s3 + $0x98] sm:$0xff]  ;;  %v8115_v19 = vld [vmem:[%s13152_s3 + $0x90] sm:$0xff] }
 0x53a   : > { %9592 = vmatprep.subr.mxu1 %v8153_v48  ;;  %9558 = vmatpush3.msra.mxu0 %v8105_v52  ;;  %v8148_v13 = vld [vmem:[%s13152_s3 + $0x198] sm:$0xff]  ;;  %v8064_v28 = vrot.slane %v8059_v57, %v8063_v9  ;;  %v8068_v32 = vrot.slane %v8059_v57, %v8067_v62  ;;  %v8072_v56 = vrot.slane %v8059_v57, %v8071_v2  ;;  %v8147_v41 = vld [vmem:[%s13152_s3 + $0x190] sm:$0xff]  ;;  %v8114_v18 = vld [vmem:[%s13152_s3 + $0x88] sm:$0xff] }
 0x53b   : > { %9593 = vmatpush3.msra.mxu1 %v8137_v59  ;;  %9559 = vmatprep.subr.mxu0 %v8120_v38  ;;  %v8100_v61 = vld [vmem:[%s13152_s3 + $0x18] sm:$0xff]  ;;  %v8076_v49 = vrot.slane %v8059_v57, %v8075_v26  ;;  %v8099_v21 = vld [vmem:[%s13152_s3 + $0x10] sm:$0xff]  ;;  %v8146_v43 = vld [vmem:[%s13152_s3 + $0x188] sm:$0xff] }
 0x53c   : > { %9594 = vmatprep.subr.mxu1 %v8152_v14  ;;  %9560 = vmatpush3.msra.mxu0 %v8104_v22  ;;  %v8132_v7 = vld [vmem:[%s13152_s3 + $0x118] sm:$0xff]  ;;  %v8077_v0 = vcombine.low %v8064_v28, %v8068_v32  ;;  %v8131_v15 = vld [vmem:[%s13152_s3 + $0x110] sm:$0xff]  ;;  %v8098_v5 = vld [vmem:[%s13152_s3 + $0x8] sm:$0xff] }
 0x53d   : > { %9595 = vmatpush3.msra.mxu1 %v8136_v12  ;;  %9561 = vmatprep.subr.mxu0 %v8119_v58  ;;  %v8078_v20 = vcombine.low %v8072_v56, %v8076_v49  ;;  %v8130_v6 = vld [vmem:[%s13152_s3 + $0x108] sm:$0xff]  ;;  %v8113_v47 = vld [vmem:[%s13152_s3 + $0x80] sm:$0xff]  ;;  %v8338_v36 = vld [vmem:[%s13154_s5 + $0x38] sm:$0xff] }
 0x53e   : > { %9596 = vmatprep.subr.mxu1 %v8151_v1  ;;  %9562 = vmatpush3.msra.mxu0 %v8103_v63  ;;  %v8085_v44 = vrot.slane %v8077_v0, %v12901_v17  ;;  %v8145_v27 = vld [vmem:[%s13152_s3 + $0x180] sm:$0xff]  ;;  %v8337_v34 = vld [vmem:[%s13154_s5 + $0x30] sm:$0xff]  ;;  %v8334_v8 = vld [vmem:[%s13154_s5 + $0x18] sm:$0xff] }
 0x53f   : > { %9597 = vmatpush3.msra.mxu1 %v8135_v42  ;;  %9563 = vmatprep.subr.mxu0 %v8118_v11  ;;  %v8092_v53 = vrot.slane %v8078_v20, %v12901_v17  ;;  %v8058_v39 = vld [vmem:[#allocation2] sm:$0xff]  ;;  %v8333_v46 = vld [vmem:[%s13154_s5 + $0x10] sm:$0xff]  ;;  %v8332_v48 = vld [vmem:[%s13154_s5 + $0x8] sm:$0xff] }
 0x540   : > { %9598 = vmatprep.subr.mxu1 %v8150_v60  ;;  %9564 = vmatpush3.msra.mxu0 %v8102_v3  ;;  %v8097_v29 = vld [vmem:[%s13152_s3] sm:$0xff]  ;;  %v9535_v14 = vld [vmem:[#allocation8] ss:$0 sm:$0xff]  ;;  %v9536_v60 = vld [vmem:[#allocation3] ss:$0 sm:$0xff] }
 0x541   : > { %9599 = vmatpush3.msra.mxu1 %v8134_v4  ;;  %9565 = vmatprep.subr.mxu0 %v8117_v35  ;;  %v8093_v51 = vcombine.low %v8085_v44, %v8092_v53  ;;  %v8129_v30 = vld [vmem:[%s13152_s3 + $0x100] sm:$0xff] }
 0x542   : > { %9600 = vmatprep.subr.mxu1 %v8149_v23  ;;  %9566 = vmatpush3.msra.mxu0 %v8101_v50  ;;  %v8335_v25 = vld [vmem:[%s13154_s5 + $0x20] sm:$0xff] }
 0x543   : > { %9601 = vmatpush3.msra.mxu1 %v8133_v45  ;;  %9567 = vmatprep.subr.mxu0 %v8116_v40  ;;  %v8095_v55 = vadd.f32 %v8093_v51, %v8058_v39  ;;  %v8331_v52 = vld [vmem:[%s13154_s5] sm:$0xff] }
 0x544   : > { %9602 = vmatprep.subr.mxu1 %v8148_v13  ;;  %9568 = vmatpush3.msra.mxu0 %v8100_v61 }
 0x545   : > { %9603 = vmatpush3.msra.mxu1 %v8132_v7  ;;  %9569 = vmatprep.subr.mxu0 %v8115_v19  ;;  %v8096_v16 = vmax.f32 %v8095_v55, 0.0 }
 0x546   : > { %9604 = vmatprep.subr.mxu1 %v8147_v41  ;;  %9570 = vmatpush3.msra.mxu0 %v8099_v21 }
 0x547   : > { %9605 = vmatpush3.msra.mxu1 %v8131_v15  ;;  %9571 = vmatprep.subr.mxu0 %v8114_v18  ;;  %v8176_v54 = vrot.slane %v8096_v16, %v12901_v17  ;;  %v8169_v31 = vcombine.high %v8096_v16, %v8096_v16 }
 0x548   : > { %9606 = vmatprep.subr.mxu1 %v8146_v43  ;;  %9572 = vmatpush3.msra.mxu0 %v8098_v5 }
 0x549   : > { %9607 = vmatpush3.msra.mxu1 %v8130_v6  ;;  %9573 = vmatprep.subr.mxu0 %v8113_v47  ;;  %v8184_v33 = vcombine.high %v8176_v54, %v8176_v54  ;;  %v8183_v10 = vrot.slane %v8169_v31, %v12901_v17  ;;  %v8336_v17 = vld [vmem:[%s13154_s5 + $0x28] sm:$0xff] }
 0x54a   : > { %9608 = vmatprep.subr.mxu1 %v8145_v27  ;;  %9574 = vmatpush3.msra.mxu0 %v8097_v29 }
 0x54b   : > { %9609 = vmatpush3.msra.mxu1 %v8129_v30  ;;  %9622 = vmatprep.subr.mxu0 %v11380_v24  ;;  %v8185_v37 = vcombine.high %v8183_v10, %v8183_v10 }
 0x54c   : > { %8254 = vmatprep.mubr.f32.mxu0 %v8184_v33 }
 0x54d   : > { %8255 = vmatmul.mubr.f32.vlgmr.msra.gmra.mxu0 %v8176_v54  ;;  %8324 = vmatprep.mubr.f32.mxu1 %v8185_v37 }
 0x54e   : > { %9623 = vmatpush3.msra.mxu0 %v8338_v36  ;;  %8325 = vmatmul.mubr.f32.vlgmr.msra.gmra.mxu1 %v8183_v10 }
 0x54f   : > { %9624 = vmatprep.subr.mxu0 %v11380_v24  ;;  %9638 = vmatprep.mubr.msk.f32.mxu0 %vm11381_vm0, %v11380_v24 }
 0x550   : > { %9625 = vmatpush3.msra.mxu0 %v8337_v34 }
 0x551   : > { %9626 = vmatprep.subr.mxu0 %v11380_v24 }
 0x552   : > { %9627 = vmatpush3.msra.mxu0 %v8336_v17 }
 0x553   : > { %9628 = vmatprep.subr.mxu0 %v11380_v24 }
 0x554   : > { %9629 = vmatpush3.msra.mxu0 %v8335_v25 }
 0x555   : > { %9630 = vmatprep.subr.mxu0 %v11380_v24 }
 0x556   : > { %9631 = vmatpush3.msra.mxu0 %v8334_v8 }
 0x557   : > { %9632 = vmatprep.subr.mxu0 %v11380_v24 }
 0x558   : > { %9633 = vmatpush3.msra.mxu0 %v8333_v46 }
 0x559   : > { %9634 = vmatprep.subr.mxu0 %v11380_v24 }
 0x55a   : > { %9635 = vmatpush3.msra.mxu0 %v8332_v48 }
 0x55b   : > { %9636 = vmatprep.subr.mxu0 %v11380_v24 }
 0x55c   : > { %9637 = vmatpush3.msra.mxu0 %v8331_v52 }
 0x60d   : > { %v9575_v59 = vpop.f32.mrf.mxu0 }
 0x60e   : > { %v9610_v38 = vpop.f32.mrf.mxu1 }
 0x60f   : > { %v9576_v22 = vpop.f32.mrf.mxu0 }
 0x610   : > { %v9577_v12 = vadd.f32 %v9576_v22, %v9575_v59  ;;  %v9611_v58 = vpop.f32.mrf.mxu1 }
 0x611   : > { %v9612_v63 = vadd.f32 %v9611_v58, %v9610_v38 }
 0x612   : > { %v8257_v1 = vadd.f32 %v9577_v12, %v9535_v14 }
 0x614   : > { %v8327_v42 = vadd.f32 %v9612_v63, %v8257_v1 }
 0x616   : > { %v8330_v11 = vmax.f32 %v8327_v42, 0.0 }
 0x618   : > { %9639 = vmatmul.mubr.msk.f32.vlgmr.msra.gmra.mxu0 %vm8346_vm1, %v8330_v11 }
 0x6d8   : > { %v8416_v9 = vpop.f32.mrf.mxu0 }
 0x6d9   : > { %v8417_v62 = vadd.f32 %v9536_v60, %v8416_v9 }
 0x6da   : > { %v9640_v2 = vpop.f32.mrf.mxu0 }
 0x6db   : > { %v9538_v3 = vmul.f32 -1.442695, %v8417_v62 }
 0x6dd   : > { %11248 = vpow2.f32 %v9538_v3 }
 0x6ea   : > { %v11249_v4 = vpop.eup %11248 }
 0x6eb   : > { %v8423_v26 = vadd.f32 1.0, %v11249_v4 }
 0x6ed   : > { %11250 = vrcp.f32 %v8423_v26 }
 0x6fa   : > { %v11251_v35 = vpop.eup %11250 }
 0x6fb   : > { %8427 = vst.msk [vmem:[%s13156_s7] sm:$0x3] %vm8426_vm2, %v11251_v35 }
 0x6fc PF: > { %p20_p4 = scmp.ge.s32.totalorder %s11447_s30, 5   ;;  %s13170_s26 = smov %s11362_s27 }
 0x6fd   : > { %s13171_s27 = smov %s11366_s28  ;;  %s13172_s28 = smov %s11457_s10 }
 0x6fe   : > { %s13173_s29 = smov %s11447_s30  ;;  %22 = sbr.rel (!%p20_p4) target bundleno = 7 (0x7), region = 103 }
 0x703   :  { %8439 = vsyncpa [#allocation5], 1 }
 0x704   :  { %8441 = vsyncpa [#allocation5 + $0x1], 1 }
 0x705   :  { %8442 = vsyncpa [#allocation7], 1 }

</bundles_post_ra>
